<compile_context>
chip_gen: v5e
topology: v5e:2x2
jax: 0.10.0
libtpu: 0.0.40
codegen_flags: <defaults>
</compile_context>

<pallas_src>
import functools

import jax
import jax.numpy as jnp
from jax import lax
from jax.experimental import pallas as pl


# ---------------------------------------------------------------------------
# Pallas kernel 1: grid-less MXU matmul (bf16 inputs, f32 accumulation).
# Every transposed convolution in the decoder is exactly one of these.
# ---------------------------------------------------------------------------
def _matmul_kernel(a_ref, b_ref, o_ref):
    o_ref[...] = jnp.dot(a_ref[...], b_ref[...],
                         preferred_element_type=jnp.float32)


def pallas_matmul(a, b):
    """(M, K) @ (K, N) -> (M, N) f32, single block, no grid, no host padding."""
    m, k = a.shape
    k2, n = b.shape
    assert k == k2, (a.shape, b.shape)
    return pl.pallas_call(
        _matmul_kernel,
        out_shape=jax.ShapeDtypeStruct((m, n), jnp.float32),
    )(a, b)


# ---------------------------------------------------------------------------
# Pallas kernel 2: fused BatchNorm2d (batch statistics) + activation on the
# channel-last (N*H*W, C) slab.  Per-channel stats are a sublane reduction,
# the affine/activation is elementwise -> one read + one write of the map.
# ---------------------------------------------------------------------------
def _bn_act_kernel(x_ref, g_ref, b_ref, o_ref, *, inv_count, eps, act):
    x = x_ref[...]                                            # (L, C) f32
    mean = jnp.sum(x, axis=0, keepdims=True) * inv_count      # (1, C)
    d = x - mean
    var = jnp.sum(d * d, axis=0, keepdims=True) * inv_count   # biased (PyTorch BN)
    scale = lax.rsqrt(var + eps) * g_ref[...]
    y = d * scale + b_ref[...]
    if act == "relu":
        y = jnp.maximum(y, 0.0)
    elif act == "tanh":
        y = jnp.tanh(y)
    o_ref[...] = y


def batchnorm_act(x_2d, gamma_2d, beta_2d, act, eps=1e-5):
    l, c = x_2d.shape
    kern = functools.partial(_bn_act_kernel, inv_count=1.0 / l, eps=eps, act=act)
    return pl.pallas_call(
        kern,
        out_shape=jax.ShapeDtypeStruct((l, c), jnp.float32),
    )(x_2d, gamma_2d, beta_2d)


# ---------------------------------------------------------------------------
# ConvTranspose2d lowering.  Weight matrices are pre-reshaped at init to
# (Cin, KH*KW*Cout) with column order (kh, kw, co), so the matmul result
# reshapes for free to (N, H, W, KH, KW, Cout).
# Conv bias is never applied: every conv feeds BatchNorm, and a per-channel
# constant is exactly removed by the mean subtraction.
# ---------------------------------------------------------------------------
def conv_transpose_first(x_2d, w_mat, kh, kw, cout):
    """First block: 1x1 spatial input, padding 0 -> pure matmul, NHWC output."""
    n = x_2d.shape[0]
    cols = pallas_matmul(x_2d.astype(jnp.bfloat16), w_mat)    # (N, kh*kw*cout)
    return cols.reshape(n, kh, kw, cout)


def conv_transpose_s2k4p1(x_nhwc, w_mat, cout):
    """ConvTranspose2d(kernel=4, stride=2, padding=1) on an NHWC tensor.

    One MXU matmul produces all (kh, kw) contributions; the stride-2
    overlap-add is done by output-parity (subpixel) decomposition:
        out[2m  ] = cols[kh=1, h=m] + cols[kh=3, h=m-1]
        out[2m+1] = cols[kh=2, h=m] + cols[kh=0, h=m+1]
    (same along w with kw), then one depth-to-space reshape interleaves the
    four parity planes.  Shifts/adds/concats only -- no strided scatter-adds.
    """
    n, h, w, cin = x_nhwc.shape
    a = x_nhwc.reshape(n * h * w, cin).astype(jnp.bfloat16)
    cols = pallas_matmul(a, w_mat)                            # (N*H*W, 16*cout)
    cols = cols.reshape(n, h, w, 4, 4, cout)

    # Combine along H by output-row parity.
    r_even = cols[:, :, :, 1] + jnp.pad(
        cols[:, :-1, :, 3], ((0, 0), (1, 0), (0, 0), (0, 0), (0, 0)))
    r_odd = cols[:, :, :, 2] + jnp.pad(
        cols[:, 1:, :, 0], ((0, 0), (0, 1), (0, 0), (0, 0), (0, 0)))

    # Combine along W by output-column parity.
    def w_combine(t):                                         # t: (N, H, W, 4, C)
        c_even = t[:, :, :, 1] + jnp.pad(
            t[:, :, :-1, 3], ((0, 0), (0, 0), (1, 0), (0, 0)))
        c_odd = t[:, :, :, 2] + jnp.pad(
            t[:, :, 1:, 0], ((0, 0), (0, 0), (0, 1), (0, 0)))
        return c_even, c_odd

    p00, p01 = w_combine(r_even)                              # even output rows
    p10, p11 = w_combine(r_odd)                               # odd  output rows
    out = jnp.stack([jnp.stack([p00, p01], axis=3),
                     jnp.stack([p10, p11], axis=3)], axis=2)  # (N, H, 2, W, 2, C)
    return out.reshape(n, 2 * h, 2 * w, cout)


# ---------------------------------------------------------------------------
# IdDecoder
# ---------------------------------------------------------------------------
def get_same_padding(kernel_size, stride):
    return (kernel_size - stride) // 2      # = 1 for k=4, s=2


class IdDecoderPallas:
    """ConvTranspose2d -> BatchNorm2d(batch stats) -> ReLU/Tanh blocks."""

    def __init__(self, hparams, key):
        self.hparams = hparams
        self.in_channels = hparams["in_channels"]
        self.latent_channels = hparams["latent_dim"]
        self.latent_id_hw = tuple(hparams["latent_dim_id"])
        chs = list(hparams["chs"])[::-1]
        chs = [self.latent_channels] + chs + [self.in_channels]
        padding = get_same_padding(kernel_size=4, stride=2)
        assert padding == 1  # baked into the subpixel decomposition above

        def make_layer(k, in_ch, out_ch, k_hw, act, kind):
            k1, k2 = jax.random.split(k, 2)
            kh, kw = k_hw
            fan = in_ch * kh * kw
            w = jax.random.normal(k1, (in_ch, out_ch, kh, kw), jnp.float32) / jnp.sqrt(fan)
            # (Cin, Cout, KH, KW) -> (Cin, KH*KW*Cout), column order (kh, kw, co).
            # Reshaped + cast to bf16 ONCE at init (MXU-native inputs, f32 acc).
            w_mat = w.transpose(0, 2, 3, 1).reshape(in_ch, kh * kw * out_ch)
            w_mat = w_mat.astype(jnp.bfloat16)
            gamma = (1.0 + 0.1 * jax.random.normal(k2, (out_ch,), jnp.float32))
            # BN affine params kept in the (1, C) shape the kernel consumes.
            gamma = gamma.reshape(1, out_ch)
            beta = jnp.zeros((1, out_ch), jnp.float32)
            # NOTE: the ConvTranspose2d bias is omitted -- a per-channel constant
            # added before BatchNorm is exactly cancelled by the mean subtraction.
            return dict(w_mat=w_mat, gamma=gamma, beta=beta,
                        kh=kh, kw=kw, cout=out_ch, act=act, kind=kind)

        keys = jax.random.split(key, len(chs) - 1)
        lh, lw = self.latent_id_hw
        self.layers = []
        # first block: ConvTranspose2dBlock(latent -> chs[1], kernel=(lh,lw), s=2, p=0, ReLU)
        self.layers.append(make_layer(keys[0], chs[0], chs[1], (lh, lw), "relu", "first"))
        # middle blocks: DoubleConvTranspose2d(in+skip -> out, kernel=4, s=2, p=1, ReLU)
        for i in range(1, len(chs) - 2):
            self.layers.append(
                make_layer(keys[i], chs[i] + chs[i], chs[i + 1], (4, 4), "relu", "up"))
        # last block: ConvTranspose2dBlock(chs[-2] -> in_channels, kernel=4, s=2, p=1, Tanh)
        self.layers.append(make_layer(keys[-1], chs[-2], chs[-1], (4, 4), "tanh", "up"))

    def _apply_block(self, x, layer):
        if layer["kind"] == "first":
            y = conv_transpose_first(x, layer["w_mat"],
                                     layer["kh"], layer["kw"], layer["cout"])
        else:
            y = conv_transpose_s2k4p1(x, layer["w_mat"], layer["cout"])
        n, h, w, c = y.shape
        y = batchnorm_act(y.reshape(n * h * w, c),
                          layer["gamma"], layer["beta"], layer["act"])
        return y.reshape(n, h, w, c)

    def __call__(self, encoded, skip_outs):
        # Skips arrive NCHW (PyTorch convention); convert once to NHWC.
        # The last (reversed) skip is never consumed -- matches the PyTorch wiring
        # (the unused transpose is DCE'd under jit).
        skips = [s.transpose(0, 2, 3, 1) for s in skip_outs[::-1]]
        x = encoded.reshape(encoded.shape[0], self.latent_channels)   # 1x1 spatial
        for i, layer in enumerate(self.layers[:-2]):
            y = self._apply_block(x, layer)
            # torch.cat([x, skip], dim=1) == channel concat in NHWC.
            x = jnp.concatenate([y, skips[i]], axis=-1)
        x = self._apply_block(x, self.layers[-2])
        x = self._apply_block(x, self.layers[-1])
        return x.transpose(0, 3, 1, 2)                # back to NCHW at the boundary


# ---------------------------------------------------------------------------
if __name__ == "__main__":
    hparams = {
        "in_channels": 3,
        "latent_dim": 16,
        "latent_dim_id": (4, 4),
        "chs": [8, 16, 32],     # encoder channel ladder (reversed inside decoder)
    }
    key = jax.random.PRNGKey(0)
    k_param, k_enc, k_s0, k_s1, k_s2 = jax.random.split(key, 5)

    n = 2
    decoder = IdDecoderPallas(hparams, k_param)

    encoded = jax.random.normal(k_enc, (n, hparams["latent_dim"]), jnp.float32)
    # Encoder skip outputs in encoder order (channels 8, 16, 32), NCHW.
    skip_outs = [
        jax.random.normal(k_s0, (n, 8, 16, 16), jnp.float32),
        jax.random.normal(k_s1, (n, 16, 8, 8), jnp.float32),
        jax.random.normal(k_s2, (n, 32, 4, 4), jnp.float32),
    ]

    fwd = jax.jit(lambda enc, skips: decoder(enc, skips))
    out = jax.block_until_ready(fwd(encoded, skip_outs))
    assert out.shape == (n, hparams["in_channels"], 32, 32), out.shape
    assert bool(jnp.all(jnp.isfinite(out)))
    print("KERNEL_OK")
</pallas_src>

<mosaic_0001>
module attributes {stable_mosaic.version = 11 : i64} {
  func.func @_matmul_kernel(%arg0: memref<32x64xbf16, #tpu.memory_space<vmem>>, %arg1: memref<64x256xbf16, #tpu.memory_space<vmem>>, %arg2: memref<32x256xf32, #tpu.memory_space<vmem>>) attributes {dimension_semantics = [], scalar_prefetch = 0 : i64, scratch_operands = 0 : i64, tpu.core_type = #tpu.core_type<tc>} {
    %c0 = arith.constant 0 : index
    %c0_0 = arith.constant 0 : index
    %0 = vector.load %arg0[%c0, %c0_0] : memref<32x64xbf16, #tpu.memory_space<vmem>>, vector<32x64xbf16>
    %c0_1 = arith.constant 0 : index
    %c0_2 = arith.constant 0 : index
    %1 = vector.load %arg1[%c0_1, %c0_2] : memref<64x256xbf16, #tpu.memory_space<vmem>>, vector<64x256xbf16>
    %cst = arith.constant dense<0.000000e+00> : vector<32x256xf32>
    %2 = tpu.matmul %0, %1, %cst {dimension_numbers = #tpu.dot_dimension_numbers<[1], [0], [0], [1], [0, 0, 1, 1], [], []>} : vector<32x64xbf16>, vector<64x256xbf16>, vector<32x256xf32> -> vector<32x256xf32>
    %c0_3 = arith.constant 0 : index
    %c0_4 = arith.constant 0 : index
    %3 = vector.load %arg2[%c0_3, %c0_4] : memref<32x256xf32, #tpu.memory_space<vmem>>, vector<32x256xf32>
    tpu.vector_store %arg2[%c0_3, %c0_4], %2 {strides = array<i32>} : memref<32x256xf32, #tpu.memory_space<vmem>>, vector<32x256xf32>,
    return
  }
}

module attributes {stable_mosaic.version = 11 : i64} {
  func.func @_matmul_kernel(%arg0: memref<2x16xbf16, #tpu.memory_space<vmem>>, %arg1: memref<16x512xbf16, #tpu.memory_space<vmem>>, %arg2: memref<2x512xf32, #tpu.memory_space<vmem>>) attributes {dimension_semantics = [], scalar_prefetch = 0 : i64, scratch_operands = 0 : i64, tpu.core_type = #tpu.core_type<tc>} {
    %c0 = arith.constant 0 : index
    %c0_0 = arith.constant 0 : index
    %0 = vector.load %arg0[%c0, %c0_0] : memref<2x16xbf16, #tpu.memory_space<vmem>>, vector<2x16xbf16>
    %c0_1 = arith.constant 0 : index
    %c0_2 = arith.constant 0 : index
    %1 = vector.load %arg1[%c0_1, %c0_2] : memref<16x512xbf16, #tpu.memory_space<vmem>>, vector<16x512xbf16>
    %cst = arith.constant dense<0.000000e+00> : vector<2x512xf32>
    %2 = tpu.matmul %0, %1, %cst {dimension_numbers = #tpu.dot_dimension_numbers<[1], [0], [0], [1], [0, 0, 1, 1], [], []>} : vector<2x16xbf16>, vector<16x512xbf16>, vector<2x512xf32> -> vector<2x512xf32>
    %c0_3 = arith.constant 0 : index
    %c0_4 = arith.constant 0 : index
    %3 = vector.load %arg2[%c0_3, %c0_4] : memref<2x512xf32, #tpu.memory_space<vmem>>, vector<2x512xf32>
    tpu.vector_store %arg2[%c0_3, %c0_4], %2 {strides = array<i32>} : memref<2x512xf32, #tpu.memory_space<vmem>>, vector<2x512xf32>,
    return
  }
}

module attributes {stable_mosaic.version = 11 : i64} {
  func.func @_bn_act_kernel(%arg0: memref<32x32xf32, #tpu.memory_space<vmem>>, %arg1: memref<1x32xf32, #tpu.memory_space<vmem>>, %arg2: memref<1x32xf32, #tpu.memory_space<vmem>>, %arg3: memref<32x32xf32, #tpu.memory_space<vmem>>) attributes {dimension_semantics = [], scalar_prefetch = 0 : i64, scratch_operands = 0 : i64, tpu.core_type = #tpu.core_type<tc>} {
    %c0 = arith.constant 0 : index
    %c0_0 = arith.constant 0 : index
    %0 = vector.load %arg0[%c0, %c0_0] : memref<32x32xf32, #tpu.memory_space<vmem>>, vector<32x32xf32>
    %cst = arith.constant dense<0.000000e+00> : vector<32xf32>
    %1 = vector.multi_reduction <add>, %0, %cst [0] : vector<32x32xf32> to vector<32xf32>
    %2 = vector.shape_cast %1 : vector<32xf32> to vector<1x32xf32>
    %cst_1 = arith.constant 3.125000e-02 : f32
    %3 = vector.broadcast %cst_1 : f32 to vector<1x32xf32>
    %4 = arith.mulf %2, %3 : vector<1x32xf32>
    %5 = vector.broadcast %4 : vector<1x32xf32> to vector<32x32xf32>
    %6 = arith.subf %0, %5 : vector<32x32xf32>
    %7 = arith.mulf %6, %6 : vector<32x32xf32>
    %cst_2 = arith.constant dense<0.000000e+00> : vector<32xf32>
    %8 = vector.multi_reduction <add>, %7, %cst_2 [0] : vector<32x32xf32> to vector<32xf32>
    %9 = vector.shape_cast %8 : vector<32xf32> to vector<1x32xf32>
    %cst_3 = arith.constant 3.125000e-02 : f32
    %10 = vector.broadcast %cst_3 : f32 to vector<1x32xf32>
    %11 = arith.mulf %9, %10 : vector<1x32xf32>
    %cst_4 = arith.constant 9.99999974E-6 : f32
    %12 = vector.broadcast %cst_4 : f32 to vector<1x32xf32>
    %13 = arith.addf %11, %12 : vector<1x32xf32>
    %14 = math.rsqrt %13 : vector<1x32xf32>
    %c0_5 = arith.constant 0 : index
    %c0_6 = arith.constant 0 : index
    %15 = vector.load %arg1[%c0_5, %c0_6] : memref<1x32xf32, #tpu.memory_space<vmem>>, vector<1x32xf32>
    %16 = arith.mulf %14, %15 : vector<1x32xf32>
    %17 = vector.broadcast %16 : vector<1x32xf32> to vector<32x32xf32>
    %18 = arith.mulf %6, %17 : vector<32x32xf32>
    %c0_7 = arith.constant 0 : index
    %c0_8 = arith.constant 0 : index
    %19 = vector.load %arg2[%c0_7, %c0_8] : memref<1x32xf32, #tpu.memory_space<vmem>>, vector<1x32xf32>
    %20 = vector.broadcast %19 : vector<1x32xf32> to vector<32x32xf32>
    %21 = arith.addf %18, %20 : vector<32x32xf32>
    %cst_9 = arith.constant 0.000000e+00 : f32
    %22 = vector.broadcast %cst_9 : f32 to vector<32x32xf32>
    %23 = arith.maximumf %21, %22 : vector<32x32xf32>
    %c0_10 = arith.constant 0 : index
    %c0_11 = arith.constant 0 : index
    %24 = vector.load %arg3[%c0_10, %c0_11] : memref<32x32xf32, #tpu.memory_space<vmem>>, vector<32x32xf32>
    tpu.vector_store %arg3[%c0_10, %c0_11], %23 {strides = array<i32>} : memref<32x32xf32, #tpu.memory_space<vmem>>, vector<32x32xf32>,
    return
  }
}

module attributes {stable_mosaic.version = 11 : i64} {
  func.func @_bn_act_kernel(%arg0: memref<128x16xf32, #tpu.memory_space<vmem>>, %arg1: memref<1x16xf32, #tpu.memory_space<vmem>>, %arg2: memref<1x16xf32, #tpu.memory_space<vmem>>, %arg3: memref<128x16xf32, #tpu.memory_space<vmem>>) attributes {dimension_semantics = [], scalar_prefetch = 0 : i64, scratch_operands = 0 : i64, tpu.core_type = #tpu.core_type<tc>} {
    %c0 = arith.constant 0 : index
    %c0_0 = arith.constant 0 : index
    %0 = vector.load %arg0[%c0, %c0_0] : memref<128x16xf32, #tpu.memory_space<vmem>>, vector<128x16xf32>
    %cst = arith.constant dense<0.000000e+00> : vector<16xf32>
    %1 = vector.multi_reduction <add>, %0, %cst [0] : vector<128x16xf32> to vector<16xf32>
    %2 = vector.shape_cast %1 : vector<16xf32> to vector<1x16xf32>
    %cst_1 = arith.constant 7.812500e-03 : f32
    %3 = vector.broadcast %cst_1 : f32 to vector<1x16xf32>
    %4 = arith.mulf %2, %3 : vector<1x16xf32>
    %5 = vector.broadcast %4 : vector<1x16xf32> to vector<128x16xf32>
    %6 = arith.subf %0, %5 : vector<128x16xf32>
    %7 = arith.mulf %6, %6 : vector<128x16xf32>
    %cst_2 = arith.constant dense<0.000000e+00> : vector<16xf32>
    %8 = vector.multi_reduction <add>, %7, %cst_2 [0] : vector<128x16xf32> to vector<16xf32>
    %9 = vector.shape_cast %8 : vector<16xf32> to vector<1x16xf32>
    %cst_3 = arith.constant 7.812500e-03 : f32
    %10 = vector.broadcast %cst_3 : f32 to vector<1x16xf32>
    %11 = arith.mulf %9, %10 : vector<1x16xf32>
    %cst_4 = arith.constant 9.99999974E-6 : f32
    %12 = vector.broadcast %cst_4 : f32 to vector<1x16xf32>
    %13 = arith.addf %11, %12 : vector<1x16xf32>
    %14 = math.rsqrt %13 : vector<1x16xf32>
    %c0_5 = arith.constant 0 : index
    %c0_6 = arith.constant 0 : index
    %15 = vector.load %arg1[%c0_5, %c0_6] : memref<1x16xf32, #tpu.memory_space<vmem>>, vector<1x16xf32>
    %16 = arith.mulf %14, %15 : vector<1x16xf32>
    %17 = vector.broadcast %16 : vector<1x16xf32> to vector<128x16xf32>
    %18 = arith.mulf %6, %17 : vector<128x16xf32>
    %c0_7 = arith.constant 0 : index
    %c0_8 = arith.constant 0 : index
    %19 = vector.load %arg2[%c0_7, %c0_8] : memref<1x16xf32, #tpu.memory_space<vmem>>, vector<1x16xf32>
    %20 = vector.broadcast %19 : vector<1x16xf32> to vector<128x16xf32>
    %21 = arith.addf %18, %20 : vector<128x16xf32>
    %cst_9 = arith.constant 0.000000e+00 : f32
    %22 = vector.broadcast %cst_9 : f32 to vector<128x16xf32>
    %23 = arith.maximumf %21, %22 : vector<128x16xf32>
    %c0_10 = arith.constant 0 : index
    %c0_11 = arith.constant 0 : index
    %24 = vector.load %arg3[%c0_10, %c0_11] : memref<128x16xf32, #tpu.memory_space<vmem>>, vector<128x16xf32>
    tpu.vector_store %arg3[%c0_10, %c0_11], %23 {strides = array<i32>} : memref<128x16xf32, #tpu.memory_space<vmem>>, vector<128x16xf32>,
    return
  }
}

module attributes {stable_mosaic.version = 11 : i64} {
  func.func @_matmul_kernel(%arg0: memref<128x32xbf16, #tpu.memory_space<vmem>>, %arg1: memref<32x128xbf16, #tpu.memory_space<vmem>>, %arg2: memref<128x128xf32, #tpu.memory_space<vmem>>) attributes {dimension_semantics = [], scalar_prefetch = 0 : i64, scratch_operands = 0 : i64, tpu.core_type = #tpu.core_type<tc>} {
    %c0 = arith.constant 0 : index
    %c0_0 = arith.constant 0 : index
    %0 = vector.load %arg0[%c0, %c0_0] : memref<128x32xbf16, #tpu.memory_space<vmem>>, vector<128x32xbf16>
    %c0_1 = arith.constant 0 : index
    %c0_2 = arith.constant 0 : index
    %1 = vector.load %arg1[%c0_1, %c0_2] : memref<32x128xbf16, #tpu.memory_space<vmem>>, vector<32x128xbf16>
    %cst = arith.constant dense<0.000000e+00> : vector<128x128xf32>
    %2 = tpu.matmul %0, %1, %cst {dimension_numbers = #tpu.dot_dimension_numbers<[1], [0], [0], [1], [0, 0, 1, 1], [], []>} : vector<128x32xbf16>, vector<32x128xbf16>, vector<128x128xf32> -> vector<128x128xf32>
    %c0_3 = arith.constant 0 : index
    %c0_4 = arith.constant 0 : index
    %3 = vector.load %arg2[%c0_3, %c0_4] : memref<128x128xf32, #tpu.memory_space<vmem>>, vector<128x128xf32>
    tpu.vector_store %arg2[%c0_3, %c0_4], %2 {strides = array<i32>} : memref<128x128xf32, #tpu.memory_space<vmem>>, vector<128x128xf32>,
    return
  }
}

module attributes {stable_mosaic.version = 11 : i64} {
  func.func @_bn_act_kernel(%arg0: memref<512x8xf32, #tpu.memory_space<vmem>>, %arg1: memref<1x8xf32, #tpu.memory_space<vmem>>, %arg2: memref<1x8xf32, #tpu.memory_space<vmem>>, %arg3: memref<512x8xf32, #tpu.memory_space<vmem>>) attributes {dimension_semantics = [], scalar_prefetch = 0 : i64, scratch_operands = 0 : i64, tpu.core_type = #tpu.core_type<tc>} {
    %c0 = arith.constant 0 : index
    %c0_0 = arith.constant 0 : index
    %0 = vector.load %arg0[%c0, %c0_0] : memref<512x8xf32, #tpu.memory_space<vmem>>, vector<512x8xf32>
    %cst = arith.constant dense<0.000000e+00> : vector<8xf32>
    %1 = vector.multi_reduction <add>, %0, %cst [0] : vector<512x8xf32> to vector<8xf32>
    %2 = vector.shape_cast %1 : vector<8xf32> to vector<1x8xf32>
    %cst_1 = arith.constant 0.001953125 : f32
    %3 = vector.broadcast %cst_1 : f32 to vector<1x8xf32>
    %4 = arith.mulf %2, %3 : vector<1x8xf32>
    %5 = vector.broadcast %4 : vector<1x8xf32> to vector<512x8xf32>
    %6 = arith.subf %0, %5 : vector<512x8xf32>
    %7 = arith.mulf %6, %6 : vector<512x8xf32>
    %cst_2 = arith.constant dense<0.000000e+00> : vector<8xf32>
    %8 = vector.multi_reduction <add>, %7, %cst_2 [0] : vector<512x8xf32> to vector<8xf32>
    %9 = vector.shape_cast %8 : vector<8xf32> to vector<1x8xf32>
    %cst_3 = arith.constant 0.001953125 : f32
    %10 = vector.broadcast %cst_3 : f32 to vector<1x8xf32>
    %11 = arith.mulf %9, %10 : vector<1x8xf32>
    %cst_4 = arith.constant 9.99999974E-6 : f32
    %12 = vector.broadcast %cst_4 : f32 to vector<1x8xf32>
    %13 = arith.addf %11, %12 : vector<1x8xf32>
    %14 = math.rsqrt %13 : vector<1x8xf32>
    %c0_5 = arith.constant 0 : index
    %c0_6 = arith.constant 0 : index
    %15 = vector.load %arg1[%c0_5, %c0_6] : memref<1x8xf32, #tpu.memory_space<vmem>>, vector<1x8xf32>
    %16 = arith.mulf %14, %15 : vector<1x8xf32>
    %17 = vector.broadcast %16 : vector<1x8xf32> to vector<512x8xf32>
    %18 = arith.mulf %6, %17 : vector<512x8xf32>
    %c0_7 = arith.constant 0 : index
    %c0_8 = arith.constant 0 : index
    %19 = vector.load %arg2[%c0_7, %c0_8] : memref<1x8xf32, #tpu.memory_space<vmem>>, vector<1x8xf32>
    %20 = vector.broadcast %19 : vector<1x8xf32> to vector<512x8xf32>
    %21 = arith.addf %18, %20 : vector<512x8xf32>
    %cst_9 = arith.constant 0.000000e+00 : f32
    %22 = vector.broadcast %cst_9 : f32 to vector<512x8xf32>
    %23 = arith.maximumf %21, %22 : vector<512x8xf32>
    %c0_10 = arith.constant 0 : index
    %c0_11 = arith.constant 0 : index
    %24 = vector.load %arg3[%c0_10, %c0_11] : memref<512x8xf32, #tpu.memory_space<vmem>>, vector<512x8xf32>
    tpu.vector_store %arg3[%c0_10, %c0_11], %23 {strides = array<i32>} : memref<512x8xf32, #tpu.memory_space<vmem>>, vector<512x8xf32>,
    return
  }
}

module attributes {stable_mosaic.version = 11 : i64} {
  func.func @_matmul_kernel(%arg0: memref<512x8xbf16, #tpu.memory_space<vmem>>, %arg1: memref<8x48xbf16, #tpu.memory_space<vmem>>, %arg2: memref<512x48xf32, #tpu.memory_space<vmem>>) attributes {dimension_semantics = [], scalar_prefetch = 0 : i64, scratch_operands = 0 : i64, tpu.core_type = #tpu.core_type<tc>} {
    %c0 = arith.constant 0 : index
    %c0_0 = arith.constant 0 : index
    %0 = vector.load %arg0[%c0, %c0_0] : memref<512x8xbf16, #tpu.memory_space<vmem>>, vector<512x8xbf16>
    %c0_1 = arith.constant 0 : index
    %c0_2 = arith.constant 0 : index
    %1 = vector.load %arg1[%c0_1, %c0_2] : memref<8x48xbf16, #tpu.memory_space<vmem>>, vector<8x48xbf16>
    %cst = arith.constant dense<0.000000e+00> : vector<512x48xf32>
    %2 = tpu.matmul %0, %1, %cst {dimension_numbers = #tpu.dot_dimension_numbers<[1], [0], [0], [1], [0, 0, 1, 1], [], []>} : vector<512x8xbf16>, vector<8x48xbf16>, vector<512x48xf32> -> vector<512x48xf32>
    %c0_3 = arith.constant 0 : index
    %c0_4 = arith.constant 0 : index
    %3 = vector.load %arg2[%c0_3, %c0_4] : memref<512x48xf32, #tpu.memory_space<vmem>>, vector<512x48xf32>
    tpu.vector_store %arg2[%c0_3, %c0_4], %2 {strides = array<i32>} : memref<512x48xf32, #tpu.memory_space<vmem>>, vector<512x48xf32>,
    return
  }
}

module attributes {stable_mosaic.version = 11 : i64} {
  func.func @_bn_act_kernel(%arg0: memref<2048x3xf32, #tpu.memory_space<vmem>>, %arg1: memref<1x3xf32, #tpu.memory_space<vmem>>, %arg2: memref<1x3xf32, #tpu.memory_space<vmem>>, %arg3: memref<2048x3xf32, #tpu.memory_space<vmem>>) attributes {dimension_semantics = [], scalar_prefetch = 0 : i64, scratch_operands = 0 : i64, tpu.core_type = #tpu.core_type<tc>} {
    %c0 = arith.constant 0 : index
    %c0_0 = arith.constant 0 : index
    %0 = vector.load %arg0[%c0, %c0_0] : memref<2048x3xf32, #tpu.memory_space<vmem>>, vector<2048x3xf32>
    %cst = arith.constant dense<0.000000e+00> : vector<3xf32>
    %1 = vector.multi_reduction <add>, %0, %cst [0] : vector<2048x3xf32> to vector<3xf32>
    %2 = vector.shape_cast %1 : vector<3xf32> to vector<1x3xf32>
    %cst_1 = arith.constant 4.8828125E-4 : f32
    %3 = vector.broadcast %cst_1 : f32 to vector<1x3xf32>
    %4 = arith.mulf %2, %3 : vector<1x3xf32>
    %5 = vector.broadcast %4 : vector<1x3xf32> to vector<2048x3xf32>
    %6 = arith.subf %0, %5 : vector<2048x3xf32>
    %7 = arith.mulf %6, %6 : vector<2048x3xf32>
    %cst_2 = arith.constant dense<0.000000e+00> : vector<3xf32>
    %8 = vector.multi_reduction <add>, %7, %cst_2 [0] : vector<2048x3xf32> to vector<3xf32>
    %9 = vector.shape_cast %8 : vector<3xf32> to vector<1x3xf32>
    %cst_3 = arith.constant 4.8828125E-4 : f32
    %10 = vector.broadcast %cst_3 : f32 to vector<1x3xf32>
    %11 = arith.mulf %9, %10 : vector<1x3xf32>
    %cst_4 = arith.constant 9.99999974E-6 : f32
    %12 = vector.broadcast %cst_4 : f32 to vector<1x3xf32>
    %13 = arith.addf %11, %12 : vector<1x3xf32>
    %14 = math.rsqrt %13 : vector<1x3xf32>
    %c0_5 = arith.constant 0 : index
    %c0_6 = arith.constant 0 : index
    %15 = vector.load %arg1[%c0_5, %c0_6] : memref<1x3xf32, #tpu.memory_space<vmem>>, vector<1x3xf32>
    %16 = arith.mulf %14, %15 : vector<1x3xf32>
    %17 = vector.broadcast %16 : vector<1x3xf32> to vector<2048x3xf32>
    %18 = arith.mulf %6, %17 : vector<2048x3xf32>
    %c0_7 = arith.constant 0 : index
    %c0_8 = arith.constant 0 : index
    %19 = vector.load %arg2[%c0_7, %c0_8] : memref<1x3xf32, #tpu.memory_space<vmem>>, vector<1x3xf32>
    %20 = vector.broadcast %19 : vector<1x3xf32> to vector<2048x3xf32>
    %21 = arith.addf %18, %20 : vector<2048x3xf32>
    %22 = math.tanh %21 : vector<2048x3xf32>
    %c0_9 = arith.constant 0 : index
    %c0_10 = arith.constant 0 : index
    %23 = vector.load %arg3[%c0_9, %c0_10] : memref<2048x3xf32, #tpu.memory_space<vmem>>, vector<2048x3xf32>
    tpu.vector_store %arg3[%c0_9, %c0_10], %22 {strides = array<i32>} : memref<2048x3xf32, #tpu.memory_space<vmem>>, vector<2048x3xf32>,
    return
  }
}

</mosaic_0001>

<bundles_post_ra>
// kernel: _lambda_.10
= control target key start
LH: loop header
LB: loop body
LE: loop exit
PB: predicated region body
PF: predicated region fallthrough
CT: control target
= control target key end

     0   :  { %vm74_vm0 = vcmask 523264   ;;  %s286_s1 = inlined_call_operand.vmem [shape: bf16[64,256], index: 1, kind: input, shape index: {}]   ;;  %s287_s0 = inlined_call_operand.vmem [shape: bf16[32,64], index: 0, kind: input, shape index: {}]   ;;  %s288_s2 = inlined_call_operand.vmem [shape: f32[32,256], index: 2, kind: output, shape index: {}]  }
   0x1   :  { %v165_v0 = vld [vmem:[%s286_s1 + $0x30] sm:$0xf]  ;;  %v184_v1 = vld [vmem:[%s286_s1 + $0x34] sm:$0xf0]  ;;  %v183_v2 = vld [vmem:[%s286_s1 + $0x34] sm:$0xf] }
   0x2   :  { %v166_v3 = vor.u32 %v184_v1, %v165_v0  ;;  %v167_v4 = vld [vmem:[%s286_s1 + $0x38] sm:$0xf0]  ;;  %v157_v5 = vld [vmem:[%s286_s1 + $0x20] sm:$0xf]  ;;  %v182_v6 = vld [vmem:[%s286_s1 + $0x24] sm:$0xf0] }
   0x3   :  { %v170_v7 = vor.u32 %v183_v2, %v167_v4  ;;  %v181_v8 = vld [vmem:[%s286_s1 + $0x24] sm:$0xf]  ;;  %v159_v9 = vld [vmem:[%s286_s1 + $0x28] sm:$0xf0]  ;;  %v158_v10 = vor.u32 %v182_v6, %v157_v5  ;;  %v149_v12 = vld [vmem:[%s286_s1 + $0x10] sm:$0xf] }
   0x4   :  { %85 = vmatpush.bf16.msra.mxu0 %v166_v3  ;;  %185 = vmatpush.bf16.msra.mxu2 %v166_v3  ;;  %v162_v11 = vor.u32 %v181_v8, %v159_v9  ;;  %v180_v13 = vld [vmem:[%s286_s1 + $0x14] sm:$0xf0]  ;;  %v179_v14 = vld [vmem:[%s286_s1 + $0x14] sm:$0xf]  ;;  %v151_v15 = vld [vmem:[%s286_s1 + $0x18] sm:$0xf0] }
   0x5   :  { %104 = vmatpush.bf16.msra.mxu1 %v170_v7  ;;  %189 = vmatpush.bf16.msra.mxu3 %v170_v7  ;;  %v150_v16 = vor.u32 %v180_v13, %v149_v12  ;;  %v154_v17 = vor.u32 %v179_v14, %v151_v15  ;;  %v141_v18 = vld [vmem:[%s286_s1] sm:$0xf]  ;;  %v178_v19 = vld [vmem:[%s286_s1 + $0x4] sm:$0xf0]  ;;  %v177_v20 = vld [vmem:[%s286_s1 + $0x4] sm:$0xf] }
   0x6   :  { %v143_v21 = vld [vmem:[%s286_s1 + $0x8] sm:$0xf0]  ;;  %v142_v22 = vor.u32 %v178_v19, %v141_v18  ;;  %v175_v24 = vld [vmem:[%s287_s0] sm:$0xff] }
   0x7   :  { %v146_v23 = vor.u32 %v177_v20, %v143_v21  ;;  %v176_v25 = vld [vmem:[%s287_s0 + $0x8] sm:$0xff] }
   0x8   :  { %86 = vmatpush.bf16.msra.mxu0 %v158_v10  ;;  %186 = vmatpush.bf16.msra.mxu2 %v158_v10 }
   0x9   :  { %105 = vmatpush.bf16.msra.mxu1 %v162_v11  ;;  %190 = vmatpush.bf16.msra.mxu3 %v162_v11 }
   0xc   :  { %87 = vmatpush.bf16.msra.mxu0 %v150_v16  ;;  %187 = vmatpush.bf16.msra.mxu2 %v150_v16 }
   0xd   :  { %106 = vmatpush.bf16.msra.mxu1 %v154_v17  ;;  %191 = vmatpush.bf16.msra.mxu3 %v154_v17 }
  0x10   :  { %88 = vmatpush.bf16.msra.mxu0 %v142_v22  ;;  %188 = vmatpush.bf16.msra.mxu2 %v142_v22 }
  0x11   :  { %107 = vmatpush.bf16.msra.mxu1 %v146_v23  ;;  %192 = vmatpush.bf16.msra.mxu3 %v146_v23 }
  0x13   :  { %171 = vmatmul.msk.bf16.vlgmr.msra.gmra.mxu0 %vm74_vm0, %v175_v24  ;;  %172 = vmatmul.msk.bf16.vlgmr.msra.gmra.mxu2 %vm74_vm0, %v176_v25 }
  0x14   :  { %173 = vmatmul.msk.bf16.vlgmr.msra.gmra.mxu1 %vm74_vm0, %v175_v24  ;;  %174 = vmatmul.msk.bf16.vlgmr.msra.gmra.mxu3 %vm74_vm0, %v176_v25 }
  0x90   :  { %v90_v26 = vpop.f32.mrf.mxu0 }
  0x91   :  { %119 = vst [vmem:[%s288_s2] sm:$0xff] %v90_v26  ;;  %v109_v27 = vpop.f32.mrf.mxu1 }
  0x92   :  { %120 = vst [vmem:[%s288_s2 + $0x8] sm:$0xff] %v109_v27 }
  0x96   :  { %v95_v28 = vpop.f32.mrf.mxu2 }
  0x97   :  { %123 = vst [vmem:[%s288_s2 + $0x20] sm:$0xff] %v95_v28  ;;  %v114_v29 = vpop.f32.mrf.mxu3 }
  0x98   :  { %124 = vst [vmem:[%s288_s2 + $0x28] sm:$0xff] %v114_v29  ;;  %v92_v30 = vpop.f32.mrf.mxu0 }
  0x99   :  { %121 = vst [vmem:[%s288_s2 + $0x10] sm:$0xff] %v92_v30  ;;  %v111_v31 = vpop.f32.mrf.mxu1 }
  0x9a   :  { %122 = vst [vmem:[%s288_s2 + $0x18] sm:$0xff] %v111_v31 }
  0x9e   :  { %v97_v32 = vpop.f32.mrf.mxu2 }
  0x9f   :  { %125 = vst [vmem:[%s288_s2 + $0x30] sm:$0xff] %v97_v32  ;;  %v116_v33 = vpop.f32.mrf.mxu3 }
  0xa0   :  { %126 = vst [vmem:[%s288_s2 + $0x38] sm:$0xff] %v116_v33 }

// kernel: _lambda_.8
= control target key start
LH: loop header
LB: loop body
LE: loop exit
PB: predicated region body
PF: predicated region fallthrough
CT: control target
= control target key end

     0   :  { %7 = vsyncpa [#allocation3], 0  ;;  %s182_s12 = smov [#allocation2]   ;;  %s183_s14 = smov 256   ;;  %s209_s0 = inlined_call_operand.vmem [shape: bf16[2,16], index: 0, kind: input, shape index: {}]   ;;  %s210_s1 = inlined_call_operand.hbm [shape: bf16[16,512], index: 1, kind: input, shape index: {}]   ;;  %s211_s2 = inlined_call_operand.vmem [shape: f32[2,512], index: 2, kind: output, shape index: {}]  }
   0x1   :  { %s14_s11 = sshll.u32 %s210_s1, 4  ;;  %s16_s13 = sshll.u32 %s182_s12, 4  ;;  %s15_s11 = int_to_ptr.hbm [resolvable:$true] %s14_s11  ;;  %s17_s13 = int_to_ptr.vmem [resolvable:$true] %s16_s13 }
   0x2   :  { %s184_s15 = smov 16  }
   0x3   :  { %22 = dma.hbm_to_vmem [thread:$0]  %s15_s11, 512, %s17_s13, [#allocation3], %s183_s14, %s183_s14, %s184_s15  }
   0x4   :  { %180 = dma.done.wait [#allocation3], 512  }
   0x5   :  { %181 = vsyncadd [#allocation3], 4294966784  ;;  %v131_v0 = vld [vmem:[#allocation2] sm:$0xf]  ;;  %v151_v1 = vld [vmem:[#allocation2 + $0xc] sm:$0xf0] }
   0x6   :  { %v149_v2 = vld [vmem:[#allocation2 + $0x4] sm:$0xf]  ;;  %v132_v3 = vor.u32 %v151_v1, %v131_v0  ;;  %v133_v4 = vld [vmem:[#allocation2 + $0x10] sm:$0xf0]  ;;  %v139_v5 = vld [vmem:[#allocation2 + $0x8] sm:$0xf] }
   0x7   :  { %v152_v6 = vld [vmem:[#allocation2 + $0x14] sm:$0xf0]  ;;  %v136_v7 = vor.u32 %v149_v2, %v133_v4  ;;  %v150_v9 = vld [vmem:[#allocation2 + $0xc] sm:$0xf]  ;;  %v141_v10 = vld [vmem:[#allocation2 + $0x18] sm:$0xf0] }
   0x8   :  { %v140_v8 = vor.u32 %v152_v6, %v139_v5  ;;  %64 = vmatpush.bf16.msra.mxu0 %v132_v3  ;;  %v144_v11 = vor.u32 %v150_v9, %v141_v10  ;;  %v28_v12 = vld [vmem:[%s209_s0] sm:$0x1]  ;;  %vm53_vm0 = vcmask 130048   ;;  %vm116_vm1 = vcmask 1041408  }
   0x9   :  { %77 = vmatpush.bf16.msra.mxu1 %v136_v7  ;;  %vm118_vm2 = vcmask 1045508   ;;  %vm120_vm3 = vcmask 1043456  }
   0xa   :  { %90 = vmatpush.bf16.msra.mxu2 %v140_v8  ;;  %103 = vmatpush.bf16.msra.mxu3 %v144_v11 }
   0xb   :  { %145 = vmatmul.msk.bf16.vlgmr.msra.gmra.mxu0 %vm53_vm0, %v28_v12 }
   0xc   :  { %146 = vmatmul.msk.bf16.vlgmr.msra.gmra.mxu1 %vm53_vm0, %v28_v12 }
   0xd   :  { %147 = vmatmul.msk.bf16.vlgmr.msra.gmra.mxu2 %vm53_vm0, %v28_v12  ;;  %148 = vmatmul.msk.bf16.vlgmr.msra.gmra.mxu3 %vm53_vm0, %v28_v12 }
  0x88   :  { %v66_v13 = vpop.f32.mrf.mxu0 }
  0x89   :  { %v79_v14 = vpop.f32.mrf.mxu1 }
  0x8a   :  { %v113_v15 = vrot.slane %v79_v14, 6 }
  0x8c   :  { %v117_v22 = vsel %vm116_vm1, %v66_v13, %v113_v15 }
  0x90   :  { %v92_v16 = vpop.f32.mrf.mxu2  ;;  %v105_v18 = vpop.f32.mrf.mxu3 }
  0x91   :  { %v114_v17 = vrot.slane %v92_v16, 4  ;;  %v68_v19 = vpop.f32.mrf.mxu0  ;;  %v115_v20 = vrot.slane %v105_v18, 2  ;;  %v81_v21 = vpop.f32.mrf.mxu1 }
  0x93   :  { %v119_v23 = vsel %vm118_vm2, %v114_v17, %v115_v20 }
  0x94   :  { %v121_v24 = vsel %vm120_vm3, %v117_v22, %v119_v23 }
  0x95   :  { %123 = vst [vmem:[%s211_s2] sm:$0xff] %v121_v24 }
  0x98   :  { %v94_v25 = vpop.f32.mrf.mxu2  ;;  %v107_v26 = vpop.f32.mrf.mxu3 }
  0x99   :  { %128 = vsyncpa [#allocation3], 1 }

// kernel: _lambda_.9
= control target key start
LH: loop header
LB: loop body
LE: loop exit
PB: predicated region body
PF: predicated region fallthrough
CT: control target
= control target key end

     0   :  { %vm18_vm0 = vcmask 261120   ;;  %s158_s0 = inlined_call_operand.vmem [shape: f32[32,32], index: 0, kind: input, shape index: {}]   ;;  %s159_s2 = inlined_call_operand.vmem [shape: f32[1,32], index: 2, kind: input, shape index: {}]   ;;  %s160_s1 = inlined_call_operand.vmem [shape: f32[1,32], index: 1, kind: input, shape index: {}]   ;;  %s161_s3 = inlined_call_operand.vmem [shape: f32[32,32], index: 3, kind: output, shape index: {}]  }
   0x1   :  { %v14_v0 = vld [vmem:[%s158_s0] sm:$0xff]  ;;  %v15_v1 = vld [vmem:[%s158_s0 + $0x8] sm:$0xff]  ;;  %v16_v2 = vld [vmem:[%s158_s0 + $0x10] sm:$0xff] }
   0x2   :  { %v17_v3 = vld [vmem:[%s158_s0 + $0x18] sm:$0xff]  ;;  %v19_v4 = vsel %vm18_vm0, %v14_v0, 0.0  ;;  %v20_v5 = vsel %vm18_vm0, %v15_v1, 0.0  ;;  %v22_v6 = vsel %vm18_vm0, %v16_v2, 0.0  ;;  %v66_v47 = vld [vmem:[%s160_s1] sm:$0x1] }
   0x3   :  { %v21_v7 = vadd.f32 %v20_v5, %v19_v4  ;;  %v24_v8 = vsel %vm18_vm0, %v17_v3, 0.0  ;;  %v93_v51 = vld [vmem:[%s159_s2] ss:$0 sm:$0xff] }
   0x5   :  { %v23_v9 = vadd.f32 %v22_v6, %v21_v7 }
   0x7   :  { %v25_v10 = vadd.f32 %v24_v8, %v23_v9 }
   0x9   :  { %v26_v11 = vrot.slane %v25_v10, 4 }
   0xb   :  { %v27_v12 = vadd.f32 %v26_v11, %v25_v10 }
   0xd   :  { %v28_v13 = vrot.slane %v27_v12, 2 }
   0xf   :  { %v29_v14 = vadd.f32 %v28_v13, %v27_v12 }
  0x11   :  { %v30_v15 = vrot.slane %v29_v14, 1 }
  0x13   :  { %v31_v16 = vadd.f32 %v30_v15, %v29_v14 }
  0x15   :  { %v32_v17 = vmul.f32 0.03125, %v31_v16 }
  0x17   :  { %v33_v18 = vsub.f32 %v14_v0, %v32_v17  ;;  %v34_v19 = vsub.f32 %v15_v1, %v32_v17  ;;  %v35_v20 = vsub.f32 %v16_v2, %v32_v17  ;;  %v36_v21 = vsub.f32 %v17_v3, %v32_v17 }
  0x19   :  { %v37_v22 = vmul.f32 %v33_v18, %v33_v18  ;;  %v38_v23 = vmul.f32 %v34_v19, %v34_v19  ;;  %v39_v24 = vmul.f32 %v35_v20, %v35_v20  ;;  %v40_v25 = vmul.f32 %v36_v21, %v36_v21 }
  0x1b   :  { %v41_v26 = vsel %vm18_vm0, %v37_v22, 0.0  ;;  %v42_v27 = vsel %vm18_vm0, %v38_v23, 0.0  ;;  %v44_v28 = vsel %vm18_vm0, %v39_v24, 0.0  ;;  %v46_v30 = vsel %vm18_vm0, %v40_v25, 0.0 }
  0x1c   :  { %v43_v29 = vadd.f32 %v42_v27, %v41_v26 }
  0x1e   :  { %v45_v31 = vadd.f32 %v44_v28, %v43_v29 }
  0x20   :  { %v47_v32 = vadd.f32 %v46_v30, %v45_v31 }
  0x22   :  { %v48_v33 = vrot.slane %v47_v32, 4 }
  0x24   :  { %v49_v34 = vadd.f32 %v48_v33, %v47_v32 }
  0x26   :  { %v50_v35 = vrot.slane %v49_v34, 2 }
  0x28   :  { %v51_v36 = vadd.f32 %v50_v35, %v49_v34 }
  0x2a   :  { %v52_v37 = vrot.slane %v51_v36, 1 }
  0x2c   :  { %v53_v38 = vadd.f32 %v52_v37, %v51_v36 }
  0x2e   :  { %v54_v39 = vmul.f32 0.03125, %v53_v38 }
  0x30   :  { %v55_v40 = vadd.f32 1e-05, %v54_v39 }
  0x32   :  { %94 = vrsqrt.f32 %v55_v40  ;;  %vm62_vm1 = vweird.f32 %v55_v40 }
  0x38   :  { %v95_v41 = vpop.eup %94 }
  0x39   :  { %v57_v42 = vmul.f32 %v95_v41, %v55_v40  ;;  %vm63_vm2 = vweird.f32 %v95_v41 }
  0x3a   :  { %vm64_vm3 = vmor %vm62_vm1, %vm63_vm2 }
  0x3b   :  { %v58_v43 = vmul.f32 %v95_v41, %v57_v42 }
  0x3d   :  { %v59_v44 = vmul.f32 0.5, %v58_v43 }
  0x3f   :  { %v60_v45 = vsub.f32 1.5, %v59_v44 }
  0x41   :  { %v61_v46 = vmul.f32 %v95_v41, %v60_v45 }
  0x43   :  { %v65_v48 = vsel %vm64_vm3, %v95_v41, %v61_v46 }
  0x44   :  { %v67_v49 = vmul.f32 %v66_v47, %v65_v48 }
  0x46   :  { %v68_v50 = vperm.slane %v67_v49, 0 }
  0x48   :  { %v69_v52 = vmul.f32 %v68_v50, %v33_v18  ;;  %v70_v53 = vmul.f32 %v68_v50, %v34_v19  ;;  %v71_v54 = vmul.f32 %v68_v50, %v35_v20  ;;  %v72_v55 = vmul.f32 %v68_v50, %v36_v21 }
  0x4a   :  { %v77_v56 = vadd.f32 %v93_v51, %v69_v52  ;;  %v78_v57 = vadd.f32 %v93_v51, %v70_v53  ;;  %v79_v58 = vadd.f32 %v93_v51, %v71_v54  ;;  %v80_v59 = vadd.f32 %v93_v51, %v72_v55 }
  0x4c   :  { %v81_v60 = vmax.f32 %v77_v56, 0.0  ;;  %v82_v61 = vmax.f32 %v78_v57, 0.0  ;;  %v83_v62 = vmax.f32 %v79_v58, 0.0  ;;  %v84_v63 = vmax.f32 %v80_v59, 0.0 }
  0x4e   :  { %85 = vst.msk [vmem:[%s161_s3] sm:$0xff] %vm18_vm0, %v81_v60 }
  0x4f   :  { %86 = vst.msk [vmem:[%s161_s3 + $0x8] sm:$0xff] %vm18_vm0, %v82_v61 }
  0x50   :  { %87 = vst.msk [vmem:[%s161_s3 + $0x10] sm:$0xff] %vm18_vm0, %v83_v62 }
  0x51   :  { %88 = vst.msk [vmem:[%s161_s3 + $0x18] sm:$0xff] %vm18_vm0, %v84_v63 }

// kernel: _lambda_.12
= control target key start
LH: loop header
LB: loop body
LE: loop exit
PB: predicated region body
PF: predicated region fallthrough
CT: control target
= control target key end

     0   :  { %vm84_vm0 = vcmask 261120   ;;  %s343_s1 = inlined_call_operand.vmem [shape: bf16[32,128], index: 1, kind: input, shape index: {}]   ;;  %s344_s0 = inlined_call_operand.vmem [shape: bf16[128,32], index: 0, kind: input, shape index: {}]   ;;  %s345_s2 = inlined_call_operand.vmem [shape: f32[128,128], index: 2, kind: output, shape index: {}]  }
   0x1   :  { %v235_v0 = vld [vmem:[%s343_s1 + $0x8] sm:$0xff]  ;;  %v234_v1 = vld [vmem:[%s343_s1] sm:$0xff]  ;;  %v228_v3 = vld [vmem:[%s344_s0 + $0x10] sm:$0xff] }
   0x2   :  { %115 = vmatpush.bf16.msra.mxu0 %v235_v0  ;;  %236 = vmatpush.bf16.msra.mxu1 %v235_v0  ;;  %v226_v2 = vld [vmem:[%s344_s0] sm:$0xff]  ;;  %v232_v5 = vld [vmem:[%s344_s0 + $0x30] sm:$0xff]  ;;  %v227_v6 = vld [vmem:[%s344_s0 + $0x8] sm:$0xff] }
   0x3   :  { %237 = vmatpush.bf16.msra.mxu2 %v235_v0  ;;  %238 = vmatpush.bf16.msra.mxu3 %v235_v0  ;;  %v230_v4 = vld [vmem:[%s344_s0 + $0x20] sm:$0xff]  ;;  %v229_v7 = vld [vmem:[%s344_s0 + $0x18] sm:$0xff]  ;;  %v231_v8 = vld [vmem:[%s344_s0 + $0x28] sm:$0xff] }
   0x4   :  { %v233_v9 = vld [vmem:[%s344_s0 + $0x38] sm:$0xff] }
   0x6   :  { %116 = vmatpush.bf16.msra.mxu0 %v234_v1  ;;  %239 = vmatpush.bf16.msra.mxu1 %v234_v1 }
   0x7   :  { %240 = vmatpush.bf16.msra.mxu2 %v234_v1  ;;  %241 = vmatpush.bf16.msra.mxu3 %v234_v1 }
   0x9   :  { %218 = vmatmul.msk.bf16.vlgmr.msra.gmra.mxu0 %vm84_vm0, %v226_v2  ;;  %220 = vmatmul.msk.bf16.vlgmr.msra.gmra.mxu1 %vm84_vm0, %v228_v3 }
   0xa   :  { %222 = vmatmul.msk.bf16.vlgmr.msra.gmra.mxu2 %vm84_vm0, %v230_v4  ;;  %224 = vmatmul.msk.bf16.vlgmr.msra.gmra.mxu3 %vm84_vm0, %v232_v5 }
  0x19   :  { %219 = vmatmul.msk.bf16.gmra.mxu0 %vm84_vm0, %v227_v6  ;;  %221 = vmatmul.msk.bf16.gmra.mxu1 %vm84_vm0, %v229_v7 }
  0x1a   :  { %223 = vmatmul.msk.bf16.gmra.mxu2 %vm84_vm0, %v231_v8  ;;  %225 = vmatmul.msk.bf16.gmra.mxu3 %vm84_vm0, %v233_v9 }
  0x86   :  { %v118_v10 = vpop.f32.mrf.mxu0  ;;  %v128_v11 = vpop.f32.mrf.mxu1 }
  0x87   :  { %158 = vst [vmem:[%s345_s2] sm:$0xff] %v118_v10 }
  0x88   :  { %162 = vst [vmem:[%s345_s2 + $0x20] sm:$0xff] %v128_v11 }
  0x8d   :  { %v138_v12 = vpop.f32.mrf.mxu2  ;;  %v148_v13 = vpop.f32.mrf.mxu3 }
  0x8e   :  { %166 = vst [vmem:[%s345_s2 + $0x40] sm:$0xff] %v138_v12  ;;  %v120_v14 = vpop.f32.mrf.mxu0  ;;  %v130_v15 = vpop.f32.mrf.mxu1 }
  0x8f   :  { %170 = vst [vmem:[%s345_s2 + $0x60] sm:$0xff] %v148_v13 }
  0x90   :  { %159 = vst [vmem:[%s345_s2 + $0x8] sm:$0xff] %v120_v14 }
  0x91   :  { %163 = vst [vmem:[%s345_s2 + $0x28] sm:$0xff] %v130_v15 }
  0x95   :  { %v140_v16 = vpop.f32.mrf.mxu2  ;;  %v150_v17 = vpop.f32.mrf.mxu3 }
  0x96   :  { %167 = vst [vmem:[%s345_s2 + $0x48] sm:$0xff] %v140_v16  ;;  %v123_v18 = vpop.f32.mrf.mxu0  ;;  %v133_v19 = vpop.f32.mrf.mxu1 }
  0x97   :  { %171 = vst [vmem:[%s345_s2 + $0x68] sm:$0xff] %v150_v17 }
  0x98   :  { %160 = vst [vmem:[%s345_s2 + $0x10] sm:$0xff] %v123_v18 }
  0x99   :  { %164 = vst [vmem:[%s345_s2 + $0x30] sm:$0xff] %v133_v19 }
  0x9d   :  { %v143_v20 = vpop.f32.mrf.mxu2  ;;  %v153_v21 = vpop.f32.mrf.mxu3 }
  0x9e   :  { %168 = vst [vmem:[%s345_s2 + $0x50] sm:$0xff] %v143_v20  ;;  %v125_v22 = vpop.f32.mrf.mxu0  ;;  %v135_v23 = vpop.f32.mrf.mxu1 }
  0x9f   :  { %172 = vst [vmem:[%s345_s2 + $0x70] sm:$0xff] %v153_v21 }
  0xa0   :  { %161 = vst [vmem:[%s345_s2 + $0x18] sm:$0xff] %v125_v22 }
  0xa1   :  { %165 = vst [vmem:[%s345_s2 + $0x38] sm:$0xff] %v135_v23 }
  0xa5   :  { %v145_v24 = vpop.f32.mrf.mxu2  ;;  %v155_v25 = vpop.f32.mrf.mxu3 }
  0xa6   :  { %169 = vst [vmem:[%s345_s2 + $0x58] sm:$0xff] %v145_v24 }
  0xa7   :  { %173 = vst [vmem:[%s345_s2 + $0x78] sm:$0xff] %v155_v25 }

// kernel: _lambda_.11
= control target key start
LH: loop header
LB: loop body
LE: loop exit
PB: predicated region body
PF: predicated region fallthrough
CT: control target
= control target key end

     0   :  { %vm30_vm0 = vcmask 130048   ;;  %s478_s0 = inlined_call_operand.vmem [shape: f32[128,16], index: 0, kind: input, shape index: {}]   ;;  %s479_s2 = inlined_call_operand.vmem [shape: f32[1,16], index: 2, kind: input, shape index: {}]   ;;  %s480_s1 = inlined_call_operand.vmem [shape: f32[1,16], index: 1, kind: input, shape index: {}]   ;;  %s481_s3 = inlined_call_operand.vmem [shape: f32[128,16], index: 3, kind: output, shape index: {}]  }
   0x1   :  { %v14_v0 = vld [vmem:[%s478_s0] sm:$0xff]  ;;  %v15_v1 = vld [vmem:[%s478_s0 + $0x8] sm:$0xff]  ;;  %v16_v2 = vld [vmem:[%s478_s0 + $0x10] sm:$0xff] }
   0x2   :  { %v17_v3 = vld [vmem:[%s478_s0 + $0x18] sm:$0xff]  ;;  %v31_v4 = vsel %vm30_vm0, %v14_v0, 0.0  ;;  %v32_v5 = vsel %vm30_vm0, %v15_v1, 0.0  ;;  %v34_v6 = vsel %vm30_vm0, %v16_v2, 0.0  ;;  %v18_v7 = vld [vmem:[%s478_s0 + $0x20] sm:$0xff]  ;;  %v19_v10 = vld [vmem:[%s478_s0 + $0x28] sm:$0xff] }
   0x3   :  { %v33_v8 = vadd.f32 %v32_v5, %v31_v4  ;;  %v36_v9 = vsel %vm30_vm0, %v17_v3, 0.0  ;;  %v38_v12 = vsel %vm30_vm0, %v18_v7, 0.0  ;;  %v20_v13 = vld [vmem:[%s478_s0 + $0x30] sm:$0xff]  ;;  %v40_v15 = vsel %vm30_vm0, %v19_v10, 0.0  ;;  %v21_v16 = vld [vmem:[%s478_s0 + $0x38] sm:$0xff]  ;;  %v22_v19 = vld [vmem:[%s478_s0 + $0x40] sm:$0xff] }
   0x4   :  { %v42_v18 = vsel %vm30_vm0, %v20_v13, 0.0  ;;  %v44_v21 = vsel %vm30_vm0, %v21_v16, 0.0  ;;  %v23_v22 = vld [vmem:[%s478_s0 + $0x48] sm:$0xff]  ;;  %v46_v24 = vsel %vm30_vm0, %v22_v19, 0.0  ;;  %v24_v25 = vld [vmem:[%s478_s0 + $0x50] sm:$0xff]  ;;  %v25_v28 = vld [vmem:[%s478_s0 + $0x58] sm:$0xff] }
   0x5   :  { %v35_v11 = vadd.f32 %v34_v6, %v33_v8  ;;  %v48_v27 = vsel %vm30_vm0, %v23_v22, 0.0  ;;  %v50_v30 = vsel %vm30_vm0, %v24_v25, 0.0  ;;  %v26_v31 = vld [vmem:[%s478_s0 + $0x60] sm:$0xff]  ;;  %v52_v33 = vsel %vm30_vm0, %v25_v28, 0.0  ;;  %v27_v34 = vld [vmem:[%s478_s0 + $0x68] sm:$0xff]  ;;  %v28_v37 = vld [vmem:[%s478_s0 + $0x70] sm:$0xff] }
   0x6   :  { %v54_v36 = vsel %vm30_vm0, %v26_v31, 0.0  ;;  %v56_v39 = vsel %vm30_vm0, %v27_v34, 0.0  ;;  %v29_v40 = vld [vmem:[%s478_s0 + $0x78] sm:$0xff]  ;;  %v58_v42 = vsel %vm30_vm0, %v28_v37, 0.0 }
   0x7   :  { %v37_v14 = vadd.f32 %v36_v9, %v35_v11  ;;  %v60_v44 = vsel %vm30_vm0, %v29_v40, 0.0 }
   0x9   :  { %v39_v17 = vadd.f32 %v38_v12, %v37_v14 }
   0xb   :  { %v41_v20 = vadd.f32 %v40_v15, %v39_v17 }
   0xd   :  { %v43_v23 = vadd.f32 %v42_v18, %v41_v20 }
   0xf   :  { %v45_v26 = vadd.f32 %v44_v21, %v43_v23 }
  0x11   :  { %v47_v29 = vadd.f32 %v46_v24, %v45_v26 }
  0x13   :  { %v49_v32 = vadd.f32 %v48_v27, %v47_v29 }
  0x15   :  { %v51_v35 = vadd.f32 %v50_v30, %v49_v32 }
  0x17   :  { %v53_v38 = vadd.f32 %v52_v33, %v51_v35 }
  0x19   :  { %v55_v41 = vadd.f32 %v54_v36, %v53_v38 }
  0x1b   :  { %v57_v43 = vadd.f32 %v56_v39, %v55_v41 }
  0x1d   :  { %v59_v45 = vadd.f32 %v58_v42, %v57_v43 }
  0x1f   :  { %v61_v46 = vadd.f32 %v60_v44, %v59_v45 }
  0x21   :  { %v62_v47 = vrot.slane %v61_v46, 4 }
  0x23   :  { %v63_v48 = vadd.f32 %v62_v47, %v61_v46 }
  0x25   :  { %v64_v49 = vrot.slane %v63_v48, 2 }
  0x27   :  { %v65_v50 = vadd.f32 %v64_v49, %v63_v48 }
  0x29   :  { %v66_v51 = vrot.slane %v65_v50, 1 }
  0x2b   :  { %v67_v52 = vadd.f32 %v66_v51, %v65_v50 }
  0x2d   :  { %v68_v53 = vmul.f32 0.0078125, %v67_v52 }
  0x2f   :  { %v312_v54 = vsub.f32 %v14_v0, %v68_v53  ;;  %v314_v55 = vsub.f32 %v15_v1, %v68_v53  ;;  %v316_v56 = vsub.f32 %v16_v2, %v68_v53  ;;  %v318_v57 = vsub.f32 %v17_v3, %v68_v53 }
  0x30   :  { %v320_v58 = vsub.f32 %v18_v7, %v68_v53  ;;  %v328_v62 = vsub.f32 %v19_v10, %v68_v53  ;;  %v332_v0 = vsub.f32 %v20_v13, %v68_v53  ;;  %v339_v6 = vsub.f32 %v21_v16, %v68_v53 }
  0x31   :  { %v85_v59 = vmul.f32 %v312_v54, %v312_v54  ;;  %v86_v60 = vmul.f32 %v314_v55, %v314_v55  ;;  %v87_v61 = vmul.f32 %v316_v56, %v316_v56  ;;  %v88_v63 = vmul.f32 %v318_v57, %v318_v57 }
  0x32   :  { %v89_v1 = vmul.f32 %v320_v58, %v320_v58  ;;  %v90_v7 = vmul.f32 %v328_v62, %v328_v62  ;;  %v344_v10 = vsub.f32 %v22_v19, %v68_v53  ;;  %v91_v11 = vmul.f32 %v332_v0, %v332_v0 }
  0x33   :  { %v101_v2 = vsel %vm30_vm0, %v85_v59, 0.0  ;;  %v102_v3 = vsel %vm30_vm0, %v86_v60, 0.0  ;;  %v104_v4 = vsel %vm30_vm0, %v87_v61, 0.0  ;;  %v106_v8 = vsel %vm30_vm0, %v88_v63, 0.0 }
  0x34   :  { %v103_v5 = vadd.f32 %v102_v3, %v101_v2  ;;  %v108_v12 = vsel %vm30_vm0, %v89_v1, 0.0  ;;  %v349_v14 = vsub.f32 %v23_v22, %v68_v53  ;;  %v92_v15 = vmul.f32 %v339_v6, %v339_v6 }
  0x35   :  { %v110_v16 = vsel %vm30_vm0, %v90_v7, 0.0  ;;  %v354_v18 = vsub.f32 %v24_v25, %v68_v53  ;;  %v93_v19 = vmul.f32 %v344_v10, %v344_v10  ;;  %v112_v20 = vsel %vm30_vm0, %v91_v11, 0.0 }
  0x36   :  { %v105_v9 = vadd.f32 %v104_v4, %v103_v5  ;;  %v359_v23 = vsub.f32 %v25_v28, %v68_v53  ;;  %v94_v22 = vmul.f32 %v349_v14, %v349_v14  ;;  %v114_v24 = vsel %vm30_vm0, %v92_v15, 0.0 }
  0x37   :  { %v364_v27 = vsub.f32 %v26_v31, %v68_v53  ;;  %v95_v25 = vmul.f32 %v354_v18, %v354_v18  ;;  %v116_v29 = vsel %vm30_vm0, %v93_v19, 0.0  ;;  %v369_v32 = vsub.f32 %v27_v34, %v68_v53 }
  0x38   :  { %v107_v13 = vadd.f32 %v106_v8, %v105_v9  ;;  %v96_v28 = vmul.f32 %v359_v23, %v359_v23  ;;  %v118_v33 = vsel %vm30_vm0, %v94_v22, 0.0  ;;  %v374_v36 = vsub.f32 %v28_v37, %v68_v53 }
  0x39   :  { %v97_v31 = vmul.f32 %v364_v27, %v364_v27  ;;  %v120_v38 = vsel %vm30_vm0, %v95_v25, 0.0  ;;  %v379_v41 = vsub.f32 %v29_v40, %v68_v53  ;;  %v98_v34 = vmul.f32 %v369_v32, %v369_v32 }
  0x3a   :  { %v109_v17 = vadd.f32 %v108_v12, %v107_v13  ;;  %v122_v42 = vsel %vm30_vm0, %v96_v28, 0.0  ;;  %v99_v44 = vmul.f32 %v374_v36, %v374_v36  ;;  %v150_v12 = vld [vmem:[%s480_s1] sm:$0x1] }
  0x3b   :  { %v124_v37 = vsel %vm30_vm0, %v97_v31, 0.0  ;;  %v100_v46 = vmul.f32 %v379_v41, %v379_v41  ;;  %v126_v47 = vsel %vm30_vm0, %v98_v34, 0.0 }
  0x3c   :  { %v111_v21 = vadd.f32 %v110_v16, %v109_v17  ;;  %v128_v40 = vsel %vm30_vm0, %v99_v44, 0.0  ;;  %v225_v17 = vld [vmem:[%s479_s2] ss:$0 sm:$0xff] }
  0x3d   :  { %v130_v50 = vsel %vm30_vm0, %v100_v46, 0.0 }
  0x3e   :  { %v113_v26 = vadd.f32 %v112_v20, %v111_v21 }
  0x40   :  { %v115_v30 = vadd.f32 %v114_v24, %v113_v26 }
  0x42   :  { %v117_v35 = vadd.f32 %v116_v29, %v115_v30 }
  0x44   :  { %v119_v39 = vadd.f32 %v118_v33, %v117_v35 }
  0x46   :  { %v121_v43 = vadd.f32 %v120_v38, %v119_v39 }
  0x48   :  { %v123_v45 = vadd.f32 %v122_v42, %v121_v43 }
  0x4a   :  { %v125_v48 = vadd.f32 %v124_v37, %v123_v45 }
  0x4c   :  { %v127_v49 = vadd.f32 %v126_v47, %v125_v48 }
  0x4e   :  { %v129_v51 = vadd.f32 %v128_v40, %v127_v49 }
  0x50   :  { %v131_v52 = vadd.f32 %v130_v50, %v129_v51 }
  0x52   :  { %v132_v53 = vrot.slane %v131_v52, 4 }
  0x54   :  { %v133_v59 = vadd.f32 %v132_v53, %v131_v52 }
  0x56   :  { %v134_v60 = vrot.slane %v133_v59, 2 }
  0x58   :  { %v135_v61 = vadd.f32 %v134_v60, %v133_v59 }
  0x5a   :  { %v136_v63 = vrot.slane %v135_v61, 1 }
  0x5c   :  { %v137_v1 = vadd.f32 %v136_v63, %v135_v61 }
  0x5e   :  { %v138_v2 = vmul.f32 0.0078125, %v137_v1 }
  0x60   :  { %v139_v3 = vadd.f32 1e-05, %v138_v2 }
  0x62   :  { %226 = vrsqrt.f32 %v139_v3  ;;  %vm146_vm1 = vweird.f32 %v139_v3 }
  0x68   :  { %v227_v4 = vpop.eup %226 }
  0x69   :  { %v141_v5 = vmul.f32 %v227_v4, %v139_v3  ;;  %vm147_vm2 = vweird.f32 %v227_v4 }
  0x6a   :  { %vm148_vm3 = vmor %vm146_vm1, %vm147_vm2 }
  0x6b   :  { %v142_v7 = vmul.f32 %v227_v4, %v141_v5 }
  0x6d   :  { %v143_v8 = vmul.f32 0.5, %v142_v7 }
  0x6f   :  { %v144_v9 = vsub.f32 1.5, %v143_v8 }
  0x71   :  { %v145_v11 = vmul.f32 %v227_v4, %v144_v9 }
  0x73   :  { %v149_v13 = vsel %vm148_vm3, %v227_v4, %v145_v11 }
  0x74   :  { %v151_v15 = vmul.f32 %v150_v12, %v149_v13 }
  0x76   :  { %v152_v16 = vperm.slane %v151_v15, 0 }
  0x78   :  { %v153_v19 = vmul.f32 %v152_v16, %v312_v54  ;;  %v154_v20 = vmul.f32 %v152_v16, %v314_v55  ;;  %v155_v21 = vmul.f32 %v152_v16, %v316_v56  ;;  %v156_v22 = vmul.f32 %v152_v16, %v318_v57 }
  0x79   :  { %v157_v24 = vmul.f32 %v152_v16, %v320_v58  ;;  %v158_v26 = vmul.f32 %v152_v16, %v328_v62  ;;  %v159_v25 = vmul.f32 %v152_v16, %v332_v0  ;;  %v160_v29 = vmul.f32 %v152_v16, %v339_v6 }
  0x7a   :  { %v173_v30 = vadd.f32 %v225_v17, %v153_v19  ;;  %v174_v28 = vadd.f32 %v225_v17, %v154_v20  ;;  %v175_v33 = vadd.f32 %v225_v17, %v155_v21  ;;  %v176_v35 = vadd.f32 %v225_v17, %v156_v22 }
  0x7b   :  { %v177_v31 = vadd.f32 %v225_v17, %v157_v24  ;;  %v178_v54 = vadd.f32 %v225_v17, %v158_v26  ;;  %v179_v38 = vadd.f32 %v225_v17, %v159_v25  ;;  %v180_v42 = vadd.f32 %v225_v17, %v160_v29 }
  0x7c   :  { %v189_v55 = vmax.f32 %v173_v30, 0.0  ;;  %v190_v39 = vmax.f32 %v174_v28, 0.0  ;;  %v191_v56 = vmax.f32 %v175_v33, 0.0  ;;  %v192_v34 = vmax.f32 %v176_v35, 0.0 }
  0x7d   :  { %v193_v57 = vmax.f32 %v177_v31, 0.0  ;;  %v161_v58 = vmul.f32 %v152_v16, %v344_v10  ;;  %v162_v62 = vmul.f32 %v152_v16, %v349_v14  ;;  %v163_v0 = vmul.f32 %v152_v16, %v354_v18 }
  0x7e   :  { %205 = vst.msk [vmem:[%s481_s3] sm:$0xff] %vm30_vm0, %v189_v55  ;;  %v164_v6 = vmul.f32 %v152_v16, %v359_v23  ;;  %v194_v43 = vmax.f32 %v178_v54, 0.0  ;;  %v195_v44 = vmax.f32 %v179_v38, 0.0  ;;  %v165_v37 = vmul.f32 %v152_v16, %v364_v27 }
  0x7f   :  { %206 = vst.msk [vmem:[%s481_s3 + $0x8] sm:$0xff] %vm30_vm0, %v190_v39  ;;  %v166_v45 = vmul.f32 %v152_v16, %v369_v32  ;;  %v181_v10 = vadd.f32 %v225_v17, %v161_v58  ;;  %v182_v14 = vadd.f32 %v225_v17, %v162_v62  ;;  %v183_v18 = vadd.f32 %v225_v17, %v163_v0 }
  0x80   :  { %207 = vst.msk [vmem:[%s481_s3 + $0x10] sm:$0xff] %vm30_vm0, %v191_v56  ;;  %v167_v23 = vmul.f32 %v152_v16, %v374_v36  ;;  %v196_v46 = vmax.f32 %v180_v42, 0.0  ;;  %v184_v47 = vadd.f32 %v225_v17, %v164_v6  ;;  %v168_v27 = vmul.f32 %v152_v16, %v379_v41 }
  0x81   :  { %208 = vst.msk [vmem:[%s481_s3 + $0x18] sm:$0xff] %vm30_vm0, %v192_v34  ;;  %v197_v32 = vmax.f32 %v181_v10, 0.0  ;;  %v185_v48 = vadd.f32 %v225_v17, %v165_v37  ;;  %v198_v36 = vmax.f32 %v182_v14, 0.0  ;;  %v186_v40 = vadd.f32 %v225_v17, %v166_v45 }
  0x82   :  { %209 = vst.msk [vmem:[%s481_s3 + $0x20] sm:$0xff] %vm30_vm0, %v193_v57  ;;  %v199_v41 = vmax.f32 %v183_v18, 0.0  ;;  %v187_v49 = vadd.f32 %v225_v17, %v167_v23  ;;  %v200_v50 = vmax.f32 %v184_v47, 0.0  ;;  %v188_v51 = vadd.f32 %v225_v17, %v168_v27 }
  0x83   :  { %210 = vst.msk [vmem:[%s481_s3 + $0x28] sm:$0xff] %vm30_vm0, %v194_v43  ;;  %v201_v52 = vmax.f32 %v185_v48, 0.0  ;;  %v202_v53 = vmax.f32 %v186_v40, 0.0 }
  0x84   :  { %211 = vst.msk [vmem:[%s481_s3 + $0x30] sm:$0xff] %vm30_vm0, %v195_v44  ;;  %v203_v59 = vmax.f32 %v187_v49, 0.0  ;;  %v204_v60 = vmax.f32 %v188_v51, 0.0 }
  0x85   :  { %212 = vst.msk [vmem:[%s481_s3 + $0x38] sm:$0xff] %vm30_vm0, %v196_v46 }
  0x86   :  { %213 = vst.msk [vmem:[%s481_s3 + $0x40] sm:$0xff] %vm30_vm0, %v197_v32 }
  0x87   :  { %214 = vst.msk [vmem:[%s481_s3 + $0x48] sm:$0xff] %vm30_vm0, %v198_v36 }
  0x88   :  { %215 = vst.msk [vmem:[%s481_s3 + $0x50] sm:$0xff] %vm30_vm0, %v199_v41 }
  0x89   :  { %216 = vst.msk [vmem:[%s481_s3 + $0x58] sm:$0xff] %vm30_vm0, %v200_v50 }
  0x8a   :  { %217 = vst.msk [vmem:[%s481_s3 + $0x60] sm:$0xff] %vm30_vm0, %v201_v52 }
  0x8b   :  { %218 = vst.msk [vmem:[%s481_s3 + $0x68] sm:$0xff] %vm30_vm0, %v202_v53 }
  0x8c   :  { %219 = vst.msk [vmem:[%s481_s3 + $0x70] sm:$0xff] %vm30_vm0, %v203_v59 }
  0x8d   :  { %220 = vst.msk [vmem:[%s481_s3 + $0x78] sm:$0xff] %vm30_vm0, %v204_v60 }

// kernel: _lambda_.13
= control target key start
LH: loop header
LB: loop body
LE: loop exit
PB: predicated region body
PF: predicated region fallthrough
CT: control target
= control target key end

     0   :  { %vm78_vm0 = vcmask 64512   ;;  %s2135_s0 = inlined_call_operand.vmem [shape: f32[512,8], index: 0, kind: input, shape index: {}]   ;;  %s2136_s2 = inlined_call_operand.vmem [shape: f32[1,8], index: 2, kind: input, shape index: {}]   ;;  %s2137_s1 = inlined_call_operand.vmem [shape: f32[1,8], index: 1, kind: input, shape index: {}]   ;;  %s2138_s3 = inlined_call_operand.vmem [shape: f32[512,8], index: 3, kind: output, shape index: {}]  }
   0x1   :  { %v779_v0 = vld [vmem:[%s2135_s0] sm:$0xff]  ;;  %v784_v1 = vld [vmem:[%s2135_s0 + $0x8] sm:$0xff]  ;;  %v789_v2 = vld [vmem:[%s2135_s0 + $0x10] sm:$0xff] }
   0x2   :  { %v794_v3 = vld [vmem:[%s2135_s0 + $0x18] sm:$0xff]  ;;  %v79_v4 = vsel %vm78_vm0, %v779_v0, 0.0  ;;  %v80_v5 = vsel %vm78_vm0, %v784_v1, 0.0  ;;  %v82_v6 = vsel %vm78_vm0, %v789_v2, 0.0  ;;  %v805_v7 = vld [vmem:[%s2135_s0 + $0x20] sm:$0xff]  ;;  %v812_v10 = vld [vmem:[%s2135_s0 + $0x28] sm:$0xff] }
   0x3   :  { %v81_v8 = vadd.f32 %v80_v5, %v79_v4  ;;  %v84_v9 = vsel %vm78_vm0, %v794_v3, 0.0  ;;  %v86_v12 = vsel %vm78_vm0, %v805_v7, 0.0  ;;  %v819_v13 = vld [vmem:[%s2135_s0 + $0x30] sm:$0xff]  ;;  %v88_v15 = vsel %vm78_vm0, %v812_v10, 0.0  ;;  %v826_v16 = vld [vmem:[%s2135_s0 + $0x38] sm:$0xff]  ;;  %v833_v19 = vld [vmem:[%s2135_s0 + $0x40] sm:$0xff] }
   0x4   :  { %v90_v18 = vsel %vm78_vm0, %v819_v13, 0.0  ;;  %v92_v21 = vsel %vm78_vm0, %v826_v16, 0.0  ;;  %v840_v22 = vld [vmem:[%s2135_s0 + $0x48] sm:$0xff]  ;;  %v94_v24 = vsel %vm78_vm0, %v833_v19, 0.0  ;;  %v847_v25 = vld [vmem:[%s2135_s0 + $0x50] sm:$0xff]  ;;  %v854_v28 = vld [vmem:[%s2135_s0 + $0x58] sm:$0xff] }
   0x5   :  { %v83_v11 = vadd.f32 %v82_v6, %v81_v8  ;;  %v96_v27 = vsel %vm78_vm0, %v840_v22, 0.0  ;;  %v98_v30 = vsel %vm78_vm0, %v847_v25, 0.0  ;;  %v861_v31 = vld [vmem:[%s2135_s0 + $0x60] sm:$0xff]  ;;  %v100_v33 = vsel %vm78_vm0, %v854_v28, 0.0  ;;  %v868_v34 = vld [vmem:[%s2135_s0 + $0x68] sm:$0xff]  ;;  %v875_v37 = vld [vmem:[%s2135_s0 + $0x70] sm:$0xff] }
   0x6   :  { %v102_v36 = vsel %vm78_vm0, %v861_v31, 0.0  ;;  %v104_v39 = vsel %vm78_vm0, %v868_v34, 0.0  ;;  %v882_v40 = vld [vmem:[%s2135_s0 + $0x78] sm:$0xff]  ;;  %v106_v42 = vsel %vm78_vm0, %v875_v37, 0.0  ;;  %v889_v43 = vld [vmem:[%s2135_s0 + $0x80] sm:$0xff]  ;;  %v896_v46 = vld [vmem:[%s2135_s0 + $0x88] sm:$0xff] }
   0x7   :  { %v85_v14 = vadd.f32 %v84_v9, %v83_v11  ;;  %v108_v45 = vsel %vm78_vm0, %v882_v40, 0.0  ;;  %v110_v48 = vsel %vm78_vm0, %v889_v43, 0.0  ;;  %v903_v49 = vld [vmem:[%s2135_s0 + $0x90] sm:$0xff]  ;;  %v112_v51 = vsel %vm78_vm0, %v896_v46, 0.0  ;;  %v910_v52 = vld [vmem:[%s2135_s0 + $0x98] sm:$0xff]  ;;  %v917_v55 = vld [vmem:[%s2135_s0 + $0xa0] sm:$0xff] }
   0x8   :  { %v114_v54 = vsel %vm78_vm0, %v903_v49, 0.0  ;;  %v116_v57 = vsel %vm78_vm0, %v910_v52, 0.0  ;;  %v924_v58 = vld [vmem:[%s2135_s0 + $0xa8] sm:$0xff]  ;;  %v118_v60 = vsel %vm78_vm0, %v917_v55, 0.0  ;;  %v931_v61 = vld [vmem:[%s2135_s0 + $0xb0] sm:$0xff]  ;;  %v938_v4 = vld [vmem:[%s2135_s0 + $0xb8] sm:$0xff] }
   0x9   :  { %v87_v17 = vadd.f32 %v86_v12, %v85_v14  ;;  %v120_v63 = vsel %vm78_vm0, %v924_v58, 0.0  ;;  %v122_v6 = vsel %vm78_vm0, %v931_v61, 0.0  ;;  %v945_v8 = vld [vmem:[%s2135_s0 + $0xc0] sm:$0xff]  ;;  %v124_v11 = vsel %vm78_vm0, %v938_v4, 0.0  ;;  %v952_v12 = vld [vmem:[%s2135_s0 + $0xc8] sm:$0xff] }
   0xb   :  { %v89_v20 = vadd.f32 %v88_v15, %v87_v17  ;;  %v126_v15 = vsel %vm78_vm0, %v945_v8, 0.0  ;;  %v959_v17 = vld [vmem:[%s2135_s0 + $0xd0] sm:$0xff] }
   0xd   :  { %v91_v23 = vadd.f32 %v90_v18, %v89_v20  ;;  %v128_v20 = vsel %vm78_vm0, %v952_v12, 0.0 }
   0xf   :  { %v93_v26 = vadd.f32 %v92_v21, %v91_v23  ;;  %v966_v21 = vld [vmem:[%s2135_s0 + $0xd8] sm:$0xff] }
  0x11   :  { %v95_v29 = vadd.f32 %v94_v24, %v93_v26  ;;  %v130_v24 = vsel %vm78_vm0, %v959_v17, 0.0  ;;  %v973_v26 = vld [vmem:[%s2135_s0 + $0xe0] sm:$0xff] }
  0x13   :  { %v97_v32 = vadd.f32 %v96_v27, %v95_v29  ;;  %v132_v29 = vsel %vm78_vm0, %v966_v21, 0.0 }
  0x15   :  { %v99_v35 = vadd.f32 %v98_v30, %v97_v32  ;;  %v980_v30 = vld [vmem:[%s2135_s0 + $0xe8] sm:$0xff] }
  0x17   :  { %v101_v38 = vadd.f32 %v100_v33, %v99_v35  ;;  %v134_v33 = vsel %vm78_vm0, %v973_v26, 0.0  ;;  %v987_v35 = vld [vmem:[%s2135_s0 + $0xf0] sm:$0xff] }
  0x19   :  { %v103_v41 = vadd.f32 %v102_v36, %v101_v38  ;;  %v136_v38 = vsel %vm78_vm0, %v980_v30, 0.0 }
  0x1b   :  { %v105_v44 = vadd.f32 %v104_v39, %v103_v41  ;;  %v994_v39 = vld [vmem:[%s2135_s0 + $0xf8] sm:$0xff] }
  0x1d   :  { %v107_v47 = vadd.f32 %v106_v42, %v105_v44  ;;  %v138_v42 = vsel %vm78_vm0, %v987_v35, 0.0  ;;  %v1001_v44 = vld [vmem:[%s2135_s0 + $0x100] sm:$0xff] }
  0x1f   :  { %v109_v50 = vadd.f32 %v108_v45, %v107_v47  ;;  %v140_v47 = vsel %vm78_vm0, %v994_v39, 0.0 }
  0x21   :  { %v111_v53 = vadd.f32 %v110_v48, %v109_v50  ;;  %v1008_v48 = vld [vmem:[%s2135_s0 + $0x108] sm:$0xff] }
  0x23   :  { %v113_v56 = vadd.f32 %v112_v51, %v111_v53  ;;  %v142_v51 = vsel %vm78_vm0, %v1001_v44, 0.0  ;;  %v1015_v53 = vld [vmem:[%s2135_s0 + $0x110] sm:$0xff] }
  0x25   :  { %v115_v59 = vadd.f32 %v114_v54, %v113_v56  ;;  %v144_v56 = vsel %vm78_vm0, %v1008_v48, 0.0 }
  0x27   :  { %v117_v62 = vadd.f32 %v116_v57, %v115_v59  ;;  %v1022_v57 = vld [vmem:[%s2135_s0 + $0x118] sm:$0xff] }
  0x29   :  { %v119_v5 = vadd.f32 %v118_v60, %v117_v62  ;;  %v146_v60 = vsel %vm78_vm0, %v1015_v53, 0.0  ;;  %v1029_v62 = vld [vmem:[%s2135_s0 + $0x120] sm:$0xff] }
  0x2b   :  { %v121_v9 = vadd.f32 %v120_v63, %v119_v5  ;;  %v148_v5 = vsel %vm78_vm0, %v1022_v57, 0.0 }
  0x2d   :  { %v123_v14 = vadd.f32 %v122_v6, %v121_v9  ;;  %v1036_v6 = vld [vmem:[%s2135_s0 + $0x128] sm:$0xff] }
  0x2f   :  { %v125_v18 = vadd.f32 %v124_v11, %v123_v14  ;;  %v150_v11 = vsel %vm78_vm0, %v1029_v62, 0.0  ;;  %v1043_v14 = vld [vmem:[%s2135_s0 + $0x130] sm:$0xff] }
  0x31   :  { %v127_v23 = vadd.f32 %v126_v15, %v125_v18  ;;  %v152_v18 = vsel %vm78_vm0, %v1036_v6, 0.0 }
  0x33   :  { %v129_v27 = vadd.f32 %v128_v20, %v127_v23  ;;  %v1050_v20 = vld [vmem:[%s2135_s0 + $0x138] sm:$0xff] }
  0x35   :  { %v131_v32 = vadd.f32 %v130_v24, %v129_v27  ;;  %v154_v24 = vsel %vm78_vm0, %v1043_v14, 0.0  ;;  %v1057_v27 = vld [vmem:[%s2135_s0 + $0x140] sm:$0xff] }
  0x37   :  { %v133_v36 = vadd.f32 %v132_v29, %v131_v32  ;;  %v156_v32 = vsel %vm78_vm0, %v1050_v20, 0.0 }
  0x39   :  { %v135_v41 = vadd.f32 %v134_v33, %v133_v36  ;;  %v1064_v33 = vld [vmem:[%s2135_s0 + $0x148] sm:$0xff] }
  0x3b   :  { %v137_v45 = vadd.f32 %v136_v38, %v135_v41  ;;  %v158_v38 = vsel %vm78_vm0, %v1057_v27, 0.0  ;;  %v1071_v41 = vld [vmem:[%s2135_s0 + $0x150] sm:$0xff] }
  0x3d   :  { %v139_v50 = vadd.f32 %v138_v42, %v137_v45  ;;  %v160_v45 = vsel %vm78_vm0, %v1064_v33, 0.0 }
  0x3f   :  { %v141_v54 = vadd.f32 %v140_v47, %v139_v50  ;;  %v1078_v47 = vld [vmem:[%s2135_s0 + $0x158] sm:$0xff] }
  0x41   :  { %v143_v59 = vadd.f32 %v142_v51, %v141_v54  ;;  %v162_v51 = vsel %vm78_vm0, %v1071_v41, 0.0  ;;  %v1085_v54 = vld [vmem:[%s2135_s0 + $0x160] sm:$0xff] }
  0x43   :  { %v145_v63 = vadd.f32 %v144_v56, %v143_v59  ;;  %v164_v59 = vsel %vm78_vm0, %v1078_v47, 0.0 }
  0x45   :  { %v147_v9 = vadd.f32 %v146_v60, %v145_v63  ;;  %v1092_v60 = vld [vmem:[%s2135_s0 + $0x168] sm:$0xff] }
  0x47   :  { %v149_v15 = vadd.f32 %v148_v5, %v147_v9  ;;  %v166_v5 = vsel %vm78_vm0, %v1085_v54, 0.0  ;;  %v1099_v9 = vld [vmem:[%s2135_s0 + $0x170] sm:$0xff] }
  0x49   :  { %v151_v23 = vadd.f32 %v150_v11, %v149_v15  ;;  %v168_v15 = vsel %vm78_vm0, %v1092_v60, 0.0 }
  0x4b   :  { %v153_v29 = vadd.f32 %v152_v18, %v151_v23  ;;  %v1106_v18 = vld [vmem:[%s2135_s0 + $0x178] sm:$0xff] }
  0x4d   :  { %v155_v36 = vadd.f32 %v154_v24, %v153_v29  ;;  %v170_v24 = vsel %vm78_vm0, %v1099_v9, 0.0  ;;  %v1113_v29 = vld [vmem:[%s2135_s0 + $0x180] sm:$0xff] }
  0x4f   :  { %v157_v42 = vadd.f32 %v156_v32, %v155_v36  ;;  %v172_v36 = vsel %vm78_vm0, %v1106_v18, 0.0 }
  0x51   :  { %v159_v50 = vadd.f32 %v158_v38, %v157_v42  ;;  %v1120_v38 = vld [vmem:[%s2135_s0 + $0x188] sm:$0xff] }
  0x52   :  { %2175 = vst [vmem:[#allocation2_spill] sm:$0xff] %v1120_v38 }
  0x53   :  { %v161_v56 = vadd.f32 %v160_v45, %v159_v50  ;;  %v174_v45 = vsel %vm78_vm0, %v1113_v29, 0.0  ;;  %v1127_v50 = vld [vmem:[%s2135_s0 + $0x190] sm:$0xff] }
  0x54   :  { %2176 = vst [vmem:[#allocation3_spill] sm:$0xff] %v1127_v50 }
  0x55   :  { %v163_v63 = vadd.f32 %v162_v51, %v161_v56  ;;  %v176_v56 = vsel %vm78_vm0, %v1120_v38, 0.0 }
  0x57   :  { %v165_v11 = vadd.f32 %v164_v59, %v163_v63  ;;  %v1134_v59 = vld [vmem:[%s2135_s0 + $0x198] sm:$0xff] }
  0x58   :  { %2177 = vst [vmem:[#allocation4_spill] sm:$0xff] %v1134_v59 }
  0x59   :  { %v167_v23 = vadd.f32 %v166_v5, %v165_v11  ;;  %v178_v5 = vsel %vm78_vm0, %v1127_v50, 0.0  ;;  %v1141_v11 = vld [vmem:[%s2135_s0 + $0x1a0] sm:$0xff] }
  0x5a   :  { %2178 = vst [vmem:[#allocation5_spill] sm:$0xff] %v1141_v11 }
  0x5b   :  { %v169_v32 = vadd.f32 %v168_v15, %v167_v23  ;;  %v180_v23 = vsel %vm78_vm0, %v1134_v59, 0.0 }
  0x5d   :  { %v171_v42 = vadd.f32 %v170_v24, %v169_v32  ;;  %v1148_v24 = vld [vmem:[%s2135_s0 + $0x1a8] sm:$0xff] }
  0x5e   :  { %2179 = vst [vmem:[#allocation6_spill] sm:$0xff] %v1148_v24 }
  0x5f   :  { %v173_v51 = vadd.f32 %v172_v36, %v171_v42  ;;  %v182_v36 = vsel %vm78_vm0, %v1141_v11, 0.0  ;;  %v1155_v42 = vld [vmem:[%s2135_s0 + $0x1b0] sm:$0xff] }
  0x60   :  { %2180 = vst [vmem:[#allocation7_spill] sm:$0xff] %v1155_v42 }
  0x61   :  { %v175_v63 = vadd.f32 %v174_v45, %v173_v51  ;;  %v184_v51 = vsel %vm78_vm0, %v1148_v24, 0.0 }
  0x63   :  { %v177_v15 = vadd.f32 %v176_v56, %v175_v63  ;;  %v1162_v56 = vld [vmem:[%s2135_s0 + $0x1b8] sm:$0xff] }
  0x64   :  { %2181 = vst [vmem:[#allocation8_spill] sm:$0xff] %v1162_v56 }
  0x65   :  { %v179_v32 = vadd.f32 %v178_v5, %v177_v15  ;;  %v186_v5 = vsel %vm78_vm0, %v1155_v42, 0.0  ;;  %v1169_v15 = vld [vmem:[%s2135_s0 + $0x1c0] sm:$0xff] }
  0x66   :  { %2182 = vst [vmem:[#allocation9_spill] sm:$0xff] %v1169_v15 }
  0x67   :  { %v181_v45 = vadd.f32 %v180_v23, %v179_v32  ;;  %v188_v23 = vsel %vm78_vm0, %v1162_v56, 0.0  ;;  %v1176_v32 = vld [vmem:[%s2135_s0 + $0x1c8] sm:$0xff] }
  0x68   :  { %2183 = vst [vmem:[#allocation10_spill] sm:$0xff] %v1176_v32 }
  0x69   :  { %v183_v63 = vadd.f32 %v182_v36, %v181_v45  ;;  %v190_v36 = vsel %vm78_vm0, %v1169_v15, 0.0  ;;  %v1183_v45 = vld [vmem:[%s2135_s0 + $0x1d0] sm:$0xff] }
  0x6a   :  { %2184 = vst [vmem:[#allocation11_spill] sm:$0xff] %v1183_v45 }
  0x6b   :  { %v185_v11 = vadd.f32 %v184_v51, %v183_v63  ;;  %v192_v51 = vsel %vm78_vm0, %v1176_v32, 0.0  ;;  %v1190_v63 = vld [vmem:[%s2135_s0 + $0x1d8] sm:$0xff] }
  0x6c   :  { %2185 = vst [vmem:[#allocation12_spill] sm:$0xff] %v1190_v63  ;;  %v196_v15 = vsel %vm78_vm0, %v1190_v63, 0.0 }
  0x6d   :  { %v187_v24 = vadd.f32 %v186_v5, %v185_v11  ;;  %v194_v11 = vsel %vm78_vm0, %v1183_v45, 0.0 }
  0x6f   :  { %v189_v42 = vadd.f32 %v188_v23, %v187_v24  ;;  %v1199_v24 = vld [vmem:[%s2135_s0 + $0x1e0] sm:$0xff] }
  0x70   :  { %2186 = vst [vmem:[#allocation13_spill] sm:$0xff] %v1199_v24  ;;  %v198_v59 = vsel %vm78_vm0, %v1199_v24, 0.0 }
  0x71   :  { %v191_v56 = vadd.f32 %v190_v36, %v189_v42  ;;  %v1206_v42 = vld [vmem:[%s2135_s0 + $0x1e8] sm:$0xff] }
  0x72   :  { %2187 = vst [vmem:[#allocation14_spill] sm:$0xff] %v1206_v42 }
  0x73   :  { %v193_v5 = vadd.f32 %v192_v51, %v191_v56  ;;  %v200_v56 = vsel %vm78_vm0, %v1206_v42, 0.0  ;;  %v1213_v51 = vld [vmem:[%s2135_s0 + $0x1f0] sm:$0xff] }
  0x74   :  { %2188 = vst [vmem:[#allocation15_spill] sm:$0xff] %v1213_v51 }
  0x75   :  { %v195_v23 = vadd.f32 %v194_v11, %v193_v5  ;;  %v1220_v11 = vld [vmem:[%s2135_s0 + $0x1f8] sm:$0xff] }
  0x77   :  { %v197_v32 = vadd.f32 %v196_v15, %v195_v23  ;;  %v202_v15 = vsel %vm78_vm0, %v1213_v51, 0.0 }
  0x79   :  { %v199_v36 = vadd.f32 %v198_v59, %v197_v32  ;;  %v204_v59 = vsel %vm78_vm0, %v1220_v11, 0.0 }
  0x7b   :  { %v201_v63 = vadd.f32 %v200_v56, %v199_v36 }
  0x7d   :  { %v203_v5 = vadd.f32 %v202_v15, %v201_v63 }
  0x7f   :  { %v205_v32 = vadd.f32 %v204_v59, %v203_v5 }
  0x81   :  { %v206_v23 = vrot.slane %v205_v32, 4 }
  0x83   :  { %v207_v42 = vadd.f32 %v206_v23, %v205_v32 }
  0x85   :  { %v208_v24 = vrot.slane %v207_v42, 2 }
  0x87   :  { %v209_v45 = vadd.f32 %v208_v24, %v207_v42 }
  0x89   :  { %v210_v50 = vrot.slane %v209_v45, 1 }
  0x8b   :  { %v211_v38 = vadd.f32 %v210_v50, %v209_v45 }
  0x8d   :  { %v1224_v36 = vmul.f32 0.001953125, %v211_v38 }
  0x8f   :  { %v1228_v56 = vsub.f32 %v779_v0, %v1224_v36  ;;  %v1232_v51 = vsub.f32 %v784_v1, %v1224_v36  ;;  %v1236_v63 = vsub.f32 %v789_v2, %v1224_v36  ;;  %v1240_v15 = vsub.f32 %v794_v3, %v1224_v36 }
  0x90   :  { %v1244_v38 = vsub.f32 %v805_v7, %v1224_v36  ;;  %v1254_v2 = vsub.f32 %v812_v10, %v1224_v36  ;;  %v1260_v7 = vsub.f32 %v819_v13, %v1224_v36  ;;  %v1269_v10 = vsub.f32 %v826_v16, %v1224_v36 }
  0x91   :  { %v277_v0 = vmul.f32 %v1228_v56, %v1228_v56  ;;  %v278_v50 = vmul.f32 %v1232_v51, %v1232_v51  ;;  %v279_v1 = vmul.f32 %v1236_v63, %v1236_v63  ;;  %v280_v3 = vmul.f32 %v1240_v15, %v1240_v15 }
  0x92   :  { %2189 = vst [vmem:[#allocation16_spill] sm:$0xff] %v1244_v38  ;;  %v281_v45 = vmul.f32 %v1244_v38, %v1244_v38  ;;  %v282_v32 = vmul.f32 %v1254_v2, %v1254_v2  ;;  %v1276_v38 = vsub.f32 %v833_v19, %v1224_v36  ;;  %v1283_v16 = vsub.f32 %v840_v22, %v1224_v36 }
  0x93   :  { %v341_v24 = vsel %vm78_vm0, %v277_v0, 0.0  ;;  %v342_v42 = vsel %vm78_vm0, %v278_v50, 0.0  ;;  %v344_v5 = vsel %vm78_vm0, %v279_v1, 0.0  ;;  %v346_v13 = vsel %vm78_vm0, %v280_v3, 0.0 }
  0x94   :  { %v343_v59 = vadd.f32 %v342_v42, %v341_v24  ;;  %v283_v0 = vmul.f32 %v1260_v7, %v1260_v7  ;;  %v348_v50 = vsel %vm78_vm0, %v281_v45, 0.0  ;;  %v284_v24 = vmul.f32 %v1269_v10, %v1269_v10 }
  0x95   :  { %v350_v3 = vsel %vm78_vm0, %v282_v32, 0.0  ;;  %v1290_v19 = vsub.f32 %v847_v25, %v1224_v36  ;;  %v1297_v22 = vsub.f32 %v854_v28, %v1224_v36  ;;  %v1304_v25 = vsub.f32 %v861_v31, %v1224_v36 }
  0x96   :  { %v345_v23 = vadd.f32 %v344_v5, %v343_v59  ;;  %v285_v5 = vmul.f32 %v1276_v38, %v1276_v38  ;;  %v352_v45 = vsel %vm78_vm0, %v283_v0, 0.0  ;;  %v354_v32 = vsel %vm78_vm0, %v284_v24, 0.0 }
  0x97   :  { %v1311_v28 = vsub.f32 %v868_v34, %v1224_v36  ;;  %v1318_v31 = vsub.f32 %v875_v37, %v1224_v36  ;;  %v1325_v34 = vsub.f32 %v882_v40, %v1224_v36  ;;  %v1332_v37 = vsub.f32 %v889_v43, %v1224_v36 }
  0x98   :  { %v347_v1 = vadd.f32 %v346_v13, %v345_v23  ;;  %v286_v13 = vmul.f32 %v1283_v16, %v1283_v16  ;;  %v356_v0 = vsel %vm78_vm0, %v285_v5, 0.0  ;;  %v1339_v40 = vsub.f32 %v896_v46, %v1224_v36 }
  0x99   :  { %v1346_v43 = vsub.f32 %v903_v49, %v1224_v36  ;;  %v1353_v46 = vsub.f32 %v910_v52, %v1224_v36  ;;  %v1360_v49 = vsub.f32 %v917_v55, %v1224_v36  ;;  %v1367_v52 = vsub.f32 %v924_v58, %v1224_v36 }
  0x9a   :  { %v349_v42 = vadd.f32 %v348_v50, %v347_v1  ;;  %v287_v50 = vmul.f32 %v1290_v19, %v1290_v19  ;;  %v358_v24 = vsel %vm78_vm0, %v286_v13, 0.0  ;;  %v1374_v55 = vsub.f32 %v931_v61, %v1224_v36 }
  0x9b   :  { %v1381_v58 = vsub.f32 %v938_v4, %v1224_v36  ;;  %v1388_v61 = vsub.f32 %v945_v8, %v1224_v36  ;;  %v1395_v4 = vsub.f32 %v952_v12, %v1224_v36  ;;  %v1402_v8 = vsub.f32 %v959_v17, %v1224_v36 }
  0x9c   :  { %v351_v59 = vadd.f32 %v350_v3, %v349_v42  ;;  %v288_v3 = vmul.f32 %v1297_v22, %v1297_v22  ;;  %v360_v5 = vsel %vm78_vm0, %v287_v50, 0.0  ;;  %v1409_v12 = vsub.f32 %v966_v21, %v1224_v36 }
  0x9d   :  { %v1416_v17 = vsub.f32 %v973_v26, %v1224_v36  ;;  %v1423_v21 = vsub.f32 %v980_v30, %v1224_v36  ;;  %v1430_v26 = vsub.f32 %v987_v35, %v1224_v36  ;;  %v1437_v30 = vsub.f32 %v994_v39, %v1224_v36 }
  0x9e   :  { %v353_v23 = vadd.f32 %v352_v45, %v351_v59  ;;  %v289_v45 = vmul.f32 %v1304_v25, %v1304_v25  ;;  %v362_v13 = vsel %vm78_vm0, %v288_v3, 0.0  ;;  %v1444_v35 = vsub.f32 %v1001_v44, %v1224_v36 }
  0x9f   :  { %v1451_v39 = vsub.f32 %v1008_v48, %v1224_v36  ;;  %v1458_v44 = vsub.f32 %v1015_v53, %v1224_v36  ;;  %v1465_v48 = vsub.f32 %v1022_v57, %v1224_v36  ;;  %v1472_v53 = vsub.f32 %v1029_v62, %v1224_v36 }
  0xa0   :  { %v355_v1 = vadd.f32 %v354_v32, %v353_v23  ;;  %v290_v32 = vmul.f32 %v1311_v28, %v1311_v28  ;;  %v364_v50 = vsel %vm78_vm0, %v289_v45, 0.0  ;;  %v1479_v57 = vsub.f32 %v1036_v6, %v1224_v36 }
  0xa1   :  { %v1486_v62 = vsub.f32 %v1043_v14, %v1224_v36  ;;  %v1493_v6 = vsub.f32 %v1050_v20, %v1224_v36  ;;  %v1500_v14 = vsub.f32 %v1057_v27, %v1224_v36  ;;  %v1507_v20 = vsub.f32 %v1064_v33, %v1224_v36 }
  0xa2   :  { %v357_v42 = vadd.f32 %v356_v0, %v355_v1  ;;  %v291_v0 = vmul.f32 %v1318_v31, %v1318_v31  ;;  %v366_v3 = vsel %vm78_vm0, %v290_v32, 0.0  ;;  %v1514_v27 = vsub.f32 %v1071_v41, %v1224_v36 }
  0xa3   :  { %v1521_v33 = vsub.f32 %v1078_v47, %v1224_v36  ;;  %v1528_v41 = vsub.f32 %v1085_v54, %v1224_v36  ;;  %v1535_v47 = vsub.f32 %v1092_v60, %v1224_v36  ;;  %v1542_v54 = vsub.f32 %v1099_v9, %v1224_v36 }
  0xa4   :  { %v359_v59 = vadd.f32 %v358_v24, %v357_v42  ;;  %v292_v24 = vmul.f32 %v1325_v34, %v1325_v34  ;;  %v368_v45 = vsel %vm78_vm0, %v291_v0, 0.0  ;;  %v1549_v60 = vsub.f32 %v1106_v18, %v1224_v36 }
  0xa5   :  { %2190 = vst [vmem:[#allocation17_spill] sm:$0xff] %v1521_v33  ;;  %v1556_v9 = vsub.f32 %v1113_v29, %v1224_v36 }
  0xa6   :  { %v361_v23 = vadd.f32 %v360_v5, %v359_v59  ;;  %v293_v5 = vmul.f32 %v1332_v37, %v1332_v37  ;;  %v370_v32 = vsel %vm78_vm0, %v292_v24, 0.0  ;;  %2191 = vst [vmem:[#allocation18_spill] sm:$0xff] %v1528_v41 }
  0xa7   :  { %2192 = vst [vmem:[#allocation19_spill] sm:$0xff] %v1535_v47 }
  0xa8   :  { %v363_v1 = vadd.f32 %v362_v13, %v361_v23  ;;  %v294_v13 = vmul.f32 %v1339_v40, %v1339_v40  ;;  %v372_v0 = vsel %vm78_vm0, %v293_v5, 0.0  ;;  %2193 = vst [vmem:[#allocation20_spill] sm:$0xff] %v1542_v54 }
  0xa9   :  { %2194 = vst [vmem:[#allocation21_spill] sm:$0xff] %v1549_v60 }
  0xaa   :  { %v365_v42 = vadd.f32 %v364_v50, %v363_v1  ;;  %v295_v50 = vmul.f32 %v1346_v43, %v1346_v43  ;;  %v374_v24 = vsel %vm78_vm0, %v294_v13, 0.0  ;;  %2195 = vst [vmem:[#allocation22_spill] sm:$0xff] %v1556_v9 }
  0xac   :  { %v367_v59 = vadd.f32 %v366_v3, %v365_v42  ;;  %v296_v3 = vmul.f32 %v1353_v46, %v1353_v46  ;;  %v376_v5 = vsel %vm78_vm0, %v295_v50, 0.0 }
  0xae   :  { %v369_v23 = vadd.f32 %v368_v45, %v367_v59  ;;  %v297_v45 = vmul.f32 %v1360_v49, %v1360_v49  ;;  %v378_v13 = vsel %vm78_vm0, %v296_v3, 0.0 }
  0xb0   :  { %v371_v1 = vadd.f32 %v370_v32, %v369_v23  ;;  %v298_v32 = vmul.f32 %v1367_v52, %v1367_v52  ;;  %v380_v50 = vsel %vm78_vm0, %v297_v45, 0.0 }
  0xb2   :  { %v373_v42 = vadd.f32 %v372_v0, %v371_v1  ;;  %v299_v0 = vmul.f32 %v1374_v55, %v1374_v55  ;;  %v382_v3 = vsel %vm78_vm0, %v298_v32, 0.0 }
  0xb4   :  { %v375_v59 = vadd.f32 %v374_v24, %v373_v42  ;;  %v300_v24 = vmul.f32 %v1381_v58, %v1381_v58  ;;  %v384_v45 = vsel %vm78_vm0, %v299_v0, 0.0 }
  0xb6   :  { %v377_v23 = vadd.f32 %v376_v5, %v375_v59  ;;  %v301_v5 = vmul.f32 %v1388_v61, %v1388_v61  ;;  %v386_v32 = vsel %vm78_vm0, %v300_v24, 0.0 }
  0xb8   :  { %v379_v1 = vadd.f32 %v378_v13, %v377_v23  ;;  %v302_v13 = vmul.f32 %v1395_v4, %v1395_v4  ;;  %v388_v0 = vsel %vm78_vm0, %v301_v5, 0.0 }
  0xba   :  { %v381_v42 = vadd.f32 %v380_v50, %v379_v1  ;;  %v303_v50 = vmul.f32 %v1402_v8, %v1402_v8  ;;  %v390_v24 = vsel %vm78_vm0, %v302_v13, 0.0 }
  0xbc   :  { %v383_v59 = vadd.f32 %v382_v3, %v381_v42  ;;  %v304_v3 = vmul.f32 %v1409_v12, %v1409_v12  ;;  %v392_v5 = vsel %vm78_vm0, %v303_v50, 0.0 }
  0xbe   :  { %v385_v23 = vadd.f32 %v384_v45, %v383_v59  ;;  %v305_v45 = vmul.f32 %v1416_v17, %v1416_v17  ;;  %v394_v13 = vsel %vm78_vm0, %v304_v3, 0.0 }
  0xc0   :  { %v387_v1 = vadd.f32 %v386_v32, %v385_v23  ;;  %v306_v32 = vmul.f32 %v1423_v21, %v1423_v21  ;;  %v396_v50 = vsel %vm78_vm0, %v305_v45, 0.0 }
  0xc2   :  { %v389_v42 = vadd.f32 %v388_v0, %v387_v1  ;;  %v307_v0 = vmul.f32 %v1430_v26, %v1430_v26  ;;  %v398_v3 = vsel %vm78_vm0, %v306_v32, 0.0 }
  0xc4   :  { %v391_v59 = vadd.f32 %v390_v24, %v389_v42  ;;  %v308_v24 = vmul.f32 %v1437_v30, %v1437_v30  ;;  %v400_v45 = vsel %vm78_vm0, %v307_v0, 0.0 }
  0xc6   :  { %v393_v23 = vadd.f32 %v392_v5, %v391_v59  ;;  %v309_v5 = vmul.f32 %v1444_v35, %v1444_v35  ;;  %v402_v32 = vsel %vm78_vm0, %v308_v24, 0.0 }
  0xc8   :  { %v395_v1 = vadd.f32 %v394_v13, %v393_v23  ;;  %v310_v13 = vmul.f32 %v1451_v39, %v1451_v39  ;;  %v404_v0 = vsel %vm78_vm0, %v309_v5, 0.0 }
  0xca   :  { %v397_v42 = vadd.f32 %v396_v50, %v395_v1  ;;  %v311_v50 = vmul.f32 %v1458_v44, %v1458_v44  ;;  %v406_v24 = vsel %vm78_vm0, %v310_v13, 0.0 }
  0xcc   :  { %v399_v59 = vadd.f32 %v398_v3, %v397_v42  ;;  %v312_v3 = vmul.f32 %v1465_v48, %v1465_v48  ;;  %v408_v5 = vsel %vm78_vm0, %v311_v50, 0.0 }
  0xce   :  { %v401_v23 = vadd.f32 %v400_v45, %v399_v59  ;;  %v313_v45 = vmul.f32 %v1472_v53, %v1472_v53  ;;  %v410_v13 = vsel %vm78_vm0, %v312_v3, 0.0 }
  0xd0   :  { %v403_v1 = vadd.f32 %v402_v32, %v401_v23  ;;  %v314_v32 = vmul.f32 %v1479_v57, %v1479_v57  ;;  %v412_v50 = vsel %vm78_vm0, %v313_v45, 0.0 }
  0xd2   :  { %v405_v42 = vadd.f32 %v404_v0, %v403_v1  ;;  %v315_v0 = vmul.f32 %v1486_v62, %v1486_v62  ;;  %v414_v3 = vsel %vm78_vm0, %v314_v32, 0.0 }
  0xd4   :  { %v407_v59 = vadd.f32 %v406_v24, %v405_v42  ;;  %v316_v24 = vmul.f32 %v1493_v6, %v1493_v6  ;;  %v416_v45 = vsel %vm78_vm0, %v315_v0, 0.0 }
  0xd6   :  { %v409_v23 = vadd.f32 %v408_v5, %v407_v59  ;;  %v317_v5 = vmul.f32 %v1500_v14, %v1500_v14  ;;  %v418_v32 = vsel %vm78_vm0, %v316_v24, 0.0 }
  0xd8   :  { %v411_v1 = vadd.f32 %v410_v13, %v409_v23  ;;  %v318_v13 = vmul.f32 %v1507_v20, %v1507_v20  ;;  %v420_v0 = vsel %vm78_vm0, %v317_v5, 0.0 }
  0xda   :  { %v413_v42 = vadd.f32 %v412_v50, %v411_v1  ;;  %v319_v50 = vmul.f32 %v1514_v27, %v1514_v27  ;;  %v422_v24 = vsel %vm78_vm0, %v318_v13, 0.0 }
  0xdc   :  { %v415_v59 = vadd.f32 %v414_v3, %v413_v42  ;;  %v320_v3 = vmul.f32 %v1521_v33, %v1521_v33  ;;  %v424_v5 = vsel %vm78_vm0, %v319_v50, 0.0 }
  0xde   :  { %v417_v23 = vadd.f32 %v416_v45, %v415_v59  ;;  %v321_v45 = vmul.f32 %v1528_v41, %v1528_v41  ;;  %v426_v13 = vsel %vm78_vm0, %v320_v3, 0.0 }
  0xe0   :  { %v419_v1 = vadd.f32 %v418_v32, %v417_v23  ;;  %v322_v32 = vmul.f32 %v1535_v47, %v1535_v47  ;;  %v428_v50 = vsel %vm78_vm0, %v321_v45, 0.0 }
  0xe2   :  { %v421_v42 = vadd.f32 %v420_v0, %v419_v1  ;;  %v323_v0 = vmul.f32 %v1542_v54, %v1542_v54  ;;  %v430_v3 = vsel %vm78_vm0, %v322_v32, 0.0  ;;  %v325_v54 = vmul.f32 %v1556_v9, %v1556_v9 }
  0xe4   :  { %v423_v59 = vadd.f32 %v422_v24, %v421_v42  ;;  %v2196_v24 = vld [vmem:[#allocation2_spill] sm:$0xff]  ;;  %v324_v42 = vmul.f32 %v1549_v60, %v1549_v60  ;;  %v432_v45 = vsel %vm78_vm0, %v323_v0, 0.0  ;;  %v436_v0 = vsel %vm78_vm0, %v325_v54, 0.0 }
  0xe5   :  { %v1563_v18 = vsub.f32 %v2196_v24, %v1224_v36 }
  0xe6   :  { %v425_v23 = vadd.f32 %v424_v5, %v423_v59  ;;  %v2198_v59 = vld [vmem:[#allocation3_spill] sm:$0xff]  ;;  %v434_v32 = vsel %vm78_vm0, %v324_v42, 0.0 }
  0xe7   :  { %2197 = vst [vmem:[#allocation2_spill] sm:$0xff] %v1563_v18  ;;  %v1570_v29 = vsub.f32 %v2198_v59, %v1224_v36  ;;  %v326_v60 = vmul.f32 %v1563_v18, %v1563_v18 }
  0xe8   :  { %v427_v1 = vadd.f32 %v426_v13, %v425_v23  ;;  %v2200_v23 = vld [vmem:[#allocation4_spill] sm:$0xff] }
  0xe9   :  { %2199 = vst [vmem:[#allocation3_spill] sm:$0xff] %v1570_v29  ;;  %v1577_v24 = vsub.f32 %v2200_v23, %v1224_v36  ;;  %v327_v9 = vmul.f32 %v1570_v29, %v1570_v29  ;;  %v438_v42 = vsel %vm78_vm0, %v326_v60, 0.0 }
  0xea   :  { %v429_v5 = vadd.f32 %v428_v50, %v427_v1  ;;  %v2202_v1 = vld [vmem:[#allocation5_spill] sm:$0xff] }
  0xeb   :  { %2201 = vst [vmem:[#allocation4_spill] sm:$0xff] %v1577_v24  ;;  %v1584_v59 = vsub.f32 %v2202_v1, %v1224_v36  ;;  %v328_v18 = vmul.f32 %v1577_v24, %v1577_v24  ;;  %v440_v54 = vsel %vm78_vm0, %v327_v9, 0.0 }
  0xec   :  { %v431_v13 = vadd.f32 %v430_v3, %v429_v5  ;;  %v2204_v5 = vld [vmem:[#allocation6_spill] sm:$0xff] }
  0xed   :  { %2203 = vst [vmem:[#allocation5_spill] sm:$0xff] %v1584_v59  ;;  %v1591_v23 = vsub.f32 %v2204_v5, %v1224_v36  ;;  %v329_v29 = vmul.f32 %v1584_v59, %v1584_v59  ;;  %v442_v60 = vsel %vm78_vm0, %v328_v18, 0.0 }
  0xee   :  { %v433_v50 = vadd.f32 %v432_v45, %v431_v13  ;;  %v2206_v13 = vld [vmem:[#allocation7_spill] sm:$0xff] }
  0xef   :  { %2205 = vst [vmem:[#allocation6_spill] sm:$0xff] %v1591_v23  ;;  %v1598_v1 = vsub.f32 %v2206_v13, %v1224_v36  ;;  %v330_v24 = vmul.f32 %v1591_v23, %v1591_v23  ;;  %v444_v9 = vsel %vm78_vm0, %v329_v29, 0.0 }
  0xf0   :  { %v435_v3 = vadd.f32 %v434_v32, %v433_v50  ;;  %v2208_v50 = vld [vmem:[#allocation8_spill] sm:$0xff] }
  0xf1   :  { %2207 = vst [vmem:[#allocation7_spill] sm:$0xff] %v1598_v1  ;;  %v1605_v5 = vsub.f32 %v2208_v50, %v1224_v36  ;;  %v331_v59 = vmul.f32 %v1598_v1, %v1598_v1  ;;  %v446_v18 = vsel %vm78_vm0, %v330_v24, 0.0 }
  0xf2   :  { %v437_v45 = vadd.f32 %v436_v0, %v435_v3  ;;  %v2210_v3 = vld [vmem:[#allocation9_spill] sm:$0xff] }
  0xf3   :  { %2209 = vst [vmem:[#allocation8_spill] sm:$0xff] %v1605_v5  ;;  %v1612_v13 = vsub.f32 %v2210_v3, %v1224_v36  ;;  %v332_v23 = vmul.f32 %v1605_v5, %v1605_v5  ;;  %v448_v29 = vsel %vm78_vm0, %v331_v59, 0.0 }
  0xf4   :  { %v439_v32 = vadd.f32 %v438_v42, %v437_v45  ;;  %v2212_v45 = vld [vmem:[#allocation10_spill] sm:$0xff] }
  0xf5   :  { %2211 = vst [vmem:[#allocation9_spill] sm:$0xff] %v1612_v13  ;;  %v1619_v50 = vsub.f32 %v2212_v45, %v1224_v36  ;;  %v333_v1 = vmul.f32 %v1612_v13, %v1612_v13  ;;  %v450_v24 = vsel %vm78_vm0, %v332_v23, 0.0 }
  0xf6   :  { %v441_v0 = vadd.f32 %v440_v54, %v439_v32  ;;  %v2214_v32 = vld [vmem:[#allocation11_spill] sm:$0xff] }
  0xf7   :  { %2213 = vst [vmem:[#allocation10_spill] sm:$0xff] %v1619_v50  ;;  %v1626_v3 = vsub.f32 %v2214_v32, %v1224_v36  ;;  %v334_v5 = vmul.f32 %v1619_v50, %v1619_v50  ;;  %v452_v59 = vsel %vm78_vm0, %v333_v1, 0.0 }
  0xf8   :  { %v443_v42 = vadd.f32 %v442_v60, %v441_v0  ;;  %v2216_v0 = vld [vmem:[#allocation12_spill] sm:$0xff] }
  0xf9   :  { %2215 = vst [vmem:[#allocation11_spill] sm:$0xff] %v1626_v3  ;;  %v1633_v45 = vsub.f32 %v2216_v0, %v1224_v36  ;;  %v335_v13 = vmul.f32 %v1626_v3, %v1626_v3  ;;  %v454_v23 = vsel %vm78_vm0, %v334_v5, 0.0 }
  0xfa   :  { %v445_v54 = vadd.f32 %v444_v9, %v443_v42  ;;  %v2218_v42 = vld [vmem:[#allocation13_spill] sm:$0xff] }
  0xfb   :  { %2217 = vst [vmem:[#allocation12_spill] sm:$0xff] %v1633_v45  ;;  %v1640_v32 = vsub.f32 %v2218_v42, %v1224_v36  ;;  %v336_v50 = vmul.f32 %v1633_v45, %v1633_v45  ;;  %v456_v1 = vsel %vm78_vm0, %v335_v13, 0.0 }
  0xfc   :  { %v447_v60 = vadd.f32 %v446_v18, %v445_v54  ;;  %v2220_v54 = vld [vmem:[#allocation14_spill] sm:$0xff] }
  0xfd   :  { %2219 = vst [vmem:[#allocation13_spill] sm:$0xff] %v1640_v32  ;;  %v1647_v0 = vsub.f32 %v2220_v54, %v1224_v36  ;;  %v337_v3 = vmul.f32 %v1640_v32, %v1640_v32  ;;  %v458_v5 = vsel %vm78_vm0, %v336_v50, 0.0 }
  0xfe   :  { %v449_v9 = vadd.f32 %v448_v29, %v447_v60  ;;  %v2222_v60 = vld [vmem:[#allocation15_spill] sm:$0xff] }
  0xff   :  { %2221 = vst [vmem:[#allocation14_spill] sm:$0xff] %v1647_v0  ;;  %v1654_v42 = vsub.f32 %v2222_v60, %v1224_v36  ;;  %v338_v54 = vmul.f32 %v1647_v0, %v1647_v0  ;;  %v460_v60 = vsel %vm78_vm0, %v337_v3, 0.0 }
 0x100   :  { %v451_v18 = vadd.f32 %v450_v24, %v449_v9  ;;  %v1661_v9 = vsub.f32 %v1220_v11, %v1224_v36 }
 0x101   :  { %2223 = vst [vmem:[#allocation15_spill] sm:$0xff] %v1654_v42 }
 0x102   :  { %v453_v29 = vadd.f32 %v452_v59, %v451_v18  ;;  %2224 = vst [vmem:[#allocation23_spill] sm:$0xff] %v1661_v9  ;;  %v339_v18 = vmul.f32 %v1654_v42, %v1654_v42  ;;  %v340_v13 = vmul.f32 %v1661_v9, %v1661_v9 }
 0x104   :  { %v455_v24 = vadd.f32 %v454_v23, %v453_v29  ;;  %v462_v23 = vsel %vm78_vm0, %v338_v54, 0.0  ;;  %v464_v11 = vsel %vm78_vm0, %v339_v18, 0.0  ;;  %v466_v0 = vsel %vm78_vm0, %v340_v13, 0.0 }
 0x106   :  { %v457_v59 = vadd.f32 %v456_v1, %v455_v24 }
 0x108   :  { %v459_v45 = vadd.f32 %v458_v5, %v457_v59 }
 0x10a   :  { %v461_v29 = vadd.f32 %v460_v60, %v459_v45 }
 0x10c   :  { %v463_v36 = vadd.f32 %v462_v23, %v461_v29  ;;  %v2225_v29 = vld [vmem:[#allocation16_spill] sm:$0xff] }
 0x10e   :  { %v465_v32 = vadd.f32 %v464_v11, %v463_v36 }
 0x110   :  { %v467_v50 = vadd.f32 %v466_v0, %v465_v32  ;;  %v486_v32 = vld [vmem:[%s2137_s1] sm:$0x1] }
 0x112   :  { %v468_v1 = vrot.slane %v467_v50, 4 }
 0x114   :  { %v469_v24 = vadd.f32 %v468_v1, %v467_v50 }
 0x116   :  { %v470_v47 = vrot.slane %v469_v24, 2 }
 0x118   :  { %v471_v42 = vadd.f32 %v470_v47, %v469_v24 }
 0x11a   :  { %v472_v41 = vrot.slane %v471_v42, 1 }
 0x11c   :  { %v473_v3 = vadd.f32 %v472_v41, %v471_v42  ;;  %v1682_v41 = vld [vmem:[%s2136_s2] ss:$0 sm:$0xff] }
 0x11e   :  { %v474_v5 = vmul.f32 0.001953125, %v473_v3 }
 0x120   :  { %v475_v59 = vadd.f32 1e-05, %v474_v5 }
 0x122   :  { %754 = vrsqrt.f32 %v475_v59  ;;  %vm482_vm1 = vweird.f32 %v475_v59 }
 0x128   :  { %v755_v9 = vpop.eup %754 }
 0x129   :  { %v477_v33 = vmul.f32 %v755_v9, %v475_v59  ;;  %vm483_vm2 = vweird.f32 %v755_v9 }
 0x12a   :  { %vm484_vm3 = vmor %vm482_vm1, %vm483_vm2 }
 0x12b   :  { %v478_v54 = vmul.f32 %v755_v9, %v477_v33 }
 0x12d   :  { %v479_v45 = vmul.f32 0.5, %v478_v54 }
 0x12f   :  { %v480_v18 = vsub.f32 1.5, %v479_v45 }
 0x131   :  { %v481_v60 = vmul.f32 %v755_v9, %v480_v18 }
 0x133   :  { %v485_v0 = vsel %vm484_vm3, %v755_v9, %v481_v60 }
 0x134   :  { %v487_v47 = vmul.f32 %v486_v32, %v485_v0 }
 0x136   :  { %v1677_v13 = vperm.slane %v487_v47, 0 }
 0x138   :  { %v489_v33 = vmul.f32 %v1677_v13, %v1228_v56  ;;  %v490_v42 = vmul.f32 %v1677_v13, %v1232_v51  ;;  %v491_v23 = vmul.f32 %v1677_v13, %v1236_v63  ;;  %v492_v9 = vmul.f32 %v1677_v13, %v1240_v15 }
 0x139   :  { %v493_v11 = vmul.f32 %v1677_v13, %v2225_v29  ;;  %v494_v36 = vmul.f32 %v1677_v13, %v1254_v2  ;;  %v495_v50 = vmul.f32 %v1677_v13, %v1260_v7  ;;  %v496_v56 = vmul.f32 %v1677_v13, %v1269_v10 }
 0x13a   :  { %v557_v51 = vadd.f32 %v1682_v41, %v489_v33  ;;  %v558_v1 = vadd.f32 %v1682_v41, %v490_v42  ;;  %v559_v63 = vadd.f32 %v1682_v41, %v491_v23  ;;  %v560_v15 = vadd.f32 %v1682_v41, %v492_v9 }
 0x13b   :  { %v561_v24 = vadd.f32 %v1682_v41, %v493_v11  ;;  %v562_v3 = vadd.f32 %v1682_v41, %v494_v36  ;;  %v563_v7 = vadd.f32 %v1682_v41, %v495_v50  ;;  %v564_v10 = vadd.f32 %v1682_v41, %v496_v56 }
 0x13c   :  { %v621_v5 = vmax.f32 %v557_v51, 0.0  ;;  %v622_v2 = vmax.f32 %v558_v1, 0.0  ;;  %v623_v59 = vmax.f32 %v559_v63, 0.0  ;;  %v624_v54 = vmax.f32 %v560_v15, 0.0 }
 0x13d   :  { %v625_v45 = vmax.f32 %v561_v24, 0.0  ;;  %v497_v18 = vmul.f32 %v1677_v13, %v1276_v38  ;;  %v498_v60 = vmul.f32 %v1677_v13, %v1283_v16  ;;  %v499_v32 = vmul.f32 %v1677_v13, %v1290_v19 }
 0x13e   :  { %685 = vst.msk [vmem:[%s2138_s3] sm:$0xff] %vm78_vm0, %v621_v5  ;;  %v500_v0 = vmul.f32 %v1677_v13, %v1297_v22  ;;  %v626_v47 = vmax.f32 %v562_v3, 0.0  ;;  %v501_v33 = vmul.f32 %v1677_v13, %v1304_v25  ;;  %v502_v38 = vmul.f32 %v1677_v13, %v1311_v28 }
 0x13f   :  { %686 = vst.msk [vmem:[%s2138_s3 + $0x8] sm:$0xff] %vm78_vm0, %v622_v2  ;;  %v503_v16 = vmul.f32 %v1677_v13, %v1318_v31  ;;  %v627_v19 = vmax.f32 %v563_v7, 0.0  ;;  %v565_v22 = vadd.f32 %v1682_v41, %v497_v18  ;;  %v566_v42 = vadd.f32 %v1682_v41, %v498_v60 }
 0x140   :  { %687 = vst.msk [vmem:[%s2138_s3 + $0x10] sm:$0xff] %vm78_vm0, %v623_v59  ;;  %v567_v23 = vadd.f32 %v1682_v41, %v499_v32  ;;  %v628_v25 = vmax.f32 %v564_v10, 0.0  ;;  %v568_v28 = vadd.f32 %v1682_v41, %v500_v0  ;;  %v504_v31 = vmul.f32 %v1677_v13, %v1325_v34 }
 0x141   :  { %688 = vst.msk [vmem:[%s2138_s3 + $0x18] sm:$0xff] %vm78_vm0, %v624_v54  ;;  %v629_v9 = vmax.f32 %v565_v22, 0.0  ;;  %v569_v29 = vadd.f32 %v1682_v41, %v501_v33  ;;  %v630_v11 = vmax.f32 %v566_v42, 0.0  ;;  %v570_v36 = vadd.f32 %v1682_v41, %v502_v38 }
 0x142   :  { %689 = vst.msk [vmem:[%s2138_s3 + $0x20] sm:$0xff] %vm78_vm0, %v625_v45  ;;  %v571_v50 = vadd.f32 %v1682_v41, %v503_v16  ;;  %v631_v34 = vmax.f32 %v567_v23, 0.0  ;;  %v505_v56 = vmul.f32 %v1677_v13, %v1332_v37  ;;  %v506_v51 = vmul.f32 %v1677_v13, %v1339_v40 }
 0x143   :  { %690 = vst.msk [vmem:[%s2138_s3 + $0x28] sm:$0xff] %vm78_vm0, %v626_v47  ;;  %v507_v1 = vmul.f32 %v1677_v13, %v1346_v43  ;;  %v632_v63 = vmax.f32 %v568_v28, 0.0  ;;  %v572_v15 = vadd.f32 %v1682_v41, %v504_v31  ;;  %v508_v24 = vmul.f32 %v1677_v13, %v1353_v46 }
 0x144   :  { %691 = vst.msk [vmem:[%s2138_s3 + $0x30] sm:$0xff] %vm78_vm0, %v627_v19  ;;  %v633_v37 = vmax.f32 %v569_v29, 0.0  ;;  %v573_v40 = vadd.f32 %v1682_v41, %v505_v56  ;;  %v509_v43 = vmul.f32 %v1677_v13, %v1360_v49  ;;  %v634_v3 = vmax.f32 %v570_v36, 0.0 }
 0x145   :  { %692 = vst.msk [vmem:[%s2138_s3 + $0x38] sm:$0xff] %vm78_vm0, %v628_v25  ;;  %v574_v5 = vadd.f32 %v1682_v41, %v506_v51  ;;  %v510_v46 = vmul.f32 %v1677_v13, %v1367_v52  ;;  %v635_v2 = vmax.f32 %v571_v50, 0.0  ;;  %v575_v59 = vadd.f32 %v1682_v41, %v507_v1 }
 0x146   :  { %693 = vst.msk [vmem:[%s2138_s3 + $0x40] sm:$0xff] %vm78_vm0, %v629_v9  ;;  %v511_v49 = vmul.f32 %v1677_v13, %v1374_v55  ;;  %v636_v7 = vmax.f32 %v572_v15, 0.0  ;;  %v576_v54 = vadd.f32 %v1682_v41, %v508_v24  ;;  %v512_v52 = vmul.f32 %v1677_v13, %v1381_v58 }
 0x147   :  { %694 = vst.msk [vmem:[%s2138_s3 + $0x48] sm:$0xff] %vm78_vm0, %v630_v11  ;;  %v637_v45 = vmax.f32 %v573_v40, 0.0  ;;  %v577_v10 = vadd.f32 %v1682_v41, %v509_v43  ;;  %v513_v55 = vmul.f32 %v1677_v13, %v1388_v61  ;;  %v638_v18 = vmax.f32 %v574_v5, 0.0 }
 0x148   :  { %695 = vst.msk [vmem:[%s2138_s3 + $0x50] sm:$0xff] %vm78_vm0, %v631_v34  ;;  %v578_v60 = vadd.f32 %v1682_v41, %v510_v46  ;;  %v514_v58 = vmul.f32 %v1677_v13, %v1395_v4  ;;  %v639_v32 = vmax.f32 %v575_v59, 0.0  ;;  %v579_v0 = vadd.f32 %v1682_v41, %v511_v49 }
 0x149   :  { %696 = vst.msk [vmem:[%s2138_s3 + $0x58] sm:$0xff] %vm78_vm0, %v632_v63  ;;  %v515_v61 = vmul.f32 %v1677_v13, %v1402_v8  ;;  %v640_v47 = vmax.f32 %v576_v54, 0.0  ;;  %v580_v33 = vadd.f32 %v1682_v41, %v512_v52  ;;  %v516_v4 = vmul.f32 %v1677_v13, %v1409_v12 }
 0x14a   :  { %697 = vst.msk [vmem:[%s2138_s3 + $0x60] sm:$0xff] %vm78_vm0, %v633_v37  ;;  %v641_v38 = vmax.f32 %v577_v10, 0.0  ;;  %v581_v16 = vadd.f32 %v1682_v41, %v513_v55  ;;  %v517_v8 = vmul.f32 %v1677_v13, %v1416_v17  ;;  %v642_v19 = vmax.f32 %v578_v60, 0.0 }
 0x14b   :  { %698 = vst.msk [vmem:[%s2138_s3 + $0x68] sm:$0xff] %vm78_vm0, %v634_v3  ;;  %v582_v22 = vadd.f32 %v1682_v41, %v514_v58  ;;  %v518_v12 = vmul.f32 %v1677_v13, %v1423_v21  ;;  %v643_v42 = vmax.f32 %v579_v0, 0.0  ;;  %v583_v23 = vadd.f32 %v1682_v41, %v515_v61  ;;  %v2228_v58 = vld [vmem:[#allocation19_spill] sm:$0xff] }
 0x14c   :  { %699 = vst.msk [vmem:[%s2138_s3 + $0x70] sm:$0xff] %vm78_vm0, %v635_v2  ;;  %v519_v17 = vmul.f32 %v1677_v13, %v1430_v26  ;;  %v644_v25 = vmax.f32 %v580_v33, 0.0  ;;  %v584_v28 = vadd.f32 %v1682_v41, %v516_v4  ;;  %v520_v21 = vmul.f32 %v1677_v13, %v1437_v30 }
 0x14d   :  { %700 = vst.msk [vmem:[%s2138_s3 + $0x78] sm:$0xff] %vm78_vm0, %v636_v7  ;;  %v645_v31 = vmax.f32 %v581_v16, 0.0  ;;  %v585_v9 = vadd.f32 %v1682_v41, %v517_v8  ;;  %v521_v26 = vmul.f32 %v1677_v13, %v1444_v35  ;;  %v646_v29 = vmax.f32 %v582_v22, 0.0  ;;  %v2230_v16 = vld [vmem:[#allocation21_spill] sm:$0xff] }
 0x14e   :  { %701 = vst.msk [vmem:[%s2138_s3 + $0x80] sm:$0xff] %vm78_vm0, %v637_v45  ;;  %v586_v11 = vadd.f32 %v1682_v41, %v518_v12  ;;  %v522_v30 = vmul.f32 %v1677_v13, %v1451_v39  ;;  %v647_v36 = vmax.f32 %v583_v23, 0.0  ;;  %v587_v50 = vadd.f32 %v1682_v41, %v519_v17  ;;  %v2231_v12 = vld [vmem:[#allocation22_spill] sm:$0xff] }
 0x14f   :  { %702 = vst.msk [vmem:[%s2138_s3 + $0x88] sm:$0xff] %vm78_vm0, %v638_v18  ;;  %v523_v35 = vmul.f32 %v1677_v13, %v1458_v44  ;;  %v648_v34 = vmax.f32 %v584_v28, 0.0  ;;  %v588_v56 = vadd.f32 %v1682_v41, %v520_v21  ;;  %v524_v39 = vmul.f32 %v1677_v13, %v1465_v48  ;;  %v2233_v21 = vld [vmem:[#allocation23_spill] sm:$0xff] }
 0x150   :  { %703 = vst.msk [vmem:[%s2138_s3 + $0x90] sm:$0xff] %vm78_vm0, %v639_v32  ;;  %v649_v51 = vmax.f32 %v585_v9, 0.0  ;;  %v589_v1 = vadd.f32 %v1682_v41, %v521_v26  ;;  %v525_v44 = vmul.f32 %v1677_v13, %v1472_v53  ;;  %v650_v63 = vmax.f32 %v586_v11, 0.0 }
 0x151   :  { %704 = vst.msk [vmem:[%s2138_s3 + $0x98] sm:$0xff] %vm78_vm0, %v640_v47  ;;  %v590_v15 = vadd.f32 %v1682_v41, %v522_v30  ;;  %v526_v48 = vmul.f32 %v1677_v13, %v1479_v57  ;;  %v651_v24 = vmax.f32 %v587_v50, 0.0  ;;  %v591_v37 = vadd.f32 %v1682_v41, %v523_v35  ;;  %v2229_v47 = vld [vmem:[#allocation20_spill] sm:$0xff] }
 0x152   :  { %705 = vst.msk [vmem:[%s2138_s3 + $0xa0] sm:$0xff] %vm78_vm0, %v641_v38  ;;  %v527_v53 = vmul.f32 %v1677_v13, %v1486_v62  ;;  %v652_v40 = vmax.f32 %v588_v56, 0.0  ;;  %v592_v43 = vadd.f32 %v1682_v41, %v524_v39  ;;  %v528_v57 = vmul.f32 %v1677_v13, %v1493_v6  ;;  %v2235_v50 = vld [vmem:[#allocation4_spill] sm:$0xff] }
 0x153   :  { %706 = vst.msk [vmem:[%s2138_s3 + $0xa8] sm:$0xff] %vm78_vm0, %v642_v19  ;;  %v653_v3 = vmax.f32 %v589_v1, 0.0  ;;  %v593_v5 = vadd.f32 %v1682_v41, %v525_v44  ;;  %v529_v62 = vmul.f32 %v1677_v13, %v1500_v14  ;;  %v654_v46 = vmax.f32 %v590_v15, 0.0  ;;  %v2237_v15 = vld [vmem:[#allocation6_spill] sm:$0xff] }
 0x154   :  { %707 = vst.msk [vmem:[%s2138_s3 + $0xb0] sm:$0xff] %vm78_vm0, %v643_v42  ;;  %v594_v2 = vadd.f32 %v1682_v41, %v526_v48  ;;  %v530_v6 = vmul.f32 %v1677_v13, %v1507_v20  ;;  %v655_v59 = vmax.f32 %v591_v37, 0.0  ;;  %v595_v49 = vadd.f32 %v1682_v41, %v527_v53  ;;  %v2226_v20 = vld [vmem:[#allocation17_spill] sm:$0xff]  ;;  %v2238_v53 = vld [vmem:[#allocation7_spill] sm:$0xff] }
 0x155   :  { %708 = vst.msk [vmem:[%s2138_s3 + $0xb8] sm:$0xff] %vm78_vm0, %v644_v25  ;;  %v531_v14 = vmul.f32 %v1677_v13, %v1514_v27  ;;  %v656_v7 = vmax.f32 %v592_v43, 0.0  ;;  %v596_v54 = vadd.f32 %v1682_v41, %v528_v57  ;;  %v532_v52 = vmul.f32 %v1677_v13, %v2226_v20  ;;  %v2227_v27 = vld [vmem:[#allocation18_spill] sm:$0xff] }
 0x156   :  { %709 = vst.msk [vmem:[%s2138_s3 + $0xc0] sm:$0xff] %vm78_vm0, %v645_v31  ;;  %v657_v45 = vmax.f32 %v593_v5, 0.0  ;;  %v597_v10 = vadd.f32 %v1682_v41, %v529_v62  ;;  %v533_v55 = vmul.f32 %v1677_v13, %v2227_v27  ;;  %v658_v18 = vmax.f32 %v594_v2, 0.0  ;;  %v2232_v25 = vld [vmem:[#allocation2_spill] sm:$0xff]  ;;  %v2240_v2 = vld [vmem:[#allocation9_spill] sm:$0xff] }
 0x157   :  { %710 = vst.msk [vmem:[%s2138_s3 + $0xc8] sm:$0xff] %vm78_vm0, %v646_v29  ;;  %v598_v60 = vadd.f32 %v1682_v41, %v530_v6  ;;  %v534_v32 = vmul.f32 %v1677_v13, %v2228_v58  ;;  %v659_v0 = vmax.f32 %v595_v49, 0.0  ;;  %v599_v61 = vadd.f32 %v1682_v41, %v531_v14  ;;  %v2234_v29 = vld [vmem:[#allocation3_spill] sm:$0xff]  ;;  %v2241_v14 = vld [vmem:[#allocation10_spill] sm:$0xff] }
 0x158   :  { %711 = vst.msk [vmem:[%s2138_s3 + $0xd0] sm:$0xff] %vm78_vm0, %v647_v36  ;;  %v535_v33 = vmul.f32 %v1677_v13, %v2229_v47  ;;  %v660_v4 = vmax.f32 %v596_v54, 0.0  ;;  %v600_v38 = vadd.f32 %v1682_v41, %v532_v52  ;;  %v536_v8 = vmul.f32 %v1677_v13, %v2230_v16  ;;  %v2242_v52 = vld [vmem:[#allocation11_spill] sm:$0xff] }
 0x159   :  { %712 = vst.msk [vmem:[%s2138_s3 + $0xd8] sm:$0xff] %vm78_vm0, %v648_v34  ;;  %v661_v19 = vmax.f32 %v597_v10, 0.0  ;;  %v601_v22 = vadd.f32 %v1682_v41, %v533_v55  ;;  %v537_v42 = vmul.f32 %v1677_v13, %v2231_v12  ;;  %v662_v23 = vmax.f32 %v598_v60, 0.0  ;;  %v2243_v55 = vld [vmem:[#allocation12_spill] sm:$0xff] }
 0x15a   :  { %713 = vst.msk [vmem:[%s2138_s3 + $0xe0] sm:$0xff] %vm78_vm0, %v649_v51  ;;  %v602_v17 = vadd.f32 %v1682_v41, %v534_v32  ;;  %v538_v28 = vmul.f32 %v1677_v13, %v2232_v25  ;;  %v552_v31 = vmul.f32 %v1677_v13, %v2233_v21  ;;  %v663_v9 = vmax.f32 %v599_v61, 0.0  ;;  %v2236_v51 = vld [vmem:[#allocation5_spill] sm:$0xff] }
 0x15b   :  { %714 = vst.msk [vmem:[%s2138_s3 + $0xe8] sm:$0xff] %vm78_vm0, %v650_v63  ;;  %v603_v26 = vadd.f32 %v1682_v41, %v535_v33  ;;  %v539_v11 = vmul.f32 %v1677_v13, %v2234_v29  ;;  %v664_v30 = vmax.f32 %v600_v38, 0.0  ;;  %v604_v36 = vadd.f32 %v1682_v41, %v536_v8  ;;  %v2244_v32 = vld [vmem:[#allocation13_spill] sm:$0xff]  ;;  %v2245_v33 = vld [vmem:[#allocation14_spill] sm:$0xff]  ;;  %v2246_v8 = vld [vmem:[#allocation15_spill] sm:$0xff] }
 0x15c   :  { %715 = vst.msk [vmem:[%s2138_s3 + $0xf0] sm:$0xff] %vm78_vm0, %v651_v24  ;;  %v540_v35 = vmul.f32 %v1677_v13, %v2235_v50  ;;  %v1999_v34 = vadd.f32 %v1682_v41, %v552_v31  ;;  %v665_v56 = vmax.f32 %v601_v22, 0.0  ;;  %v605_v39 = vadd.f32 %v1682_v41, %v537_v42 }
 0x15d   :  { %716 = vst.msk [vmem:[%s2138_s3 + $0xf8] sm:$0xff] %vm78_vm0, %v652_v40  ;;  %v541_v1 = vmul.f32 %v1677_v13, %v2236_v51  ;;  %v666_v44 = vmax.f32 %v602_v17, 0.0  ;;  %v606_v63 = vadd.f32 %v1682_v41, %v538_v28  ;;  %v542_v48 = vmul.f32 %v1677_v13, %v2237_v15 }
 0x15e   :  { %717 = vst.msk [vmem:[%s2138_s3 + $0x100] sm:$0xff] %vm78_vm0, %v653_v3  ;;  %v667_v24 = vmax.f32 %v603_v26, 0.0  ;;  %v607_v37 = vadd.f32 %v1682_v41, %v539_v11  ;;  %v543_v40 = vmul.f32 %v1677_v13, %v2238_v53  ;;  %v668_v43 = vmax.f32 %v604_v36, 0.0  ;;  %v2239_v3 = vld [vmem:[#allocation8_spill] sm:$0xff] }
 0x15f   :  { %718 = vst.msk [vmem:[%s2138_s3 + $0x108] sm:$0xff] %vm78_vm0, %v654_v46  ;;  %v608_v57 = vadd.f32 %v1682_v41, %v540_v35  ;;  %v544_v5 = vmul.f32 %v1677_v13, %v2239_v3  ;;  %v669_v62 = vmax.f32 %v605_v39, 0.0  ;;  %v609_v46 = vadd.f32 %v1682_v41, %v541_v1 }
 0x160   :  { %719 = vst.msk [vmem:[%s2138_s3 + $0x110] sm:$0xff] %vm78_vm0, %v655_v59  ;;  %v545_v6 = vmul.f32 %v1677_v13, %v2240_v2  ;;  %v670_v59 = vmax.f32 %v606_v63, 0.0  ;;  %v610_v49 = vadd.f32 %v1682_v41, %v542_v48  ;;  %v671_v54 = vmax.f32 %v607_v37, 0.0 }
 0x161   :  { %720 = vst.msk [vmem:[%s2138_s3 + $0x118] sm:$0xff] %vm78_vm0, %v656_v7  ;;  %v546_v7 = vmul.f32 %v1677_v13, %v2241_v14  ;;  %v611_v20 = vadd.f32 %v1682_v41, %v543_v40  ;;  %v672_v10 = vmax.f32 %v608_v57, 0.0  ;;  %v612_v27 = vadd.f32 %v1682_v41, %v544_v5 }
 0x162   :  { %721 = vst.msk [vmem:[%s2138_s3 + $0x120] sm:$0xff] %vm78_vm0, %v657_v45  ;;  %v547_v45 = vmul.f32 %v1677_v13, %v2242_v52  ;;  %v673_v60 = vmax.f32 %v609_v46, 0.0  ;;  %v613_v58 = vadd.f32 %v1682_v41, %v545_v6  ;;  %v674_v61 = vmax.f32 %v610_v49, 0.0 }
 0x163   :  { %722 = vst.msk [vmem:[%s2138_s3 + $0x128] sm:$0xff] %vm78_vm0, %v658_v18  ;;  %v548_v18 = vmul.f32 %v1677_v13, %v2243_v55  ;;  %v614_v47 = vadd.f32 %v1682_v41, %v546_v7  ;;  %v675_v38 = vmax.f32 %v611_v20, 0.0  ;;  %v676_v22 = vmax.f32 %v612_v27, 0.0 }
 0x164   :  { %723 = vst.msk [vmem:[%s2138_s3 + $0x130] sm:$0xff] %vm78_vm0, %v659_v0  ;;  %v549_v0 = vmul.f32 %v1677_v13, %v2244_v32  ;;  %v615_v16 = vadd.f32 %v1682_v41, %v547_v45  ;;  %v677_v42 = vmax.f32 %v613_v58, 0.0  ;;  %v684_v26 = vmax.f32 %v1999_v34, 0.0 }
 0x165   :  { %724 = vst.msk [vmem:[%s2138_s3 + $0x138] sm:$0xff] %vm78_vm0, %v660_v4  ;;  %v550_v4 = vmul.f32 %v1677_v13, %v2245_v33  ;;  %v616_v12 = vadd.f32 %v1682_v41, %v548_v18 }
 0x166   :  { %725 = vst.msk [vmem:[%s2138_s3 + $0x140] sm:$0xff] %vm78_vm0, %v661_v19  ;;  %v551_v19 = vmul.f32 %v1677_v13, %v2246_v8  ;;  %v678_v13 = vmax.f32 %v614_v47, 0.0  ;;  %v679_v25 = vmax.f32 %v615_v16, 0.0 }
 0x167   :  { %726 = vst.msk [vmem:[%s2138_s3 + $0x148] sm:$0xff] %vm78_vm0, %v662_v23  ;;  %v617_v23 = vadd.f32 %v1682_v41, %v549_v0  ;;  %v618_v17 = vadd.f32 %v1682_v41, %v550_v4  ;;  %v680_v21 = vmax.f32 %v616_v12, 0.0 }
 0x168   :  { %727 = vst.msk [vmem:[%s2138_s3 + $0x150] sm:$0xff] %vm78_vm0, %v663_v9  ;;  %v619_v28 = vadd.f32 %v1682_v41, %v551_v19 }
 0x169   :  { %728 = vst.msk [vmem:[%s2138_s3 + $0x158] sm:$0xff] %vm78_vm0, %v664_v30  ;;  %v681_v31 = vmax.f32 %v617_v23, 0.0  ;;  %v682_v9 = vmax.f32 %v618_v17, 0.0 }
 0x16a   :  { %729 = vst.msk [vmem:[%s2138_s3 + $0x160] sm:$0xff] %vm78_vm0, %v665_v56  ;;  %v683_v41 = vmax.f32 %v619_v28, 0.0 }
 0x16b   :  { %730 = vst.msk [vmem:[%s2138_s3 + $0x168] sm:$0xff] %vm78_vm0, %v666_v44 }
 0x16c   :  { %731 = vst.msk [vmem:[%s2138_s3 + $0x170] sm:$0xff] %vm78_vm0, %v667_v24 }
 0x16d   :  { %732 = vst.msk [vmem:[%s2138_s3 + $0x178] sm:$0xff] %vm78_vm0, %v668_v43 }
 0x16e   :  { %733 = vst.msk [vmem:[%s2138_s3 + $0x180] sm:$0xff] %vm78_vm0, %v669_v62 }
 0x16f   :  { %734 = vst.msk [vmem:[%s2138_s3 + $0x188] sm:$0xff] %vm78_vm0, %v670_v59 }
 0x170   :  { %735 = vst.msk [vmem:[%s2138_s3 + $0x190] sm:$0xff] %vm78_vm0, %v671_v54 }
 0x171   :  { %736 = vst.msk [vmem:[%s2138_s3 + $0x198] sm:$0xff] %vm78_vm0, %v672_v10 }
 0x172   :  { %737 = vst.msk [vmem:[%s2138_s3 + $0x1a0] sm:$0xff] %vm78_vm0, %v673_v60 }
 0x173   :  { %738 = vst.msk [vmem:[%s2138_s3 + $0x1a8] sm:$0xff] %vm78_vm0, %v674_v61 }
 0x174   :  { %739 = vst.msk [vmem:[%s2138_s3 + $0x1b0] sm:$0xff] %vm78_vm0, %v675_v38 }
 0x175   :  { %740 = vst.msk [vmem:[%s2138_s3 + $0x1b8] sm:$0xff] %vm78_vm0, %v676_v22 }
 0x176   :  { %741 = vst.msk [vmem:[%s2138_s3 + $0x1c0] sm:$0xff] %vm78_vm0, %v677_v42 }
 0x177   :  { %742 = vst.msk [vmem:[%s2138_s3 + $0x1c8] sm:$0xff] %vm78_vm0, %v678_v13 }
 0x178   :  { %743 = vst.msk [vmem:[%s2138_s3 + $0x1d0] sm:$0xff] %vm78_vm0, %v679_v25 }
 0x179   :  { %744 = vst.msk [vmem:[%s2138_s3 + $0x1d8] sm:$0xff] %vm78_vm0, %v680_v21 }
 0x17a   :  { %745 = vst.msk [vmem:[%s2138_s3 + $0x1e0] sm:$0xff] %vm78_vm0, %v681_v31 }
 0x17b   :  { %746 = vst.msk [vmem:[%s2138_s3 + $0x1e8] sm:$0xff] %vm78_vm0, %v682_v9 }
 0x17c   :  { %747 = vst.msk [vmem:[%s2138_s3 + $0x1f0] sm:$0xff] %vm78_vm0, %v683_v41 }
 0x17d   :  { %748 = vst.msk [vmem:[%s2138_s3 + $0x1f8] sm:$0xff] %vm78_vm0, %v684_v26 }

// kernel: _lambda_.14
= control target key start
LH: loop header
LB: loop body
LE: loop exit
PB: predicated region body
PF: predicated region fallthrough
CT: control target
= control target key end

     0   :  { %vm334_vm0 = vcmask 1043456   ;;  %vm237_vm1 = vcmask 64512   ;;  %vm507_vm2 = vcmask 392192   ;;  %s1173_s1 = inlined_call_operand.vmem [shape: bf16[8,48], index: 1, kind: input, shape index: {}]   ;;  %s1174_s0 = inlined_call_operand.vmem [shape: bf16[512,8], index: 0, kind: input, shape index: {}]   ;;  %s1175_s2 = inlined_call_operand.vmem [shape: f32[512,48], index: 2, kind: output, shape index: {}]  }
   0x1   :  { %v76_v0 = vld [vmem:[%s1173_s1] sm:$0xf]  ;;  %v737_v6 = vld [vmem:[%s1174_s0 + $0x8] sm:$0xff]  ;;  %v738_v10 = vld [vmem:[%s1174_s0 + $0x10] sm:$0xff] }
   0x2   :  { %v336_v1 = vsel %vm334_vm0, %v76_v0, 0  ;;  %v736_v2 = vld [vmem:[%s1174_s0] sm:$0xff]  ;;  %v745_v7 = vld [vmem:[%s1174_s0 + $0x48] sm:$0xff]  ;;  %v746_v11 = vld [vmem:[%s1174_s0 + $0x50] sm:$0xff] }
   0x3   :  { %v744_v3 = vld [vmem:[%s1174_s0 + $0x40] sm:$0xff]  ;;  %345 = vmatpush.bf16.msra.mxu0 %v336_v1  ;;  %768 = vmatpush.bf16.msra.mxu1 %v336_v1  ;;  %v753_v8 = vld [vmem:[%s1174_s0 + $0x88] sm:$0xff]  ;;  %v754_v12 = vld [vmem:[%s1174_s0 + $0x90] sm:$0xff] }
   0x4   :  { %v752_v4 = vld [vmem:[%s1174_s0 + $0x80] sm:$0xff]  ;;  %769 = vmatpush.bf16.msra.mxu2 %v336_v1  ;;  %770 = vmatpush.bf16.msra.mxu3 %v336_v1  ;;  %v761_v9 = vld [vmem:[%s1174_s0 + $0xc8] sm:$0xff]  ;;  %v762_v13 = vld [vmem:[%s1174_s0 + $0xd0] sm:$0xff] }
   0x5   :  { %v760_v5 = vld [vmem:[%s1174_s0 + $0xc0] sm:$0xff]  ;;  %v739_v14 = vld [vmem:[%s1174_s0 + $0x18] sm:$0xff]  ;;  %v741_v22 = vld [vmem:[%s1174_s0 + $0x28] sm:$0xff] }
   0x6   :  { %704 = vmatmul.msk.bf16.vlgmr.msra.gmra.mxu0 %vm237_vm1, %v736_v2  ;;  %712 = vmatmul.msk.bf16.vlgmr.msra.gmra.mxu1 %vm237_vm1, %v744_v3  ;;  %v747_v15 = vld [vmem:[%s1174_s0 + $0x58] sm:$0xff]  ;;  %v740_v18 = vld [vmem:[%s1174_s0 + $0x20] sm:$0xff]  ;;  %v749_v23 = vld [vmem:[%s1174_s0 + $0x68] sm:$0xff] }
   0x7   :  { %720 = vmatmul.msk.bf16.vlgmr.msra.gmra.mxu2 %vm237_vm1, %v752_v4  ;;  %728 = vmatmul.msk.bf16.vlgmr.msra.gmra.mxu3 %vm237_vm1, %v760_v5  ;;  %v755_v16 = vld [vmem:[%s1174_s0 + $0x98] sm:$0xff]  ;;  %v748_v19 = vld [vmem:[%s1174_s0 + $0x60] sm:$0xff]  ;;  %v757_v24 = vld [vmem:[%s1174_s0 + $0xa8] sm:$0xff] }
   0x8   :  { %v763_v17 = vld [vmem:[%s1174_s0 + $0xd8] sm:$0xff]  ;;  %v756_v20 = vld [vmem:[%s1174_s0 + $0xa0] sm:$0xff]  ;;  %v765_v25 = vld [vmem:[%s1174_s0 + $0xe8] sm:$0xff] }
   0x9   :  { %v764_v21 = vld [vmem:[%s1174_s0 + $0xe0] sm:$0xff]  ;;  %v742_v26 = vld [vmem:[%s1174_s0 + $0x30] sm:$0xff]  ;;  %v743_v30 = vld [vmem:[%s1174_s0 + $0x38] sm:$0xff] }
   0xa   :  { %v750_v27 = vld [vmem:[%s1174_s0 + $0x70] sm:$0xff]  ;;  %v751_v31 = vld [vmem:[%s1174_s0 + $0x78] sm:$0xff] }
   0xb   :  { %v758_v28 = vld [vmem:[%s1174_s0 + $0xb0] sm:$0xff]  ;;  %v759_v32 = vld [vmem:[%s1174_s0 + $0xb8] sm:$0xff] }
   0xc   :  { %v766_v29 = vld [vmem:[%s1174_s0 + $0xf0] sm:$0xff]  ;;  %v767_v33 = vld [vmem:[%s1174_s0 + $0xf8] sm:$0xff] }
  0x16   :  { %705 = vmatmul.msk.bf16.gmra.mxu0 %vm237_vm1, %v737_v6  ;;  %713 = vmatmul.msk.bf16.gmra.mxu1 %vm237_vm1, %v745_v7 }
  0x17   :  { %721 = vmatmul.msk.bf16.gmra.mxu2 %vm237_vm1, %v753_v8  ;;  %729 = vmatmul.msk.bf16.gmra.mxu3 %vm237_vm1, %v761_v9 }
  0x26   :  { %706 = vmatmul.msk.bf16.gmra.mxu0 %vm237_vm1, %v738_v10  ;;  %714 = vmatmul.msk.bf16.gmra.mxu1 %vm237_vm1, %v746_v11 }
  0x27   :  { %722 = vmatmul.msk.bf16.gmra.mxu2 %vm237_vm1, %v754_v12  ;;  %730 = vmatmul.msk.bf16.gmra.mxu3 %vm237_vm1, %v762_v13 }
  0x36   :  { %707 = vmatmul.msk.bf16.gmra.mxu0 %vm237_vm1, %v739_v14  ;;  %715 = vmatmul.msk.bf16.gmra.mxu1 %vm237_vm1, %v747_v15 }
  0x37   :  { %723 = vmatmul.msk.bf16.gmra.mxu2 %vm237_vm1, %v755_v16  ;;  %731 = vmatmul.msk.bf16.gmra.mxu3 %vm237_vm1, %v763_v17 }
  0x46   :  { %708 = vmatmul.msk.bf16.gmra.mxu0 %vm237_vm1, %v740_v18  ;;  %716 = vmatmul.msk.bf16.gmra.mxu1 %vm237_vm1, %v748_v19 }
  0x47   :  { %724 = vmatmul.msk.bf16.gmra.mxu2 %vm237_vm1, %v756_v20  ;;  %732 = vmatmul.msk.bf16.gmra.mxu3 %vm237_vm1, %v764_v21 }
  0x56   :  { %709 = vmatmul.msk.bf16.gmra.mxu0 %vm237_vm1, %v741_v22  ;;  %717 = vmatmul.msk.bf16.gmra.mxu1 %vm237_vm1, %v749_v23 }
  0x57   :  { %725 = vmatmul.msk.bf16.gmra.mxu2 %vm237_vm1, %v757_v24  ;;  %733 = vmatmul.msk.bf16.gmra.mxu3 %vm237_vm1, %v765_v25 }
  0x66   :  { %710 = vmatmul.msk.bf16.gmra.mxu0 %vm237_vm1, %v742_v26  ;;  %718 = vmatmul.msk.bf16.gmra.mxu1 %vm237_vm1, %v750_v27 }
  0x67   :  { %726 = vmatmul.msk.bf16.gmra.mxu2 %vm237_vm1, %v758_v28  ;;  %734 = vmatmul.msk.bf16.gmra.mxu3 %vm237_vm1, %v766_v29 }
  0x76   :  { %711 = vmatmul.msk.bf16.gmra.mxu0 %vm237_vm1, %v743_v30  ;;  %719 = vmatmul.msk.bf16.gmra.mxu1 %vm237_vm1, %v751_v31 }
  0x77   :  { %727 = vmatmul.msk.bf16.gmra.mxu2 %vm237_vm1, %v759_v32  ;;  %735 = vmatmul.msk.bf16.gmra.mxu3 %vm237_vm1, %v767_v33 }
  0x83   :  { %v347_v34 = vpop.f32.mrf.mxu0  ;;  %v387_v35 = vpop.f32.mrf.mxu1 }
  0x84   :  { %508 = vst.msk [vmem:[%s1175_s2] sm:$0xff] %vm507_vm2, %v347_v34 }
  0x85   :  { %524 = vst.msk [vmem:[%s1175_s2 + $0x80] sm:$0xff] %vm507_vm2, %v387_v35 }
  0x8a   :  { %v427_v36 = vpop.f32.mrf.mxu2  ;;  %v467_v37 = vpop.f32.mrf.mxu3 }
  0x8b   :  { %540 = vst.msk [vmem:[%s1175_s2 + $0x100] sm:$0xff] %vm507_vm2, %v427_v36  ;;  %v349_v38 = vpop.f32.mrf.mxu0  ;;  %v389_v39 = vpop.f32.mrf.mxu1 }
  0x8c   :  { %556 = vst.msk [vmem:[%s1175_s2 + $0x180] sm:$0xff] %vm507_vm2, %v467_v37 }
  0x8d   :  { %509 = vst.msk [vmem:[%s1175_s2 + $0x8] sm:$0xff] %vm507_vm2, %v349_v38 }
  0x8e   :  { %525 = vst.msk [vmem:[%s1175_s2 + $0x88] sm:$0xff] %vm507_vm2, %v389_v39 }
  0x92   :  { %v429_v40 = vpop.f32.mrf.mxu2  ;;  %v469_v41 = vpop.f32.mrf.mxu3 }
  0x93   :  { %541 = vst.msk [vmem:[%s1175_s2 + $0x108] sm:$0xff] %vm507_vm2, %v429_v40  ;;  %v352_v42 = vpop.f32.mrf.mxu0  ;;  %v392_v43 = vpop.f32.mrf.mxu1 }
  0x94   :  { %557 = vst.msk [vmem:[%s1175_s2 + $0x188] sm:$0xff] %vm507_vm2, %v469_v41 }
  0x95   :  { %510 = vst.msk [vmem:[%s1175_s2 + $0x10] sm:$0xff] %vm507_vm2, %v352_v42 }
  0x96   :  { %526 = vst.msk [vmem:[%s1175_s2 + $0x90] sm:$0xff] %vm507_vm2, %v392_v43 }
  0x9a   :  { %v432_v44 = vpop.f32.mrf.mxu2  ;;  %v472_v45 = vpop.f32.mrf.mxu3 }
  0x9b   :  { %542 = vst.msk [vmem:[%s1175_s2 + $0x110] sm:$0xff] %vm507_vm2, %v432_v44  ;;  %v354_v46 = vpop.f32.mrf.mxu0  ;;  %v394_v47 = vpop.f32.mrf.mxu1 }
  0x9c   :  { %558 = vst.msk [vmem:[%s1175_s2 + $0x190] sm:$0xff] %vm507_vm2, %v472_v45 }
  0x9d   :  { %511 = vst.msk [vmem:[%s1175_s2 + $0x18] sm:$0xff] %vm507_vm2, %v354_v46 }
  0x9e   :  { %527 = vst.msk [vmem:[%s1175_s2 + $0x98] sm:$0xff] %vm507_vm2, %v394_v47 }
  0xa2   :  { %v434_v48 = vpop.f32.mrf.mxu2  ;;  %v474_v49 = vpop.f32.mrf.mxu3 }
  0xa3   :  { %543 = vst.msk [vmem:[%s1175_s2 + $0x118] sm:$0xff] %vm507_vm2, %v434_v48  ;;  %v357_v50 = vpop.f32.mrf.mxu0  ;;  %v397_v51 = vpop.f32.mrf.mxu1 }
  0xa4   :  { %559 = vst.msk [vmem:[%s1175_s2 + $0x198] sm:$0xff] %vm507_vm2, %v474_v49 }
  0xa5   :  { %512 = vst.msk [vmem:[%s1175_s2 + $0x20] sm:$0xff] %vm507_vm2, %v357_v50 }
  0xa6   :  { %528 = vst.msk [vmem:[%s1175_s2 + $0xa0] sm:$0xff] %vm507_vm2, %v397_v51 }
  0xaa   :  { %v437_v52 = vpop.f32.mrf.mxu2  ;;  %v477_v53 = vpop.f32.mrf.mxu3 }
  0xab   :  { %544 = vst.msk [vmem:[%s1175_s2 + $0x120] sm:$0xff] %vm507_vm2, %v437_v52  ;;  %v359_v54 = vpop.f32.mrf.mxu0  ;;  %v399_v55 = vpop.f32.mrf.mxu1 }
  0xac   :  { %560 = vst.msk [vmem:[%s1175_s2 + $0x1a0] sm:$0xff] %vm507_vm2, %v477_v53 }
  0xad   :  { %513 = vst.msk [vmem:[%s1175_s2 + $0x28] sm:$0xff] %vm507_vm2, %v359_v54 }
  0xae   :  { %529 = vst.msk [vmem:[%s1175_s2 + $0xa8] sm:$0xff] %vm507_vm2, %v399_v55 }
  0xb2   :  { %v439_v56 = vpop.f32.mrf.mxu2  ;;  %v479_v57 = vpop.f32.mrf.mxu3 }
  0xb3   :  { %545 = vst.msk [vmem:[%s1175_s2 + $0x128] sm:$0xff] %vm507_vm2, %v439_v56  ;;  %v362_v58 = vpop.f32.mrf.mxu0  ;;  %v402_v59 = vpop.f32.mrf.mxu1 }
  0xb4   :  { %561 = vst.msk [vmem:[%s1175_s2 + $0x1a8] sm:$0xff] %vm507_vm2, %v479_v57 }
  0xb5   :  { %514 = vst.msk [vmem:[%s1175_s2 + $0x30] sm:$0xff] %vm507_vm2, %v362_v58 }
  0xb6   :  { %530 = vst.msk [vmem:[%s1175_s2 + $0xb0] sm:$0xff] %vm507_vm2, %v402_v59 }
  0xba   :  { %v442_v60 = vpop.f32.mrf.mxu2  ;;  %v482_v61 = vpop.f32.mrf.mxu3 }
  0xbb   :  { %546 = vst.msk [vmem:[%s1175_s2 + $0x130] sm:$0xff] %vm507_vm2, %v442_v60  ;;  %v364_v62 = vpop.f32.mrf.mxu0  ;;  %v404_v63 = vpop.f32.mrf.mxu1 }
  0xbc   :  { %562 = vst.msk [vmem:[%s1175_s2 + $0x1b0] sm:$0xff] %vm507_vm2, %v482_v61 }
  0xbd   :  { %515 = vst.msk [vmem:[%s1175_s2 + $0x38] sm:$0xff] %vm507_vm2, %v364_v62 }
  0xbe   :  { %531 = vst.msk [vmem:[%s1175_s2 + $0xb8] sm:$0xff] %vm507_vm2, %v404_v63 }
  0xc2   :  { %v444_v0 = vpop.f32.mrf.mxu2  ;;  %v484_v1 = vpop.f32.mrf.mxu3 }
  0xc3   :  { %547 = vst.msk [vmem:[%s1175_s2 + $0x138] sm:$0xff] %vm507_vm2, %v444_v0  ;;  %v367_v2 = vpop.f32.mrf.mxu0  ;;  %v407_v3 = vpop.f32.mrf.mxu1 }
  0xc4   :  { %563 = vst.msk [vmem:[%s1175_s2 + $0x1b8] sm:$0xff] %vm507_vm2, %v484_v1 }
  0xc5   :  { %516 = vst.msk [vmem:[%s1175_s2 + $0x40] sm:$0xff] %vm507_vm2, %v367_v2 }
  0xc6   :  { %532 = vst.msk [vmem:[%s1175_s2 + $0xc0] sm:$0xff] %vm507_vm2, %v407_v3 }
  0xca   :  { %v447_v4 = vpop.f32.mrf.mxu2  ;;  %v487_v5 = vpop.f32.mrf.mxu3 }
  0xcb   :  { %548 = vst.msk [vmem:[%s1175_s2 + $0x140] sm:$0xff] %vm507_vm2, %v447_v4  ;;  %v369_v6 = vpop.f32.mrf.mxu0  ;;  %v409_v7 = vpop.f32.mrf.mxu1 }
  0xcc   :  { %564 = vst.msk [vmem:[%s1175_s2 + $0x1c0] sm:$0xff] %vm507_vm2, %v487_v5 }
  0xcd   :  { %517 = vst.msk [vmem:[%s1175_s2 + $0x48] sm:$0xff] %vm507_vm2, %v369_v6 }
  0xce   :  { %533 = vst.msk [vmem:[%s1175_s2 + $0xc8] sm:$0xff] %vm507_vm2, %v409_v7 }
  0xd2   :  { %v449_v8 = vpop.f32.mrf.mxu2  ;;  %v489_v9 = vpop.f32.mrf.mxu3 }
  0xd3   :  { %549 = vst.msk [vmem:[%s1175_s2 + $0x148] sm:$0xff] %vm507_vm2, %v449_v8  ;;  %v372_v10 = vpop.f32.mrf.mxu0  ;;  %v412_v11 = vpop.f32.mrf.mxu1 }
  0xd4   :  { %565 = vst.msk [vmem:[%s1175_s2 + $0x1c8] sm:$0xff] %vm507_vm2, %v489_v9 }
  0xd5   :  { %518 = vst.msk [vmem:[%s1175_s2 + $0x50] sm:$0xff] %vm507_vm2, %v372_v10 }
  0xd6   :  { %534 = vst.msk [vmem:[%s1175_s2 + $0xd0] sm:$0xff] %vm507_vm2, %v412_v11 }
  0xda   :  { %v452_v12 = vpop.f32.mrf.mxu2  ;;  %v492_v13 = vpop.f32.mrf.mxu3 }
  0xdb   :  { %550 = vst.msk [vmem:[%s1175_s2 + $0x150] sm:$0xff] %vm507_vm2, %v452_v12  ;;  %v374_v14 = vpop.f32.mrf.mxu0  ;;  %v414_v15 = vpop.f32.mrf.mxu1 }
  0xdc   :  { %566 = vst.msk [vmem:[%s1175_s2 + $0x1d0] sm:$0xff] %vm507_vm2, %v492_v13 }
  0xdd   :  { %519 = vst.msk [vmem:[%s1175_s2 + $0x58] sm:$0xff] %vm507_vm2, %v374_v14 }
  0xde   :  { %535 = vst.msk [vmem:[%s1175_s2 + $0xd8] sm:$0xff] %vm507_vm2, %v414_v15 }
  0xe2   :  { %v454_v16 = vpop.f32.mrf.mxu2  ;;  %v494_v17 = vpop.f32.mrf.mxu3 }
  0xe3   :  { %551 = vst.msk [vmem:[%s1175_s2 + $0x158] sm:$0xff] %vm507_vm2, %v454_v16  ;;  %v377_v18 = vpop.f32.mrf.mxu0  ;;  %v417_v19 = vpop.f32.mrf.mxu1 }
  0xe4   :  { %567 = vst.msk [vmem:[%s1175_s2 + $0x1d8] sm:$0xff] %vm507_vm2, %v494_v17 }
  0xe5   :  { %520 = vst.msk [vmem:[%s1175_s2 + $0x60] sm:$0xff] %vm507_vm2, %v377_v18 }
  0xe6   :  { %536 = vst.msk [vmem:[%s1175_s2 + $0xe0] sm:$0xff] %vm507_vm2, %v417_v19 }
  0xea   :  { %v457_v20 = vpop.f32.mrf.mxu2  ;;  %v497_v21 = vpop.f32.mrf.mxu3 }
  0xeb   :  { %552 = vst.msk [vmem:[%s1175_s2 + $0x160] sm:$0xff] %vm507_vm2, %v457_v20  ;;  %v379_v22 = vpop.f32.mrf.mxu0  ;;  %v419_v23 = vpop.f32.mrf.mxu1 }
  0xec   :  { %568 = vst.msk [vmem:[%s1175_s2 + $0x1e0] sm:$0xff] %vm507_vm2, %v497_v21 }
  0xed   :  { %521 = vst.msk [vmem:[%s1175_s2 + $0x68] sm:$0xff] %vm507_vm2, %v379_v22 }
  0xee   :  { %537 = vst.msk [vmem:[%s1175_s2 + $0xe8] sm:$0xff] %vm507_vm2, %v419_v23 }
  0xf2   :  { %v459_v24 = vpop.f32.mrf.mxu2  ;;  %v499_v25 = vpop.f32.mrf.mxu3 }
  0xf3   :  { %553 = vst.msk [vmem:[%s1175_s2 + $0x168] sm:$0xff] %vm507_vm2, %v459_v24  ;;  %v382_v26 = vpop.f32.mrf.mxu0  ;;  %v422_v27 = vpop.f32.mrf.mxu1 }
  0xf4   :  { %569 = vst.msk [vmem:[%s1175_s2 + $0x1e8] sm:$0xff] %vm507_vm2, %v499_v25 }
  0xf5   :  { %522 = vst.msk [vmem:[%s1175_s2 + $0x70] sm:$0xff] %vm507_vm2, %v382_v26 }
  0xf6   :  { %538 = vst.msk [vmem:[%s1175_s2 + $0xf0] sm:$0xff] %vm507_vm2, %v422_v27 }
  0xfa   :  { %v462_v28 = vpop.f32.mrf.mxu2  ;;  %v502_v29 = vpop.f32.mrf.mxu3 }
  0xfb   :  { %554 = vst.msk [vmem:[%s1175_s2 + $0x170] sm:$0xff] %vm507_vm2, %v462_v28  ;;  %v384_v30 = vpop.f32.mrf.mxu0  ;;  %v424_v31 = vpop.f32.mrf.mxu1 }
  0xfc   :  { %570 = vst.msk [vmem:[%s1175_s2 + $0x1f0] sm:$0xff] %vm507_vm2, %v502_v29 }
  0xfd   :  { %523 = vst.msk [vmem:[%s1175_s2 + $0x78] sm:$0xff] %vm507_vm2, %v384_v30 }
  0xfe   :  { %539 = vst.msk [vmem:[%s1175_s2 + $0xf8] sm:$0xff] %vm507_vm2, %v424_v31 }
 0x102   :  { %v464_v32 = vpop.f32.mrf.mxu2  ;;  %v504_v33 = vpop.f32.mrf.mxu3 }
 0x103   :  { %555 = vst.msk [vmem:[%s1175_s2 + $0x178] sm:$0xff] %vm507_vm2, %v464_v32 }
 0x104   :  { %571 = vst.msk [vmem:[%s1175_s2 + $0x1f8] sm:$0xff] %vm507_vm2, %v504_v33 }

// kernel: _lambda_.15
= control target key start
LH: loop header
LB: loop body
LE: loop exit
PB: predicated region body
PF: predicated region fallthrough
CT: control target
= control target key end

     0   :  { %vm270_vm0 = vcmask 23552   ;;  %s8800_s0 = inlined_call_operand.vmem [shape: f32[2048,3], index: 0, kind: input, shape index: {}]   ;;  %s8801_s2 = inlined_call_operand.vmem [shape: f32[1,3], index: 2, kind: input, shape index: {}]   ;;  %s8802_s1 = inlined_call_operand.vmem [shape: f32[1,3], index: 1, kind: input, shape index: {}]   ;;  %s8803_s3 = inlined_call_operand.vmem [shape: f32[2048,3], index: 3, kind: output, shape index: {}]  }
   0x1   :  { %v14_v0 = vld [vmem:[%s8800_s0] sm:$0xff]  ;;  %v15_v1 = vld [vmem:[%s8800_s0 + $0x8] sm:$0xff]  ;;  %v16_v2 = vld [vmem:[%s8800_s0 + $0x10] sm:$0xff] }
   0x2   :  { %v17_v3 = vld [vmem:[%s8800_s0 + $0x18] sm:$0xff]  ;;  %v271_v4 = vsel %vm270_vm0, %v14_v0, 0.0  ;;  %v272_v5 = vsel %vm270_vm0, %v15_v1, 0.0  ;;  %v274_v6 = vsel %vm270_vm0, %v16_v2, 0.0  ;;  %v18_v7 = vld [vmem:[%s8800_s0 + $0x20] sm:$0xff]  ;;  %v19_v10 = vld [vmem:[%s8800_s0 + $0x28] sm:$0xff] }
   0x3   :  { %v273_v8 = vadd.f32 %v272_v5, %v271_v4  ;;  %v276_v9 = vsel %vm270_vm0, %v17_v3, 0.0  ;;  %v278_v12 = vsel %vm270_vm0, %v18_v7, 0.0  ;;  %v20_v13 = vld [vmem:[%s8800_s0 + $0x30] sm:$0xff]  ;;  %v280_v15 = vsel %vm270_vm0, %v19_v10, 0.0  ;;  %v21_v16 = vld [vmem:[%s8800_s0 + $0x38] sm:$0xff]  ;;  %v22_v19 = vld [vmem:[%s8800_s0 + $0x40] sm:$0xff] }
   0x4   :  { %v282_v18 = vsel %vm270_vm0, %v20_v13, 0.0  ;;  %v284_v21 = vsel %vm270_vm0, %v21_v16, 0.0  ;;  %v23_v22 = vld [vmem:[%s8800_s0 + $0x48] sm:$0xff]  ;;  %v286_v24 = vsel %vm270_vm0, %v22_v19, 0.0  ;;  %v24_v25 = vld [vmem:[%s8800_s0 + $0x50] sm:$0xff]  ;;  %v25_v28 = vld [vmem:[%s8800_s0 + $0x58] sm:$0xff] }
   0x5   :  { %v275_v11 = vadd.f32 %v274_v6, %v273_v8  ;;  %v288_v27 = vsel %vm270_vm0, %v23_v22, 0.0  ;;  %v290_v30 = vsel %vm270_vm0, %v24_v25, 0.0  ;;  %v26_v31 = vld [vmem:[%s8800_s0 + $0x60] sm:$0xff]  ;;  %v292_v33 = vsel %vm270_vm0, %v25_v28, 0.0  ;;  %v27_v34 = vld [vmem:[%s8800_s0 + $0x68] sm:$0xff]  ;;  %v28_v37 = vld [vmem:[%s8800_s0 + $0x70] sm:$0xff] }
   0x6   :  { %v294_v36 = vsel %vm270_vm0, %v26_v31, 0.0  ;;  %v296_v39 = vsel %vm270_vm0, %v27_v34, 0.0  ;;  %v29_v40 = vld [vmem:[%s8800_s0 + $0x78] sm:$0xff]  ;;  %v298_v42 = vsel %vm270_vm0, %v28_v37, 0.0  ;;  %v30_v43 = vld [vmem:[%s8800_s0 + $0x80] sm:$0xff]  ;;  %v31_v46 = vld [vmem:[%s8800_s0 + $0x88] sm:$0xff] }
   0x7   :  { %v277_v14 = vadd.f32 %v276_v9, %v275_v11  ;;  %v300_v45 = vsel %vm270_vm0, %v29_v40, 0.0  ;;  %v302_v48 = vsel %vm270_vm0, %v30_v43, 0.0  ;;  %v32_v49 = vld [vmem:[%s8800_s0 + $0x90] sm:$0xff]  ;;  %v304_v51 = vsel %vm270_vm0, %v31_v46, 0.0  ;;  %v33_v52 = vld [vmem:[%s8800_s0 + $0x98] sm:$0xff]  ;;  %v34_v55 = vld [vmem:[%s8800_s0 + $0xa0] sm:$0xff] }
   0x8   :  { %v306_v54 = vsel %vm270_vm0, %v32_v49, 0.0  ;;  %v308_v57 = vsel %vm270_vm0, %v33_v52, 0.0  ;;  %v35_v58 = vld [vmem:[%s8800_s0 + $0xa8] sm:$0xff]  ;;  %v310_v60 = vsel %vm270_vm0, %v34_v55, 0.0  ;;  %v36_v61 = vld [vmem:[%s8800_s0 + $0xb0] sm:$0xff]  ;;  %v37_v0 = vld [vmem:[%s8800_s0 + $0xb8] sm:$0xff] }
   0x9   :  { %v279_v17 = vadd.f32 %v278_v12, %v277_v14  ;;  %v312_v63 = vsel %vm270_vm0, %v35_v58, 0.0  ;;  %v314_v2 = vsel %vm270_vm0, %v36_v61, 0.0  ;;  %v38_v3 = vld [vmem:[%s8800_s0 + $0xc0] sm:$0xff]  ;;  %v316_v5 = vsel %vm270_vm0, %v37_v0, 0.0  ;;  %v39_v6 = vld [vmem:[%s8800_s0 + $0xc8] sm:$0xff]  ;;  %v40_v9 = vld [vmem:[%s8800_s0 + $0xd0] sm:$0xff] }
   0xa   :  { %v318_v8 = vsel %vm270_vm0, %v38_v3, 0.0  ;;  %v320_v11 = vsel %vm270_vm0, %v39_v6, 0.0  ;;  %v41_v12 = vld [vmem:[%s8800_s0 + $0xd8] sm:$0xff]  ;;  %v322_v14 = vsel %vm270_vm0, %v40_v9, 0.0 }
   0xb   :  { %v281_v20 = vadd.f32 %v280_v15, %v279_v17  ;;  %v42_v15 = vld [vmem:[%s8800_s0 + $0xe0] sm:$0xff]  ;;  %v324_v17 = vsel %vm270_vm0, %v41_v12, 0.0 }
   0xd   :  { %v283_v23 = vadd.f32 %v282_v18, %v281_v20  ;;  %v43_v18 = vld [vmem:[%s8800_s0 + $0xe8] sm:$0xff]  ;;  %v326_v20 = vsel %vm270_vm0, %v42_v15, 0.0 }
   0xf   :  { %v285_v26 = vadd.f32 %v284_v21, %v283_v23  ;;  %v44_v21 = vld [vmem:[%s8800_s0 + $0xf0] sm:$0xff]  ;;  %v328_v23 = vsel %vm270_vm0, %v43_v18, 0.0 }
  0x11   :  { %v287_v29 = vadd.f32 %v286_v24, %v285_v26  ;;  %v45_v24 = vld [vmem:[%s8800_s0 + $0xf8] sm:$0xff]  ;;  %v330_v26 = vsel %vm270_vm0, %v44_v21, 0.0 }
  0x13   :  { %v289_v32 = vadd.f32 %v288_v27, %v287_v29  ;;  %v46_v27 = vld [vmem:[%s8800_s0 + $0x100] sm:$0xff]  ;;  %v332_v29 = vsel %vm270_vm0, %v45_v24, 0.0 }
  0x15   :  { %v291_v35 = vadd.f32 %v290_v30, %v289_v32  ;;  %v47_v30 = vld [vmem:[%s8800_s0 + $0x108] sm:$0xff]  ;;  %v334_v32 = vsel %vm270_vm0, %v46_v27, 0.0 }
  0x17   :  { %v293_v38 = vadd.f32 %v292_v33, %v291_v35  ;;  %v48_v33 = vld [vmem:[%s8800_s0 + $0x110] sm:$0xff]  ;;  %v336_v35 = vsel %vm270_vm0, %v47_v30, 0.0 }
  0x19   :  { %v295_v41 = vadd.f32 %v294_v36, %v293_v38  ;;  %v49_v36 = vld [vmem:[%s8800_s0 + $0x118] sm:$0xff]  ;;  %v338_v38 = vsel %vm270_vm0, %v48_v33, 0.0 }
  0x1b   :  { %v297_v44 = vadd.f32 %v296_v39, %v295_v41  ;;  %v50_v39 = vld [vmem:[%s8800_s0 + $0x120] sm:$0xff]  ;;  %v340_v41 = vsel %vm270_vm0, %v49_v36, 0.0 }
  0x1d   :  { %v299_v47 = vadd.f32 %v298_v42, %v297_v44  ;;  %v51_v42 = vld [vmem:[%s8800_s0 + $0x128] sm:$0xff]  ;;  %v342_v44 = vsel %vm270_vm0, %v50_v39, 0.0 }
  0x1f   :  { %v301_v50 = vadd.f32 %v300_v45, %v299_v47  ;;  %v52_v45 = vld [vmem:[%s8800_s0 + $0x130] sm:$0xff]  ;;  %v344_v47 = vsel %vm270_vm0, %v51_v42, 0.0 }
  0x21   :  { %v303_v53 = vadd.f32 %v302_v48, %v301_v50  ;;  %v53_v48 = vld [vmem:[%s8800_s0 + $0x138] sm:$0xff]  ;;  %v346_v50 = vsel %vm270_vm0, %v52_v45, 0.0 }
  0x23   :  { %v305_v56 = vadd.f32 %v304_v51, %v303_v53  ;;  %v54_v51 = vld [vmem:[%s8800_s0 + $0x140] sm:$0xff]  ;;  %v348_v53 = vsel %vm270_vm0, %v53_v48, 0.0 }
  0x25   :  { %v307_v59 = vadd.f32 %v306_v54, %v305_v56  ;;  %v55_v54 = vld [vmem:[%s8800_s0 + $0x148] sm:$0xff]  ;;  %v350_v56 = vsel %vm270_vm0, %v54_v51, 0.0 }
  0x27   :  { %v309_v62 = vadd.f32 %v308_v57, %v307_v59  ;;  %v56_v57 = vld [vmem:[%s8800_s0 + $0x150] sm:$0xff]  ;;  %v352_v59 = vsel %vm270_vm0, %v55_v54, 0.0 }
  0x29   :  { %v311_v1 = vadd.f32 %v310_v60, %v309_v62  ;;  %v57_v60 = vld [vmem:[%s8800_s0 + $0x158] sm:$0xff]  ;;  %v354_v62 = vsel %vm270_vm0, %v56_v57, 0.0 }
  0x2b   :  { %v313_v4 = vadd.f32 %v312_v63, %v311_v1  ;;  %v58_v63 = vld [vmem:[%s8800_s0 + $0x160] sm:$0xff]  ;;  %v356_v1 = vsel %vm270_vm0, %v57_v60, 0.0 }
  0x2d   :  { %v315_v7 = vadd.f32 %v314_v2, %v313_v4  ;;  %v59_v2 = vld [vmem:[%s8800_s0 + $0x168] sm:$0xff]  ;;  %v358_v4 = vsel %vm270_vm0, %v58_v63, 0.0 }
  0x2f   :  { %v317_v10 = vadd.f32 %v316_v5, %v315_v7  ;;  %v60_v5 = vld [vmem:[%s8800_s0 + $0x170] sm:$0xff]  ;;  %v360_v7 = vsel %vm270_vm0, %v59_v2, 0.0 }
  0x31   :  { %v319_v13 = vadd.f32 %v318_v8, %v317_v10  ;;  %v61_v8 = vld [vmem:[%s8800_s0 + $0x178] sm:$0xff]  ;;  %v362_v10 = vsel %vm270_vm0, %v60_v5, 0.0 }
  0x33   :  { %v321_v16 = vadd.f32 %v320_v11, %v319_v13  ;;  %v62_v11 = vld [vmem:[%s8800_s0 + $0x180] sm:$0xff]  ;;  %v364_v13 = vsel %vm270_vm0, %v61_v8, 0.0 }
  0x35   :  { %v323_v19 = vadd.f32 %v322_v14, %v321_v16  ;;  %v63_v14 = vld [vmem:[%s8800_s0 + $0x188] sm:$0xff]  ;;  %v366_v16 = vsel %vm270_vm0, %v62_v11, 0.0 }
  0x37   :  { %v325_v22 = vadd.f32 %v324_v17, %v323_v19  ;;  %v64_v17 = vld [vmem:[%s8800_s0 + $0x190] sm:$0xff]  ;;  %v368_v19 = vsel %vm270_vm0, %v63_v14, 0.0 }
  0x39   :  { %v327_v25 = vadd.f32 %v326_v20, %v325_v22  ;;  %v65_v20 = vld [vmem:[%s8800_s0 + $0x198] sm:$0xff]  ;;  %v370_v22 = vsel %vm270_vm0, %v64_v17, 0.0 }
  0x3b   :  { %v329_v28 = vadd.f32 %v328_v23, %v327_v25  ;;  %v66_v23 = vld [vmem:[%s8800_s0 + $0x1a0] sm:$0xff]  ;;  %v372_v25 = vsel %vm270_vm0, %v65_v20, 0.0 }
  0x3d   :  { %v331_v31 = vadd.f32 %v330_v26, %v329_v28  ;;  %v67_v26 = vld [vmem:[%s8800_s0 + $0x1a8] sm:$0xff]  ;;  %v374_v28 = vsel %vm270_vm0, %v66_v23, 0.0 }
  0x3f   :  { %v333_v34 = vadd.f32 %v332_v29, %v331_v31  ;;  %v68_v29 = vld [vmem:[%s8800_s0 + $0x1b0] sm:$0xff]  ;;  %v376_v31 = vsel %vm270_vm0, %v67_v26, 0.0 }
  0x41   :  { %v335_v37 = vadd.f32 %v334_v32, %v333_v34  ;;  %v69_v32 = vld [vmem:[%s8800_s0 + $0x1b8] sm:$0xff]  ;;  %v378_v34 = vsel %vm270_vm0, %v68_v29, 0.0 }
  0x43   :  { %v337_v40 = vadd.f32 %v336_v35, %v335_v37  ;;  %v70_v35 = vld [vmem:[%s8800_s0 + $0x1c0] sm:$0xff]  ;;  %v380_v37 = vsel %vm270_vm0, %v69_v32, 0.0 }
  0x45   :  { %v339_v43 = vadd.f32 %v338_v38, %v337_v40  ;;  %v71_v38 = vld [vmem:[%s8800_s0 + $0x1c8] sm:$0xff]  ;;  %v382_v40 = vsel %vm270_vm0, %v70_v35, 0.0 }
  0x47   :  { %v341_v46 = vadd.f32 %v340_v41, %v339_v43  ;;  %v72_v41 = vld [vmem:[%s8800_s0 + $0x1d0] sm:$0xff]  ;;  %v384_v43 = vsel %vm270_vm0, %v71_v38, 0.0 }
  0x49   :  { %v343_v49 = vadd.f32 %v342_v44, %v341_v46  ;;  %v73_v44 = vld [vmem:[%s8800_s0 + $0x1d8] sm:$0xff]  ;;  %v386_v46 = vsel %vm270_vm0, %v72_v41, 0.0 }
  0x4b   :  { %v345_v52 = vadd.f32 %v344_v47, %v343_v49  ;;  %v74_v47 = vld [vmem:[%s8800_s0 + $0x1e0] sm:$0xff]  ;;  %v388_v49 = vsel %vm270_vm0, %v73_v44, 0.0 }
  0x4d   :  { %v347_v55 = vadd.f32 %v346_v50, %v345_v52  ;;  %v75_v50 = vld [vmem:[%s8800_s0 + $0x1e8] sm:$0xff]  ;;  %v390_v52 = vsel %vm270_vm0, %v74_v47, 0.0 }
  0x4f   :  { %v349_v58 = vadd.f32 %v348_v53, %v347_v55  ;;  %v76_v53 = vld [vmem:[%s8800_s0 + $0x1f0] sm:$0xff]  ;;  %v392_v55 = vsel %vm270_vm0, %v75_v50, 0.0 }
  0x51   :  { %v351_v61 = vadd.f32 %v350_v56, %v349_v58  ;;  %v77_v56 = vld [vmem:[%s8800_s0 + $0x1f8] sm:$0xff]  ;;  %v394_v58 = vsel %vm270_vm0, %v76_v53, 0.0 }
  0x53   :  { %v353_v0 = vadd.f32 %v352_v59, %v351_v61  ;;  %v78_v59 = vld [vmem:[%s8800_s0 + $0x200] sm:$0xff]  ;;  %v396_v61 = vsel %vm270_vm0, %v77_v56, 0.0 }
  0x55   :  { %v355_v3 = vadd.f32 %v354_v62, %v353_v0  ;;  %v79_v62 = vld [vmem:[%s8800_s0 + $0x208] sm:$0xff]  ;;  %v398_v0 = vsel %vm270_vm0, %v78_v59, 0.0 }
  0x57   :  { %v357_v6 = vadd.f32 %v356_v1, %v355_v3  ;;  %v80_v1 = vld [vmem:[%s8800_s0 + $0x210] sm:$0xff]  ;;  %v400_v3 = vsel %vm270_vm0, %v79_v62, 0.0 }
  0x59   :  { %v359_v9 = vadd.f32 %v358_v4, %v357_v6  ;;  %v81_v4 = vld [vmem:[%s8800_s0 + $0x218] sm:$0xff]  ;;  %v402_v6 = vsel %vm270_vm0, %v80_v1, 0.0 }
  0x5b   :  { %v361_v12 = vadd.f32 %v360_v7, %v359_v9  ;;  %v82_v7 = vld [vmem:[%s8800_s0 + $0x220] sm:$0xff]  ;;  %v404_v9 = vsel %vm270_vm0, %v81_v4, 0.0 }
  0x5d   :  { %v363_v15 = vadd.f32 %v362_v10, %v361_v12  ;;  %v83_v10 = vld [vmem:[%s8800_s0 + $0x228] sm:$0xff]  ;;  %v406_v12 = vsel %vm270_vm0, %v82_v7, 0.0 }
  0x5f   :  { %v365_v18 = vadd.f32 %v364_v13, %v363_v15  ;;  %v84_v13 = vld [vmem:[%s8800_s0 + $0x230] sm:$0xff]  ;;  %v408_v15 = vsel %vm270_vm0, %v83_v10, 0.0 }
  0x61   :  { %v367_v21 = vadd.f32 %v366_v16, %v365_v18  ;;  %v85_v16 = vld [vmem:[%s8800_s0 + $0x238] sm:$0xff]  ;;  %v410_v18 = vsel %vm270_vm0, %v84_v13, 0.0 }
  0x63   :  { %v369_v24 = vadd.f32 %v368_v19, %v367_v21  ;;  %v86_v19 = vld [vmem:[%s8800_s0 + $0x240] sm:$0xff]  ;;  %v412_v21 = vsel %vm270_vm0, %v85_v16, 0.0 }
  0x65   :  { %v371_v27 = vadd.f32 %v370_v22, %v369_v24  ;;  %v87_v22 = vld [vmem:[%s8800_s0 + $0x248] sm:$0xff]  ;;  %v414_v24 = vsel %vm270_vm0, %v86_v19, 0.0 }
  0x67   :  { %v373_v30 = vadd.f32 %v372_v25, %v371_v27  ;;  %v88_v25 = vld [vmem:[%s8800_s0 + $0x250] sm:$0xff]  ;;  %v416_v27 = vsel %vm270_vm0, %v87_v22, 0.0 }
  0x69   :  { %v375_v33 = vadd.f32 %v374_v28, %v373_v30  ;;  %v89_v28 = vld [vmem:[%s8800_s0 + $0x258] sm:$0xff]  ;;  %v418_v30 = vsel %vm270_vm0, %v88_v25, 0.0 }
  0x6b   :  { %v377_v36 = vadd.f32 %v376_v31, %v375_v33  ;;  %v90_v31 = vld [vmem:[%s8800_s0 + $0x260] sm:$0xff]  ;;  %v420_v33 = vsel %vm270_vm0, %v89_v28, 0.0 }
  0x6d   :  { %v379_v39 = vadd.f32 %v378_v34, %v377_v36  ;;  %v91_v34 = vld [vmem:[%s8800_s0 + $0x268] sm:$0xff]  ;;  %v422_v36 = vsel %vm270_vm0, %v90_v31, 0.0 }
  0x6f   :  { %v381_v42 = vadd.f32 %v380_v37, %v379_v39  ;;  %v92_v37 = vld [vmem:[%s8800_s0 + $0x270] sm:$0xff]  ;;  %v424_v39 = vsel %vm270_vm0, %v91_v34, 0.0 }
  0x71   :  { %v383_v45 = vadd.f32 %v382_v40, %v381_v42  ;;  %v93_v40 = vld [vmem:[%s8800_s0 + $0x278] sm:$0xff]  ;;  %v426_v42 = vsel %vm270_vm0, %v92_v37, 0.0 }
  0x73   :  { %v385_v48 = vadd.f32 %v384_v43, %v383_v45  ;;  %v94_v43 = vld [vmem:[%s8800_s0 + $0x280] sm:$0xff]  ;;  %v428_v45 = vsel %vm270_vm0, %v93_v40, 0.0 }
  0x75   :  { %v387_v51 = vadd.f32 %v386_v46, %v385_v48  ;;  %v95_v46 = vld [vmem:[%s8800_s0 + $0x288] sm:$0xff]  ;;  %v430_v48 = vsel %vm270_vm0, %v94_v43, 0.0 }
  0x77   :  { %v389_v54 = vadd.f32 %v388_v49, %v387_v51  ;;  %v96_v49 = vld [vmem:[%s8800_s0 + $0x290] sm:$0xff]  ;;  %v432_v51 = vsel %vm270_vm0, %v95_v46, 0.0 }
  0x79   :  { %v391_v57 = vadd.f32 %v390_v52, %v389_v54  ;;  %v97_v52 = vld [vmem:[%s8800_s0 + $0x298] sm:$0xff]  ;;  %v434_v54 = vsel %vm270_vm0, %v96_v49, 0.0 }
  0x7b   :  { %v393_v60 = vadd.f32 %v392_v55, %v391_v57  ;;  %v98_v55 = vld [vmem:[%s8800_s0 + $0x2a0] sm:$0xff]  ;;  %v436_v57 = vsel %vm270_vm0, %v97_v52, 0.0 }
  0x7d   :  { %v395_v63 = vadd.f32 %v394_v58, %v393_v60  ;;  %v99_v58 = vld [vmem:[%s8800_s0 + $0x2a8] sm:$0xff]  ;;  %v438_v60 = vsel %vm270_vm0, %v98_v55, 0.0 }
  0x7f   :  { %v397_v2 = vadd.f32 %v396_v61, %v395_v63  ;;  %v100_v61 = vld [vmem:[%s8800_s0 + $0x2b0] sm:$0xff]  ;;  %v440_v63 = vsel %vm270_vm0, %v99_v58, 0.0 }
  0x81   :  { %v399_v5 = vadd.f32 %v398_v0, %v397_v2  ;;  %v101_v0 = vld [vmem:[%s8800_s0 + $0x2b8] sm:$0xff]  ;;  %v442_v2 = vsel %vm270_vm0, %v100_v61, 0.0 }
  0x83   :  { %v401_v8 = vadd.f32 %v400_v3, %v399_v5  ;;  %v102_v3 = vld [vmem:[%s8800_s0 + $0x2c0] sm:$0xff]  ;;  %v444_v5 = vsel %vm270_vm0, %v101_v0, 0.0 }
  0x85   :  { %v403_v11 = vadd.f32 %v402_v6, %v401_v8  ;;  %v103_v6 = vld [vmem:[%s8800_s0 + $0x2c8] sm:$0xff]  ;;  %v446_v8 = vsel %vm270_vm0, %v102_v3, 0.0 }
  0x87   :  { %v405_v14 = vadd.f32 %v404_v9, %v403_v11  ;;  %v104_v9 = vld [vmem:[%s8800_s0 + $0x2d0] sm:$0xff]  ;;  %v448_v11 = vsel %vm270_vm0, %v103_v6, 0.0 }
  0x89   :  { %v407_v17 = vadd.f32 %v406_v12, %v405_v14  ;;  %v105_v12 = vld [vmem:[%s8800_s0 + $0x2d8] sm:$0xff]  ;;  %v450_v14 = vsel %vm270_vm0, %v104_v9, 0.0 }
  0x8b   :  { %v409_v20 = vadd.f32 %v408_v15, %v407_v17  ;;  %v106_v15 = vld [vmem:[%s8800_s0 + $0x2e0] sm:$0xff]  ;;  %v452_v17 = vsel %vm270_vm0, %v105_v12, 0.0 }
  0x8d   :  { %v411_v23 = vadd.f32 %v410_v18, %v409_v20  ;;  %v107_v18 = vld [vmem:[%s8800_s0 + $0x2e8] sm:$0xff]  ;;  %v454_v20 = vsel %vm270_vm0, %v106_v15, 0.0 }
  0x8f   :  { %v413_v26 = vadd.f32 %v412_v21, %v411_v23  ;;  %v108_v21 = vld [vmem:[%s8800_s0 + $0x2f0] sm:$0xff]  ;;  %v456_v23 = vsel %vm270_vm0, %v107_v18, 0.0 }
  0x91   :  { %v415_v29 = vadd.f32 %v414_v24, %v413_v26  ;;  %v109_v24 = vld [vmem:[%s8800_s0 + $0x2f8] sm:$0xff]  ;;  %v458_v26 = vsel %vm270_vm0, %v108_v21, 0.0 }
  0x93   :  { %v417_v32 = vadd.f32 %v416_v27, %v415_v29  ;;  %v110_v27 = vld [vmem:[%s8800_s0 + $0x300] sm:$0xff]  ;;  %v460_v29 = vsel %vm270_vm0, %v109_v24, 0.0 }
  0x95   :  { %v419_v35 = vadd.f32 %v418_v30, %v417_v32  ;;  %v111_v30 = vld [vmem:[%s8800_s0 + $0x308] sm:$0xff]  ;;  %v462_v32 = vsel %vm270_vm0, %v110_v27, 0.0 }
  0x97   :  { %v421_v38 = vadd.f32 %v420_v33, %v419_v35  ;;  %v112_v33 = vld [vmem:[%s8800_s0 + $0x310] sm:$0xff]  ;;  %v464_v35 = vsel %vm270_vm0, %v111_v30, 0.0 }
  0x99   :  { %v423_v41 = vadd.f32 %v422_v36, %v421_v38  ;;  %v113_v36 = vld [vmem:[%s8800_s0 + $0x318] sm:$0xff]  ;;  %v466_v38 = vsel %vm270_vm0, %v112_v33, 0.0 }
  0x9b   :  { %v425_v44 = vadd.f32 %v424_v39, %v423_v41  ;;  %v114_v39 = vld [vmem:[%s8800_s0 + $0x320] sm:$0xff]  ;;  %v468_v41 = vsel %vm270_vm0, %v113_v36, 0.0 }
  0x9d   :  { %v427_v47 = vadd.f32 %v426_v42, %v425_v44  ;;  %v115_v42 = vld [vmem:[%s8800_s0 + $0x328] sm:$0xff]  ;;  %v470_v44 = vsel %vm270_vm0, %v114_v39, 0.0 }
  0x9f   :  { %v429_v50 = vadd.f32 %v428_v45, %v427_v47  ;;  %v116_v45 = vld [vmem:[%s8800_s0 + $0x330] sm:$0xff]  ;;  %v472_v47 = vsel %vm270_vm0, %v115_v42, 0.0 }
  0xa1   :  { %v431_v53 = vadd.f32 %v430_v48, %v429_v50  ;;  %v117_v48 = vld [vmem:[%s8800_s0 + $0x338] sm:$0xff]  ;;  %v474_v50 = vsel %vm270_vm0, %v116_v45, 0.0 }
  0xa3   :  { %v433_v56 = vadd.f32 %v432_v51, %v431_v53  ;;  %v118_v51 = vld [vmem:[%s8800_s0 + $0x340] sm:$0xff]  ;;  %v476_v53 = vsel %vm270_vm0, %v117_v48, 0.0 }
  0xa5   :  { %v435_v59 = vadd.f32 %v434_v54, %v433_v56  ;;  %v119_v54 = vld [vmem:[%s8800_s0 + $0x348] sm:$0xff]  ;;  %v478_v56 = vsel %vm270_vm0, %v118_v51, 0.0 }
  0xa7   :  { %v437_v62 = vadd.f32 %v436_v57, %v435_v59  ;;  %v120_v57 = vld [vmem:[%s8800_s0 + $0x350] sm:$0xff]  ;;  %v480_v59 = vsel %vm270_vm0, %v119_v54, 0.0 }
  0xa9   :  { %v439_v1 = vadd.f32 %v438_v60, %v437_v62  ;;  %v121_v60 = vld [vmem:[%s8800_s0 + $0x358] sm:$0xff]  ;;  %v482_v62 = vsel %vm270_vm0, %v120_v57, 0.0 }
  0xab   :  { %v441_v4 = vadd.f32 %v440_v63, %v439_v1  ;;  %v122_v63 = vld [vmem:[%s8800_s0 + $0x360] sm:$0xff]  ;;  %v484_v1 = vsel %vm270_vm0, %v121_v60, 0.0 }
  0xad   :  { %v443_v7 = vadd.f32 %v442_v2, %v441_v4  ;;  %v123_v2 = vld [vmem:[%s8800_s0 + $0x368] sm:$0xff]  ;;  %v486_v4 = vsel %vm270_vm0, %v122_v63, 0.0 }
  0xaf   :  { %v445_v10 = vadd.f32 %v444_v5, %v443_v7  ;;  %v124_v5 = vld [vmem:[%s8800_s0 + $0x370] sm:$0xff]  ;;  %v488_v7 = vsel %vm270_vm0, %v123_v2, 0.0 }
  0xb1   :  { %v447_v13 = vadd.f32 %v446_v8, %v445_v10  ;;  %v125_v8 = vld [vmem:[%s8800_s0 + $0x378] sm:$0xff]  ;;  %v490_v10 = vsel %vm270_vm0, %v124_v5, 0.0 }
  0xb3   :  { %v449_v16 = vadd.f32 %v448_v11, %v447_v13  ;;  %v126_v11 = vld [vmem:[%s8800_s0 + $0x380] sm:$0xff]  ;;  %v492_v13 = vsel %vm270_vm0, %v125_v8, 0.0 }
  0xb5   :  { %v451_v19 = vadd.f32 %v450_v14, %v449_v16  ;;  %v127_v14 = vld [vmem:[%s8800_s0 + $0x388] sm:$0xff]  ;;  %v494_v16 = vsel %vm270_vm0, %v126_v11, 0.0 }
  0xb7   :  { %v453_v22 = vadd.f32 %v452_v17, %v451_v19  ;;  %v128_v17 = vld [vmem:[%s8800_s0 + $0x390] sm:$0xff]  ;;  %v496_v19 = vsel %vm270_vm0, %v127_v14, 0.0 }
  0xb9   :  { %v455_v25 = vadd.f32 %v454_v20, %v453_v22  ;;  %v129_v20 = vld [vmem:[%s8800_s0 + $0x398] sm:$0xff]  ;;  %v498_v22 = vsel %vm270_vm0, %v128_v17, 0.0 }
  0xbb   :  { %v457_v28 = vadd.f32 %v456_v23, %v455_v25  ;;  %v130_v23 = vld [vmem:[%s8800_s0 + $0x3a0] sm:$0xff]  ;;  %v500_v25 = vsel %vm270_vm0, %v129_v20, 0.0 }
  0xbd   :  { %v459_v31 = vadd.f32 %v458_v26, %v457_v28  ;;  %v131_v26 = vld [vmem:[%s8800_s0 + $0x3a8] sm:$0xff]  ;;  %v502_v28 = vsel %vm270_vm0, %v130_v23, 0.0 }
  0xbf   :  { %v461_v34 = vadd.f32 %v460_v29, %v459_v31  ;;  %v132_v29 = vld [vmem:[%s8800_s0 + $0x3b0] sm:$0xff]  ;;  %v504_v31 = vsel %vm270_vm0, %v131_v26, 0.0 }
  0xc1   :  { %v463_v37 = vadd.f32 %v462_v32, %v461_v34  ;;  %v133_v32 = vld [vmem:[%s8800_s0 + $0x3b8] sm:$0xff]  ;;  %v506_v34 = vsel %vm270_vm0, %v132_v29, 0.0 }
  0xc3   :  { %v465_v40 = vadd.f32 %v464_v35, %v463_v37  ;;  %v134_v35 = vld [vmem:[%s8800_s0 + $0x3c0] sm:$0xff]  ;;  %v508_v37 = vsel %vm270_vm0, %v133_v32, 0.0 }
  0xc5   :  { %v467_v43 = vadd.f32 %v466_v38, %v465_v40  ;;  %v135_v38 = vld [vmem:[%s8800_s0 + $0x3c8] sm:$0xff]  ;;  %v510_v40 = vsel %vm270_vm0, %v134_v35, 0.0 }
  0xc7   :  { %v469_v46 = vadd.f32 %v468_v41, %v467_v43  ;;  %v136_v41 = vld [vmem:[%s8800_s0 + $0x3d0] sm:$0xff]  ;;  %v512_v43 = vsel %vm270_vm0, %v135_v38, 0.0 }
  0xc9   :  { %v471_v49 = vadd.f32 %v470_v44, %v469_v46  ;;  %v137_v44 = vld [vmem:[%s8800_s0 + $0x3d8] sm:$0xff]  ;;  %v514_v46 = vsel %vm270_vm0, %v136_v41, 0.0 }
  0xcb   :  { %v473_v52 = vadd.f32 %v472_v47, %v471_v49  ;;  %v138_v47 = vld [vmem:[%s8800_s0 + $0x3e0] sm:$0xff]  ;;  %v516_v49 = vsel %vm270_vm0, %v137_v44, 0.0 }
  0xcd   :  { %v475_v55 = vadd.f32 %v474_v50, %v473_v52  ;;  %v139_v50 = vld [vmem:[%s8800_s0 + $0x3e8] sm:$0xff]  ;;  %v518_v52 = vsel %vm270_vm0, %v138_v47, 0.0 }
  0xcf   :  { %v477_v58 = vadd.f32 %v476_v53, %v475_v55  ;;  %v140_v53 = vld [vmem:[%s8800_s0 + $0x3f0] sm:$0xff]  ;;  %v520_v55 = vsel %vm270_vm0, %v139_v50, 0.0 }
  0xd1   :  { %v479_v61 = vadd.f32 %v478_v56, %v477_v58  ;;  %v141_v56 = vld [vmem:[%s8800_s0 + $0x3f8] sm:$0xff]  ;;  %v522_v58 = vsel %vm270_vm0, %v140_v53, 0.0 }
  0xd3   :  { %v481_v0 = vadd.f32 %v480_v59, %v479_v61  ;;  %v142_v59 = vld [vmem:[%s8800_s0 + $0x400] sm:$0xff]  ;;  %v524_v61 = vsel %vm270_vm0, %v141_v56, 0.0 }
  0xd5   :  { %v483_v3 = vadd.f32 %v482_v62, %v481_v0  ;;  %v143_v62 = vld [vmem:[%s8800_s0 + $0x408] sm:$0xff]  ;;  %v526_v0 = vsel %vm270_vm0, %v142_v59, 0.0 }
  0xd7   :  { %v485_v6 = vadd.f32 %v484_v1, %v483_v3  ;;  %v144_v1 = vld [vmem:[%s8800_s0 + $0x410] sm:$0xff]  ;;  %v528_v3 = vsel %vm270_vm0, %v143_v62, 0.0 }
  0xd9   :  { %v487_v9 = vadd.f32 %v486_v4, %v485_v6  ;;  %v145_v4 = vld [vmem:[%s8800_s0 + $0x418] sm:$0xff]  ;;  %v530_v6 = vsel %vm270_vm0, %v144_v1, 0.0 }
  0xdb   :  { %v489_v12 = vadd.f32 %v488_v7, %v487_v9  ;;  %v146_v7 = vld [vmem:[%s8800_s0 + $0x420] sm:$0xff]  ;;  %v532_v9 = vsel %vm270_vm0, %v145_v4, 0.0 }
  0xdd   :  { %v491_v15 = vadd.f32 %v490_v10, %v489_v12  ;;  %v147_v10 = vld [vmem:[%s8800_s0 + $0x428] sm:$0xff]  ;;  %v534_v12 = vsel %vm270_vm0, %v146_v7, 0.0 }
  0xdf   :  { %v493_v18 = vadd.f32 %v492_v13, %v491_v15  ;;  %v148_v13 = vld [vmem:[%s8800_s0 + $0x430] sm:$0xff]  ;;  %v536_v15 = vsel %vm270_vm0, %v147_v10, 0.0 }
  0xe1   :  { %v495_v21 = vadd.f32 %v494_v16, %v493_v18  ;;  %v149_v16 = vld [vmem:[%s8800_s0 + $0x438] sm:$0xff]  ;;  %v538_v18 = vsel %vm270_vm0, %v148_v13, 0.0 }
  0xe3   :  { %v497_v24 = vadd.f32 %v496_v19, %v495_v21  ;;  %v150_v19 = vld [vmem:[%s8800_s0 + $0x440] sm:$0xff]  ;;  %v540_v21 = vsel %vm270_vm0, %v149_v16, 0.0 }
  0xe5   :  { %v499_v27 = vadd.f32 %v498_v22, %v497_v24  ;;  %v151_v22 = vld [vmem:[%s8800_s0 + $0x448] sm:$0xff]  ;;  %v542_v24 = vsel %vm270_vm0, %v150_v19, 0.0 }
  0xe7   :  { %v501_v30 = vadd.f32 %v500_v25, %v499_v27  ;;  %v152_v25 = vld [vmem:[%s8800_s0 + $0x450] sm:$0xff]  ;;  %v544_v27 = vsel %vm270_vm0, %v151_v22, 0.0 }
  0xe9   :  { %v503_v33 = vadd.f32 %v502_v28, %v501_v30  ;;  %v153_v28 = vld [vmem:[%s8800_s0 + $0x458] sm:$0xff]  ;;  %v546_v30 = vsel %vm270_vm0, %v152_v25, 0.0 }
  0xeb   :  { %v505_v36 = vadd.f32 %v504_v31, %v503_v33  ;;  %v154_v31 = vld [vmem:[%s8800_s0 + $0x460] sm:$0xff]  ;;  %v548_v33 = vsel %vm270_vm0, %v153_v28, 0.0 }
  0xed   :  { %v507_v39 = vadd.f32 %v506_v34, %v505_v36  ;;  %v155_v34 = vld [vmem:[%s8800_s0 + $0x468] sm:$0xff]  ;;  %v550_v36 = vsel %vm270_vm0, %v154_v31, 0.0 }
  0xef   :  { %v509_v42 = vadd.f32 %v508_v37, %v507_v39  ;;  %v156_v37 = vld [vmem:[%s8800_s0 + $0x470] sm:$0xff]  ;;  %v552_v39 = vsel %vm270_vm0, %v155_v34, 0.0 }
  0xf1   :  { %v511_v45 = vadd.f32 %v510_v40, %v509_v42  ;;  %v157_v40 = vld [vmem:[%s8800_s0 + $0x478] sm:$0xff]  ;;  %v554_v42 = vsel %vm270_vm0, %v156_v37, 0.0 }
  0xf3   :  { %v513_v48 = vadd.f32 %v512_v43, %v511_v45  ;;  %v158_v43 = vld [vmem:[%s8800_s0 + $0x480] sm:$0xff]  ;;  %v556_v45 = vsel %vm270_vm0, %v157_v40, 0.0 }
  0xf5   :  { %v515_v51 = vadd.f32 %v514_v46, %v513_v48  ;;  %v159_v46 = vld [vmem:[%s8800_s0 + $0x488] sm:$0xff]  ;;  %v558_v48 = vsel %vm270_vm0, %v158_v43, 0.0 }
  0xf7   :  { %v517_v54 = vadd.f32 %v516_v49, %v515_v51  ;;  %v160_v49 = vld [vmem:[%s8800_s0 + $0x490] sm:$0xff]  ;;  %v560_v51 = vsel %vm270_vm0, %v159_v46, 0.0 }
  0xf9   :  { %v519_v57 = vadd.f32 %v518_v52, %v517_v54  ;;  %v161_v52 = vld [vmem:[%s8800_s0 + $0x498] sm:$0xff]  ;;  %v562_v54 = vsel %vm270_vm0, %v160_v49, 0.0 }
  0xfb   :  { %v521_v60 = vadd.f32 %v520_v55, %v519_v57  ;;  %v162_v55 = vld [vmem:[%s8800_s0 + $0x4a0] sm:$0xff]  ;;  %v564_v57 = vsel %vm270_vm0, %v161_v52, 0.0 }
  0xfd   :  { %v523_v63 = vadd.f32 %v522_v58, %v521_v60  ;;  %v163_v58 = vld [vmem:[%s8800_s0 + $0x4a8] sm:$0xff]  ;;  %v566_v60 = vsel %vm270_vm0, %v162_v55, 0.0 }
  0xff   :  { %v525_v2 = vadd.f32 %v524_v61, %v523_v63  ;;  %v164_v61 = vld [vmem:[%s8800_s0 + $0x4b0] sm:$0xff]  ;;  %v568_v63 = vsel %vm270_vm0, %v163_v58, 0.0 }
 0x101   :  { %v527_v5 = vadd.f32 %v526_v0, %v525_v2  ;;  %v165_v0 = vld [vmem:[%s8800_s0 + $0x4b8] sm:$0xff]  ;;  %v570_v2 = vsel %vm270_vm0, %v164_v61, 0.0 }
 0x103   :  { %v529_v8 = vadd.f32 %v528_v3, %v527_v5  ;;  %v166_v3 = vld [vmem:[%s8800_s0 + $0x4c0] sm:$0xff]  ;;  %v572_v5 = vsel %vm270_vm0, %v165_v0, 0.0 }
 0x105   :  { %v531_v11 = vadd.f32 %v530_v6, %v529_v8  ;;  %v167_v6 = vld [vmem:[%s8800_s0 + $0x4c8] sm:$0xff]  ;;  %v574_v8 = vsel %vm270_vm0, %v166_v3, 0.0 }
 0x107   :  { %v533_v14 = vadd.f32 %v532_v9, %v531_v11  ;;  %v168_v9 = vld [vmem:[%s8800_s0 + $0x4d0] sm:$0xff]  ;;  %v576_v11 = vsel %vm270_vm0, %v167_v6, 0.0 }
 0x109   :  { %v535_v17 = vadd.f32 %v534_v12, %v533_v14  ;;  %v169_v12 = vld [vmem:[%s8800_s0 + $0x4d8] sm:$0xff]  ;;  %v578_v14 = vsel %vm270_vm0, %v168_v9, 0.0 }
 0x10b   :  { %v537_v20 = vadd.f32 %v536_v15, %v535_v17  ;;  %v170_v15 = vld [vmem:[%s8800_s0 + $0x4e0] sm:$0xff]  ;;  %v580_v17 = vsel %vm270_vm0, %v169_v12, 0.0 }
 0x10d   :  { %v539_v23 = vadd.f32 %v538_v18, %v537_v20  ;;  %v171_v18 = vld [vmem:[%s8800_s0 + $0x4e8] sm:$0xff]  ;;  %v582_v20 = vsel %vm270_vm0, %v170_v15, 0.0 }
 0x10f   :  { %v541_v26 = vadd.f32 %v540_v21, %v539_v23  ;;  %v172_v21 = vld [vmem:[%s8800_s0 + $0x4f0] sm:$0xff]  ;;  %v584_v23 = vsel %vm270_vm0, %v171_v18, 0.0 }
 0x111   :  { %v543_v29 = vadd.f32 %v542_v24, %v541_v26  ;;  %v173_v24 = vld [vmem:[%s8800_s0 + $0x4f8] sm:$0xff]  ;;  %v586_v26 = vsel %vm270_vm0, %v172_v21, 0.0 }
 0x113   :  { %v545_v32 = vadd.f32 %v544_v27, %v543_v29  ;;  %v174_v27 = vld [vmem:[%s8800_s0 + $0x500] sm:$0xff]  ;;  %v588_v29 = vsel %vm270_vm0, %v173_v24, 0.0 }
 0x115   :  { %v547_v35 = vadd.f32 %v546_v30, %v545_v32  ;;  %v175_v30 = vld [vmem:[%s8800_s0 + $0x508] sm:$0xff]  ;;  %v590_v32 = vsel %vm270_vm0, %v174_v27, 0.0 }
 0x117   :  { %v549_v38 = vadd.f32 %v548_v33, %v547_v35  ;;  %v176_v33 = vld [vmem:[%s8800_s0 + $0x510] sm:$0xff]  ;;  %v592_v35 = vsel %vm270_vm0, %v175_v30, 0.0 }
 0x119   :  { %v551_v41 = vadd.f32 %v550_v36, %v549_v38  ;;  %v177_v36 = vld [vmem:[%s8800_s0 + $0x518] sm:$0xff]  ;;  %v594_v38 = vsel %vm270_vm0, %v176_v33, 0.0 }
 0x11b   :  { %v553_v44 = vadd.f32 %v552_v39, %v551_v41  ;;  %v178_v39 = vld [vmem:[%s8800_s0 + $0x520] sm:$0xff]  ;;  %v596_v41 = vsel %vm270_vm0, %v177_v36, 0.0 }
 0x11d   :  { %v555_v47 = vadd.f32 %v554_v42, %v553_v44  ;;  %v179_v42 = vld [vmem:[%s8800_s0 + $0x528] sm:$0xff]  ;;  %v598_v44 = vsel %vm270_vm0, %v178_v39, 0.0 }
 0x11f   :  { %v557_v50 = vadd.f32 %v556_v45, %v555_v47  ;;  %v180_v45 = vld [vmem:[%s8800_s0 + $0x530] sm:$0xff]  ;;  %v600_v47 = vsel %vm270_vm0, %v179_v42, 0.0 }
 0x121   :  { %v559_v53 = vadd.f32 %v558_v48, %v557_v50  ;;  %v181_v48 = vld [vmem:[%s8800_s0 + $0x538] sm:$0xff]  ;;  %v602_v50 = vsel %vm270_vm0, %v180_v45, 0.0 }
 0x123   :  { %v561_v56 = vadd.f32 %v560_v51, %v559_v53  ;;  %v182_v51 = vld [vmem:[%s8800_s0 + $0x540] sm:$0xff]  ;;  %v604_v53 = vsel %vm270_vm0, %v181_v48, 0.0 }
 0x125   :  { %v563_v59 = vadd.f32 %v562_v54, %v561_v56  ;;  %v183_v54 = vld [vmem:[%s8800_s0 + $0x548] sm:$0xff]  ;;  %v606_v56 = vsel %vm270_vm0, %v182_v51, 0.0 }
 0x127   :  { %v565_v62 = vadd.f32 %v564_v57, %v563_v59  ;;  %v184_v57 = vld [vmem:[%s8800_s0 + $0x550] sm:$0xff]  ;;  %v608_v59 = vsel %vm270_vm0, %v183_v54, 0.0 }
 0x129   :  { %v567_v1 = vadd.f32 %v566_v60, %v565_v62  ;;  %v185_v60 = vld [vmem:[%s8800_s0 + $0x558] sm:$0xff]  ;;  %v610_v62 = vsel %vm270_vm0, %v184_v57, 0.0 }
 0x12b   :  { %v569_v4 = vadd.f32 %v568_v63, %v567_v1  ;;  %v186_v63 = vld [vmem:[%s8800_s0 + $0x560] sm:$0xff]  ;;  %v612_v1 = vsel %vm270_vm0, %v185_v60, 0.0 }
 0x12d   :  { %v571_v7 = vadd.f32 %v570_v2, %v569_v4  ;;  %v187_v2 = vld [vmem:[%s8800_s0 + $0x568] sm:$0xff]  ;;  %v614_v4 = vsel %vm270_vm0, %v186_v63, 0.0 }
 0x12f   :  { %v573_v10 = vadd.f32 %v572_v5, %v571_v7  ;;  %v188_v5 = vld [vmem:[%s8800_s0 + $0x570] sm:$0xff]  ;;  %v616_v7 = vsel %vm270_vm0, %v187_v2, 0.0 }
 0x131   :  { %v575_v13 = vadd.f32 %v574_v8, %v573_v10  ;;  %v189_v8 = vld [vmem:[%s8800_s0 + $0x578] sm:$0xff]  ;;  %v618_v10 = vsel %vm270_vm0, %v188_v5, 0.0 }
 0x133   :  { %v577_v16 = vadd.f32 %v576_v11, %v575_v13  ;;  %v190_v11 = vld [vmem:[%s8800_s0 + $0x580] sm:$0xff]  ;;  %v620_v13 = vsel %vm270_vm0, %v189_v8, 0.0 }
 0x135   :  { %v579_v19 = vadd.f32 %v578_v14, %v577_v16  ;;  %v191_v14 = vld [vmem:[%s8800_s0 + $0x588] sm:$0xff]  ;;  %v622_v16 = vsel %vm270_vm0, %v190_v11, 0.0 }
 0x137   :  { %v581_v22 = vadd.f32 %v580_v17, %v579_v19  ;;  %v192_v17 = vld [vmem:[%s8800_s0 + $0x590] sm:$0xff]  ;;  %v624_v19 = vsel %vm270_vm0, %v191_v14, 0.0 }
 0x139   :  { %v583_v25 = vadd.f32 %v582_v20, %v581_v22  ;;  %v193_v20 = vld [vmem:[%s8800_s0 + $0x598] sm:$0xff]  ;;  %v626_v22 = vsel %vm270_vm0, %v192_v17, 0.0 }
 0x13b   :  { %v585_v28 = vadd.f32 %v584_v23, %v583_v25  ;;  %v194_v23 = vld [vmem:[%s8800_s0 + $0x5a0] sm:$0xff]  ;;  %v628_v25 = vsel %vm270_vm0, %v193_v20, 0.0 }
 0x13d   :  { %v587_v31 = vadd.f32 %v586_v26, %v585_v28  ;;  %v195_v26 = vld [vmem:[%s8800_s0 + $0x5a8] sm:$0xff]  ;;  %v630_v28 = vsel %vm270_vm0, %v194_v23, 0.0 }
 0x13f   :  { %v589_v34 = vadd.f32 %v588_v29, %v587_v31  ;;  %v196_v29 = vld [vmem:[%s8800_s0 + $0x5b0] sm:$0xff]  ;;  %v632_v31 = vsel %vm270_vm0, %v195_v26, 0.0 }
 0x141   :  { %v591_v37 = vadd.f32 %v590_v32, %v589_v34  ;;  %v197_v32 = vld [vmem:[%s8800_s0 + $0x5b8] sm:$0xff]  ;;  %v634_v34 = vsel %vm270_vm0, %v196_v29, 0.0 }
 0x143   :  { %v593_v40 = vadd.f32 %v592_v35, %v591_v37  ;;  %v198_v35 = vld [vmem:[%s8800_s0 + $0x5c0] sm:$0xff]  ;;  %v636_v37 = vsel %vm270_vm0, %v197_v32, 0.0 }
 0x145   :  { %v595_v43 = vadd.f32 %v594_v38, %v593_v40  ;;  %v199_v38 = vld [vmem:[%s8800_s0 + $0x5c8] sm:$0xff]  ;;  %v638_v40 = vsel %vm270_vm0, %v198_v35, 0.0 }
 0x147   :  { %v597_v46 = vadd.f32 %v596_v41, %v595_v43  ;;  %v200_v41 = vld [vmem:[%s8800_s0 + $0x5d0] sm:$0xff]  ;;  %v640_v43 = vsel %vm270_vm0, %v199_v38, 0.0 }
 0x149   :  { %v599_v49 = vadd.f32 %v598_v44, %v597_v46  ;;  %v201_v44 = vld [vmem:[%s8800_s0 + $0x5d8] sm:$0xff]  ;;  %v642_v46 = vsel %vm270_vm0, %v200_v41, 0.0 }
 0x14b   :  { %v601_v52 = vadd.f32 %v600_v47, %v599_v49  ;;  %v202_v47 = vld [vmem:[%s8800_s0 + $0x5e0] sm:$0xff]  ;;  %v644_v49 = vsel %vm270_vm0, %v201_v44, 0.0 }
 0x14d   :  { %v603_v55 = vadd.f32 %v602_v50, %v601_v52  ;;  %v203_v50 = vld [vmem:[%s8800_s0 + $0x5e8] sm:$0xff]  ;;  %v646_v52 = vsel %vm270_vm0, %v202_v47, 0.0 }
 0x14f   :  { %v605_v58 = vadd.f32 %v604_v53, %v603_v55  ;;  %v204_v53 = vld [vmem:[%s8800_s0 + $0x5f0] sm:$0xff]  ;;  %v648_v55 = vsel %vm270_vm0, %v203_v50, 0.0 }
 0x151   :  { %v607_v61 = vadd.f32 %v606_v56, %v605_v58  ;;  %v205_v56 = vld [vmem:[%s8800_s0 + $0x5f8] sm:$0xff]  ;;  %v650_v58 = vsel %vm270_vm0, %v204_v53, 0.0 }
 0x153   :  { %v609_v0 = vadd.f32 %v608_v59, %v607_v61  ;;  %v206_v59 = vld [vmem:[%s8800_s0 + $0x600] sm:$0xff]  ;;  %v652_v61 = vsel %vm270_vm0, %v205_v56, 0.0 }
 0x155   :  { %v611_v3 = vadd.f32 %v610_v62, %v609_v0  ;;  %v207_v62 = vld [vmem:[%s8800_s0 + $0x608] sm:$0xff]  ;;  %v654_v0 = vsel %vm270_vm0, %v206_v59, 0.0 }
 0x157   :  { %v613_v6 = vadd.f32 %v612_v1, %v611_v3  ;;  %v208_v1 = vld [vmem:[%s8800_s0 + $0x610] sm:$0xff]  ;;  %v656_v3 = vsel %vm270_vm0, %v207_v62, 0.0 }
 0x159   :  { %v615_v9 = vadd.f32 %v614_v4, %v613_v6  ;;  %v209_v4 = vld [vmem:[%s8800_s0 + $0x618] sm:$0xff]  ;;  %v658_v6 = vsel %vm270_vm0, %v208_v1, 0.0 }
 0x15b   :  { %v617_v12 = vadd.f32 %v616_v7, %v615_v9  ;;  %v210_v7 = vld [vmem:[%s8800_s0 + $0x620] sm:$0xff]  ;;  %v660_v9 = vsel %vm270_vm0, %v209_v4, 0.0 }
 0x15d   :  { %v619_v15 = vadd.f32 %v618_v10, %v617_v12  ;;  %v211_v10 = vld [vmem:[%s8800_s0 + $0x628] sm:$0xff]  ;;  %v662_v12 = vsel %vm270_vm0, %v210_v7, 0.0 }
 0x15f   :  { %v621_v18 = vadd.f32 %v620_v13, %v619_v15  ;;  %v212_v13 = vld [vmem:[%s8800_s0 + $0x630] sm:$0xff]  ;;  %v664_v15 = vsel %vm270_vm0, %v211_v10, 0.0 }
 0x161   :  { %v623_v21 = vadd.f32 %v622_v16, %v621_v18  ;;  %v213_v16 = vld [vmem:[%s8800_s0 + $0x638] sm:$0xff]  ;;  %v666_v18 = vsel %vm270_vm0, %v212_v13, 0.0 }
 0x163   :  { %v625_v24 = vadd.f32 %v624_v19, %v623_v21  ;;  %v214_v19 = vld [vmem:[%s8800_s0 + $0x640] sm:$0xff]  ;;  %v668_v21 = vsel %vm270_vm0, %v213_v16, 0.0 }
 0x165   :  { %v627_v27 = vadd.f32 %v626_v22, %v625_v24  ;;  %v215_v22 = vld [vmem:[%s8800_s0 + $0x648] sm:$0xff]  ;;  %v670_v24 = vsel %vm270_vm0, %v214_v19, 0.0 }
 0x167   :  { %v629_v30 = vadd.f32 %v628_v25, %v627_v27  ;;  %v216_v25 = vld [vmem:[%s8800_s0 + $0x650] sm:$0xff]  ;;  %v672_v27 = vsel %vm270_vm0, %v215_v22, 0.0 }
 0x169   :  { %v631_v33 = vadd.f32 %v630_v28, %v629_v30  ;;  %v217_v28 = vld [vmem:[%s8800_s0 + $0x658] sm:$0xff]  ;;  %v674_v30 = vsel %vm270_vm0, %v216_v25, 0.0 }
 0x16a   :  { %v676_v32 = vsel %vm270_vm0, %v217_v28, 0.0 }
 0x16b   :  { %v633_v36 = vadd.f32 %v632_v31, %v631_v33  ;;  %v218_v33 = vld [vmem:[%s8800_s0 + $0x660] sm:$0xff] }
 0x16d   :  { %v635_v39 = vadd.f32 %v634_v34, %v633_v36  ;;  %v678_v36 = vsel %vm270_vm0, %v218_v33, 0.0  ;;  %v239_v33 = vld [vmem:[%s8800_s0 + $0x708] sm:$0xff] }
 0x16f   :  { %v637_v42 = vadd.f32 %v636_v37, %v635_v39  ;;  %v219_v37 = vld [vmem:[%s8800_s0 + $0x668] sm:$0xff] }
 0x170   :  { %v680_v39 = vsel %vm270_vm0, %v219_v37, 0.0 }
 0x171   :  { %v639_v45 = vadd.f32 %v638_v40, %v637_v42  ;;  %v220_v40 = vld [vmem:[%s8800_s0 + $0x670] sm:$0xff] }
 0x172   :  { %v682_v42 = vsel %vm270_vm0, %v220_v40, 0.0 }
 0x173   :  { %v641_v48 = vadd.f32 %v640_v43, %v639_v45  ;;  %v221_v43 = vld [vmem:[%s8800_s0 + $0x678] sm:$0xff] }
 0x174   :  { %v684_v45 = vsel %vm270_vm0, %v221_v43, 0.0 }
 0x175   :  { %v643_v51 = vadd.f32 %v642_v46, %v641_v48  ;;  %v222_v46 = vld [vmem:[%s8800_s0 + $0x680] sm:$0xff] }
 0x176   :  { %v686_v48 = vsel %vm270_vm0, %v222_v46, 0.0 }
 0x177   :  { %v645_v54 = vadd.f32 %v644_v49, %v643_v51  ;;  %v223_v49 = vld [vmem:[%s8800_s0 + $0x688] sm:$0xff] }
 0x178   :  { %v688_v51 = vsel %vm270_vm0, %v223_v49, 0.0 }
 0x179   :  { %v647_v57 = vadd.f32 %v646_v52, %v645_v54  ;;  %v224_v52 = vld [vmem:[%s8800_s0 + $0x690] sm:$0xff] }
 0x17a   :  { %v690_v54 = vsel %vm270_vm0, %v224_v52, 0.0 }
 0x17b   :  { %v649_v60 = vadd.f32 %v648_v55, %v647_v57  ;;  %v225_v55 = vld [vmem:[%s8800_s0 + $0x698] sm:$0xff] }
 0x17c   :  { %v692_v57 = vsel %vm270_vm0, %v225_v55, 0.0 }
 0x17d   :  { %v651_v63 = vadd.f32 %v650_v58, %v649_v60  ;;  %v226_v58 = vld [vmem:[%s8800_s0 + $0x6a0] sm:$0xff] }
 0x17e   :  { %v694_v60 = vsel %vm270_vm0, %v226_v58, 0.0 }
 0x17f   :  { %v653_v2 = vadd.f32 %v652_v61, %v651_v63  ;;  %v227_v61 = vld [vmem:[%s8800_s0 + $0x6a8] sm:$0xff] }
 0x180   :  { %v696_v63 = vsel %vm270_vm0, %v227_v61, 0.0 }
 0x181   :  { %v655_v5 = vadd.f32 %v654_v0, %v653_v2  ;;  %v228_v0 = vld [vmem:[%s8800_s0 + $0x6b0] sm:$0xff] }
 0x182   :  { %v698_v2 = vsel %vm270_vm0, %v228_v0, 0.0 }
 0x183   :  { %v657_v8 = vadd.f32 %v656_v3, %v655_v5  ;;  %v229_v3 = vld [vmem:[%s8800_s0 + $0x6b8] sm:$0xff] }
 0x184   :  { %v700_v5 = vsel %vm270_vm0, %v229_v3, 0.0 }
 0x185   :  { %v659_v11 = vadd.f32 %v658_v6, %v657_v8  ;;  %v230_v6 = vld [vmem:[%s8800_s0 + $0x6c0] sm:$0xff] }
 0x186   :  { %v702_v8 = vsel %vm270_vm0, %v230_v6, 0.0 }
 0x187   :  { %v661_v14 = vadd.f32 %v660_v9, %v659_v11  ;;  %v231_v9 = vld [vmem:[%s8800_s0 + $0x6c8] sm:$0xff] }
 0x188   :  { %v704_v11 = vsel %vm270_vm0, %v231_v9, 0.0 }
 0x189   :  { %v663_v17 = vadd.f32 %v662_v12, %v661_v14  ;;  %v232_v12 = vld [vmem:[%s8800_s0 + $0x6d0] sm:$0xff] }
 0x18a   :  { %v706_v14 = vsel %vm270_vm0, %v232_v12, 0.0 }
 0x18b   :  { %v665_v20 = vadd.f32 %v664_v15, %v663_v17  ;;  %v233_v15 = vld [vmem:[%s8800_s0 + $0x6d8] sm:$0xff] }
 0x18c   :  { %v708_v17 = vsel %vm270_vm0, %v233_v15, 0.0 }
 0x18d   :  { %v667_v23 = vadd.f32 %v666_v18, %v665_v20  ;;  %v234_v18 = vld [vmem:[%s8800_s0 + $0x6e0] sm:$0xff] }
 0x18e   :  { %v710_v20 = vsel %vm270_vm0, %v234_v18, 0.0 }
 0x18f   :  { %v669_v26 = vadd.f32 %v668_v21, %v667_v23  ;;  %v235_v21 = vld [vmem:[%s8800_s0 + $0x6e8] sm:$0xff] }
 0x190   :  { %v712_v23 = vsel %vm270_vm0, %v235_v21, 0.0 }
 0x191   :  { %v671_v29 = vadd.f32 %v670_v24, %v669_v26  ;;  %v236_v24 = vld [vmem:[%s8800_s0 + $0x6f0] sm:$0xff] }
 0x192   :  { %v714_v26 = vsel %vm270_vm0, %v236_v24, 0.0 }
 0x193   :  { %v673_v31 = vadd.f32 %v672_v27, %v671_v29  ;;  %v237_v27 = vld [vmem:[%s8800_s0 + $0x6f8] sm:$0xff] }
 0x194   :  { %v716_v29 = vsel %vm270_vm0, %v237_v27, 0.0 }
 0x195   :  { %v675_v34 = vadd.f32 %v674_v30, %v673_v31  ;;  %v238_v30 = vld [vmem:[%s8800_s0 + $0x700] sm:$0xff] }
 0x197   :  { %v677_v35 = vadd.f32 %v676_v32, %v675_v34  ;;  %v718_v32 = vsel %vm270_vm0, %v238_v30, 0.0 }
 0x199   :  { %v679_v38 = vadd.f32 %v678_v36, %v677_v35  ;;  %v720_v35 = vsel %vm270_vm0, %v239_v33, 0.0  ;;  %v240_v36 = vld [vmem:[%s8800_s0 + $0x710] sm:$0xff] }
 0x19b   :  { %v681_v41 = vadd.f32 %v680_v39, %v679_v38  ;;  %v722_v38 = vsel %vm270_vm0, %v240_v36, 0.0  ;;  %v241_v39 = vld [vmem:[%s8800_s0 + $0x718] sm:$0xff] }
 0x19d   :  { %v683_v44 = vadd.f32 %v682_v42, %v681_v41  ;;  %v724_v41 = vsel %vm270_vm0, %v241_v39, 0.0  ;;  %v242_v42 = vld [vmem:[%s8800_s0 + $0x720] sm:$0xff] }
 0x19f   :  { %v685_v47 = vadd.f32 %v684_v45, %v683_v44  ;;  %v726_v44 = vsel %vm270_vm0, %v242_v42, 0.0  ;;  %v243_v45 = vld [vmem:[%s8800_s0 + $0x728] sm:$0xff] }
 0x1a1   :  { %v687_v50 = vadd.f32 %v686_v48, %v685_v47  ;;  %v728_v47 = vsel %vm270_vm0, %v243_v45, 0.0  ;;  %v244_v48 = vld [vmem:[%s8800_s0 + $0x730] sm:$0xff] }
 0x1a3   :  { %v689_v53 = vadd.f32 %v688_v51, %v687_v50  ;;  %v730_v50 = vsel %vm270_vm0, %v244_v48, 0.0  ;;  %v245_v51 = vld [vmem:[%s8800_s0 + $0x738] sm:$0xff] }
 0x1a5   :  { %v691_v56 = vadd.f32 %v690_v54, %v689_v53  ;;  %v732_v53 = vsel %vm270_vm0, %v245_v51, 0.0  ;;  %v246_v54 = vld [vmem:[%s8800_s0 + $0x740] sm:$0xff] }
 0x1a7   :  { %v693_v59 = vadd.f32 %v692_v57, %v691_v56  ;;  %v734_v56 = vsel %vm270_vm0, %v246_v54, 0.0  ;;  %v247_v57 = vld [vmem:[%s8800_s0 + $0x748] sm:$0xff] }
 0x1a9   :  { %v695_v62 = vadd.f32 %v694_v60, %v693_v59  ;;  %v736_v59 = vsel %vm270_vm0, %v247_v57, 0.0  ;;  %v248_v60 = vld [vmem:[%s8800_s0 + $0x750] sm:$0xff] }
 0x1ab   :  { %v697_v1 = vadd.f32 %v696_v63, %v695_v62  ;;  %v738_v62 = vsel %vm270_vm0, %v248_v60, 0.0  ;;  %v249_v63 = vld [vmem:[%s8800_s0 + $0x758] sm:$0xff] }
 0x1ad   :  { %v699_v4 = vadd.f32 %v698_v2, %v697_v1  ;;  %v740_v1 = vsel %vm270_vm0, %v249_v63, 0.0  ;;  %v250_v2 = vld [vmem:[%s8800_s0 + $0x760] sm:$0xff] }
 0x1af   :  { %v701_v7 = vadd.f32 %v700_v5, %v699_v4  ;;  %v742_v4 = vsel %vm270_vm0, %v250_v2, 0.0  ;;  %v251_v5 = vld [vmem:[%s8800_s0 + $0x768] sm:$0xff] }
 0x1b1   :  { %v703_v10 = vadd.f32 %v702_v8, %v701_v7  ;;  %v744_v7 = vsel %vm270_vm0, %v251_v5, 0.0  ;;  %v252_v8 = vld [vmem:[%s8800_s0 + $0x770] sm:$0xff] }
 0x1b3   :  { %v705_v13 = vadd.f32 %v704_v11, %v703_v10  ;;  %v746_v10 = vsel %vm270_vm0, %v252_v8, 0.0  ;;  %v253_v11 = vld [vmem:[%s8800_s0 + $0x778] sm:$0xff]  ;;  %v3381_v8 = vld [vmem:[%s8800_s0 + $0x8] sm:$0xff] }
 0x1b5   :  { %v707_v16 = vadd.f32 %v706_v14, %v705_v13  ;;  %v748_v13 = vsel %vm270_vm0, %v253_v11, 0.0  ;;  %v254_v14 = vld [vmem:[%s8800_s0 + $0x780] sm:$0xff] }
 0x1b7   :  { %v709_v19 = vadd.f32 %v708_v17, %v707_v16  ;;  %v750_v16 = vsel %vm270_vm0, %v254_v14, 0.0  ;;  %v255_v17 = vld [vmem:[%s8800_s0 + $0x788] sm:$0xff]  ;;  %v3384_v14 = vld [vmem:[%s8800_s0 + $0x20] sm:$0xff] }
 0x1b9   :  { %v711_v22 = vadd.f32 %v710_v20, %v709_v19  ;;  %v752_v19 = vsel %vm270_vm0, %v255_v17, 0.0  ;;  %v256_v20 = vld [vmem:[%s8800_s0 + $0x790] sm:$0xff] }
 0x1bb   :  { %v713_v25 = vadd.f32 %v712_v23, %v711_v22  ;;  %v754_v22 = vsel %vm270_vm0, %v256_v20, 0.0  ;;  %v257_v23 = vld [vmem:[%s8800_s0 + $0x798] sm:$0xff] }
 0x1bd   :  { %v715_v28 = vadd.f32 %v714_v26, %v713_v25  ;;  %v756_v25 = vsel %vm270_vm0, %v257_v23, 0.0  ;;  %v258_v26 = vld [vmem:[%s8800_s0 + $0x7a0] sm:$0xff] }
 0x1bf   :  { %v717_v31 = vadd.f32 %v716_v29, %v715_v28  ;;  %v758_v28 = vsel %vm270_vm0, %v258_v26, 0.0  ;;  %v259_v29 = vld [vmem:[%s8800_s0 + $0x7a8] sm:$0xff] }
 0x1c1   :  { %v719_v34 = vadd.f32 %v718_v32, %v717_v31  ;;  %v760_v31 = vsel %vm270_vm0, %v259_v29, 0.0  ;;  %v260_v32 = vld [vmem:[%s8800_s0 + $0x7b0] sm:$0xff]  ;;  %v3387_v29 = vld [vmem:[%s8800_s0 + $0x38] sm:$0xff] }
 0x1c3   :  { %v721_v37 = vadd.f32 %v720_v35, %v719_v34  ;;  %v762_v34 = vsel %vm270_vm0, %v260_v32, 0.0  ;;  %v261_v35 = vld [vmem:[%s8800_s0 + $0x7b8] sm:$0xff] }
 0x1c5   :  { %v723_v40 = vadd.f32 %v722_v38, %v721_v37  ;;  %v764_v37 = vsel %vm270_vm0, %v261_v35, 0.0  ;;  %v262_v38 = vld [vmem:[%s8800_s0 + $0x7c0] sm:$0xff] }
 0x1c7   :  { %v725_v43 = vadd.f32 %v724_v41, %v723_v40  ;;  %v766_v40 = vsel %vm270_vm0, %v262_v38, 0.0  ;;  %v263_v41 = vld [vmem:[%s8800_s0 + $0x7c8] sm:$0xff] }
 0x1c9   :  { %v727_v46 = vadd.f32 %v726_v44, %v725_v43  ;;  %v768_v43 = vsel %vm270_vm0, %v263_v41, 0.0  ;;  %v264_v44 = vld [vmem:[%s8800_s0 + $0x7d0] sm:$0xff] }
 0x1cb   :  { %v729_v49 = vadd.f32 %v728_v47, %v727_v46  ;;  %v770_v46 = vsel %vm270_vm0, %v264_v44, 0.0  ;;  %v265_v47 = vld [vmem:[%s8800_s0 + $0x7d8] sm:$0xff]  ;;  %v3390_v44 = vld [vmem:[%s8800_s0 + $0x50] sm:$0xff] }
 0x1cd   :  { %v731_v52 = vadd.f32 %v730_v50, %v729_v49  ;;  %v772_v49 = vsel %vm270_vm0, %v265_v47, 0.0  ;;  %v266_v50 = vld [vmem:[%s8800_s0 + $0x7e0] sm:$0xff] }
 0x1cf   :  { %v733_v55 = vadd.f32 %v732_v53, %v731_v52  ;;  %v774_v52 = vsel %vm270_vm0, %v266_v50, 0.0  ;;  %v267_v53 = vld [vmem:[%s8800_s0 + $0x7e8] sm:$0xff] }
 0x1d1   :  { %v735_v58 = vadd.f32 %v734_v56, %v733_v55  ;;  %v776_v55 = vsel %vm270_vm0, %v267_v53, 0.0  ;;  %v268_v56 = vld [vmem:[%s8800_s0 + $0x7f0] sm:$0xff] }
 0x1d3   :  { %v737_v61 = vadd.f32 %v736_v59, %v735_v58  ;;  %v778_v58 = vsel %vm270_vm0, %v268_v56, 0.0  ;;  %v269_v59 = vld [vmem:[%s8800_s0 + $0x7f8] sm:$0xff] }
 0x1d5   :  { %v739_v0 = vadd.f32 %v738_v62, %v737_v61  ;;  %v780_v61 = vsel %vm270_vm0, %v269_v59, 0.0  ;;  %v3393_v59 = vld [vmem:[%s8800_s0 + $0x68] sm:$0xff] }
 0x1d7   :  { %v741_v3 = vadd.f32 %v740_v1, %v739_v0 }
 0x1d9   :  { %v743_v6 = vadd.f32 %v742_v4, %v741_v3 }
 0x1db   :  { %v745_v9 = vadd.f32 %v744_v7, %v743_v6  ;;  %v3380_v6 = vld [vmem:[%s8800_s0] sm:$0xff] }
 0x1dd   :  { %v747_v12 = vadd.f32 %v746_v10, %v745_v9  ;;  %v3382_v10 = vld [vmem:[%s8800_s0 + $0x10] sm:$0xff] }
 0x1df   :  { %v749_v15 = vadd.f32 %v748_v13, %v747_v12  ;;  %v3383_v12 = vld [vmem:[%s8800_s0 + $0x18] sm:$0xff] }
 0x1e1   :  { %v751_v18 = vadd.f32 %v750_v16, %v749_v15 }
 0x1e3   :  { %v753_v21 = vadd.f32 %v752_v19, %v751_v18  ;;  %v3385_v19 = vld [vmem:[%s8800_s0 + $0x28] sm:$0xff] }
 0x1e5   :  { %v755_v24 = vadd.f32 %v754_v22, %v753_v21  ;;  %v3386_v22 = vld [vmem:[%s8800_s0 + $0x30] sm:$0xff] }
 0x1e7   :  { %v757_v27 = vadd.f32 %v756_v25, %v755_v24 }
 0x1e9   :  { %v759_v30 = vadd.f32 %v758_v28, %v757_v27 }
 0x1eb   :  { %v761_v33 = vadd.f32 %v760_v31, %v759_v30 }
 0x1ed   :  { %v763_v36 = vadd.f32 %v762_v34, %v761_v33  ;;  %v3388_v34 = vld [vmem:[%s8800_s0 + $0x40] sm:$0xff] }
 0x1ef   :  { %v765_v39 = vadd.f32 %v764_v37, %v763_v36 }
 0x1f1   :  { %v767_v42 = vadd.f32 %v766_v40, %v765_v39  ;;  %v3389_v39 = vld [vmem:[%s8800_s0 + $0x48] sm:$0xff] }
 0x1f3   :  { %v769_v45 = vadd.f32 %v768_v43, %v767_v42 }
 0x1f5   :  { %v771_v48 = vadd.f32 %v770_v46, %v769_v45 }
 0x1f7   :  { %v773_v51 = vadd.f32 %v772_v49, %v771_v48  ;;  %v3391_v49 = vld [vmem:[%s8800_s0 + $0x58] sm:$0xff] }
 0x1f9   :  { %v775_v54 = vadd.f32 %v774_v52, %v773_v51 }
 0x1fb   :  { %v777_v57 = vadd.f32 %v776_v55, %v775_v54  ;;  %v3392_v54 = vld [vmem:[%s8800_s0 + $0x60] sm:$0xff] }
 0x1fd   :  { %v779_v60 = vadd.f32 %v778_v58, %v777_v57 }
 0x1ff   :  { %v781_v62 = vadd.f32 %v780_v61, %v779_v60 }
 0x201   :  { %v782_v63 = vrot.slane %v781_v62, 4 }
 0x203   :  { %v783_v0 = vadd.f32 %v782_v63, %v781_v62 }
 0x205   :  { %v784_v1 = vrot.slane %v783_v0, 2 }
 0x207   :  { %v785_v2 = vadd.f32 %v784_v1, %v783_v0  ;;  %v3394_v0 = vld [vmem:[%s8800_s0 + $0x70] sm:$0xff] }
 0x209   :  { %v786_v3 = vrot.slane %v785_v2, 1 }
 0x20b   :  { %v787_v4 = vadd.f32 %v786_v3, %v785_v2 }
 0x20d   :  { %v4682_v5 = vmul.f32 0.00048828125, %v787_v4 }
 0x20f   :  { %v4688_v7 = vsub.f32 %v3380_v6, %v4682_v5  ;;  %v4694_v9 = vsub.f32 %v3381_v8, %v4682_v5  ;;  %v4700_v11 = vsub.f32 %v3382_v10, %v4682_v5  ;;  %v4706_v13 = vsub.f32 %v3383_v12, %v4682_v5  ;;  %v3395_v6 = vld [vmem:[%s8800_s0 + $0x78] sm:$0xff] }
 0x210   :  { %v4712_v15 = vsub.f32 %v3384_v14, %v4682_v5  ;;  %v4724_v20 = vsub.f32 %v3385_v19, %v4682_v5  ;;  %v4732_v23 = vsub.f32 %v3386_v22, %v4682_v5  ;;  %v4743_v30 = vsub.f32 %v3387_v29, %v4682_v5  ;;  %v3397_v22 = vld [vmem:[%s8800_s0 + $0x88] sm:$0xff] }
 0x211   :  { %v1045_v16 = vmul.f32 %v4688_v7, %v4688_v7  ;;  %v1046_v17 = vmul.f32 %v4694_v9, %v4694_v9  ;;  %v1047_v18 = vmul.f32 %v4700_v11, %v4700_v11  ;;  %v1048_v21 = vmul.f32 %v4706_v13, %v4706_v13 }
 0x212   :  { %v1049_v24 = vmul.f32 %v4712_v15, %v4712_v15  ;;  %v1050_v31 = vmul.f32 %v4724_v20, %v4724_v20  ;;  %v4752_v35 = vsub.f32 %v3388_v34, %v4682_v5  ;;  %v1051_v36 = vmul.f32 %v4732_v23, %v4732_v23  ;;  %v3399_v34 = vld [vmem:[%s8800_s0 + $0x98] sm:$0xff] }
 0x213   :  { %v1301_v25 = vsel %vm270_vm0, %v1045_v16, 0.0  ;;  %v1302_v26 = vsel %vm270_vm0, %v1046_v17, 0.0  ;;  %v1304_v27 = vsel %vm270_vm0, %v1047_v18, 0.0  ;;  %v1306_v32 = vsel %vm270_vm0, %v1048_v21, 0.0  ;;  %v3396_v16 = vld [vmem:[%s8800_s0 + $0x80] sm:$0xff] }
 0x214   :  { %v1303_v28 = vadd.f32 %v1302_v26, %v1301_v25  ;;  %v1308_v37 = vsel %vm270_vm0, %v1049_v24, 0.0  ;;  %v4761_v40 = vsub.f32 %v3389_v39, %v4682_v5  ;;  %v1052_v41 = vmul.f32 %v4743_v30, %v4743_v30 }
 0x215   :  { %v1310_v42 = vsel %vm270_vm0, %v1050_v31, 0.0  ;;  %v4770_v45 = vsub.f32 %v3390_v44, %v4682_v5  ;;  %v1053_v46 = vmul.f32 %v4752_v35, %v4752_v35  ;;  %v1312_v47 = vsel %vm270_vm0, %v1051_v36, 0.0 }
 0x216   :  { %v1305_v33 = vadd.f32 %v1304_v27, %v1303_v28  ;;  %v4779_v50 = vsub.f32 %v3391_v49, %v4682_v5  ;;  %v1054_v51 = vmul.f32 %v4761_v40, %v4761_v40  ;;  %v1314_v52 = vsel %vm270_vm0, %v1052_v41, 0.0  ;;  %v3398_v28 = vld [vmem:[%s8800_s0 + $0x90] sm:$0xff]  ;;  %v3400_v41 = vld [vmem:[%s8800_s0 + $0xa0] sm:$0xff] }
 0x217   :  { %v4788_v55 = vsub.f32 %v3392_v54, %v4682_v5  ;;  %v1055_v56 = vmul.f32 %v4770_v45, %v4770_v45  ;;  %v1316_v57 = vsel %vm270_vm0, %v1053_v46, 0.0  ;;  %v4797_v60 = vsub.f32 %v3393_v59, %v4682_v5  ;;  %v3403_v59 = vld [vmem:[%s8800_s0 + $0xb8] sm:$0xff] }
 0x218   :  { %v1307_v38 = vadd.f32 %v1306_v32, %v1305_v33  ;;  %v1056_v61 = vmul.f32 %v4779_v50, %v4779_v50  ;;  %v1318_v62 = vsel %vm270_vm0, %v1054_v51, 0.0  ;;  %v4806_v1 = vsub.f32 %v3394_v0, %v4682_v5 }
 0x219   :  { %v1057_v2 = vmul.f32 %v4788_v55, %v4788_v55  ;;  %v1320_v3 = vsel %vm270_vm0, %v1055_v56, 0.0  ;;  %v4815_v8 = vsub.f32 %v3395_v6, %v4682_v5  ;;  %v1058_v10 = vmul.f32 %v4797_v60, %v4797_v60 }
 0x21a   :  { %v1309_v43 = vadd.f32 %v1308_v37, %v1307_v38  ;;  %v1322_v12 = vsel %vm270_vm0, %v1056_v61, 0.0  ;;  %v4824_v17 = vsub.f32 %v3396_v16, %v4682_v5  ;;  %v1059_v18 = vmul.f32 %v4806_v1, %v4806_v1 }
 0x21b   :  { %v1324_v19 = vsel %vm270_vm0, %v1057_v2, 0.0  ;;  %v4833_v24 = vsub.f32 %v3397_v22, %v4682_v5  ;;  %v1060_v25 = vmul.f32 %v4815_v8, %v4815_v8  ;;  %v1326_v26 = vsel %vm270_vm0, %v1058_v10, 0.0  ;;  %v3404_v2 = vld [vmem:[%s8800_s0 + $0xc0] sm:$0xff] }
 0x21c   :  { %v1311_v48 = vadd.f32 %v1310_v42, %v1309_v43  ;;  %v4842_v29 = vsub.f32 %v3398_v28, %v4682_v5  ;;  %v1061_v31 = vmul.f32 %v4824_v17, %v4824_v17  ;;  %v1328_v32 = vsel %vm270_vm0, %v1059_v18, 0.0  ;;  %v3407_v28 = vld [vmem:[%s8800_s0 + $0xd8] sm:$0xff] }
 0x21d   :  { %v4851_v36 = vsub.f32 %v3399_v34, %v4682_v5  ;;  %v1062_v37 = vmul.f32 %v4833_v24, %v4833_v24  ;;  %v1330_v38 = vsel %vm270_vm0, %v1060_v25, 0.0  ;;  %v4860_v42 = vsub.f32 %v3400_v41, %v4682_v5 }
 0x21e   :  { %v1313_v53 = vadd.f32 %v1312_v47, %v1311_v48  ;;  %v1063_v43 = vmul.f32 %v4842_v29, %v4842_v29  ;;  %v1332_v44 = vsel %vm270_vm0, %v1061_v31, 0.0  ;;  %v3401_v47 = vld [vmem:[%s8800_s0 + $0xa8] sm:$0xff]  ;;  %v4887_v61 = vsub.f32 %v3403_v59, %v4682_v5  ;;  %v3411_v59 = vld [vmem:[%s8800_s0 + $0xf8] sm:$0xff] }
 0x21f   :  { %v4869_v48 = vsub.f32 %v3401_v47, %v4682_v5  ;;  %v1064_v49 = vmul.f32 %v4851_v36, %v4851_v36  ;;  %v1334_v51 = vsel %vm270_vm0, %v1062_v37, 0.0  ;;  %v1065_v56 = vmul.f32 %v4860_v42, %v4860_v42  ;;  %v3408_v37 = vld [vmem:[%s8800_s0 + $0xe0] sm:$0xff] }
 0x220   :  { %v1315_v58 = vadd.f32 %v1314_v52, %v1313_v53  ;;  %v3402_v53 = vld [vmem:[%s8800_s0 + $0xb0] sm:$0xff]  ;;  %v1068_v16 = vmul.f32 %v4887_v61, %v4887_v61  ;;  %v4923_v31 = vsub.f32 %v3407_v28, %v4682_v5 }
 0x221   :  { %v4878_v54 = vsub.f32 %v3402_v53, %v4682_v5  ;;  %v1340_v6 = vsel %vm270_vm0, %v1065_v56, 0.0 }
 0x222   :  { %v1317_v63 = vadd.f32 %v1316_v57, %v1315_v58  ;;  %v1336_v57 = vsel %vm270_vm0, %v1063_v43, 0.0  ;;  %v1072_v47 = vmul.f32 %v4923_v31, %v4923_v31 }
 0x224   :  { %v1319_v4 = vadd.f32 %v1318_v62, %v1317_v63  ;;  %v1066_v62 = vmul.f32 %v4869_v48, %v4869_v48  ;;  %v1338_v63 = vsel %vm270_vm0, %v1064_v49, 0.0 }
 0x226   :  { %v1321_v14 = vadd.f32 %v1320_v3, %v1319_v4  ;;  %v4896_v3 = vsub.f32 %v3404_v2, %v4682_v5  ;;  %v1067_v4 = vmul.f32 %v4878_v54, %v4878_v54  ;;  %v1342_v18 = vsel %vm270_vm0, %v1066_v62, 0.0 }
 0x227   :  { %v4959_v62 = vsub.f32 %v3411_v59, %v4682_v5 }
 0x228   :  { %v1323_v21 = vadd.f32 %v1322_v12, %v1321_v14  ;;  %v3405_v12 = vld [vmem:[%s8800_s0 + $0xc8] sm:$0xff]  ;;  %v1069_v25 = vmul.f32 %v4896_v3, %v4896_v3 }
 0x229   :  { %v4905_v14 = vsub.f32 %v3405_v12, %v4682_v5 }
 0x22a   :  { %v1325_v27 = vadd.f32 %v1324_v19, %v1323_v21  ;;  %v3406_v21 = vld [vmem:[%s8800_s0 + $0xd0] sm:$0xff]  ;;  %v1348_v41 = vsel %vm270_vm0, %v1069_v25, 0.0 }
 0x22b   :  { %v4914_v22 = vsub.f32 %v3406_v21, %v4682_v5  ;;  %v1076_v21 = vmul.f32 %v4959_v62, %v4959_v62 }
 0x22c   :  { %v1327_v33 = vadd.f32 %v1326_v26, %v1325_v27  ;;  %v1344_v26 = vsel %vm270_vm0, %v1067_v4, 0.0  ;;  %v3412_v4 = vld [vmem:[%s8800_s0 + $0x100] sm:$0xff] }
 0x22e   :  { %v1329_v39 = vadd.f32 %v1328_v32, %v1327_v33  ;;  %v1070_v32 = vmul.f32 %v4905_v14, %v4905_v14  ;;  %v1346_v33 = vsel %vm270_vm0, %v1068_v16, 0.0 }
 0x230   :  { %v1331_v46 = vadd.f32 %v1330_v38, %v1329_v39  ;;  %v4932_v38 = vsub.f32 %v3408_v37, %v4682_v5  ;;  %v1071_v39 = vmul.f32 %v4914_v22, %v4914_v22  ;;  %v1350_v49 = vsel %vm270_vm0, %v1070_v32, 0.0  ;;  %v3415_v37 = vld [vmem:[%s8800_s0 + $0x118] sm:$0xff] }
 0x232   :  { %v1333_v52 = vadd.f32 %v1332_v44, %v1331_v46  ;;  %v3409_v44 = vld [vmem:[%s8800_s0 + $0xe8] sm:$0xff]  ;;  %v1073_v56 = vmul.f32 %v4932_v38, %v4932_v38 }
 0x233   :  { %v4941_v46 = vsub.f32 %v3409_v44, %v4682_v5 }
 0x234   :  { %v1335_v58 = vadd.f32 %v1334_v51, %v1333_v52  ;;  %v3410_v52 = vld [vmem:[%s8800_s0 + $0xf0] sm:$0xff]  ;;  %v1356_v12 = vsel %vm270_vm0, %v1073_v56, 0.0 }
 0x235   :  { %v4950_v53 = vsub.f32 %v3410_v52, %v4682_v5 }
 0x236   :  { %v1337_v0 = vadd.f32 %v1336_v57, %v1335_v58  ;;  %v1352_v57 = vsel %vm270_vm0, %v1071_v39, 0.0  ;;  %v4995_v39 = vsub.f32 %v3415_v37, %v4682_v5 }
 0x238   :  { %v1339_v10 = vadd.f32 %v1338_v63, %v1337_v0  ;;  %v1074_v63 = vmul.f32 %v4941_v46, %v4941_v46  ;;  %v1354_v0 = vsel %vm270_vm0, %v1072_v47, 0.0  ;;  %v3416_v47 = vld [vmem:[%s8800_s0 + $0x120] sm:$0xff]  ;;  %v1080_v59 = vmul.f32 %v4995_v39, %v4995_v39 }
 0x23a   :  { %v1341_v19 = vadd.f32 %v1340_v6, %v1339_v10  ;;  %v4968_v6 = vsub.f32 %v3412_v4, %v4682_v5  ;;  %v1075_v10 = vmul.f32 %v4950_v53, %v4950_v53  ;;  %v1358_v25 = vsel %vm270_vm0, %v1074_v63, 0.0 }
 0x23c   :  { %v1343_v27 = vadd.f32 %v1342_v18, %v1341_v19  ;;  %v3413_v18 = vld [vmem:[%s8800_s0 + $0x108] sm:$0xff]  ;;  %v1077_v32 = vmul.f32 %v4968_v6, %v4968_v6 }
 0x23d   :  { %v4977_v19 = vsub.f32 %v3413_v18, %v4682_v5  ;;  %v3419_v18 = vld [vmem:[%s8800_s0 + $0x138] sm:$0xff] }
 0x23e   :  { %v1345_v34 = vadd.f32 %v1344_v26, %v1343_v27  ;;  %v3414_v27 = vld [vmem:[%s8800_s0 + $0x110] sm:$0xff]  ;;  %v1364_v52 = vsel %vm270_vm0, %v1077_v32, 0.0  ;;  %v3420_v32 = vld [vmem:[%s8800_s0 + $0x140] sm:$0xff] }
 0x23f   :  { %v4986_v28 = vsub.f32 %v3414_v27, %v4682_v5 }
 0x240   :  { %v1347_v43 = vadd.f32 %v1346_v33, %v1345_v34  ;;  %v1360_v33 = vsel %vm270_vm0, %v1075_v10, 0.0 }
 0x242   :  { %v1349_v51 = vadd.f32 %v1348_v41, %v1347_v43  ;;  %v1078_v41 = vmul.f32 %v4977_v19, %v4977_v19  ;;  %v1362_v43 = vsel %vm270_vm0, %v1076_v21, 0.0  ;;  %v5031_v21 = vsub.f32 %v3419_v18, %v4682_v5 }
 0x244   :  { %v1351_v58 = vadd.f32 %v1350_v49, %v1349_v51  ;;  %v5004_v49 = vsub.f32 %v3416_v47, %v4682_v5  ;;  %v1079_v51 = vmul.f32 %v4986_v28, %v4986_v28  ;;  %v1366_v63 = vsel %vm270_vm0, %v1078_v41, 0.0 }
 0x245   :  { %v1084_v47 = vmul.f32 %v5031_v21, %v5031_v21 }
 0x246   :  { %v1353_v2 = vadd.f32 %v1352_v57, %v1351_v58  ;;  %v3417_v57 = vld [vmem:[%s8800_s0 + $0x128] sm:$0xff]  ;;  %v1081_v10 = vmul.f32 %v5004_v49, %v5004_v49 }
 0x247   :  { %v5013_v58 = vsub.f32 %v3417_v57, %v4682_v5 }
 0x248   :  { %v1355_v16 = vadd.f32 %v1354_v0, %v1353_v2  ;;  %v3418_v2 = vld [vmem:[%s8800_s0 + $0x130] sm:$0xff]  ;;  %v1372_v37 = vsel %vm270_vm0, %v1081_v10, 0.0 }
 0x249   :  { %v5022_v4 = vsub.f32 %v3418_v2, %v4682_v5  ;;  %v3423_v2 = vld [vmem:[%s8800_s0 + $0x158] sm:$0xff] }
 0x24a   :  { %v1357_v26 = vadd.f32 %v1356_v12, %v1355_v16  ;;  %v1368_v12 = vsel %vm270_vm0, %v1079_v51, 0.0  ;;  %v5067_v10 = vsub.f32 %v3423_v2, %v4682_v5  ;;  %v3427_v2 = vld [vmem:[%s8800_s0 + $0x178] sm:$0xff] }
 0x24c   :  { %v1359_v34 = vadd.f32 %v1358_v25, %v1357_v26  ;;  %v1082_v25 = vmul.f32 %v5013_v58, %v5013_v58  ;;  %v1370_v26 = vsel %vm270_vm0, %v1080_v59, 0.0  ;;  %9019 = vst [vmem:[#allocation3_spill] sm:$0xff] %v5067_v10 }
 0x24e   :  { %v1361_v44 = vadd.f32 %v1360_v33, %v1359_v34  ;;  %v5040_v33 = vsub.f32 %v3420_v32, %v4682_v5  ;;  %v1083_v34 = vmul.f32 %v5022_v4, %v5022_v4  ;;  %v1374_v51 = vsel %vm270_vm0, %v1082_v25, 0.0  ;;  %v3424_v25 = vld [vmem:[%s8800_s0 + $0x160] sm:$0xff] }
 0x250   :  { %v1363_v56 = vadd.f32 %v1362_v43, %v1361_v44  ;;  %v3421_v43 = vld [vmem:[%s8800_s0 + $0x148] sm:$0xff]  ;;  %v1085_v59 = vmul.f32 %v5040_v33, %v5040_v33 }
 0x251   :  { %v5049_v44 = vsub.f32 %v3421_v43, %v4682_v5  ;;  %v1088_v43 = vmul.f32 %v5067_v10, %v5067_v10 }
 0x252   :  { %v1365_v0 = vadd.f32 %v1364_v52, %v1363_v56  ;;  %v3422_v56 = vld [vmem:[%s8800_s0 + $0x150] sm:$0xff]  ;;  %v1380_v32 = vsel %vm270_vm0, %v1085_v59, 0.0 }
 0x253   :  { %v5058_v57 = vsub.f32 %v3422_v56, %v4682_v5 }
 0x254   :  { %v1367_v16 = vadd.f32 %v1366_v63, %v1365_v0  ;;  %v1376_v63 = vsel %vm270_vm0, %v1083_v34, 0.0 }
 0x255   :  { %9018 = vst [vmem:[#allocation2_spill] sm:$0xff] %v5058_v57 }
 0x256   :  { %v1369_v27 = vadd.f32 %v1368_v12, %v1367_v16  ;;  %v1086_v12 = vmul.f32 %v5049_v44, %v5049_v44  ;;  %v1378_v16 = vsel %vm270_vm0, %v1084_v47, 0.0 }
 0x258   :  { %v1371_v41 = vadd.f32 %v1370_v26, %v1369_v27  ;;  %v5076_v26 = vsub.f32 %v3424_v25, %v4682_v5  ;;  %v1087_v27 = vmul.f32 %v5058_v57, %v5058_v57  ;;  %v1382_v47 = vsel %vm270_vm0, %v1086_v12, 0.0 }
 0x259   :  { %v5103_v12 = vsub.f32 %v3427_v2, %v4682_v5  ;;  %v3430_v2 = vld [vmem:[%s8800_s0 + $0x190] sm:$0xff] }
 0x25a   :  { %v1373_v52 = vadd.f32 %v1372_v37, %v1371_v41  ;;  %9020 = vst [vmem:[#allocation4_spill] sm:$0xff] %v5076_v26  ;;  %v3425_v37 = vld [vmem:[%s8800_s0 + $0x168] sm:$0xff]  ;;  %v1089_v59 = vmul.f32 %v5076_v26, %v5076_v26 }
 0x25b   :  { %v5085_v41 = vsub.f32 %v3425_v37, %v4682_v5  ;;  %9023 = vst [vmem:[#allocation7_spill] sm:$0xff] %v5103_v12 }
 0x25c   :  { %v1375_v0 = vadd.f32 %v1374_v51, %v1373_v52  ;;  %v3426_v52 = vld [vmem:[%s8800_s0 + $0x170] sm:$0xff]  ;;  %v1388_v37 = vsel %vm270_vm0, %v1089_v59, 0.0  ;;  %v5130_v59 = vsub.f32 %v3430_v2, %v4682_v5 }
 0x25d   :  { %9021 = vst [vmem:[#allocation5_spill] sm:$0xff] %v5085_v41  ;;  %v5094_v56 = vsub.f32 %v3426_v52, %v4682_v5  ;;  %v1092_v52 = vmul.f32 %v5103_v12, %v5103_v12 }
 0x25e   :  { %v1377_v18 = vadd.f32 %v1376_v63, %v1375_v0  ;;  %v1384_v63 = vsel %vm270_vm0, %v1087_v27, 0.0  ;;  %9026 = vst [vmem:[#allocation10_spill] sm:$0xff] %v5130_v59 }
 0x25f   :  { %9022 = vst [vmem:[#allocation6_spill] sm:$0xff] %v5094_v56 }
 0x260   :  { %v1379_v34 = vadd.f32 %v1378_v16, %v1377_v18  ;;  %v1090_v16 = vmul.f32 %v5085_v41, %v5085_v41  ;;  %v1386_v18 = vsel %vm270_vm0, %v1088_v43, 0.0 }
 0x262   :  { %v1381_v51 = vadd.f32 %v1380_v32, %v1379_v34  ;;  %v3428_v32 = vld [vmem:[%s8800_s0 + $0x180] sm:$0xff]  ;;  %v1091_v34 = vmul.f32 %v5094_v56, %v5094_v56 }
 0x263   :  { %v5112_v27 = vsub.f32 %v3428_v32, %v4682_v5 }
 0x264   :  { %v1383_v0 = vadd.f32 %v1382_v47, %v1381_v51  ;;  %v3429_v51 = vld [vmem:[%s8800_s0 + $0x188] sm:$0xff] }
 0x265   :  { %9024 = vst [vmem:[#allocation8_spill] sm:$0xff] %v5112_v27  ;;  %v5121_v43 = vsub.f32 %v3429_v51, %v4682_v5  ;;  %v3431_v51 = vld [vmem:[%s8800_s0 + $0x198] sm:$0xff] }
 0x266   :  { %v1385_v25 = vadd.f32 %v1384_v63, %v1383_v0  ;;  %v1390_v63 = vsel %vm270_vm0, %v1090_v16, 0.0  ;;  %v5139_v16 = vsub.f32 %v3431_v51, %v4682_v5 }
 0x267   :  { %9025 = vst [vmem:[#allocation9_spill] sm:$0xff] %v5121_v43 }
 0x268   :  { %v1387_v47 = vadd.f32 %v1386_v18, %v1385_v25  ;;  %v1093_v18 = vmul.f32 %v5112_v27, %v5112_v27  ;;  %v1392_v25 = vsel %vm270_vm0, %v1091_v34, 0.0  ;;  %9027 = vst [vmem:[#allocation11_spill] sm:$0xff] %v5139_v16  ;;  %v3432_v27 = vld [vmem:[%s8800_s0 + $0x1a0] sm:$0xff] }
 0x269   :  { %v5148_v34 = vsub.f32 %v3432_v27, %v4682_v5 }
 0x26a   :  { %v1389_v0 = vadd.f32 %v1388_v37, %v1387_v47  ;;  %v1094_v37 = vmul.f32 %v5121_v43, %v5121_v43  ;;  %v1394_v47 = vsel %vm270_vm0, %v1092_v52, 0.0  ;;  %v3433_v43 = vld [vmem:[%s8800_s0 + $0x1a8] sm:$0xff] }
 0x26b   :  { %9028 = vst [vmem:[#allocation12_spill] sm:$0xff] %v5148_v34  ;;  %v5157_v52 = vsub.f32 %v3433_v43, %v4682_v5 }
 0x26c   :  { %v1391_v32 = vadd.f32 %v1390_v63, %v1389_v0  ;;  %v1095_v63 = vmul.f32 %v5130_v59, %v5130_v59  ;;  %v1396_v0 = vsel %vm270_vm0, %v1093_v18, 0.0  ;;  %v3434_v59 = vld [vmem:[%s8800_s0 + $0x1b0] sm:$0xff] }
 0x26d   :  { %9029 = vst [vmem:[#allocation13_spill] sm:$0xff] %v5157_v52  ;;  %v5166_v18 = vsub.f32 %v3434_v59, %v4682_v5 }
 0x26e   :  { %v1393_v2 = vadd.f32 %v1392_v25, %v1391_v32  ;;  %v1096_v25 = vmul.f32 %v5139_v16, %v5139_v16  ;;  %v1398_v32 = vsel %vm270_vm0, %v1094_v37, 0.0  ;;  %v3435_v16 = vld [vmem:[%s8800_s0 + $0x1b8] sm:$0xff] }
 0x26f   :  { %9030 = vst [vmem:[#allocation14_spill] sm:$0xff] %v5166_v18  ;;  %v5175_v37 = vsub.f32 %v3435_v16, %v4682_v5 }
 0x270   :  { %v1395_v51 = vadd.f32 %v1394_v47, %v1393_v2  ;;  %v1097_v47 = vmul.f32 %v5148_v34, %v5148_v34  ;;  %v1400_v2 = vsel %vm270_vm0, %v1095_v63, 0.0  ;;  %v3436_v34 = vld [vmem:[%s8800_s0 + $0x1c0] sm:$0xff] }
 0x271   :  { %9031 = vst [vmem:[#allocation15_spill] sm:$0xff] %v5175_v37  ;;  %v5184_v63 = vsub.f32 %v3436_v34, %v4682_v5 }
 0x272   :  { %v1397_v27 = vadd.f32 %v1396_v0, %v1395_v51  ;;  %v1098_v0 = vmul.f32 %v5157_v52, %v5157_v52  ;;  %v1402_v51 = vsel %vm270_vm0, %v1096_v25, 0.0  ;;  %v3437_v52 = vld [vmem:[%s8800_s0 + $0x1c8] sm:$0xff] }
 0x273   :  { %9032 = vst [vmem:[#allocation16_spill] sm:$0xff] %v5184_v63  ;;  %v5193_v25 = vsub.f32 %v3437_v52, %v4682_v5 }
 0x274   :  { %v1399_v43 = vadd.f32 %v1398_v32, %v1397_v27  ;;  %v1099_v32 = vmul.f32 %v5166_v18, %v5166_v18  ;;  %v1404_v27 = vsel %vm270_vm0, %v1097_v47, 0.0  ;;  %v3438_v18 = vld [vmem:[%s8800_s0 + $0x1d0] sm:$0xff] }
 0x275   :  { %9033 = vst [vmem:[#allocation17_spill] sm:$0xff] %v5193_v25  ;;  %v5202_v47 = vsub.f32 %v3438_v18, %v4682_v5 }
 0x276   :  { %v1401_v59 = vadd.f32 %v1400_v2, %v1399_v43  ;;  %v1100_v2 = vmul.f32 %v5175_v37, %v5175_v37  ;;  %v1406_v43 = vsel %vm270_vm0, %v1098_v0, 0.0  ;;  %v3439_v37 = vld [vmem:[%s8800_s0 + $0x1d8] sm:$0xff] }
 0x277   :  { %9034 = vst [vmem:[#allocation18_spill] sm:$0xff] %v5202_v47  ;;  %v5211_v0 = vsub.f32 %v3439_v37, %v4682_v5 }
 0x278   :  { %v1403_v16 = vadd.f32 %v1402_v51, %v1401_v59  ;;  %v1101_v51 = vmul.f32 %v5184_v63, %v5184_v63  ;;  %v1408_v59 = vsel %vm270_vm0, %v1099_v32, 0.0  ;;  %v3440_v63 = vld [vmem:[%s8800_s0 + $0x1e0] sm:$0xff] }
 0x279   :  { %9035 = vst [vmem:[#allocation19_spill] sm:$0xff] %v5211_v0  ;;  %v5220_v32 = vsub.f32 %v3440_v63, %v4682_v5 }
 0x27a   :  { %v1405_v34 = vadd.f32 %v1404_v27, %v1403_v16  ;;  %v1102_v27 = vmul.f32 %v5193_v25, %v5193_v25  ;;  %v1410_v16 = vsel %vm270_vm0, %v1100_v2, 0.0  ;;  %v3441_v25 = vld [vmem:[%s8800_s0 + $0x1e8] sm:$0xff] }
 0x27b   :  { %9036 = vst [vmem:[#allocation20_spill] sm:$0xff] %v5220_v32  ;;  %v5229_v2 = vsub.f32 %v3441_v25, %v4682_v5 }
 0x27c   :  { %v1407_v52 = vadd.f32 %v1406_v43, %v1405_v34  ;;  %v1103_v43 = vmul.f32 %v5202_v47, %v5202_v47  ;;  %v1412_v34 = vsel %vm270_vm0, %v1101_v51, 0.0  ;;  %v3442_v47 = vld [vmem:[%s8800_s0 + $0x1f0] sm:$0xff] }
 0x27d   :  { %9037 = vst [vmem:[#allocation21_spill] sm:$0xff] %v5229_v2  ;;  %v5238_v51 = vsub.f32 %v3442_v47, %v4682_v5 }
 0x27e   :  { %v1409_v18 = vadd.f32 %v1408_v59, %v1407_v52  ;;  %v1104_v59 = vmul.f32 %v5211_v0, %v5211_v0  ;;  %v1414_v52 = vsel %vm270_vm0, %v1102_v27, 0.0  ;;  %v3443_v0 = vld [vmem:[%s8800_s0 + $0x1f8] sm:$0xff] }
 0x27f   :  { %9038 = vst [vmem:[#allocation22_spill] sm:$0xff] %v5238_v51  ;;  %v5247_v27 = vsub.f32 %v3443_v0, %v4682_v5 }
 0x280   :  { %v1411_v37 = vadd.f32 %v1410_v16, %v1409_v18  ;;  %v1105_v16 = vmul.f32 %v5220_v32, %v5220_v32  ;;  %v1416_v18 = vsel %vm270_vm0, %v1103_v43, 0.0  ;;  %v3444_v32 = vld [vmem:[%s8800_s0 + $0x200] sm:$0xff] }
 0x281   :  { %9039 = vst [vmem:[#allocation23_spill] sm:$0xff] %v5247_v27  ;;  %v5256_v43 = vsub.f32 %v3444_v32, %v4682_v5 }
 0x282   :  { %v1413_v63 = vadd.f32 %v1412_v34, %v1411_v37  ;;  %v1106_v34 = vmul.f32 %v5229_v2, %v5229_v2  ;;  %v1418_v37 = vsel %vm270_vm0, %v1104_v59, 0.0  ;;  %v3445_v2 = vld [vmem:[%s8800_s0 + $0x208] sm:$0xff] }
 0x283   :  { %9040 = vst [vmem:[#allocation24_spill] sm:$0xff] %v5256_v43  ;;  %v5265_v59 = vsub.f32 %v3445_v2, %v4682_v5 }
 0x284   :  { %v1415_v25 = vadd.f32 %v1414_v52, %v1413_v63  ;;  %v1107_v52 = vmul.f32 %v5238_v51, %v5238_v51  ;;  %v1420_v63 = vsel %vm270_vm0, %v1105_v16, 0.0  ;;  %v3446_v51 = vld [vmem:[%s8800_s0 + $0x210] sm:$0xff] }
 0x285   :  { %9041 = vst [vmem:[#allocation25_spill] sm:$0xff] %v5265_v59  ;;  %v5274_v16 = vsub.f32 %v3446_v51, %v4682_v5 }
 0x286   :  { %v1417_v47 = vadd.f32 %v1416_v18, %v1415_v25  ;;  %v1108_v18 = vmul.f32 %v5247_v27, %v5247_v27  ;;  %v1422_v25 = vsel %vm270_vm0, %v1106_v34, 0.0  ;;  %v3447_v27 = vld [vmem:[%s8800_s0 + $0x218] sm:$0xff] }
 0x287   :  { %9042 = vst [vmem:[#allocation26_spill] sm:$0xff] %v5274_v16  ;;  %v5283_v34 = vsub.f32 %v3447_v27, %v4682_v5 }
 0x288   :  { %v1419_v0 = vadd.f32 %v1418_v37, %v1417_v47  ;;  %v1109_v37 = vmul.f32 %v5256_v43, %v5256_v43  ;;  %v1424_v47 = vsel %vm270_vm0, %v1107_v52, 0.0  ;;  %v3448_v43 = vld [vmem:[%s8800_s0 + $0x220] sm:$0xff] }
 0x289   :  { %9043 = vst [vmem:[#allocation27_spill] sm:$0xff] %v5283_v34  ;;  %v5292_v52 = vsub.f32 %v3448_v43, %v4682_v5 }
 0x28a   :  { %v1421_v32 = vadd.f32 %v1420_v63, %v1419_v0  ;;  %v1110_v63 = vmul.f32 %v5265_v59, %v5265_v59  ;;  %v1426_v0 = vsel %vm270_vm0, %v1108_v18, 0.0  ;;  %v3449_v59 = vld [vmem:[%s8800_s0 + $0x228] sm:$0xff] }
 0x28b   :  { %9044 = vst [vmem:[#allocation28_spill] sm:$0xff] %v5292_v52  ;;  %v5301_v18 = vsub.f32 %v3449_v59, %v4682_v5 }
 0x28c   :  { %v1423_v2 = vadd.f32 %v1422_v25, %v1421_v32  ;;  %v1111_v25 = vmul.f32 %v5274_v16, %v5274_v16  ;;  %v1428_v32 = vsel %vm270_vm0, %v1109_v37, 0.0  ;;  %v3450_v16 = vld [vmem:[%s8800_s0 + $0x230] sm:$0xff] }
 0x28d   :  { %9045 = vst [vmem:[#allocation29_spill] sm:$0xff] %v5301_v18  ;;  %v5310_v37 = vsub.f32 %v3450_v16, %v4682_v5 }
 0x28e   :  { %v1425_v51 = vadd.f32 %v1424_v47, %v1423_v2  ;;  %v1112_v47 = vmul.f32 %v5283_v34, %v5283_v34  ;;  %v1430_v2 = vsel %vm270_vm0, %v1110_v63, 0.0  ;;  %v3451_v34 = vld [vmem:[%s8800_s0 + $0x238] sm:$0xff] }
 0x28f   :  { %9046 = vst [vmem:[#allocation30_spill] sm:$0xff] %v5310_v37  ;;  %v5319_v63 = vsub.f32 %v3451_v34, %v4682_v5 }
 0x290   :  { %v1427_v27 = vadd.f32 %v1426_v0, %v1425_v51  ;;  %v1113_v0 = vmul.f32 %v5292_v52, %v5292_v52  ;;  %v1432_v51 = vsel %vm270_vm0, %v1111_v25, 0.0  ;;  %v3452_v52 = vld [vmem:[%s8800_s0 + $0x240] sm:$0xff] }
 0x291   :  { %9047 = vst [vmem:[#allocation31_spill] sm:$0xff] %v5319_v63  ;;  %v5328_v25 = vsub.f32 %v3452_v52, %v4682_v5 }
 0x292   :  { %v1429_v43 = vadd.f32 %v1428_v32, %v1427_v27  ;;  %v1114_v32 = vmul.f32 %v5301_v18, %v5301_v18  ;;  %v1434_v27 = vsel %vm270_vm0, %v1112_v47, 0.0  ;;  %v3453_v18 = vld [vmem:[%s8800_s0 + $0x248] sm:$0xff] }
 0x293   :  { %9048 = vst [vmem:[#allocation32_spill] sm:$0xff] %v5328_v25  ;;  %v5337_v47 = vsub.f32 %v3453_v18, %v4682_v5 }
 0x294   :  { %v1431_v59 = vadd.f32 %v1430_v2, %v1429_v43  ;;  %v1115_v2 = vmul.f32 %v5310_v37, %v5310_v37  ;;  %v1436_v43 = vsel %vm270_vm0, %v1113_v0, 0.0  ;;  %v3454_v37 = vld [vmem:[%s8800_s0 + $0x250] sm:$0xff] }
 0x295   :  { %9049 = vst [vmem:[#allocation33_spill] sm:$0xff] %v5337_v47  ;;  %v5346_v0 = vsub.f32 %v3454_v37, %v4682_v5 }
 0x296   :  { %v1433_v16 = vadd.f32 %v1432_v51, %v1431_v59  ;;  %v1116_v51 = vmul.f32 %v5319_v63, %v5319_v63  ;;  %v1438_v59 = vsel %vm270_vm0, %v1114_v32, 0.0  ;;  %v3455_v63 = vld [vmem:[%s8800_s0 + $0x258] sm:$0xff] }
 0x297   :  { %9050 = vst [vmem:[#allocation34_spill] sm:$0xff] %v5346_v0  ;;  %v5355_v32 = vsub.f32 %v3455_v63, %v4682_v5 }
 0x298   :  { %v1435_v34 = vadd.f32 %v1434_v27, %v1433_v16  ;;  %v1117_v27 = vmul.f32 %v5328_v25, %v5328_v25  ;;  %v1440_v16 = vsel %vm270_vm0, %v1115_v2, 0.0  ;;  %v3456_v25 = vld [vmem:[%s8800_s0 + $0x260] sm:$0xff] }
 0x299   :  { %9051 = vst [vmem:[#allocation35_spill] sm:$0xff] %v5355_v32  ;;  %v5364_v2 = vsub.f32 %v3456_v25, %v4682_v5 }
 0x29a   :  { %v1437_v52 = vadd.f32 %v1436_v43, %v1435_v34  ;;  %v1118_v43 = vmul.f32 %v5337_v47, %v5337_v47  ;;  %v1442_v34 = vsel %vm270_vm0, %v1116_v51, 0.0  ;;  %v3457_v47 = vld [vmem:[%s8800_s0 + $0x268] sm:$0xff] }
 0x29b   :  { %9052 = vst [vmem:[#allocation36_spill] sm:$0xff] %v5364_v2  ;;  %v5373_v51 = vsub.f32 %v3457_v47, %v4682_v5 }
 0x29c   :  { %v1439_v18 = vadd.f32 %v1438_v59, %v1437_v52  ;;  %v1119_v59 = vmul.f32 %v5346_v0, %v5346_v0  ;;  %v1444_v52 = vsel %vm270_vm0, %v1117_v27, 0.0  ;;  %v3458_v0 = vld [vmem:[%s8800_s0 + $0x270] sm:$0xff] }
 0x29d   :  { %9053 = vst [vmem:[#allocation37_spill] sm:$0xff] %v5373_v51  ;;  %v5382_v27 = vsub.f32 %v3458_v0, %v4682_v5 }
 0x29e   :  { %v1441_v37 = vadd.f32 %v1440_v16, %v1439_v18  ;;  %v1120_v16 = vmul.f32 %v5355_v32, %v5355_v32  ;;  %v1446_v18 = vsel %vm270_vm0, %v1118_v43, 0.0  ;;  %v3459_v32 = vld [vmem:[%s8800_s0 + $0x278] sm:$0xff] }
 0x29f   :  { %9054 = vst [vmem:[#allocation38_spill] sm:$0xff] %v5382_v27  ;;  %v5391_v43 = vsub.f32 %v3459_v32, %v4682_v5 }
 0x2a0   :  { %v1443_v63 = vadd.f32 %v1442_v34, %v1441_v37  ;;  %v1121_v34 = vmul.f32 %v5364_v2, %v5364_v2  ;;  %v1448_v37 = vsel %vm270_vm0, %v1119_v59, 0.0  ;;  %v3460_v2 = vld [vmem:[%s8800_s0 + $0x280] sm:$0xff] }
 0x2a1   :  { %9055 = vst [vmem:[#allocation39_spill] sm:$0xff] %v5391_v43  ;;  %v5400_v59 = vsub.f32 %v3460_v2, %v4682_v5 }
 0x2a2   :  { %v1445_v25 = vadd.f32 %v1444_v52, %v1443_v63  ;;  %v1122_v52 = vmul.f32 %v5373_v51, %v5373_v51  ;;  %v1450_v63 = vsel %vm270_vm0, %v1120_v16, 0.0  ;;  %v3461_v51 = vld [vmem:[%s8800_s0 + $0x288] sm:$0xff] }
 0x2a3   :  { %9056 = vst [vmem:[#allocation40_spill] sm:$0xff] %v5400_v59  ;;  %v5409_v16 = vsub.f32 %v3461_v51, %v4682_v5 }
 0x2a4   :  { %v1447_v47 = vadd.f32 %v1446_v18, %v1445_v25  ;;  %v1123_v18 = vmul.f32 %v5382_v27, %v5382_v27  ;;  %v1452_v25 = vsel %vm270_vm0, %v1121_v34, 0.0  ;;  %v3462_v27 = vld [vmem:[%s8800_s0 + $0x290] sm:$0xff] }
 0x2a5   :  { %9057 = vst [vmem:[#allocation41_spill] sm:$0xff] %v5409_v16  ;;  %v5418_v34 = vsub.f32 %v3462_v27, %v4682_v5 }
 0x2a6   :  { %v1449_v0 = vadd.f32 %v1448_v37, %v1447_v47  ;;  %v1124_v37 = vmul.f32 %v5391_v43, %v5391_v43  ;;  %v1454_v47 = vsel %vm270_vm0, %v1122_v52, 0.0  ;;  %v3463_v43 = vld [vmem:[%s8800_s0 + $0x298] sm:$0xff] }
 0x2a7   :  { %9058 = vst [vmem:[#allocation42_spill] sm:$0xff] %v5418_v34  ;;  %v5427_v52 = vsub.f32 %v3463_v43, %v4682_v5 }
 0x2a8   :  { %v1451_v32 = vadd.f32 %v1450_v63, %v1449_v0  ;;  %v1125_v63 = vmul.f32 %v5400_v59, %v5400_v59  ;;  %v1456_v0 = vsel %vm270_vm0, %v1123_v18, 0.0  ;;  %v3464_v59 = vld [vmem:[%s8800_s0 + $0x2a0] sm:$0xff] }
 0x2a9   :  { %9059 = vst [vmem:[#allocation43_spill] sm:$0xff] %v5427_v52  ;;  %v5436_v18 = vsub.f32 %v3464_v59, %v4682_v5 }
 0x2aa   :  { %v1453_v2 = vadd.f32 %v1452_v25, %v1451_v32  ;;  %v1126_v25 = vmul.f32 %v5409_v16, %v5409_v16  ;;  %v1458_v32 = vsel %vm270_vm0, %v1124_v37, 0.0  ;;  %v3465_v16 = vld [vmem:[%s8800_s0 + $0x2a8] sm:$0xff] }
 0x2ab   :  { %9060 = vst [vmem:[#allocation44_spill] sm:$0xff] %v5436_v18  ;;  %v5445_v37 = vsub.f32 %v3465_v16, %v4682_v5 }
 0x2ac   :  { %v1455_v51 = vadd.f32 %v1454_v47, %v1453_v2  ;;  %v1127_v47 = vmul.f32 %v5418_v34, %v5418_v34  ;;  %v1460_v2 = vsel %vm270_vm0, %v1125_v63, 0.0  ;;  %v3466_v34 = vld [vmem:[%s8800_s0 + $0x2b0] sm:$0xff] }
 0x2ad   :  { %9061 = vst [vmem:[#allocation45_spill] sm:$0xff] %v5445_v37  ;;  %v5454_v63 = vsub.f32 %v3466_v34, %v4682_v5 }
 0x2ae   :  { %v1457_v27 = vadd.f32 %v1456_v0, %v1455_v51  ;;  %v1128_v0 = vmul.f32 %v5427_v52, %v5427_v52  ;;  %v1462_v51 = vsel %vm270_vm0, %v1126_v25, 0.0  ;;  %v3467_v52 = vld [vmem:[%s8800_s0 + $0x2b8] sm:$0xff] }
 0x2af   :  { %9062 = vst [vmem:[#allocation46_spill] sm:$0xff] %v5454_v63  ;;  %v5463_v25 = vsub.f32 %v3467_v52, %v4682_v5 }
 0x2b0   :  { %v1459_v43 = vadd.f32 %v1458_v32, %v1457_v27  ;;  %v1129_v32 = vmul.f32 %v5436_v18, %v5436_v18  ;;  %v1464_v27 = vsel %vm270_vm0, %v1127_v47, 0.0  ;;  %v3468_v18 = vld [vmem:[%s8800_s0 + $0x2c0] sm:$0xff] }
 0x2b1   :  { %9063 = vst [vmem:[#allocation47_spill] sm:$0xff] %v5463_v25  ;;  %v5472_v47 = vsub.f32 %v3468_v18, %v4682_v5 }
 0x2b2   :  { %v1461_v59 = vadd.f32 %v1460_v2, %v1459_v43  ;;  %v1130_v2 = vmul.f32 %v5445_v37, %v5445_v37  ;;  %v1466_v43 = vsel %vm270_vm0, %v1128_v0, 0.0  ;;  %v3469_v37 = vld [vmem:[%s8800_s0 + $0x2c8] sm:$0xff] }
 0x2b3   :  { %9064 = vst [vmem:[#allocation48_spill] sm:$0xff] %v5472_v47  ;;  %v5481_v0 = vsub.f32 %v3469_v37, %v4682_v5 }
 0x2b4   :  { %v1463_v16 = vadd.f32 %v1462_v51, %v1461_v59  ;;  %v1131_v51 = vmul.f32 %v5454_v63, %v5454_v63  ;;  %v1468_v59 = vsel %vm270_vm0, %v1129_v32, 0.0  ;;  %v3470_v63 = vld [vmem:[%s8800_s0 + $0x2d0] sm:$0xff] }
 0x2b5   :  { %9065 = vst [vmem:[#allocation49_spill] sm:$0xff] %v5481_v0  ;;  %v5490_v32 = vsub.f32 %v3470_v63, %v4682_v5 }
 0x2b6   :  { %v1465_v34 = vadd.f32 %v1464_v27, %v1463_v16  ;;  %v1132_v27 = vmul.f32 %v5463_v25, %v5463_v25  ;;  %v1470_v16 = vsel %vm270_vm0, %v1130_v2, 0.0  ;;  %v3471_v25 = vld [vmem:[%s8800_s0 + $0x2d8] sm:$0xff] }
 0x2b7   :  { %9066 = vst [vmem:[#allocation50_spill] sm:$0xff] %v5490_v32  ;;  %v5499_v2 = vsub.f32 %v3471_v25, %v4682_v5 }
 0x2b8   :  { %v1467_v52 = vadd.f32 %v1466_v43, %v1465_v34  ;;  %v1133_v43 = vmul.f32 %v5472_v47, %v5472_v47  ;;  %v1472_v34 = vsel %vm270_vm0, %v1131_v51, 0.0  ;;  %v3472_v47 = vld [vmem:[%s8800_s0 + $0x2e0] sm:$0xff] }
 0x2b9   :  { %9067 = vst [vmem:[#allocation51_spill] sm:$0xff] %v5499_v2  ;;  %v5508_v51 = vsub.f32 %v3472_v47, %v4682_v5 }
 0x2ba   :  { %v1469_v18 = vadd.f32 %v1468_v59, %v1467_v52  ;;  %v1134_v59 = vmul.f32 %v5481_v0, %v5481_v0  ;;  %v1474_v52 = vsel %vm270_vm0, %v1132_v27, 0.0  ;;  %v3473_v0 = vld [vmem:[%s8800_s0 + $0x2e8] sm:$0xff] }
 0x2bb   :  { %9068 = vst [vmem:[#allocation52_spill] sm:$0xff] %v5508_v51  ;;  %v5517_v27 = vsub.f32 %v3473_v0, %v4682_v5 }
 0x2bc   :  { %v1471_v37 = vadd.f32 %v1470_v16, %v1469_v18  ;;  %v1135_v16 = vmul.f32 %v5490_v32, %v5490_v32  ;;  %v1476_v18 = vsel %vm270_vm0, %v1133_v43, 0.0  ;;  %v3474_v32 = vld [vmem:[%s8800_s0 + $0x2f0] sm:$0xff] }
 0x2bd   :  { %9069 = vst [vmem:[#allocation53_spill] sm:$0xff] %v5517_v27  ;;  %v5526_v43 = vsub.f32 %v3474_v32, %v4682_v5 }
 0x2be   :  { %v1473_v63 = vadd.f32 %v1472_v34, %v1471_v37  ;;  %v1136_v34 = vmul.f32 %v5499_v2, %v5499_v2  ;;  %v1478_v37 = vsel %vm270_vm0, %v1134_v59, 0.0  ;;  %v3475_v2 = vld [vmem:[%s8800_s0 + $0x2f8] sm:$0xff] }
 0x2bf   :  { %9070 = vst [vmem:[#allocation54_spill] sm:$0xff] %v5526_v43  ;;  %v5535_v59 = vsub.f32 %v3475_v2, %v4682_v5 }
 0x2c0   :  { %v1475_v25 = vadd.f32 %v1474_v52, %v1473_v63  ;;  %v1137_v52 = vmul.f32 %v5508_v51, %v5508_v51  ;;  %v1480_v63 = vsel %vm270_vm0, %v1135_v16, 0.0  ;;  %v3476_v51 = vld [vmem:[%s8800_s0 + $0x300] sm:$0xff] }
 0x2c1   :  { %9071 = vst [vmem:[#allocation55_spill] sm:$0xff] %v5535_v59  ;;  %v5544_v16 = vsub.f32 %v3476_v51, %v4682_v5 }
 0x2c2   :  { %v1477_v47 = vadd.f32 %v1476_v18, %v1475_v25  ;;  %v1138_v18 = vmul.f32 %v5517_v27, %v5517_v27  ;;  %v1482_v25 = vsel %vm270_vm0, %v1136_v34, 0.0  ;;  %v3477_v27 = vld [vmem:[%s8800_s0 + $0x308] sm:$0xff] }
 0x2c3   :  { %9072 = vst [vmem:[#allocation56_spill] sm:$0xff] %v5544_v16  ;;  %v5553_v34 = vsub.f32 %v3477_v27, %v4682_v5 }
 0x2c4   :  { %v1479_v0 = vadd.f32 %v1478_v37, %v1477_v47  ;;  %v1139_v37 = vmul.f32 %v5526_v43, %v5526_v43  ;;  %v1484_v47 = vsel %vm270_vm0, %v1137_v52, 0.0  ;;  %v3478_v43 = vld [vmem:[%s8800_s0 + $0x310] sm:$0xff] }
 0x2c5   :  { %9073 = vst [vmem:[#allocation57_spill] sm:$0xff] %v5553_v34  ;;  %v5562_v52 = vsub.f32 %v3478_v43, %v4682_v5 }
 0x2c6   :  { %v1481_v32 = vadd.f32 %v1480_v63, %v1479_v0  ;;  %v1140_v63 = vmul.f32 %v5535_v59, %v5535_v59  ;;  %v1486_v0 = vsel %vm270_vm0, %v1138_v18, 0.0  ;;  %v3479_v59 = vld [vmem:[%s8800_s0 + $0x318] sm:$0xff] }
 0x2c7   :  { %9074 = vst [vmem:[#allocation58_spill] sm:$0xff] %v5562_v52  ;;  %v5571_v18 = vsub.f32 %v3479_v59, %v4682_v5 }
 0x2c8   :  { %v1483_v2 = vadd.f32 %v1482_v25, %v1481_v32  ;;  %v1141_v25 = vmul.f32 %v5544_v16, %v5544_v16  ;;  %v1488_v32 = vsel %vm270_vm0, %v1139_v37, 0.0  ;;  %v3480_v16 = vld [vmem:[%s8800_s0 + $0x320] sm:$0xff] }
 0x2c9   :  { %9075 = vst [vmem:[#allocation59_spill] sm:$0xff] %v5571_v18  ;;  %v5580_v37 = vsub.f32 %v3480_v16, %v4682_v5 }
 0x2ca   :  { %v1485_v51 = vadd.f32 %v1484_v47, %v1483_v2  ;;  %v1142_v47 = vmul.f32 %v5553_v34, %v5553_v34  ;;  %v1490_v2 = vsel %vm270_vm0, %v1140_v63, 0.0  ;;  %v3481_v34 = vld [vmem:[%s8800_s0 + $0x328] sm:$0xff] }
 0x2cb   :  { %9076 = vst [vmem:[#allocation60_spill] sm:$0xff] %v5580_v37  ;;  %v5589_v63 = vsub.f32 %v3481_v34, %v4682_v5 }
 0x2cc   :  { %v1487_v27 = vadd.f32 %v1486_v0, %v1485_v51  ;;  %v1143_v0 = vmul.f32 %v5562_v52, %v5562_v52  ;;  %v1492_v51 = vsel %vm270_vm0, %v1141_v25, 0.0  ;;  %v3482_v52 = vld [vmem:[%s8800_s0 + $0x330] sm:$0xff] }
 0x2cd   :  { %9077 = vst [vmem:[#allocation61_spill] sm:$0xff] %v5589_v63  ;;  %v5598_v25 = vsub.f32 %v3482_v52, %v4682_v5 }
 0x2ce   :  { %v1489_v43 = vadd.f32 %v1488_v32, %v1487_v27  ;;  %v1144_v32 = vmul.f32 %v5571_v18, %v5571_v18  ;;  %v1494_v27 = vsel %vm270_vm0, %v1142_v47, 0.0  ;;  %v3483_v18 = vld [vmem:[%s8800_s0 + $0x338] sm:$0xff] }
 0x2cf   :  { %9078 = vst [vmem:[#allocation62_spill] sm:$0xff] %v5598_v25  ;;  %v5607_v47 = vsub.f32 %v3483_v18, %v4682_v5 }
 0x2d0   :  { %v1491_v59 = vadd.f32 %v1490_v2, %v1489_v43  ;;  %v1145_v2 = vmul.f32 %v5580_v37, %v5580_v37  ;;  %v1496_v43 = vsel %vm270_vm0, %v1143_v0, 0.0  ;;  %v3484_v37 = vld [vmem:[%s8800_s0 + $0x340] sm:$0xff] }
 0x2d1   :  { %9079 = vst [vmem:[#allocation63_spill] sm:$0xff] %v5607_v47  ;;  %v5616_v0 = vsub.f32 %v3484_v37, %v4682_v5 }
 0x2d2   :  { %v1493_v16 = vadd.f32 %v1492_v51, %v1491_v59  ;;  %v1146_v51 = vmul.f32 %v5589_v63, %v5589_v63  ;;  %v1498_v59 = vsel %vm270_vm0, %v1144_v32, 0.0  ;;  %v3485_v63 = vld [vmem:[%s8800_s0 + $0x348] sm:$0xff] }
 0x2d3   :  { %9080 = vst [vmem:[#allocation64_spill] sm:$0xff] %v5616_v0  ;;  %v5625_v32 = vsub.f32 %v3485_v63, %v4682_v5 }
 0x2d4   :  { %v1495_v34 = vadd.f32 %v1494_v27, %v1493_v16  ;;  %v1147_v27 = vmul.f32 %v5598_v25, %v5598_v25  ;;  %v1500_v16 = vsel %vm270_vm0, %v1145_v2, 0.0  ;;  %v3486_v25 = vld [vmem:[%s8800_s0 + $0x350] sm:$0xff] }
 0x2d5   :  { %9081 = vst [vmem:[#allocation65_spill] sm:$0xff] %v5625_v32  ;;  %v5634_v2 = vsub.f32 %v3486_v25, %v4682_v5 }
 0x2d6   :  { %v1497_v52 = vadd.f32 %v1496_v43, %v1495_v34  ;;  %v1148_v43 = vmul.f32 %v5607_v47, %v5607_v47  ;;  %v1502_v34 = vsel %vm270_vm0, %v1146_v51, 0.0  ;;  %v3487_v47 = vld [vmem:[%s8800_s0 + $0x358] sm:$0xff] }
 0x2d7   :  { %9082 = vst [vmem:[#allocation66_spill] sm:$0xff] %v5634_v2  ;;  %v5643_v51 = vsub.f32 %v3487_v47, %v4682_v5 }
 0x2d8   :  { %v1499_v18 = vadd.f32 %v1498_v59, %v1497_v52  ;;  %v1149_v59 = vmul.f32 %v5616_v0, %v5616_v0  ;;  %v1504_v52 = vsel %vm270_vm0, %v1147_v27, 0.0  ;;  %v3488_v0 = vld [vmem:[%s8800_s0 + $0x360] sm:$0xff] }
 0x2d9   :  { %9083 = vst [vmem:[#allocation67_spill] sm:$0xff] %v5643_v51  ;;  %v5652_v27 = vsub.f32 %v3488_v0, %v4682_v5 }
 0x2da   :  { %v1501_v37 = vadd.f32 %v1500_v16, %v1499_v18  ;;  %v1150_v16 = vmul.f32 %v5625_v32, %v5625_v32  ;;  %v1506_v18 = vsel %vm270_vm0, %v1148_v43, 0.0  ;;  %v3489_v32 = vld [vmem:[%s8800_s0 + $0x368] sm:$0xff] }
 0x2db   :  { %9084 = vst [vmem:[#allocation68_spill] sm:$0xff] %v5652_v27  ;;  %v5661_v43 = vsub.f32 %v3489_v32, %v4682_v5 }
 0x2dc   :  { %v1503_v63 = vadd.f32 %v1502_v34, %v1501_v37  ;;  %v1151_v34 = vmul.f32 %v5634_v2, %v5634_v2  ;;  %v1508_v37 = vsel %vm270_vm0, %v1149_v59, 0.0  ;;  %v3490_v2 = vld [vmem:[%s8800_s0 + $0x370] sm:$0xff] }
 0x2dd   :  { %9085 = vst [vmem:[#allocation69_spill] sm:$0xff] %v5661_v43  ;;  %v5670_v59 = vsub.f32 %v3490_v2, %v4682_v5 }
 0x2de   :  { %v1505_v25 = vadd.f32 %v1504_v52, %v1503_v63  ;;  %v1152_v52 = vmul.f32 %v5643_v51, %v5643_v51  ;;  %v1510_v63 = vsel %vm270_vm0, %v1150_v16, 0.0  ;;  %v3491_v51 = vld [vmem:[%s8800_s0 + $0x378] sm:$0xff] }
 0x2df   :  { %9086 = vst [vmem:[#allocation70_spill] sm:$0xff] %v5670_v59  ;;  %v5679_v16 = vsub.f32 %v3491_v51, %v4682_v5 }
 0x2e0   :  { %v1507_v47 = vadd.f32 %v1506_v18, %v1505_v25  ;;  %v1153_v18 = vmul.f32 %v5652_v27, %v5652_v27  ;;  %v1512_v25 = vsel %vm270_vm0, %v1151_v34, 0.0  ;;  %v3492_v27 = vld [vmem:[%s8800_s0 + $0x380] sm:$0xff] }
 0x2e1   :  { %9087 = vst [vmem:[#allocation71_spill] sm:$0xff] %v5679_v16  ;;  %v5688_v34 = vsub.f32 %v3492_v27, %v4682_v5 }
 0x2e2   :  { %v1509_v0 = vadd.f32 %v1508_v37, %v1507_v47  ;;  %v1154_v37 = vmul.f32 %v5661_v43, %v5661_v43  ;;  %v1514_v47 = vsel %vm270_vm0, %v1152_v52, 0.0  ;;  %v3493_v43 = vld [vmem:[%s8800_s0 + $0x388] sm:$0xff] }
 0x2e3   :  { %9088 = vst [vmem:[#allocation72_spill] sm:$0xff] %v5688_v34  ;;  %v5697_v52 = vsub.f32 %v3493_v43, %v4682_v5 }
 0x2e4   :  { %v1511_v32 = vadd.f32 %v1510_v63, %v1509_v0  ;;  %v1155_v63 = vmul.f32 %v5670_v59, %v5670_v59  ;;  %v1516_v0 = vsel %vm270_vm0, %v1153_v18, 0.0  ;;  %v3494_v59 = vld [vmem:[%s8800_s0 + $0x390] sm:$0xff] }
 0x2e5   :  { %9089 = vst [vmem:[#allocation73_spill] sm:$0xff] %v5697_v52  ;;  %v5706_v18 = vsub.f32 %v3494_v59, %v4682_v5 }
 0x2e6   :  { %v1513_v2 = vadd.f32 %v1512_v25, %v1511_v32  ;;  %v1156_v25 = vmul.f32 %v5679_v16, %v5679_v16  ;;  %v1518_v32 = vsel %vm270_vm0, %v1154_v37, 0.0  ;;  %v3495_v16 = vld [vmem:[%s8800_s0 + $0x398] sm:$0xff] }
 0x2e7   :  { %9090 = vst [vmem:[#allocation74_spill] sm:$0xff] %v5706_v18  ;;  %v5715_v37 = vsub.f32 %v3495_v16, %v4682_v5 }
 0x2e8   :  { %v1515_v51 = vadd.f32 %v1514_v47, %v1513_v2  ;;  %v1157_v47 = vmul.f32 %v5688_v34, %v5688_v34  ;;  %v1520_v2 = vsel %vm270_vm0, %v1155_v63, 0.0  ;;  %v3496_v34 = vld [vmem:[%s8800_s0 + $0x3a0] sm:$0xff] }
 0x2e9   :  { %9091 = vst [vmem:[#allocation75_spill] sm:$0xff] %v5715_v37  ;;  %v5724_v63 = vsub.f32 %v3496_v34, %v4682_v5 }
 0x2ea   :  { %v1517_v27 = vadd.f32 %v1516_v0, %v1515_v51  ;;  %v1158_v0 = vmul.f32 %v5697_v52, %v5697_v52  ;;  %v1522_v51 = vsel %vm270_vm0, %v1156_v25, 0.0  ;;  %v3497_v52 = vld [vmem:[%s8800_s0 + $0x3a8] sm:$0xff] }
 0x2eb   :  { %9092 = vst [vmem:[#allocation76_spill] sm:$0xff] %v5724_v63  ;;  %v5733_v25 = vsub.f32 %v3497_v52, %v4682_v5 }
 0x2ec   :  { %v1519_v43 = vadd.f32 %v1518_v32, %v1517_v27  ;;  %v1159_v32 = vmul.f32 %v5706_v18, %v5706_v18  ;;  %v1524_v27 = vsel %vm270_vm0, %v1157_v47, 0.0  ;;  %v3498_v18 = vld [vmem:[%s8800_s0 + $0x3b0] sm:$0xff] }
 0x2ed   :  { %9093 = vst [vmem:[#allocation77_spill] sm:$0xff] %v5733_v25  ;;  %v5742_v47 = vsub.f32 %v3498_v18, %v4682_v5 }
 0x2ee   :  { %v1521_v59 = vadd.f32 %v1520_v2, %v1519_v43  ;;  %v1160_v2 = vmul.f32 %v5715_v37, %v5715_v37  ;;  %v1526_v43 = vsel %vm270_vm0, %v1158_v0, 0.0  ;;  %v3499_v37 = vld [vmem:[%s8800_s0 + $0x3b8] sm:$0xff] }
 0x2ef   :  { %9094 = vst [vmem:[#allocation78_spill] sm:$0xff] %v5742_v47  ;;  %v5751_v0 = vsub.f32 %v3499_v37, %v4682_v5 }
 0x2f0   :  { %v1523_v16 = vadd.f32 %v1522_v51, %v1521_v59  ;;  %v1161_v51 = vmul.f32 %v5724_v63, %v5724_v63  ;;  %v1528_v59 = vsel %vm270_vm0, %v1159_v32, 0.0  ;;  %v3500_v63 = vld [vmem:[%s8800_s0 + $0x3c0] sm:$0xff] }
 0x2f1   :  { %9095 = vst [vmem:[#allocation79_spill] sm:$0xff] %v5751_v0  ;;  %v5760_v32 = vsub.f32 %v3500_v63, %v4682_v5 }
 0x2f2   :  { %v1525_v34 = vadd.f32 %v1524_v27, %v1523_v16  ;;  %v1162_v27 = vmul.f32 %v5733_v25, %v5733_v25  ;;  %v1530_v16 = vsel %vm270_vm0, %v1160_v2, 0.0  ;;  %v3501_v25 = vld [vmem:[%s8800_s0 + $0x3c8] sm:$0xff] }
 0x2f3   :  { %9096 = vst [vmem:[#allocation80_spill] sm:$0xff] %v5760_v32  ;;  %v5769_v2 = vsub.f32 %v3501_v25, %v4682_v5 }
 0x2f4   :  { %v1527_v52 = vadd.f32 %v1526_v43, %v1525_v34  ;;  %v1163_v43 = vmul.f32 %v5742_v47, %v5742_v47  ;;  %v1532_v34 = vsel %vm270_vm0, %v1161_v51, 0.0  ;;  %v3502_v47 = vld [vmem:[%s8800_s0 + $0x3d0] sm:$0xff] }
 0x2f5   :  { %9097 = vst [vmem:[#allocation81_spill] sm:$0xff] %v5769_v2  ;;  %v5778_v51 = vsub.f32 %v3502_v47, %v4682_v5 }
 0x2f6   :  { %v1529_v18 = vadd.f32 %v1528_v59, %v1527_v52  ;;  %v1164_v59 = vmul.f32 %v5751_v0, %v5751_v0  ;;  %v1534_v52 = vsel %vm270_vm0, %v1162_v27, 0.0  ;;  %v3503_v0 = vld [vmem:[%s8800_s0 + $0x3d8] sm:$0xff] }
 0x2f7   :  { %9098 = vst [vmem:[#allocation82_spill] sm:$0xff] %v5778_v51  ;;  %v5787_v27 = vsub.f32 %v3503_v0, %v4682_v5 }
 0x2f8   :  { %v1531_v37 = vadd.f32 %v1530_v16, %v1529_v18  ;;  %v1165_v16 = vmul.f32 %v5760_v32, %v5760_v32  ;;  %v1536_v18 = vsel %vm270_vm0, %v1163_v43, 0.0  ;;  %v3504_v32 = vld [vmem:[%s8800_s0 + $0x3e0] sm:$0xff] }
 0x2f9   :  { %9099 = vst [vmem:[#allocation83_spill] sm:$0xff] %v5787_v27  ;;  %v5796_v43 = vsub.f32 %v3504_v32, %v4682_v5 }
 0x2fa   :  { %v1533_v63 = vadd.f32 %v1532_v34, %v1531_v37  ;;  %v1166_v34 = vmul.f32 %v5769_v2, %v5769_v2  ;;  %v1538_v37 = vsel %vm270_vm0, %v1164_v59, 0.0  ;;  %v3505_v2 = vld [vmem:[%s8800_s0 + $0x3e8] sm:$0xff] }
 0x2fb   :  { %9100 = vst [vmem:[#allocation84_spill] sm:$0xff] %v5796_v43  ;;  %v5805_v59 = vsub.f32 %v3505_v2, %v4682_v5 }
 0x2fc   :  { %v1535_v25 = vadd.f32 %v1534_v52, %v1533_v63  ;;  %v1167_v52 = vmul.f32 %v5778_v51, %v5778_v51  ;;  %v1540_v63 = vsel %vm270_vm0, %v1165_v16, 0.0  ;;  %v3506_v51 = vld [vmem:[%s8800_s0 + $0x3f0] sm:$0xff] }
 0x2fd   :  { %9101 = vst [vmem:[#allocation85_spill] sm:$0xff] %v5805_v59  ;;  %v5814_v16 = vsub.f32 %v3506_v51, %v4682_v5 }
 0x2fe   :  { %v1537_v47 = vadd.f32 %v1536_v18, %v1535_v25  ;;  %v1168_v18 = vmul.f32 %v5787_v27, %v5787_v27  ;;  %v1542_v25 = vsel %vm270_vm0, %v1166_v34, 0.0  ;;  %v3507_v27 = vld [vmem:[%s8800_s0 + $0x3f8] sm:$0xff] }
 0x2ff   :  { %9102 = vst [vmem:[#allocation86_spill] sm:$0xff] %v5814_v16  ;;  %v5823_v34 = vsub.f32 %v3507_v27, %v4682_v5 }
 0x300   :  { %v1539_v0 = vadd.f32 %v1538_v37, %v1537_v47  ;;  %v1169_v37 = vmul.f32 %v5796_v43, %v5796_v43  ;;  %v1544_v47 = vsel %vm270_vm0, %v1167_v52, 0.0  ;;  %v3508_v43 = vld [vmem:[%s8800_s0 + $0x400] sm:$0xff] }
 0x301   :  { %9103 = vst [vmem:[#allocation87_spill] sm:$0xff] %v5823_v34  ;;  %v5832_v52 = vsub.f32 %v3508_v43, %v4682_v5 }
 0x302   :  { %v1541_v32 = vadd.f32 %v1540_v63, %v1539_v0  ;;  %v1170_v63 = vmul.f32 %v5805_v59, %v5805_v59  ;;  %v1546_v0 = vsel %vm270_vm0, %v1168_v18, 0.0  ;;  %v3509_v59 = vld [vmem:[%s8800_s0 + $0x408] sm:$0xff] }
 0x303   :  { %9104 = vst [vmem:[#allocation88_spill] sm:$0xff] %v5832_v52  ;;  %v5841_v18 = vsub.f32 %v3509_v59, %v4682_v5 }
 0x304   :  { %v1543_v2 = vadd.f32 %v1542_v25, %v1541_v32  ;;  %v1171_v25 = vmul.f32 %v5814_v16, %v5814_v16  ;;  %v1548_v32 = vsel %vm270_vm0, %v1169_v37, 0.0  ;;  %v3510_v16 = vld [vmem:[%s8800_s0 + $0x410] sm:$0xff] }
 0x305   :  { %9105 = vst [vmem:[#allocation89_spill] sm:$0xff] %v5841_v18  ;;  %v5850_v37 = vsub.f32 %v3510_v16, %v4682_v5 }
 0x306   :  { %v1545_v51 = vadd.f32 %v1544_v47, %v1543_v2  ;;  %v1172_v47 = vmul.f32 %v5823_v34, %v5823_v34  ;;  %v1550_v2 = vsel %vm270_vm0, %v1170_v63, 0.0  ;;  %v3511_v34 = vld [vmem:[%s8800_s0 + $0x418] sm:$0xff] }
 0x307   :  { %9106 = vst [vmem:[#allocation90_spill] sm:$0xff] %v5850_v37  ;;  %v5859_v63 = vsub.f32 %v3511_v34, %v4682_v5 }
 0x308   :  { %v1547_v27 = vadd.f32 %v1546_v0, %v1545_v51  ;;  %v1173_v0 = vmul.f32 %v5832_v52, %v5832_v52  ;;  %v1552_v51 = vsel %vm270_vm0, %v1171_v25, 0.0  ;;  %v3512_v52 = vld [vmem:[%s8800_s0 + $0x420] sm:$0xff] }
 0x309   :  { %9107 = vst [vmem:[#allocation91_spill] sm:$0xff] %v5859_v63  ;;  %v5868_v25 = vsub.f32 %v3512_v52, %v4682_v5 }
 0x30a   :  { %v1549_v43 = vadd.f32 %v1548_v32, %v1547_v27  ;;  %v1174_v32 = vmul.f32 %v5841_v18, %v5841_v18  ;;  %v1554_v27 = vsel %vm270_vm0, %v1172_v47, 0.0  ;;  %v3513_v18 = vld [vmem:[%s8800_s0 + $0x428] sm:$0xff] }
 0x30b   :  { %9108 = vst [vmem:[#allocation92_spill] sm:$0xff] %v5868_v25  ;;  %v5877_v47 = vsub.f32 %v3513_v18, %v4682_v5 }
 0x30c   :  { %v1551_v59 = vadd.f32 %v1550_v2, %v1549_v43  ;;  %v1175_v2 = vmul.f32 %v5850_v37, %v5850_v37  ;;  %v1556_v43 = vsel %vm270_vm0, %v1173_v0, 0.0  ;;  %v3514_v37 = vld [vmem:[%s8800_s0 + $0x430] sm:$0xff] }
 0x30d   :  { %9109 = vst [vmem:[#allocation93_spill] sm:$0xff] %v5877_v47  ;;  %v5886_v0 = vsub.f32 %v3514_v37, %v4682_v5 }
 0x30e   :  { %v1553_v16 = vadd.f32 %v1552_v51, %v1551_v59  ;;  %v1176_v51 = vmul.f32 %v5859_v63, %v5859_v63  ;;  %v1558_v59 = vsel %vm270_vm0, %v1174_v32, 0.0  ;;  %v3515_v63 = vld [vmem:[%s8800_s0 + $0x438] sm:$0xff] }
 0x30f   :  { %9110 = vst [vmem:[#allocation94_spill] sm:$0xff] %v5886_v0  ;;  %v5895_v32 = vsub.f32 %v3515_v63, %v4682_v5 }
 0x310   :  { %v1555_v34 = vadd.f32 %v1554_v27, %v1553_v16  ;;  %v1177_v27 = vmul.f32 %v5868_v25, %v5868_v25  ;;  %v1560_v16 = vsel %vm270_vm0, %v1175_v2, 0.0  ;;  %v3516_v25 = vld [vmem:[%s8800_s0 + $0x440] sm:$0xff] }
 0x311   :  { %9111 = vst [vmem:[#allocation95_spill] sm:$0xff] %v5895_v32  ;;  %v5904_v2 = vsub.f32 %v3516_v25, %v4682_v5 }
 0x312   :  { %v1557_v52 = vadd.f32 %v1556_v43, %v1555_v34  ;;  %v1178_v43 = vmul.f32 %v5877_v47, %v5877_v47  ;;  %v1562_v34 = vsel %vm270_vm0, %v1176_v51, 0.0  ;;  %v3517_v47 = vld [vmem:[%s8800_s0 + $0x448] sm:$0xff] }
 0x313   :  { %9112 = vst [vmem:[#allocation96_spill] sm:$0xff] %v5904_v2  ;;  %v5913_v51 = vsub.f32 %v3517_v47, %v4682_v5 }
 0x314   :  { %v1559_v18 = vadd.f32 %v1558_v59, %v1557_v52  ;;  %v1179_v59 = vmul.f32 %v5886_v0, %v5886_v0  ;;  %v1564_v52 = vsel %vm270_vm0, %v1177_v27, 0.0  ;;  %v3518_v0 = vld [vmem:[%s8800_s0 + $0x450] sm:$0xff] }
 0x315   :  { %9113 = vst [vmem:[#allocation97_spill] sm:$0xff] %v5913_v51  ;;  %v5922_v27 = vsub.f32 %v3518_v0, %v4682_v5 }
 0x316   :  { %v1561_v37 = vadd.f32 %v1560_v16, %v1559_v18  ;;  %v1180_v16 = vmul.f32 %v5895_v32, %v5895_v32  ;;  %v1566_v18 = vsel %vm270_vm0, %v1178_v43, 0.0  ;;  %v3519_v32 = vld [vmem:[%s8800_s0 + $0x458] sm:$0xff] }
 0x317   :  { %9114 = vst [vmem:[#allocation98_spill] sm:$0xff] %v5922_v27  ;;  %v5931_v43 = vsub.f32 %v3519_v32, %v4682_v5 }
 0x318   :  { %v1563_v63 = vadd.f32 %v1562_v34, %v1561_v37  ;;  %v1181_v34 = vmul.f32 %v5904_v2, %v5904_v2  ;;  %v1568_v37 = vsel %vm270_vm0, %v1179_v59, 0.0  ;;  %v3520_v2 = vld [vmem:[%s8800_s0 + $0x460] sm:$0xff] }
 0x319   :  { %9115 = vst [vmem:[#allocation99_spill] sm:$0xff] %v5931_v43  ;;  %v5940_v59 = vsub.f32 %v3520_v2, %v4682_v5 }
 0x31a   :  { %v1565_v25 = vadd.f32 %v1564_v52, %v1563_v63  ;;  %v1182_v52 = vmul.f32 %v5913_v51, %v5913_v51  ;;  %v1570_v63 = vsel %vm270_vm0, %v1180_v16, 0.0  ;;  %v3521_v51 = vld [vmem:[%s8800_s0 + $0x468] sm:$0xff] }
 0x31b   :  { %9116 = vst [vmem:[#allocation100_spill] sm:$0xff] %v5940_v59  ;;  %v5949_v16 = vsub.f32 %v3521_v51, %v4682_v5 }
 0x31c   :  { %v1567_v47 = vadd.f32 %v1566_v18, %v1565_v25  ;;  %v1183_v18 = vmul.f32 %v5922_v27, %v5922_v27  ;;  %v1572_v25 = vsel %vm270_vm0, %v1181_v34, 0.0  ;;  %v3522_v27 = vld [vmem:[%s8800_s0 + $0x470] sm:$0xff] }
 0x31d   :  { %9117 = vst [vmem:[#allocation101_spill] sm:$0xff] %v5949_v16  ;;  %v5958_v34 = vsub.f32 %v3522_v27, %v4682_v5 }
 0x31e   :  { %v1569_v0 = vadd.f32 %v1568_v37, %v1567_v47  ;;  %v1184_v37 = vmul.f32 %v5931_v43, %v5931_v43  ;;  %v1574_v47 = vsel %vm270_vm0, %v1182_v52, 0.0  ;;  %v3523_v43 = vld [vmem:[%s8800_s0 + $0x478] sm:$0xff] }
 0x31f   :  { %9118 = vst [vmem:[#allocation102_spill] sm:$0xff] %v5958_v34  ;;  %v5967_v52 = vsub.f32 %v3523_v43, %v4682_v5 }
 0x320   :  { %v1571_v32 = vadd.f32 %v1570_v63, %v1569_v0  ;;  %v1185_v63 = vmul.f32 %v5940_v59, %v5940_v59  ;;  %v1576_v0 = vsel %vm270_vm0, %v1183_v18, 0.0  ;;  %v3524_v59 = vld [vmem:[%s8800_s0 + $0x480] sm:$0xff] }
 0x321   :  { %9119 = vst [vmem:[#allocation103_spill] sm:$0xff] %v5967_v52  ;;  %v5976_v18 = vsub.f32 %v3524_v59, %v4682_v5 }
 0x322   :  { %v1573_v2 = vadd.f32 %v1572_v25, %v1571_v32  ;;  %v1186_v25 = vmul.f32 %v5949_v16, %v5949_v16  ;;  %v1578_v32 = vsel %vm270_vm0, %v1184_v37, 0.0  ;;  %v3525_v16 = vld [vmem:[%s8800_s0 + $0x488] sm:$0xff] }
 0x323   :  { %9120 = vst [vmem:[#allocation104_spill] sm:$0xff] %v5976_v18  ;;  %v5985_v37 = vsub.f32 %v3525_v16, %v4682_v5 }
 0x324   :  { %v1575_v51 = vadd.f32 %v1574_v47, %v1573_v2  ;;  %v1187_v47 = vmul.f32 %v5958_v34, %v5958_v34  ;;  %v1580_v2 = vsel %vm270_vm0, %v1185_v63, 0.0  ;;  %v3526_v34 = vld [vmem:[%s8800_s0 + $0x490] sm:$0xff] }
 0x325   :  { %9121 = vst [vmem:[#allocation105_spill] sm:$0xff] %v5985_v37  ;;  %v5994_v63 = vsub.f32 %v3526_v34, %v4682_v5 }
 0x326   :  { %v1577_v27 = vadd.f32 %v1576_v0, %v1575_v51  ;;  %v1188_v0 = vmul.f32 %v5967_v52, %v5967_v52  ;;  %v1582_v51 = vsel %vm270_vm0, %v1186_v25, 0.0  ;;  %v3527_v52 = vld [vmem:[%s8800_s0 + $0x498] sm:$0xff] }
 0x327   :  { %9122 = vst [vmem:[#allocation106_spill] sm:$0xff] %v5994_v63  ;;  %v6003_v25 = vsub.f32 %v3527_v52, %v4682_v5 }
 0x328   :  { %v1579_v43 = vadd.f32 %v1578_v32, %v1577_v27  ;;  %v1189_v32 = vmul.f32 %v5976_v18, %v5976_v18  ;;  %v1584_v27 = vsel %vm270_vm0, %v1187_v47, 0.0  ;;  %v3528_v18 = vld [vmem:[%s8800_s0 + $0x4a0] sm:$0xff] }
 0x329   :  { %9123 = vst [vmem:[#allocation107_spill] sm:$0xff] %v6003_v25  ;;  %v6012_v47 = vsub.f32 %v3528_v18, %v4682_v5 }
 0x32a   :  { %v1581_v59 = vadd.f32 %v1580_v2, %v1579_v43  ;;  %v1190_v2 = vmul.f32 %v5985_v37, %v5985_v37  ;;  %v1586_v43 = vsel %vm270_vm0, %v1188_v0, 0.0  ;;  %v3529_v37 = vld [vmem:[%s8800_s0 + $0x4a8] sm:$0xff] }
 0x32b   :  { %9124 = vst [vmem:[#allocation108_spill] sm:$0xff] %v6012_v47  ;;  %v6021_v0 = vsub.f32 %v3529_v37, %v4682_v5 }
 0x32c   :  { %v1583_v16 = vadd.f32 %v1582_v51, %v1581_v59  ;;  %v1191_v51 = vmul.f32 %v5994_v63, %v5994_v63  ;;  %v1588_v59 = vsel %vm270_vm0, %v1189_v32, 0.0  ;;  %v3530_v63 = vld [vmem:[%s8800_s0 + $0x4b0] sm:$0xff] }
 0x32d   :  { %9125 = vst [vmem:[#allocation109_spill] sm:$0xff] %v6021_v0  ;;  %v6030_v32 = vsub.f32 %v3530_v63, %v4682_v5 }
 0x32e   :  { %v1585_v34 = vadd.f32 %v1584_v27, %v1583_v16  ;;  %v1192_v27 = vmul.f32 %v6003_v25, %v6003_v25  ;;  %v1590_v16 = vsel %vm270_vm0, %v1190_v2, 0.0  ;;  %v3531_v25 = vld [vmem:[%s8800_s0 + $0x4b8] sm:$0xff] }
 0x32f   :  { %9126 = vst [vmem:[#allocation110_spill] sm:$0xff] %v6030_v32  ;;  %v6039_v2 = vsub.f32 %v3531_v25, %v4682_v5 }
 0x330   :  { %v1587_v52 = vadd.f32 %v1586_v43, %v1585_v34  ;;  %v1193_v43 = vmul.f32 %v6012_v47, %v6012_v47  ;;  %v1592_v34 = vsel %vm270_vm0, %v1191_v51, 0.0  ;;  %v3532_v47 = vld [vmem:[%s8800_s0 + $0x4c0] sm:$0xff] }
 0x331   :  { %9127 = vst [vmem:[#allocation111_spill] sm:$0xff] %v6039_v2  ;;  %v6048_v51 = vsub.f32 %v3532_v47, %v4682_v5 }
 0x332   :  { %v1589_v18 = vadd.f32 %v1588_v59, %v1587_v52  ;;  %v1194_v59 = vmul.f32 %v6021_v0, %v6021_v0  ;;  %v1594_v52 = vsel %vm270_vm0, %v1192_v27, 0.0  ;;  %v3533_v0 = vld [vmem:[%s8800_s0 + $0x4c8] sm:$0xff] }
 0x333   :  { %9128 = vst [vmem:[#allocation112_spill] sm:$0xff] %v6048_v51  ;;  %v6057_v27 = vsub.f32 %v3533_v0, %v4682_v5 }
 0x334   :  { %v1591_v37 = vadd.f32 %v1590_v16, %v1589_v18  ;;  %v1195_v16 = vmul.f32 %v6030_v32, %v6030_v32  ;;  %v1596_v18 = vsel %vm270_vm0, %v1193_v43, 0.0  ;;  %v3534_v32 = vld [vmem:[%s8800_s0 + $0x4d0] sm:$0xff] }
 0x335   :  { %9129 = vst [vmem:[#allocation113_spill] sm:$0xff] %v6057_v27  ;;  %v6066_v43 = vsub.f32 %v3534_v32, %v4682_v5 }
 0x336   :  { %v1593_v63 = vadd.f32 %v1592_v34, %v1591_v37  ;;  %v1196_v34 = vmul.f32 %v6039_v2, %v6039_v2  ;;  %v1598_v37 = vsel %vm270_vm0, %v1194_v59, 0.0  ;;  %v3535_v2 = vld [vmem:[%s8800_s0 + $0x4d8] sm:$0xff] }
 0x337   :  { %9130 = vst [vmem:[#allocation114_spill] sm:$0xff] %v6066_v43  ;;  %v6075_v59 = vsub.f32 %v3535_v2, %v4682_v5 }
 0x338   :  { %v1595_v25 = vadd.f32 %v1594_v52, %v1593_v63  ;;  %v1197_v52 = vmul.f32 %v6048_v51, %v6048_v51  ;;  %v1600_v63 = vsel %vm270_vm0, %v1195_v16, 0.0  ;;  %v3536_v51 = vld [vmem:[%s8800_s0 + $0x4e0] sm:$0xff] }
 0x339   :  { %9131 = vst [vmem:[#allocation115_spill] sm:$0xff] %v6075_v59  ;;  %v6084_v16 = vsub.f32 %v3536_v51, %v4682_v5 }
 0x33a   :  { %v1597_v47 = vadd.f32 %v1596_v18, %v1595_v25  ;;  %v1198_v18 = vmul.f32 %v6057_v27, %v6057_v27  ;;  %v1602_v25 = vsel %vm270_vm0, %v1196_v34, 0.0  ;;  %v3537_v27 = vld [vmem:[%s8800_s0 + $0x4e8] sm:$0xff] }
 0x33b   :  { %9132 = vst [vmem:[#allocation116_spill] sm:$0xff] %v6084_v16  ;;  %v6093_v34 = vsub.f32 %v3537_v27, %v4682_v5 }
 0x33c   :  { %v1599_v0 = vadd.f32 %v1598_v37, %v1597_v47  ;;  %v1199_v37 = vmul.f32 %v6066_v43, %v6066_v43  ;;  %v1604_v47 = vsel %vm270_vm0, %v1197_v52, 0.0  ;;  %v3538_v43 = vld [vmem:[%s8800_s0 + $0x4f0] sm:$0xff] }
 0x33d   :  { %9133 = vst [vmem:[#allocation117_spill] sm:$0xff] %v6093_v34  ;;  %v6102_v52 = vsub.f32 %v3538_v43, %v4682_v5 }
 0x33e   :  { %v1601_v32 = vadd.f32 %v1600_v63, %v1599_v0  ;;  %v1200_v63 = vmul.f32 %v6075_v59, %v6075_v59  ;;  %v1606_v0 = vsel %vm270_vm0, %v1198_v18, 0.0  ;;  %v3539_v59 = vld [vmem:[%s8800_s0 + $0x4f8] sm:$0xff] }
 0x33f   :  { %9134 = vst [vmem:[#allocation118_spill] sm:$0xff] %v6102_v52  ;;  %v6111_v18 = vsub.f32 %v3539_v59, %v4682_v5 }
 0x340   :  { %v1603_v2 = vadd.f32 %v1602_v25, %v1601_v32  ;;  %v1201_v25 = vmul.f32 %v6084_v16, %v6084_v16  ;;  %v1608_v32 = vsel %vm270_vm0, %v1199_v37, 0.0  ;;  %v3540_v16 = vld [vmem:[%s8800_s0 + $0x500] sm:$0xff] }
 0x341   :  { %9135 = vst [vmem:[#allocation119_spill] sm:$0xff] %v6111_v18  ;;  %v6120_v37 = vsub.f32 %v3540_v16, %v4682_v5 }
 0x342   :  { %v1605_v51 = vadd.f32 %v1604_v47, %v1603_v2  ;;  %v1202_v47 = vmul.f32 %v6093_v34, %v6093_v34  ;;  %v1610_v2 = vsel %vm270_vm0, %v1200_v63, 0.0  ;;  %v3541_v34 = vld [vmem:[%s8800_s0 + $0x508] sm:$0xff] }
 0x343   :  { %9136 = vst [vmem:[#allocation120_spill] sm:$0xff] %v6120_v37  ;;  %v6129_v63 = vsub.f32 %v3541_v34, %v4682_v5 }
 0x344   :  { %v1607_v27 = vadd.f32 %v1606_v0, %v1605_v51  ;;  %v1203_v0 = vmul.f32 %v6102_v52, %v6102_v52  ;;  %v1612_v51 = vsel %vm270_vm0, %v1201_v25, 0.0  ;;  %v3542_v52 = vld [vmem:[%s8800_s0 + $0x510] sm:$0xff] }
 0x345   :  { %9137 = vst [vmem:[#allocation121_spill] sm:$0xff] %v6129_v63  ;;  %v6138_v25 = vsub.f32 %v3542_v52, %v4682_v5 }
 0x346   :  { %v1609_v43 = vadd.f32 %v1608_v32, %v1607_v27  ;;  %v1204_v32 = vmul.f32 %v6111_v18, %v6111_v18  ;;  %v1614_v27 = vsel %vm270_vm0, %v1202_v47, 0.0  ;;  %v3543_v18 = vld [vmem:[%s8800_s0 + $0x518] sm:$0xff] }
 0x347   :  { %9138 = vst [vmem:[#allocation122_spill] sm:$0xff] %v6138_v25  ;;  %v6147_v47 = vsub.f32 %v3543_v18, %v4682_v5 }
 0x348   :  { %v1611_v59 = vadd.f32 %v1610_v2, %v1609_v43  ;;  %v1205_v2 = vmul.f32 %v6120_v37, %v6120_v37  ;;  %v1616_v43 = vsel %vm270_vm0, %v1203_v0, 0.0  ;;  %v3544_v37 = vld [vmem:[%s8800_s0 + $0x520] sm:$0xff] }
 0x349   :  { %9139 = vst [vmem:[#allocation123_spill] sm:$0xff] %v6147_v47  ;;  %v6156_v0 = vsub.f32 %v3544_v37, %v4682_v5 }
 0x34a   :  { %v1613_v16 = vadd.f32 %v1612_v51, %v1611_v59  ;;  %v1206_v51 = vmul.f32 %v6129_v63, %v6129_v63  ;;  %v1618_v59 = vsel %vm270_vm0, %v1204_v32, 0.0  ;;  %v3545_v63 = vld [vmem:[%s8800_s0 + $0x528] sm:$0xff] }
 0x34b   :  { %9140 = vst [vmem:[#allocation124_spill] sm:$0xff] %v6156_v0  ;;  %v6165_v32 = vsub.f32 %v3545_v63, %v4682_v5 }
 0x34c   :  { %v1615_v34 = vadd.f32 %v1614_v27, %v1613_v16  ;;  %v1207_v27 = vmul.f32 %v6138_v25, %v6138_v25  ;;  %v1620_v16 = vsel %vm270_vm0, %v1205_v2, 0.0  ;;  %v3546_v25 = vld [vmem:[%s8800_s0 + $0x530] sm:$0xff] }
 0x34d   :  { %9141 = vst [vmem:[#allocation125_spill] sm:$0xff] %v6165_v32  ;;  %v6174_v2 = vsub.f32 %v3546_v25, %v4682_v5 }
 0x34e   :  { %v1617_v52 = vadd.f32 %v1616_v43, %v1615_v34  ;;  %v1208_v43 = vmul.f32 %v6147_v47, %v6147_v47  ;;  %v1622_v34 = vsel %vm270_vm0, %v1206_v51, 0.0  ;;  %v3547_v47 = vld [vmem:[%s8800_s0 + $0x538] sm:$0xff] }
 0x34f   :  { %9142 = vst [vmem:[#allocation126_spill] sm:$0xff] %v6174_v2  ;;  %v6183_v51 = vsub.f32 %v3547_v47, %v4682_v5 }
 0x350   :  { %v1619_v18 = vadd.f32 %v1618_v59, %v1617_v52  ;;  %v1209_v59 = vmul.f32 %v6156_v0, %v6156_v0  ;;  %v1624_v52 = vsel %vm270_vm0, %v1207_v27, 0.0  ;;  %v3548_v0 = vld [vmem:[%s8800_s0 + $0x540] sm:$0xff] }
 0x351   :  { %9143 = vst [vmem:[#allocation127_spill] sm:$0xff] %v6183_v51  ;;  %v6192_v27 = vsub.f32 %v3548_v0, %v4682_v5 }
 0x352   :  { %v1621_v37 = vadd.f32 %v1620_v16, %v1619_v18  ;;  %v1210_v16 = vmul.f32 %v6165_v32, %v6165_v32  ;;  %v1626_v18 = vsel %vm270_vm0, %v1208_v43, 0.0  ;;  %v3549_v32 = vld [vmem:[%s8800_s0 + $0x548] sm:$0xff] }
 0x353   :  { %9144 = vst [vmem:[#allocation128_spill] sm:$0xff] %v6192_v27  ;;  %v6201_v43 = vsub.f32 %v3549_v32, %v4682_v5 }
 0x354   :  { %v1623_v63 = vadd.f32 %v1622_v34, %v1621_v37  ;;  %v1211_v34 = vmul.f32 %v6174_v2, %v6174_v2  ;;  %v1628_v37 = vsel %vm270_vm0, %v1209_v59, 0.0  ;;  %v3550_v2 = vld [vmem:[%s8800_s0 + $0x550] sm:$0xff] }
 0x355   :  { %9145 = vst [vmem:[#allocation129_spill] sm:$0xff] %v6201_v43  ;;  %v6210_v59 = vsub.f32 %v3550_v2, %v4682_v5 }
 0x356   :  { %v1625_v25 = vadd.f32 %v1624_v52, %v1623_v63  ;;  %v1212_v52 = vmul.f32 %v6183_v51, %v6183_v51  ;;  %v1630_v63 = vsel %vm270_vm0, %v1210_v16, 0.0  ;;  %v3551_v51 = vld [vmem:[%s8800_s0 + $0x558] sm:$0xff] }
 0x357   :  { %9146 = vst [vmem:[#allocation130_spill] sm:$0xff] %v6210_v59  ;;  %v6219_v16 = vsub.f32 %v3551_v51, %v4682_v5 }
 0x358   :  { %v1627_v47 = vadd.f32 %v1626_v18, %v1625_v25  ;;  %v1213_v18 = vmul.f32 %v6192_v27, %v6192_v27  ;;  %v1632_v25 = vsel %vm270_vm0, %v1211_v34, 0.0  ;;  %v3552_v27 = vld [vmem:[%s8800_s0 + $0x560] sm:$0xff] }
 0x359   :  { %9147 = vst [vmem:[#allocation131_spill] sm:$0xff] %v6219_v16  ;;  %v6228_v34 = vsub.f32 %v3552_v27, %v4682_v5 }
 0x35a   :  { %v1629_v0 = vadd.f32 %v1628_v37, %v1627_v47  ;;  %v1214_v37 = vmul.f32 %v6201_v43, %v6201_v43  ;;  %v1634_v47 = vsel %vm270_vm0, %v1212_v52, 0.0  ;;  %v3553_v43 = vld [vmem:[%s8800_s0 + $0x568] sm:$0xff] }
 0x35b   :  { %9148 = vst [vmem:[#allocation132_spill] sm:$0xff] %v6228_v34  ;;  %v6237_v52 = vsub.f32 %v3553_v43, %v4682_v5 }
 0x35c   :  { %v1631_v32 = vadd.f32 %v1630_v63, %v1629_v0  ;;  %v1215_v63 = vmul.f32 %v6210_v59, %v6210_v59  ;;  %v1636_v0 = vsel %vm270_vm0, %v1213_v18, 0.0  ;;  %v3554_v59 = vld [vmem:[%s8800_s0 + $0x570] sm:$0xff] }
 0x35d   :  { %9149 = vst [vmem:[#allocation133_spill] sm:$0xff] %v6237_v52  ;;  %v6246_v18 = vsub.f32 %v3554_v59, %v4682_v5 }
 0x35e   :  { %v1633_v2 = vadd.f32 %v1632_v25, %v1631_v32  ;;  %v1216_v25 = vmul.f32 %v6219_v16, %v6219_v16  ;;  %v1638_v32 = vsel %vm270_vm0, %v1214_v37, 0.0  ;;  %v3555_v16 = vld [vmem:[%s8800_s0 + $0x578] sm:$0xff] }
 0x35f   :  { %9150 = vst [vmem:[#allocation134_spill] sm:$0xff] %v6246_v18  ;;  %v6255_v37 = vsub.f32 %v3555_v16, %v4682_v5 }
 0x360   :  { %v1635_v51 = vadd.f32 %v1634_v47, %v1633_v2  ;;  %v1217_v47 = vmul.f32 %v6228_v34, %v6228_v34  ;;  %v1640_v2 = vsel %vm270_vm0, %v1215_v63, 0.0  ;;  %v3556_v34 = vld [vmem:[%s8800_s0 + $0x580] sm:$0xff] }
 0x361   :  { %9151 = vst [vmem:[#allocation135_spill] sm:$0xff] %v6255_v37  ;;  %v6264_v63 = vsub.f32 %v3556_v34, %v4682_v5 }
 0x362   :  { %v1637_v27 = vadd.f32 %v1636_v0, %v1635_v51  ;;  %v1218_v0 = vmul.f32 %v6237_v52, %v6237_v52  ;;  %v1642_v51 = vsel %vm270_vm0, %v1216_v25, 0.0  ;;  %v3557_v52 = vld [vmem:[%s8800_s0 + $0x588] sm:$0xff] }
 0x363   :  { %9152 = vst [vmem:[#allocation136_spill] sm:$0xff] %v6264_v63  ;;  %v6273_v25 = vsub.f32 %v3557_v52, %v4682_v5 }
 0x364   :  { %v1639_v43 = vadd.f32 %v1638_v32, %v1637_v27  ;;  %v1219_v32 = vmul.f32 %v6246_v18, %v6246_v18  ;;  %v1644_v27 = vsel %vm270_vm0, %v1217_v47, 0.0  ;;  %v3558_v18 = vld [vmem:[%s8800_s0 + $0x590] sm:$0xff] }
 0x365   :  { %9153 = vst [vmem:[#allocation137_spill] sm:$0xff] %v6273_v25  ;;  %v6282_v47 = vsub.f32 %v3558_v18, %v4682_v5 }
 0x366   :  { %v1641_v59 = vadd.f32 %v1640_v2, %v1639_v43  ;;  %v1220_v2 = vmul.f32 %v6255_v37, %v6255_v37  ;;  %v1646_v43 = vsel %vm270_vm0, %v1218_v0, 0.0  ;;  %v3559_v37 = vld [vmem:[%s8800_s0 + $0x598] sm:$0xff] }
 0x367   :  { %9154 = vst [vmem:[#allocation138_spill] sm:$0xff] %v6282_v47  ;;  %v6291_v0 = vsub.f32 %v3559_v37, %v4682_v5 }
 0x368   :  { %v1643_v16 = vadd.f32 %v1642_v51, %v1641_v59  ;;  %v1221_v51 = vmul.f32 %v6264_v63, %v6264_v63  ;;  %v1648_v59 = vsel %vm270_vm0, %v1219_v32, 0.0  ;;  %v3560_v63 = vld [vmem:[%s8800_s0 + $0x5a0] sm:$0xff] }
 0x369   :  { %9155 = vst [vmem:[#allocation139_spill] sm:$0xff] %v6291_v0  ;;  %v6300_v32 = vsub.f32 %v3560_v63, %v4682_v5 }
 0x36a   :  { %v1645_v34 = vadd.f32 %v1644_v27, %v1643_v16  ;;  %v1222_v27 = vmul.f32 %v6273_v25, %v6273_v25  ;;  %v1650_v16 = vsel %vm270_vm0, %v1220_v2, 0.0  ;;  %v3561_v25 = vld [vmem:[%s8800_s0 + $0x5a8] sm:$0xff] }
 0x36b   :  { %9156 = vst [vmem:[#allocation140_spill] sm:$0xff] %v6300_v32  ;;  %v6309_v2 = vsub.f32 %v3561_v25, %v4682_v5 }
 0x36c   :  { %v1647_v52 = vadd.f32 %v1646_v43, %v1645_v34  ;;  %v1223_v43 = vmul.f32 %v6282_v47, %v6282_v47  ;;  %v1652_v34 = vsel %vm270_vm0, %v1221_v51, 0.0  ;;  %v3562_v47 = vld [vmem:[%s8800_s0 + $0x5b0] sm:$0xff] }
 0x36d   :  { %9157 = vst [vmem:[#allocation141_spill] sm:$0xff] %v6309_v2  ;;  %v6318_v51 = vsub.f32 %v3562_v47, %v4682_v5 }
 0x36e   :  { %v1649_v18 = vadd.f32 %v1648_v59, %v1647_v52  ;;  %v1224_v59 = vmul.f32 %v6291_v0, %v6291_v0  ;;  %v1654_v52 = vsel %vm270_vm0, %v1222_v27, 0.0  ;;  %v3563_v0 = vld [vmem:[%s8800_s0 + $0x5b8] sm:$0xff] }
 0x36f   :  { %9158 = vst [vmem:[#allocation142_spill] sm:$0xff] %v6318_v51  ;;  %v6327_v27 = vsub.f32 %v3563_v0, %v4682_v5 }
 0x370   :  { %v1651_v37 = vadd.f32 %v1650_v16, %v1649_v18  ;;  %v1225_v16 = vmul.f32 %v6300_v32, %v6300_v32  ;;  %v1656_v18 = vsel %vm270_vm0, %v1223_v43, 0.0  ;;  %v3564_v32 = vld [vmem:[%s8800_s0 + $0x5c0] sm:$0xff] }
 0x371   :  { %9159 = vst [vmem:[#allocation143_spill] sm:$0xff] %v6327_v27  ;;  %v6336_v43 = vsub.f32 %v3564_v32, %v4682_v5 }
 0x372   :  { %v1653_v63 = vadd.f32 %v1652_v34, %v1651_v37  ;;  %v1226_v34 = vmul.f32 %v6309_v2, %v6309_v2  ;;  %v1658_v37 = vsel %vm270_vm0, %v1224_v59, 0.0  ;;  %v3565_v2 = vld [vmem:[%s8800_s0 + $0x5c8] sm:$0xff] }
 0x373   :  { %9160 = vst [vmem:[#allocation144_spill] sm:$0xff] %v6336_v43  ;;  %v6345_v59 = vsub.f32 %v3565_v2, %v4682_v5 }
 0x374   :  { %v1655_v25 = vadd.f32 %v1654_v52, %v1653_v63  ;;  %v1227_v52 = vmul.f32 %v6318_v51, %v6318_v51  ;;  %v1660_v63 = vsel %vm270_vm0, %v1225_v16, 0.0  ;;  %v3566_v51 = vld [vmem:[%s8800_s0 + $0x5d0] sm:$0xff] }
 0x375   :  { %9161 = vst [vmem:[#allocation145_spill] sm:$0xff] %v6345_v59  ;;  %v6354_v16 = vsub.f32 %v3566_v51, %v4682_v5 }
 0x376   :  { %v1657_v47 = vadd.f32 %v1656_v18, %v1655_v25  ;;  %v1228_v18 = vmul.f32 %v6327_v27, %v6327_v27  ;;  %v1662_v25 = vsel %vm270_vm0, %v1226_v34, 0.0  ;;  %v3567_v27 = vld [vmem:[%s8800_s0 + $0x5d8] sm:$0xff] }
 0x377   :  { %9162 = vst [vmem:[#allocation146_spill] sm:$0xff] %v6354_v16  ;;  %v6363_v34 = vsub.f32 %v3567_v27, %v4682_v5 }
 0x378   :  { %v1659_v0 = vadd.f32 %v1658_v37, %v1657_v47  ;;  %v1229_v37 = vmul.f32 %v6336_v43, %v6336_v43  ;;  %v1664_v47 = vsel %vm270_vm0, %v1227_v52, 0.0  ;;  %v3568_v43 = vld [vmem:[%s8800_s0 + $0x5e0] sm:$0xff] }
 0x379   :  { %9163 = vst [vmem:[#allocation147_spill] sm:$0xff] %v6363_v34  ;;  %v6372_v52 = vsub.f32 %v3568_v43, %v4682_v5 }
 0x37a   :  { %v1661_v32 = vadd.f32 %v1660_v63, %v1659_v0  ;;  %v1230_v63 = vmul.f32 %v6345_v59, %v6345_v59  ;;  %v1666_v0 = vsel %vm270_vm0, %v1228_v18, 0.0  ;;  %v3569_v59 = vld [vmem:[%s8800_s0 + $0x5e8] sm:$0xff] }
 0x37b   :  { %9164 = vst [vmem:[#allocation148_spill] sm:$0xff] %v6372_v52  ;;  %v6381_v18 = vsub.f32 %v3569_v59, %v4682_v5 }
 0x37c   :  { %v1663_v2 = vadd.f32 %v1662_v25, %v1661_v32  ;;  %v1231_v25 = vmul.f32 %v6354_v16, %v6354_v16  ;;  %v1668_v32 = vsel %vm270_vm0, %v1229_v37, 0.0  ;;  %v3570_v16 = vld [vmem:[%s8800_s0 + $0x5f0] sm:$0xff] }
 0x37d   :  { %9165 = vst [vmem:[#allocation149_spill] sm:$0xff] %v6381_v18  ;;  %v6390_v37 = vsub.f32 %v3570_v16, %v4682_v5 }
 0x37e   :  { %v1665_v51 = vadd.f32 %v1664_v47, %v1663_v2  ;;  %v1232_v47 = vmul.f32 %v6363_v34, %v6363_v34  ;;  %v1670_v2 = vsel %vm270_vm0, %v1230_v63, 0.0  ;;  %v3571_v34 = vld [vmem:[%s8800_s0 + $0x5f8] sm:$0xff] }
 0x37f   :  { %9166 = vst [vmem:[#allocation150_spill] sm:$0xff] %v6390_v37  ;;  %v6399_v63 = vsub.f32 %v3571_v34, %v4682_v5 }
 0x380   :  { %v1667_v27 = vadd.f32 %v1666_v0, %v1665_v51  ;;  %v1233_v0 = vmul.f32 %v6372_v52, %v6372_v52  ;;  %v1672_v51 = vsel %vm270_vm0, %v1231_v25, 0.0  ;;  %v3572_v52 = vld [vmem:[%s8800_s0 + $0x600] sm:$0xff] }
 0x381   :  { %9167 = vst [vmem:[#allocation151_spill] sm:$0xff] %v6399_v63  ;;  %v6408_v25 = vsub.f32 %v3572_v52, %v4682_v5 }
 0x382   :  { %v1669_v43 = vadd.f32 %v1668_v32, %v1667_v27  ;;  %v1234_v32 = vmul.f32 %v6381_v18, %v6381_v18  ;;  %v1674_v27 = vsel %vm270_vm0, %v1232_v47, 0.0  ;;  %v3573_v18 = vld [vmem:[%s8800_s0 + $0x608] sm:$0xff] }
 0x383   :  { %9168 = vst [vmem:[#allocation152_spill] sm:$0xff] %v6408_v25  ;;  %v6417_v47 = vsub.f32 %v3573_v18, %v4682_v5 }
 0x384   :  { %v1671_v59 = vadd.f32 %v1670_v2, %v1669_v43  ;;  %v1235_v2 = vmul.f32 %v6390_v37, %v6390_v37  ;;  %v1676_v43 = vsel %vm270_vm0, %v1233_v0, 0.0  ;;  %v3574_v37 = vld [vmem:[%s8800_s0 + $0x610] sm:$0xff] }
 0x385   :  { %9169 = vst [vmem:[#allocation153_spill] sm:$0xff] %v6417_v47  ;;  %v6426_v0 = vsub.f32 %v3574_v37, %v4682_v5 }
 0x386   :  { %v1673_v16 = vadd.f32 %v1672_v51, %v1671_v59  ;;  %v1236_v51 = vmul.f32 %v6399_v63, %v6399_v63  ;;  %v1678_v59 = vsel %vm270_vm0, %v1234_v32, 0.0  ;;  %v3575_v63 = vld [vmem:[%s8800_s0 + $0x618] sm:$0xff] }
 0x387   :  { %9170 = vst [vmem:[#allocation154_spill] sm:$0xff] %v6426_v0  ;;  %v6435_v32 = vsub.f32 %v3575_v63, %v4682_v5 }
 0x388   :  { %v1675_v34 = vadd.f32 %v1674_v27, %v1673_v16  ;;  %v1237_v27 = vmul.f32 %v6408_v25, %v6408_v25  ;;  %v1680_v16 = vsel %vm270_vm0, %v1235_v2, 0.0  ;;  %v3576_v25 = vld [vmem:[%s8800_s0 + $0x620] sm:$0xff] }
 0x389   :  { %9171 = vst [vmem:[#allocation155_spill] sm:$0xff] %v6435_v32  ;;  %v6444_v2 = vsub.f32 %v3576_v25, %v4682_v5 }
 0x38a   :  { %v1677_v52 = vadd.f32 %v1676_v43, %v1675_v34  ;;  %v1238_v43 = vmul.f32 %v6417_v47, %v6417_v47  ;;  %v1682_v34 = vsel %vm270_vm0, %v1236_v51, 0.0  ;;  %v3577_v47 = vld [vmem:[%s8800_s0 + $0x628] sm:$0xff] }
 0x38b   :  { %9172 = vst [vmem:[#allocation156_spill] sm:$0xff] %v6444_v2  ;;  %v6453_v51 = vsub.f32 %v3577_v47, %v4682_v5 }
 0x38c   :  { %v1679_v18 = vadd.f32 %v1678_v59, %v1677_v52  ;;  %v1239_v59 = vmul.f32 %v6426_v0, %v6426_v0  ;;  %v1684_v52 = vsel %vm270_vm0, %v1237_v27, 0.0  ;;  %v3578_v0 = vld [vmem:[%s8800_s0 + $0x630] sm:$0xff] }
 0x38d   :  { %9173 = vst [vmem:[#allocation157_spill] sm:$0xff] %v6453_v51  ;;  %v6462_v27 = vsub.f32 %v3578_v0, %v4682_v5 }
 0x38e   :  { %v1681_v37 = vadd.f32 %v1680_v16, %v1679_v18  ;;  %v1240_v16 = vmul.f32 %v6435_v32, %v6435_v32  ;;  %v1686_v18 = vsel %vm270_vm0, %v1238_v43, 0.0  ;;  %v3579_v32 = vld [vmem:[%s8800_s0 + $0x638] sm:$0xff] }
 0x38f   :  { %9174 = vst [vmem:[#allocation158_spill] sm:$0xff] %v6462_v27  ;;  %v6471_v43 = vsub.f32 %v3579_v32, %v4682_v5 }
 0x390   :  { %v1683_v63 = vadd.f32 %v1682_v34, %v1681_v37  ;;  %v1241_v34 = vmul.f32 %v6444_v2, %v6444_v2  ;;  %v1688_v37 = vsel %vm270_vm0, %v1239_v59, 0.0  ;;  %v3580_v2 = vld [vmem:[%s8800_s0 + $0x640] sm:$0xff] }
 0x391   :  { %9175 = vst [vmem:[#allocation159_spill] sm:$0xff] %v6471_v43  ;;  %v6480_v59 = vsub.f32 %v3580_v2, %v4682_v5 }
 0x392   :  { %v1685_v25 = vadd.f32 %v1684_v52, %v1683_v63  ;;  %v1242_v52 = vmul.f32 %v6453_v51, %v6453_v51  ;;  %v1690_v63 = vsel %vm270_vm0, %v1240_v16, 0.0  ;;  %v3581_v51 = vld [vmem:[%s8800_s0 + $0x648] sm:$0xff] }
 0x393   :  { %9176 = vst [vmem:[#allocation160_spill] sm:$0xff] %v6480_v59  ;;  %v6489_v16 = vsub.f32 %v3581_v51, %v4682_v5 }
 0x394   :  { %v1687_v47 = vadd.f32 %v1686_v18, %v1685_v25  ;;  %v1243_v18 = vmul.f32 %v6462_v27, %v6462_v27  ;;  %v1692_v25 = vsel %vm270_vm0, %v1241_v34, 0.0  ;;  %v3582_v27 = vld [vmem:[%s8800_s0 + $0x650] sm:$0xff] }
 0x395   :  { %9177 = vst [vmem:[#allocation161_spill] sm:$0xff] %v6489_v16  ;;  %v6498_v34 = vsub.f32 %v3582_v27, %v4682_v5 }
 0x396   :  { %v1689_v0 = vadd.f32 %v1688_v37, %v1687_v47  ;;  %v1244_v37 = vmul.f32 %v6471_v43, %v6471_v43  ;;  %v1694_v47 = vsel %vm270_vm0, %v1242_v52, 0.0  ;;  %v3583_v43 = vld [vmem:[%s8800_s0 + $0x658] sm:$0xff] }
 0x397   :  { %9178 = vst [vmem:[#allocation162_spill] sm:$0xff] %v6498_v34  ;;  %v6507_v52 = vsub.f32 %v3583_v43, %v4682_v5 }
 0x398   :  { %v1691_v32 = vadd.f32 %v1690_v63, %v1689_v0  ;;  %v1245_v63 = vmul.f32 %v6480_v59, %v6480_v59  ;;  %v1696_v0 = vsel %vm270_vm0, %v1243_v18, 0.0  ;;  %v3584_v59 = vld [vmem:[%s8800_s0 + $0x660] sm:$0xff] }
 0x399   :  { %9179 = vst [vmem:[#allocation163_spill] sm:$0xff] %v6507_v52  ;;  %v6516_v18 = vsub.f32 %v3584_v59, %v4682_v5 }
 0x39a   :  { %v1693_v2 = vadd.f32 %v1692_v25, %v1691_v32  ;;  %v1246_v25 = vmul.f32 %v6489_v16, %v6489_v16  ;;  %v1698_v32 = vsel %vm270_vm0, %v1244_v37, 0.0  ;;  %v3585_v16 = vld [vmem:[%s8800_s0 + $0x668] sm:$0xff] }
 0x39b   :  { %9180 = vst [vmem:[#allocation164_spill] sm:$0xff] %v6516_v18  ;;  %v6525_v37 = vsub.f32 %v3585_v16, %v4682_v5 }
 0x39c   :  { %v1695_v51 = vadd.f32 %v1694_v47, %v1693_v2  ;;  %v1247_v47 = vmul.f32 %v6498_v34, %v6498_v34  ;;  %v1700_v2 = vsel %vm270_vm0, %v1245_v63, 0.0  ;;  %v3586_v34 = vld [vmem:[%s8800_s0 + $0x670] sm:$0xff] }
 0x39d   :  { %9181 = vst [vmem:[#allocation165_spill] sm:$0xff] %v6525_v37  ;;  %v6534_v63 = vsub.f32 %v3586_v34, %v4682_v5 }
 0x39e   :  { %v1697_v27 = vadd.f32 %v1696_v0, %v1695_v51  ;;  %v1248_v0 = vmul.f32 %v6507_v52, %v6507_v52  ;;  %v1702_v51 = vsel %vm270_vm0, %v1246_v25, 0.0  ;;  %v3587_v52 = vld [vmem:[%s8800_s0 + $0x678] sm:$0xff] }
 0x39f   :  { %9182 = vst [vmem:[#allocation166_spill] sm:$0xff] %v6534_v63  ;;  %v6543_v25 = vsub.f32 %v3587_v52, %v4682_v5 }
 0x3a0   :  { %v1699_v43 = vadd.f32 %v1698_v32, %v1697_v27  ;;  %v1249_v32 = vmul.f32 %v6516_v18, %v6516_v18  ;;  %v1704_v27 = vsel %vm270_vm0, %v1247_v47, 0.0  ;;  %v3588_v18 = vld [vmem:[%s8800_s0 + $0x680] sm:$0xff] }
 0x3a1   :  { %9183 = vst [vmem:[#allocation167_spill] sm:$0xff] %v6543_v25  ;;  %v6552_v47 = vsub.f32 %v3588_v18, %v4682_v5 }
 0x3a2   :  { %v1701_v59 = vadd.f32 %v1700_v2, %v1699_v43  ;;  %v1250_v2 = vmul.f32 %v6525_v37, %v6525_v37  ;;  %v1706_v43 = vsel %vm270_vm0, %v1248_v0, 0.0  ;;  %v3589_v37 = vld [vmem:[%s8800_s0 + $0x688] sm:$0xff] }
 0x3a3   :  { %9184 = vst [vmem:[#allocation168_spill] sm:$0xff] %v6552_v47  ;;  %v6561_v0 = vsub.f32 %v3589_v37, %v4682_v5 }
 0x3a4   :  { %v1703_v16 = vadd.f32 %v1702_v51, %v1701_v59  ;;  %v1251_v51 = vmul.f32 %v6534_v63, %v6534_v63  ;;  %v1708_v59 = vsel %vm270_vm0, %v1249_v32, 0.0  ;;  %v3590_v63 = vld [vmem:[%s8800_s0 + $0x690] sm:$0xff] }
 0x3a5   :  { %9185 = vst [vmem:[#allocation169_spill] sm:$0xff] %v6561_v0  ;;  %v6570_v32 = vsub.f32 %v3590_v63, %v4682_v5 }
 0x3a6   :  { %v1705_v34 = vadd.f32 %v1704_v27, %v1703_v16  ;;  %v1252_v27 = vmul.f32 %v6543_v25, %v6543_v25  ;;  %v1710_v16 = vsel %vm270_vm0, %v1250_v2, 0.0  ;;  %v3591_v25 = vld [vmem:[%s8800_s0 + $0x698] sm:$0xff] }
 0x3a7   :  { %9186 = vst [vmem:[#allocation170_spill] sm:$0xff] %v6570_v32  ;;  %v6579_v2 = vsub.f32 %v3591_v25, %v4682_v5 }
 0x3a8   :  { %v1707_v52 = vadd.f32 %v1706_v43, %v1705_v34  ;;  %v1253_v43 = vmul.f32 %v6552_v47, %v6552_v47  ;;  %v1712_v34 = vsel %vm270_vm0, %v1251_v51, 0.0  ;;  %v3592_v47 = vld [vmem:[%s8800_s0 + $0x6a0] sm:$0xff] }
 0x3a9   :  { %9187 = vst [vmem:[#allocation171_spill] sm:$0xff] %v6579_v2  ;;  %v6588_v51 = vsub.f32 %v3592_v47, %v4682_v5 }
 0x3aa   :  { %v1709_v18 = vadd.f32 %v1708_v59, %v1707_v52  ;;  %v1254_v59 = vmul.f32 %v6561_v0, %v6561_v0  ;;  %v1714_v52 = vsel %vm270_vm0, %v1252_v27, 0.0  ;;  %v3593_v0 = vld [vmem:[%s8800_s0 + $0x6a8] sm:$0xff] }
 0x3ab   :  { %9188 = vst [vmem:[#allocation172_spill] sm:$0xff] %v6588_v51  ;;  %v6597_v27 = vsub.f32 %v3593_v0, %v4682_v5 }
 0x3ac   :  { %v1711_v37 = vadd.f32 %v1710_v16, %v1709_v18  ;;  %v1255_v16 = vmul.f32 %v6570_v32, %v6570_v32  ;;  %v1716_v18 = vsel %vm270_vm0, %v1253_v43, 0.0  ;;  %v3594_v32 = vld [vmem:[%s8800_s0 + $0x6b0] sm:$0xff] }
 0x3ad   :  { %9189 = vst [vmem:[#allocation173_spill] sm:$0xff] %v6597_v27  ;;  %v6606_v43 = vsub.f32 %v3594_v32, %v4682_v5 }
 0x3ae   :  { %v1713_v63 = vadd.f32 %v1712_v34, %v1711_v37  ;;  %v1256_v34 = vmul.f32 %v6579_v2, %v6579_v2  ;;  %v1718_v37 = vsel %vm270_vm0, %v1254_v59, 0.0  ;;  %v3595_v2 = vld [vmem:[%s8800_s0 + $0x6b8] sm:$0xff] }
 0x3af   :  { %9190 = vst [vmem:[#allocation174_spill] sm:$0xff] %v6606_v43  ;;  %v6615_v59 = vsub.f32 %v3595_v2, %v4682_v5 }
 0x3b0   :  { %v1715_v25 = vadd.f32 %v1714_v52, %v1713_v63  ;;  %v1257_v52 = vmul.f32 %v6588_v51, %v6588_v51  ;;  %v1720_v63 = vsel %vm270_vm0, %v1255_v16, 0.0  ;;  %v3596_v51 = vld [vmem:[%s8800_s0 + $0x6c0] sm:$0xff] }
 0x3b1   :  { %9191 = vst [vmem:[#allocation175_spill] sm:$0xff] %v6615_v59  ;;  %v6624_v16 = vsub.f32 %v3596_v51, %v4682_v5 }
 0x3b2   :  { %v1717_v47 = vadd.f32 %v1716_v18, %v1715_v25  ;;  %v1258_v18 = vmul.f32 %v6597_v27, %v6597_v27  ;;  %v1722_v25 = vsel %vm270_vm0, %v1256_v34, 0.0  ;;  %v3597_v27 = vld [vmem:[%s8800_s0 + $0x6c8] sm:$0xff] }
 0x3b3   :  { %9192 = vst [vmem:[#allocation176_spill] sm:$0xff] %v6624_v16  ;;  %v6633_v34 = vsub.f32 %v3597_v27, %v4682_v5 }
 0x3b4   :  { %v1719_v0 = vadd.f32 %v1718_v37, %v1717_v47  ;;  %v1259_v37 = vmul.f32 %v6606_v43, %v6606_v43  ;;  %v1724_v47 = vsel %vm270_vm0, %v1257_v52, 0.0  ;;  %v3598_v43 = vld [vmem:[%s8800_s0 + $0x6d0] sm:$0xff] }
 0x3b5   :  { %9193 = vst [vmem:[#allocation177_spill] sm:$0xff] %v6633_v34  ;;  %v6642_v52 = vsub.f32 %v3598_v43, %v4682_v5 }
 0x3b6   :  { %v1721_v32 = vadd.f32 %v1720_v63, %v1719_v0  ;;  %v1260_v63 = vmul.f32 %v6615_v59, %v6615_v59  ;;  %v1726_v0 = vsel %vm270_vm0, %v1258_v18, 0.0  ;;  %v3599_v59 = vld [vmem:[%s8800_s0 + $0x6d8] sm:$0xff] }
 0x3b7   :  { %9194 = vst [vmem:[#allocation178_spill] sm:$0xff] %v6642_v52  ;;  %v6651_v18 = vsub.f32 %v3599_v59, %v4682_v5 }
 0x3b8   :  { %v1723_v2 = vadd.f32 %v1722_v25, %v1721_v32  ;;  %v1261_v25 = vmul.f32 %v6624_v16, %v6624_v16  ;;  %v1728_v32 = vsel %vm270_vm0, %v1259_v37, 0.0  ;;  %v3600_v16 = vld [vmem:[%s8800_s0 + $0x6e0] sm:$0xff] }
 0x3b9   :  { %9195 = vst [vmem:[#allocation179_spill] sm:$0xff] %v6651_v18  ;;  %v6660_v37 = vsub.f32 %v3600_v16, %v4682_v5 }
 0x3ba   :  { %v1725_v51 = vadd.f32 %v1724_v47, %v1723_v2  ;;  %v1262_v47 = vmul.f32 %v6633_v34, %v6633_v34  ;;  %v1730_v2 = vsel %vm270_vm0, %v1260_v63, 0.0  ;;  %v3601_v34 = vld [vmem:[%s8800_s0 + $0x6e8] sm:$0xff] }
 0x3bb   :  { %9196 = vst [vmem:[#allocation180_spill] sm:$0xff] %v6660_v37  ;;  %v6669_v63 = vsub.f32 %v3601_v34, %v4682_v5 }
 0x3bc   :  { %v1727_v27 = vadd.f32 %v1726_v0, %v1725_v51  ;;  %v1263_v0 = vmul.f32 %v6642_v52, %v6642_v52  ;;  %v1732_v51 = vsel %vm270_vm0, %v1261_v25, 0.0  ;;  %v3602_v52 = vld [vmem:[%s8800_s0 + $0x6f0] sm:$0xff] }
 0x3bd   :  { %9197 = vst [vmem:[#allocation181_spill] sm:$0xff] %v6669_v63  ;;  %v6678_v25 = vsub.f32 %v3602_v52, %v4682_v5 }
 0x3be   :  { %v1729_v43 = vadd.f32 %v1728_v32, %v1727_v27  ;;  %v1264_v32 = vmul.f32 %v6651_v18, %v6651_v18  ;;  %v1734_v27 = vsel %vm270_vm0, %v1262_v47, 0.0  ;;  %v3603_v18 = vld [vmem:[%s8800_s0 + $0x6f8] sm:$0xff] }
 0x3bf   :  { %9198 = vst [vmem:[#allocation182_spill] sm:$0xff] %v6678_v25  ;;  %v6687_v47 = vsub.f32 %v3603_v18, %v4682_v5 }
 0x3c0   :  { %v1731_v59 = vadd.f32 %v1730_v2, %v1729_v43  ;;  %v1265_v2 = vmul.f32 %v6660_v37, %v6660_v37  ;;  %v1736_v43 = vsel %vm270_vm0, %v1263_v0, 0.0  ;;  %v3604_v37 = vld [vmem:[%s8800_s0 + $0x700] sm:$0xff] }
 0x3c1   :  { %9199 = vst [vmem:[#allocation183_spill] sm:$0xff] %v6687_v47  ;;  %v6696_v0 = vsub.f32 %v3604_v37, %v4682_v5 }
 0x3c2   :  { %v1733_v16 = vadd.f32 %v1732_v51, %v1731_v59  ;;  %v1266_v51 = vmul.f32 %v6669_v63, %v6669_v63  ;;  %v1738_v59 = vsel %vm270_vm0, %v1264_v32, 0.0  ;;  %v3605_v63 = vld [vmem:[%s8800_s0 + $0x708] sm:$0xff] }
 0x3c3   :  { %9200 = vst [vmem:[#allocation184_spill] sm:$0xff] %v6696_v0  ;;  %v6705_v32 = vsub.f32 %v3605_v63, %v4682_v5 }
 0x3c4   :  { %v1735_v34 = vadd.f32 %v1734_v27, %v1733_v16  ;;  %v1267_v27 = vmul.f32 %v6678_v25, %v6678_v25  ;;  %v1740_v16 = vsel %vm270_vm0, %v1265_v2, 0.0  ;;  %v3606_v25 = vld [vmem:[%s8800_s0 + $0x710] sm:$0xff] }
 0x3c5   :  { %9201 = vst [vmem:[#allocation185_spill] sm:$0xff] %v6705_v32  ;;  %v6714_v2 = vsub.f32 %v3606_v25, %v4682_v5 }
 0x3c6   :  { %v1737_v52 = vadd.f32 %v1736_v43, %v1735_v34  ;;  %v1268_v43 = vmul.f32 %v6687_v47, %v6687_v47  ;;  %v1742_v34 = vsel %vm270_vm0, %v1266_v51, 0.0  ;;  %v3607_v47 = vld [vmem:[%s8800_s0 + $0x718] sm:$0xff] }
 0x3c7   :  { %9202 = vst [vmem:[#allocation186_spill] sm:$0xff] %v6714_v2  ;;  %v6723_v51 = vsub.f32 %v3607_v47, %v4682_v5 }
 0x3c8   :  { %v1739_v18 = vadd.f32 %v1738_v59, %v1737_v52  ;;  %v1269_v59 = vmul.f32 %v6696_v0, %v6696_v0  ;;  %v1744_v52 = vsel %vm270_vm0, %v1267_v27, 0.0  ;;  %v3608_v0 = vld [vmem:[%s8800_s0 + $0x720] sm:$0xff] }
 0x3c9   :  { %9203 = vst [vmem:[#allocation187_spill] sm:$0xff] %v6723_v51  ;;  %v6732_v27 = vsub.f32 %v3608_v0, %v4682_v5 }
 0x3ca   :  { %v1741_v37 = vadd.f32 %v1740_v16, %v1739_v18  ;;  %v1270_v16 = vmul.f32 %v6705_v32, %v6705_v32  ;;  %v1746_v18 = vsel %vm270_vm0, %v1268_v43, 0.0  ;;  %v3609_v32 = vld [vmem:[%s8800_s0 + $0x728] sm:$0xff] }
 0x3cb   :  { %9204 = vst [vmem:[#allocation188_spill] sm:$0xff] %v6732_v27  ;;  %v6741_v43 = vsub.f32 %v3609_v32, %v4682_v5 }
 0x3cc   :  { %v1743_v63 = vadd.f32 %v1742_v34, %v1741_v37  ;;  %v1271_v34 = vmul.f32 %v6714_v2, %v6714_v2  ;;  %v1748_v37 = vsel %vm270_vm0, %v1269_v59, 0.0  ;;  %v3610_v2 = vld [vmem:[%s8800_s0 + $0x730] sm:$0xff] }
 0x3cd   :  { %9205 = vst [vmem:[#allocation189_spill] sm:$0xff] %v6741_v43  ;;  %v6750_v59 = vsub.f32 %v3610_v2, %v4682_v5 }
 0x3ce   :  { %v1745_v25 = vadd.f32 %v1744_v52, %v1743_v63  ;;  %v1272_v52 = vmul.f32 %v6723_v51, %v6723_v51  ;;  %v1750_v63 = vsel %vm270_vm0, %v1270_v16, 0.0  ;;  %v3611_v51 = vld [vmem:[%s8800_s0 + $0x738] sm:$0xff] }
 0x3cf   :  { %9206 = vst [vmem:[#allocation190_spill] sm:$0xff] %v6750_v59  ;;  %v6759_v16 = vsub.f32 %v3611_v51, %v4682_v5 }
 0x3d0   :  { %v1747_v47 = vadd.f32 %v1746_v18, %v1745_v25  ;;  %v1273_v18 = vmul.f32 %v6732_v27, %v6732_v27  ;;  %v1752_v25 = vsel %vm270_vm0, %v1271_v34, 0.0  ;;  %v3612_v27 = vld [vmem:[%s8800_s0 + $0x740] sm:$0xff] }
 0x3d1   :  { %9207 = vst [vmem:[#allocation191_spill] sm:$0xff] %v6759_v16  ;;  %v6768_v34 = vsub.f32 %v3612_v27, %v4682_v5 }
 0x3d2   :  { %v1749_v0 = vadd.f32 %v1748_v37, %v1747_v47  ;;  %v1274_v37 = vmul.f32 %v6741_v43, %v6741_v43  ;;  %v1754_v47 = vsel %vm270_vm0, %v1272_v52, 0.0  ;;  %v3613_v43 = vld [vmem:[%s8800_s0 + $0x748] sm:$0xff] }
 0x3d3   :  { %9208 = vst [vmem:[#allocation192_spill] sm:$0xff] %v6768_v34  ;;  %v6777_v52 = vsub.f32 %v3613_v43, %v4682_v5 }
 0x3d4   :  { %v1751_v32 = vadd.f32 %v1750_v63, %v1749_v0  ;;  %v1275_v63 = vmul.f32 %v6750_v59, %v6750_v59  ;;  %v1756_v0 = vsel %vm270_vm0, %v1273_v18, 0.0  ;;  %v3614_v59 = vld [vmem:[%s8800_s0 + $0x750] sm:$0xff] }
 0x3d5   :  { %9209 = vst [vmem:[#allocation193_spill] sm:$0xff] %v6777_v52  ;;  %v6786_v18 = vsub.f32 %v3614_v59, %v4682_v5 }
 0x3d6   :  { %v1753_v2 = vadd.f32 %v1752_v25, %v1751_v32  ;;  %v1276_v25 = vmul.f32 %v6759_v16, %v6759_v16  ;;  %v1758_v32 = vsel %vm270_vm0, %v1274_v37, 0.0  ;;  %v3615_v16 = vld [vmem:[%s8800_s0 + $0x758] sm:$0xff] }
 0x3d7   :  { %9210 = vst [vmem:[#allocation194_spill] sm:$0xff] %v6786_v18  ;;  %v6795_v37 = vsub.f32 %v3615_v16, %v4682_v5 }
 0x3d8   :  { %v1755_v51 = vadd.f32 %v1754_v47, %v1753_v2  ;;  %v1277_v47 = vmul.f32 %v6768_v34, %v6768_v34  ;;  %v1760_v2 = vsel %vm270_vm0, %v1275_v63, 0.0  ;;  %v3616_v34 = vld [vmem:[%s8800_s0 + $0x760] sm:$0xff] }
 0x3d9   :  { %9211 = vst [vmem:[#allocation195_spill] sm:$0xff] %v6795_v37  ;;  %v6804_v63 = vsub.f32 %v3616_v34, %v4682_v5 }
 0x3da   :  { %v1757_v27 = vadd.f32 %v1756_v0, %v1755_v51  ;;  %v1278_v0 = vmul.f32 %v6777_v52, %v6777_v52  ;;  %v1762_v51 = vsel %vm270_vm0, %v1276_v25, 0.0  ;;  %v3617_v52 = vld [vmem:[%s8800_s0 + $0x768] sm:$0xff] }
 0x3db   :  { %9212 = vst [vmem:[#allocation196_spill] sm:$0xff] %v6804_v63  ;;  %v6813_v25 = vsub.f32 %v3617_v52, %v4682_v5 }
 0x3dc   :  { %v1759_v43 = vadd.f32 %v1758_v32, %v1757_v27  ;;  %v1279_v32 = vmul.f32 %v6786_v18, %v6786_v18  ;;  %v1764_v27 = vsel %vm270_vm0, %v1277_v47, 0.0  ;;  %v3618_v18 = vld [vmem:[%s8800_s0 + $0x770] sm:$0xff] }
 0x3dd   :  { %9213 = vst [vmem:[#allocation197_spill] sm:$0xff] %v6813_v25  ;;  %v6822_v47 = vsub.f32 %v3618_v18, %v4682_v5 }
 0x3de   :  { %v1761_v59 = vadd.f32 %v1760_v2, %v1759_v43  ;;  %v1280_v2 = vmul.f32 %v6795_v37, %v6795_v37  ;;  %v1766_v43 = vsel %vm270_vm0, %v1278_v0, 0.0  ;;  %v3619_v37 = vld [vmem:[%s8800_s0 + $0x778] sm:$0xff] }
 0x3df   :  { %9214 = vst [vmem:[#allocation198_spill] sm:$0xff] %v6822_v47  ;;  %v6831_v0 = vsub.f32 %v3619_v37, %v4682_v5 }
 0x3e0   :  { %v1763_v16 = vadd.f32 %v1762_v51, %v1761_v59  ;;  %v1281_v51 = vmul.f32 %v6804_v63, %v6804_v63  ;;  %v1768_v59 = vsel %vm270_vm0, %v1279_v32, 0.0  ;;  %v3620_v63 = vld [vmem:[%s8800_s0 + $0x780] sm:$0xff] }
 0x3e1   :  { %9215 = vst [vmem:[#allocation199_spill] sm:$0xff] %v6831_v0  ;;  %v6840_v32 = vsub.f32 %v3620_v63, %v4682_v5 }
 0x3e2   :  { %v1765_v34 = vadd.f32 %v1764_v27, %v1763_v16  ;;  %v1282_v27 = vmul.f32 %v6813_v25, %v6813_v25  ;;  %v1770_v16 = vsel %vm270_vm0, %v1280_v2, 0.0  ;;  %v3621_v25 = vld [vmem:[%s8800_s0 + $0x788] sm:$0xff] }
 0x3e3   :  { %9216 = vst [vmem:[#allocation200_spill] sm:$0xff] %v6840_v32  ;;  %v6849_v2 = vsub.f32 %v3621_v25, %v4682_v5 }
 0x3e4   :  { %v1767_v52 = vadd.f32 %v1766_v43, %v1765_v34  ;;  %v1283_v43 = vmul.f32 %v6822_v47, %v6822_v47  ;;  %v1772_v34 = vsel %vm270_vm0, %v1281_v51, 0.0  ;;  %v3622_v47 = vld [vmem:[%s8800_s0 + $0x790] sm:$0xff] }
 0x3e5   :  { %9217 = vst [vmem:[#allocation201_spill] sm:$0xff] %v6849_v2  ;;  %v6858_v51 = vsub.f32 %v3622_v47, %v4682_v5 }
 0x3e6   :  { %v1769_v18 = vadd.f32 %v1768_v59, %v1767_v52  ;;  %v1284_v59 = vmul.f32 %v6831_v0, %v6831_v0  ;;  %v1774_v52 = vsel %vm270_vm0, %v1282_v27, 0.0  ;;  %v3623_v0 = vld [vmem:[%s8800_s0 + $0x798] sm:$0xff] }
 0x3e7   :  { %9218 = vst [vmem:[#allocation202_spill] sm:$0xff] %v6858_v51  ;;  %v6867_v27 = vsub.f32 %v3623_v0, %v4682_v5 }
 0x3e8   :  { %v1771_v37 = vadd.f32 %v1770_v16, %v1769_v18  ;;  %v1285_v16 = vmul.f32 %v6840_v32, %v6840_v32  ;;  %v1776_v18 = vsel %vm270_vm0, %v1283_v43, 0.0  ;;  %v3624_v32 = vld [vmem:[%s8800_s0 + $0x7a0] sm:$0xff] }
 0x3e9   :  { %9219 = vst [vmem:[#allocation203_spill] sm:$0xff] %v6867_v27  ;;  %v6876_v43 = vsub.f32 %v3624_v32, %v4682_v5 }
 0x3ea   :  { %v1773_v63 = vadd.f32 %v1772_v34, %v1771_v37  ;;  %v1286_v34 = vmul.f32 %v6849_v2, %v6849_v2  ;;  %v1778_v37 = vsel %vm270_vm0, %v1284_v59, 0.0  ;;  %v3625_v2 = vld [vmem:[%s8800_s0 + $0x7a8] sm:$0xff] }
 0x3eb   :  { %9220 = vst [vmem:[#allocation204_spill] sm:$0xff] %v6876_v43  ;;  %v6885_v59 = vsub.f32 %v3625_v2, %v4682_v5 }
 0x3ec   :  { %v1775_v25 = vadd.f32 %v1774_v52, %v1773_v63  ;;  %v1287_v52 = vmul.f32 %v6858_v51, %v6858_v51  ;;  %v1780_v63 = vsel %vm270_vm0, %v1285_v16, 0.0  ;;  %v3626_v51 = vld [vmem:[%s8800_s0 + $0x7b0] sm:$0xff] }
 0x3ed   :  { %9221 = vst [vmem:[#allocation205_spill] sm:$0xff] %v6885_v59  ;;  %v6894_v16 = vsub.f32 %v3626_v51, %v4682_v5 }
 0x3ee   :  { %v1777_v47 = vadd.f32 %v1776_v18, %v1775_v25  ;;  %v1288_v18 = vmul.f32 %v6867_v27, %v6867_v27  ;;  %v1782_v25 = vsel %vm270_vm0, %v1286_v34, 0.0  ;;  %v3627_v27 = vld [vmem:[%s8800_s0 + $0x7b8] sm:$0xff] }
 0x3ef   :  { %9222 = vst [vmem:[#allocation206_spill] sm:$0xff] %v6894_v16  ;;  %v6903_v34 = vsub.f32 %v3627_v27, %v4682_v5 }
 0x3f0   :  { %v1779_v0 = vadd.f32 %v1778_v37, %v1777_v47  ;;  %v1289_v37 = vmul.f32 %v6876_v43, %v6876_v43  ;;  %v1784_v47 = vsel %vm270_vm0, %v1287_v52, 0.0  ;;  %v3628_v43 = vld [vmem:[%s8800_s0 + $0x7c0] sm:$0xff] }
 0x3f1   :  { %9223 = vst [vmem:[#allocation207_spill] sm:$0xff] %v6903_v34  ;;  %v6912_v52 = vsub.f32 %v3628_v43, %v4682_v5 }
 0x3f2   :  { %v1781_v32 = vadd.f32 %v1780_v63, %v1779_v0  ;;  %v1290_v63 = vmul.f32 %v6885_v59, %v6885_v59  ;;  %v1786_v0 = vsel %vm270_vm0, %v1288_v18, 0.0  ;;  %v3629_v59 = vld [vmem:[%s8800_s0 + $0x7c8] sm:$0xff] }
 0x3f3   :  { %9224 = vst [vmem:[#allocation208_spill] sm:$0xff] %v6912_v52  ;;  %v6921_v18 = vsub.f32 %v3629_v59, %v4682_v5 }
 0x3f4   :  { %v1783_v2 = vadd.f32 %v1782_v25, %v1781_v32  ;;  %v1291_v25 = vmul.f32 %v6894_v16, %v6894_v16  ;;  %v1788_v32 = vsel %vm270_vm0, %v1289_v37, 0.0  ;;  %v3630_v16 = vld [vmem:[%s8800_s0 + $0x7d0] sm:$0xff] }
 0x3f5   :  { %9225 = vst [vmem:[#allocation209_spill] sm:$0xff] %v6921_v18  ;;  %v6930_v37 = vsub.f32 %v3630_v16, %v4682_v5 }
 0x3f6   :  { %v1785_v51 = vadd.f32 %v1784_v47, %v1783_v2  ;;  %v1292_v47 = vmul.f32 %v6903_v34, %v6903_v34  ;;  %v1790_v2 = vsel %vm270_vm0, %v1290_v63, 0.0  ;;  %v3631_v34 = vld [vmem:[%s8800_s0 + $0x7d8] sm:$0xff] }
 0x3f7   :  { %9226 = vst [vmem:[#allocation210_spill] sm:$0xff] %v6930_v37  ;;  %v6939_v63 = vsub.f32 %v3631_v34, %v4682_v5 }
 0x3f8   :  { %v1787_v27 = vadd.f32 %v1786_v0, %v1785_v51  ;;  %v1293_v0 = vmul.f32 %v6912_v52, %v6912_v52  ;;  %v1792_v51 = vsel %vm270_vm0, %v1291_v25, 0.0  ;;  %v3632_v52 = vld [vmem:[%s8800_s0 + $0x7e0] sm:$0xff] }
 0x3f9   :  { %9227 = vst [vmem:[#allocation211_spill] sm:$0xff] %v6939_v63  ;;  %v6948_v25 = vsub.f32 %v3632_v52, %v4682_v5 }
 0x3fa   :  { %v1789_v43 = vadd.f32 %v1788_v32, %v1787_v27  ;;  %v1294_v32 = vmul.f32 %v6921_v18, %v6921_v18  ;;  %v1794_v27 = vsel %vm270_vm0, %v1292_v47, 0.0  ;;  %v3633_v18 = vld [vmem:[%s8800_s0 + $0x7e8] sm:$0xff] }
 0x3fb   :  { %9228 = vst [vmem:[#allocation212_spill] sm:$0xff] %v6948_v25  ;;  %v6957_v47 = vsub.f32 %v3633_v18, %v4682_v5 }
 0x3fc   :  { %v1791_v59 = vadd.f32 %v1790_v2, %v1789_v43  ;;  %v1295_v2 = vmul.f32 %v6930_v37, %v6930_v37  ;;  %v1796_v43 = vsel %vm270_vm0, %v1293_v0, 0.0  ;;  %v3634_v37 = vld [vmem:[%s8800_s0 + $0x7f0] sm:$0xff] }
 0x3fd   :  { %9229 = vst [vmem:[#allocation213_spill] sm:$0xff] %v6957_v47  ;;  %v6966_v0 = vsub.f32 %v3634_v37, %v4682_v5 }
 0x3fe   :  { %v1793_v16 = vadd.f32 %v1792_v51, %v1791_v59  ;;  %v1296_v51 = vmul.f32 %v6939_v63, %v6939_v63  ;;  %v1798_v59 = vsel %vm270_vm0, %v1294_v32, 0.0  ;;  %v3635_v63 = vld [vmem:[%s8800_s0 + $0x7f8] sm:$0xff] }
 0x3ff   :  { %9230 = vst [vmem:[#allocation214_spill] sm:$0xff] %v6966_v0  ;;  %v6975_v32 = vsub.f32 %v3635_v63, %v4682_v5  ;;  %v1299_v12 = vmul.f32 %v6966_v0, %v6966_v0 }
 0x400   :  { %v1795_v34 = vadd.f32 %v1794_v27, %v1793_v16  ;;  %v1297_v27 = vmul.f32 %v6948_v25, %v6948_v25  ;;  %v1800_v16 = vsel %vm270_vm0, %v1295_v2, 0.0 }
 0x401   :  { %9231 = vst [vmem:[#allocation215_spill] sm:$0xff] %v6975_v32  ;;  %v1808_v5 = vsel %vm270_vm0, %v1299_v12, 0.0 }
 0x402   :  { %v1797_v52 = vadd.f32 %v1796_v43, %v1795_v34  ;;  %v1298_v43 = vmul.f32 %v6957_v47, %v6957_v47  ;;  %v1802_v34 = vsel %vm270_vm0, %v1296_v51, 0.0  ;;  %v1804_v25 = vsel %vm270_vm0, %v1297_v27, 0.0 }
 0x404   :  { %v1799_v18 = vadd.f32 %v1798_v59, %v1797_v52  ;;  %v1300_v59 = vmul.f32 %v6975_v32, %v6975_v32  ;;  %v1806_v52 = vsel %vm270_vm0, %v1298_v43, 0.0 }
 0x406   :  { %v1801_v37 = vadd.f32 %v1800_v16, %v1799_v18  ;;  %v1810_v47 = vsel %vm270_vm0, %v1300_v59, 0.0 }
 0x408   :  { %v1803_v2 = vadd.f32 %v1802_v34, %v1801_v37 }
 0x40a   :  { %v1805_v56 = vadd.f32 %v1804_v25, %v1803_v2 }
 0x40c   :  { %v1807_v63 = vadd.f32 %v1806_v52, %v1805_v56 }
 0x40e   :  { %v1809_v41 = vadd.f32 %v1808_v5, %v1807_v63 }
 0x410   :  { %v1811_v51 = vadd.f32 %v1810_v47, %v1809_v41  ;;  %v1830_v41 = vld [vmem:[%s8802_s1] sm:$0x1] }
 0x412   :  { %v1812_v16 = vrot.slane %v1811_v51, 4 }
 0x414   :  { %v1813_v18 = vadd.f32 %v1812_v16, %v1811_v51 }
 0x416   :  { %v1814_v26 = vrot.slane %v1813_v18, 2 }
 0x418   :  { %v1815_v0 = vadd.f32 %v1814_v26, %v1813_v18 }
 0x41a   :  { %v1816_v10 = vrot.slane %v1815_v0, 1 }
 0x41c   :  { %v1817_v27 = vadd.f32 %v1816_v10, %v1815_v0  ;;  %v6996_v10 = vld [vmem:[%s8801_s2] ss:$0 sm:$0xff] }
 0x41e   :  { %v1818_v34 = vmul.f32 0.00048828125, %v1817_v27 }
 0x420   :  { %v1819_v37 = vadd.f32 1e-05, %v1818_v34 }
 0x422   :  { %2866 = vrsqrt.f32 %v1819_v37  ;;  %vm1826_vm1 = vweird.f32 %v1819_v37 }
 0x428   :  { %v2867_v32 = vpop.eup %2866 }
 0x429   :  { %v1821_v57 = vmul.f32 %v2867_v32, %v1819_v37  ;;  %vm1827_vm2 = vweird.f32 %v2867_v32 }
 0x42a   :  { %vm1828_vm3 = vmor %vm1826_vm1, %vm1827_vm2 }
 0x42b   :  { %v1822_v43 = vmul.f32 %v2867_v32, %v1821_v57 }
 0x42d   :  { %v1823_v25 = vmul.f32 0.5, %v1822_v43 }
 0x42f   :  { %v1824_v56 = vsub.f32 1.5, %v1823_v25 }
 0x431   :  { %v1825_v12 = vmul.f32 %v2867_v32, %v1824_v56 }
 0x433   :  { %v1829_v47 = vsel %vm1828_vm3, %v2867_v32, %v1825_v12 }
 0x434   :  { %v1831_v26 = vmul.f32 %v1830_v41, %v1829_v47 }
 0x436   :  { %v6991_v2 = vperm.slane %v1831_v26, 0 }
 0x438   :  { %v1833_v57 = vmul.f32 %v6991_v2, %v4688_v7  ;;  %v1834_v0 = vmul.f32 %v6991_v2, %v4694_v9  ;;  %v1835_v59 = vmul.f32 %v6991_v2, %v4700_v11  ;;  %v1836_v32 = vmul.f32 %v6991_v2, %v4706_v13 }
 0x439   :  { %v1837_v52 = vmul.f32 %v6991_v2, %v4712_v15  ;;  %v1838_v5 = vmul.f32 %v6991_v2, %v4724_v20  ;;  %v1839_v9 = vmul.f32 %v6991_v2, %v4732_v23  ;;  %v1840_v13 = vmul.f32 %v6991_v2, %v4743_v30 }
 0x43a   :  { %v2093_v63 = vadd.f32 %v6996_v10, %v1833_v57  ;;  %v2094_v51 = vadd.f32 %v6996_v10, %v1834_v0  ;;  %v2095_v7 = vadd.f32 %v6996_v10, %v1835_v59  ;;  %v2096_v11 = vadd.f32 %v6996_v10, %v1836_v32 }
 0x43b   :  { %v2097_v15 = vadd.f32 %v6996_v10, %v1837_v52  ;;  %v1841_v20 = vmul.f32 %v6991_v2, %v4752_v35  ;;  %v2098_v16 = vadd.f32 %v6996_v10, %v1838_v5  ;;  %v1842_v18 = vmul.f32 %v6991_v2, %v4761_v40 }
 0x43c   :  { %2868 = vtanh.f32 %v2093_v63  ;;  %v2099_v23 = vadd.f32 %v6996_v10, %v1839_v9  ;;  %v1843_v27 = vmul.f32 %v6991_v2, %v4770_v45  ;;  %v2100_v30 = vadd.f32 %v6996_v10, %v1840_v13 }
 0x43d   :  { %2870 = vtanh.f32 %v2094_v51  ;;  %v1844_v34 = vmul.f32 %v6991_v2, %v4779_v50  ;;  %v2101_v35 = vadd.f32 %v6996_v10, %v1841_v20  ;;  %v1845_v37 = vmul.f32 %v6991_v2, %v4788_v55 }
 0x43e   :  { %2872 = vtanh.f32 %v2095_v7  ;;  %v2102_v40 = vadd.f32 %v6996_v10, %v1842_v18  ;;  %v1846_v43 = vmul.f32 %v6991_v2, %v4797_v60  ;;  %v2103_v45 = vadd.f32 %v6996_v10, %v1843_v27 }
 0x43f   :  { %2874 = vtanh.f32 %v2096_v11  ;;  %v1847_v56 = vmul.f32 %v6991_v2, %v4806_v1  ;;  %v2104_v55 = vadd.f32 %v6996_v10, %v1844_v34  ;;  %v1848_v12 = vmul.f32 %v6991_v2, %v4815_v8 }
 0x440   :  { %2876 = vtanh.f32 %v2097_v15  ;;  %v2105_v1 = vadd.f32 %v6996_v10, %v1845_v37  ;;  %v1849_v41 = vmul.f32 %v6991_v2, %v4824_v17  ;;  %v2106_v8 = vadd.f32 %v6996_v10, %v1846_v43 }
 0x441   :  { %2878 = vtanh.f32 %v2098_v16  ;;  %v1850_v26 = vmul.f32 %v6991_v2, %v4833_v24  ;;  %v2107_v17 = vadd.f32 %v6996_v10, %v1847_v56  ;;  %v1851_v0 = vmul.f32 %v6991_v2, %v4842_v29 }
 0x442   :  { %v2869_v25 = vpop.eup %2868  ;;  %2880 = vtanh.f32 %v2099_v23  ;;  %v2108_v24 = vadd.f32 %v6996_v10, %v1848_v12  ;;  %v1852_v32 = vmul.f32 %v6991_v2, %v4851_v36  ;;  %v2109_v29 = vadd.f32 %v6996_v10, %v1849_v41 }
 0x443   :  { %v2871_v50 = vpop.eup %2870  ;;  %2605 = vst.msk [vmem:[%s8803_s3] sm:$0xff] %vm270_vm0, %v2869_v25  ;;  %2882 = vtanh.f32 %v2100_v30  ;;  %v1853_v5 = vmul.f32 %v6991_v2, %v4860_v42  ;;  %v2110_v36 = vadd.f32 %v6996_v10, %v1850_v26  ;;  %v1854_v51 = vmul.f32 %v6991_v2, %v4869_v48 }
 0x444   :  { %v2873_v60 = vpop.eup %2872  ;;  %2606 = vst.msk [vmem:[%s8803_s3 + $0x8] sm:$0xff] %vm270_vm0, %v2871_v50  ;;  %2884 = vtanh.f32 %v2101_v35  ;;  %v2111_v42 = vadd.f32 %v6996_v10, %v1851_v0  ;;  %v1855_v9 = vmul.f32 %v6991_v2, %v4878_v54  ;;  %v2112_v48 = vadd.f32 %v6996_v10, %v1852_v32 }
 0x445   :  { %v2875_v47 = vpop.eup %2874  ;;  %2607 = vst.msk [vmem:[%s8803_s3 + $0x10] sm:$0xff] %vm270_vm0, %v2873_v60  ;;  %2886 = vtanh.f32 %v2102_v40  ;;  %v1856_v13 = vmul.f32 %v6991_v2, %v4887_v61  ;;  %v2113_v54 = vadd.f32 %v6996_v10, %v1853_v5  ;;  %v1857_v20 = vmul.f32 %v6991_v2, %v4896_v3 }
 0x446   :  { %v2877_v57 = vpop.eup %2876  ;;  %2608 = vst.msk [vmem:[%s8803_s3 + $0x18] sm:$0xff] %vm270_vm0, %v2875_v47  ;;  %2888 = vtanh.f32 %v2103_v45  ;;  %v2114_v61 = vadd.f32 %v6996_v10, %v1854_v51  ;;  %v1858_v18 = vmul.f32 %v6991_v2, %v4905_v14  ;;  %v2115_v3 = vadd.f32 %v6996_v10, %v1855_v9 }
 0x447   :  { %v2879_v59 = vpop.eup %2878  ;;  %2609 = vst.msk [vmem:[%s8803_s3 + $0x20] sm:$0xff] %vm270_vm0, %v2877_v57  ;;  %2890 = vtanh.f32 %v2104_v55  ;;  %v1859_v27 = vmul.f32 %v6991_v2, %v4914_v22  ;;  %v2116_v14 = vadd.f32 %v6996_v10, %v1856_v13  ;;  %v1860_v34 = vmul.f32 %v6991_v2, %v4923_v31 }
 0x448   :  { %v2881_v52 = vpop.eup %2880  ;;  %2610 = vst.msk [vmem:[%s8803_s3 + $0x28] sm:$0xff] %vm270_vm0, %v2879_v59  ;;  %2892 = vtanh.f32 %v2105_v1  ;;  %v2117_v22 = vadd.f32 %v6996_v10, %v1857_v20  ;;  %v1861_v37 = vmul.f32 %v6991_v2, %v4932_v38  ;;  %v2118_v31 = vadd.f32 %v6996_v10, %v1858_v18  ;;  %v9234_v20 = vld [vmem:[#allocation4_spill] sm:$0xff] }
 0x449   :  { %v2883_v63 = vpop.eup %2882  ;;  %2611 = vst.msk [vmem:[%s8803_s3 + $0x30] sm:$0xff] %vm270_vm0, %v2881_v52  ;;  %2894 = vtanh.f32 %v2106_v8  ;;  %v1862_v43 = vmul.f32 %v6991_v2, %v4941_v46  ;;  %v2119_v38 = vadd.f32 %v6996_v10, %v1859_v27  ;;  %v1863_v45 = vmul.f32 %v6991_v2, %v4950_v53 }
 0x44a   :  { %v2885_v7 = vpop.eup %2884  ;;  %2612 = vst.msk [vmem:[%s8803_s3 + $0x38] sm:$0xff] %vm270_vm0, %v2883_v63  ;;  %2896 = vtanh.f32 %v2107_v17  ;;  %v2120_v46 = vadd.f32 %v6996_v10, %v1860_v34  ;;  %v1864_v50 = vmul.f32 %v6991_v2, %v4959_v62  ;;  %v2121_v53 = vadd.f32 %v6996_v10, %v1861_v37  ;;  %v9237_v37 = vld [vmem:[#allocation7_spill] sm:$0xff] }
 0x44b   :  { %v2887_v11 = vpop.eup %2886  ;;  %2613 = vst.msk [vmem:[%s8803_s3 + $0x40] sm:$0xff] %vm270_vm0, %v2885_v7  ;;  %2898 = vtanh.f32 %v2108_v24  ;;  %v1865_v12 = vmul.f32 %v6991_v2, %v4968_v6  ;;  %v2122_v62 = vadd.f32 %v6996_v10, %v1862_v43  ;;  %v1866_v1 = vmul.f32 %v6991_v2, %v4977_v19 }
 0x44c   :  { %v2889_v15 = vpop.eup %2888  ;;  %2614 = vst.msk [vmem:[%s8803_s3 + $0x48] sm:$0xff] %vm270_vm0, %v2887_v11  ;;  %2900 = vtanh.f32 %v2109_v29  ;;  %v2123_v6 = vadd.f32 %v6996_v10, %v1863_v45  ;;  %v1867_v47 = vmul.f32 %v6991_v2, %v4986_v28  ;;  %v2124_v19 = vadd.f32 %v6996_v10, %v1864_v50 }
 0x44d   :  { %v2891_v16 = vpop.eup %2890  ;;  %2615 = vst.msk [vmem:[%s8803_s3 + $0x50] sm:$0xff] %vm270_vm0, %v2889_v15  ;;  %2902 = vtanh.f32 %v2110_v36  ;;  %v1868_v26 = vmul.f32 %v6991_v2, %v4995_v39  ;;  %v2125_v28 = vadd.f32 %v6996_v10, %v1865_v12  ;;  %v1869_v17 = vmul.f32 %v6991_v2, %v5004_v49  ;;  %v9240_v12 = vld [vmem:[#allocation10_spill] sm:$0xff] }
 0x44e   :  { %v2893_v23 = vpop.eup %2892  ;;  %2616 = vst.msk [vmem:[%s8803_s3 + $0x58] sm:$0xff] %vm270_vm0, %v2891_v16  ;;  %2904 = vtanh.f32 %v2111_v42  ;;  %v2126_v39 = vadd.f32 %v6996_v10, %v1866_v1  ;;  %v1870_v59 = vmul.f32 %v6991_v2, %v5013_v58  ;;  %v2127_v49 = vadd.f32 %v6996_v10, %v1867_v47  ;;  %v9232_v42 = vld [vmem:[#allocation2_spill] sm:$0xff] }
 0x44f   :  { %v2895_v30 = vpop.eup %2894  ;;  %2617 = vst.msk [vmem:[%s8803_s3 + $0x60] sm:$0xff] %vm270_vm0, %v2893_v23  ;;  %2906 = vtanh.f32 %v2112_v48  ;;  %v1871_v32 = vmul.f32 %v6991_v2, %v5022_v4  ;;  %v2128_v58 = vadd.f32 %v6996_v10, %v1868_v26  ;;  %v1872_v29 = vmul.f32 %v6991_v2, %v5031_v21  ;;  %v9233_v48 = vld [vmem:[#allocation3_spill] sm:$0xff]  ;;  %v9235_v23 = vld [vmem:[#allocation5_spill] sm:$0xff] }
 0x450   :  { %v2897_v35 = vpop.eup %2896  ;;  %2618 = vst.msk [vmem:[%s8803_s3 + $0x68] sm:$0xff] %vm270_vm0, %v2895_v30  ;;  %2908 = vtanh.f32 %v2113_v54  ;;  %v2129_v4 = vadd.f32 %v6996_v10, %v1869_v17  ;;  %v1873_v63 = vmul.f32 %v6991_v2, %v5040_v33  ;;  %v2130_v21 = vadd.f32 %v6996_v10, %v1870_v59  ;;  %v9243_v17 = vld [vmem:[#allocation13_spill] sm:$0xff] }
 0x451   :  { %v2899_v40 = vpop.eup %2898  ;;  %2619 = vst.msk [vmem:[%s8803_s3 + $0x70] sm:$0xff] %vm270_vm0, %v2897_v35  ;;  %2910 = vtanh.f32 %v2114_v61  ;;  %v1874_v51 = vmul.f32 %v6991_v2, %v5049_v44  ;;  %v2131_v33 = vadd.f32 %v6996_v10, %v1871_v32  ;;  %v1875_v9 = vmul.f32 %v6991_v2, %v9232_v42 }
 0x452   :  { %v2901_v25 = vpop.eup %2900  ;;  %2620 = vst.msk [vmem:[%s8803_s3 + $0x78] sm:$0xff] %vm270_vm0, %v2899_v40  ;;  %2912 = vtanh.f32 %v2115_v3  ;;  %v2132_v44 = vadd.f32 %v6996_v10, %v1872_v29  ;;  %v1876_v13 = vmul.f32 %v6991_v2, %v9233_v48  ;;  %v2133_v54 = vadd.f32 %v6996_v10, %v1873_v63  ;;  %v9246_v63 = vld [vmem:[#allocation16_spill] sm:$0xff] }
 0x453   :  { %v2903_v56 = vpop.eup %2902  ;;  %2621 = vst.msk [vmem:[%s8803_s3 + $0x80] sm:$0xff] %vm270_vm0, %v2901_v25  ;;  %2914 = vtanh.f32 %v2116_v14  ;;  %v1877_v16 = vmul.f32 %v6991_v2, %v9234_v20  ;;  %v2134_v18 = vadd.f32 %v6996_v10, %v1874_v51  ;;  %v1878_v3 = vmul.f32 %v6991_v2, %v9235_v23  ;;  %v9236_v14 = vld [vmem:[#allocation6_spill] sm:$0xff]  ;;  %v9238_v25 = vld [vmem:[#allocation8_spill] sm:$0xff] }
 0x454   :  { %v2905_v55 = vpop.eup %2904  ;;  %2622 = vst.msk [vmem:[%s8803_s3 + $0x88] sm:$0xff] %vm270_vm0, %v2903_v56  ;;  %2916 = vtanh.f32 %v2117_v22  ;;  %v2135_v30 = vadd.f32 %v6996_v10, %v1875_v9  ;;  %v1879_v34 = vmul.f32 %v6991_v2, %v9236_v14  ;;  %v2136_v22 = vadd.f32 %v6996_v10, %v1876_v13 }
 0x455   :  { %v2907_v60 = vpop.eup %2906  ;;  %2623 = vst.msk [vmem:[%s8803_s3 + $0x90] sm:$0xff] %vm270_vm0, %v2905_v55  ;;  %2918 = vtanh.f32 %v2118_v31  ;;  %v1880_v40 = vmul.f32 %v6991_v2, %v9237_v37  ;;  %v2137_v43 = vadd.f32 %v6996_v10, %v1877_v16  ;;  %v2138_v56 = vadd.f32 %v6996_v10, %v1878_v3 }
 0x456   :  { %v2909_v41 = vpop.eup %2908  ;;  %2624 = vst.msk [vmem:[%s8803_s3 + $0x98] sm:$0xff] %vm270_vm0, %v2907_v60  ;;  %2920 = vtanh.f32 %v2119_v38  ;;  %v1881_v38 = vmul.f32 %v6991_v2, %v9238_v25  ;;  %v1883_v60 = vmul.f32 %v6991_v2, %v9240_v12 }
 0x457   :  { %v2911_v8 = vpop.eup %2910  ;;  %2625 = vst.msk [vmem:[%s8803_s3 + $0xa0] sm:$0xff] %vm270_vm0, %v2909_v41  ;;  %2922 = vtanh.f32 %v2120_v46  ;;  %v9239_v46 = vld [vmem:[#allocation9_spill] sm:$0xff]  ;;  %v2140_v1 = vadd.f32 %v6996_v10, %v1880_v40  ;;  %v9241_v41 = vld [vmem:[#allocation11_spill] sm:$0xff] }
 0x458   :  { %v2913_v57 = vpop.eup %2912  ;;  %2626 = vst.msk [vmem:[%s8803_s3 + $0xa8] sm:$0xff] %vm270_vm0, %v2911_v8  ;;  %2924 = vtanh.f32 %v2121_v53  ;;  %v1882_v50 = vmul.f32 %v6991_v2, %v9239_v46  ;;  %v2139_v53 = vadd.f32 %v6996_v10, %v1879_v34  ;;  %v2141_v8 = vadd.f32 %v6996_v10, %v1881_v38 }
 0x459   :  { %v2915_v0 = vpop.eup %2914  ;;  %2627 = vst.msk [vmem:[%s8803_s3 + $0xb0] sm:$0xff] %vm270_vm0, %v2913_v57  ;;  %2926 = vtanh.f32 %v2122_v62  ;;  %v2143_v59 = vadd.f32 %v6996_v10, %v1883_v60 }
 0x45a   :  { %v2917_v24 = vpop.eup %2916  ;;  %2628 = vst.msk [vmem:[%s8803_s3 + $0xb8] sm:$0xff] %vm270_vm0, %v2915_v0  ;;  %2928 = vtanh.f32 %v2123_v6  ;;  %v1884_v6 = vmul.f32 %v6991_v2, %v9241_v41  ;;  %v1886_v0 = vmul.f32 %v6991_v2, %v9243_v17 }
 0x45b   :  { %v2919_v52 = vpop.eup %2918  ;;  %2629 = vst.msk [vmem:[%s8803_s3 + $0xc0] sm:$0xff] %vm270_vm0, %v2917_v24  ;;  %2930 = vtanh.f32 %v2124_v19  ;;  %v9242_v19 = vld [vmem:[#allocation12_spill] sm:$0xff]  ;;  %v9244_v24 = vld [vmem:[#allocation14_spill] sm:$0xff] }
 0x45c   :  { %v2921_v5 = vpop.eup %2920  ;;  %2630 = vst.msk [vmem:[%s8803_s3 + $0xc8] sm:$0xff] %vm270_vm0, %v2919_v52  ;;  %2932 = vtanh.f32 %v2125_v28  ;;  %v1885_v26 = vmul.f32 %v6991_v2, %v9242_v19  ;;  %v2142_v28 = vadd.f32 %v6996_v10, %v1882_v50  ;;  %v2144_v52 = vadd.f32 %v6996_v10, %v1884_v6 }
 0x45d   :  { %v2923_v36 = vpop.eup %2922  ;;  %2631 = vst.msk [vmem:[%s8803_s3 + $0xd0] sm:$0xff] %vm270_vm0, %v2921_v5  ;;  %2934 = vtanh.f32 %v2126_v39  ;;  %v2146_v51 = vadd.f32 %v6996_v10, %v1886_v0 }
 0x45e   :  { %v2925_v7 = vpop.eup %2924  ;;  %2632 = vst.msk [vmem:[%s8803_s3 + $0xd8] sm:$0xff] %vm270_vm0, %v2923_v36  ;;  %2936 = vtanh.f32 %v2127_v49  ;;  %v1887_v49 = vmul.f32 %v6991_v2, %v9244_v24  ;;  %v1889_v36 = vmul.f32 %v6991_v2, %v9246_v63 }
 0x45f   :  { %v2927_v11 = vpop.eup %2926  ;;  %2633 = vst.msk [vmem:[%s8803_s3 + $0xe0] sm:$0xff] %vm270_vm0, %v2925_v7  ;;  %2938 = vtanh.f32 %v2128_v58  ;;  %v9245_v58 = vld [vmem:[#allocation15_spill] sm:$0xff]  ;;  %v9247_v7 = vld [vmem:[#allocation17_spill] sm:$0xff] }
 0x460   :  { %v2929_v15 = vpop.eup %2928  ;;  %2634 = vst.msk [vmem:[%s8803_s3 + $0xe8] sm:$0xff] %vm270_vm0, %v2927_v11  ;;  %2940 = vtanh.f32 %v2129_v4  ;;  %v1888_v29 = vmul.f32 %v6991_v2, %v9245_v58  ;;  %v2145_v4 = vadd.f32 %v6996_v10, %v1885_v26  ;;  %v2147_v9 = vadd.f32 %v6996_v10, %v1887_v49  ;;  %v9248_v11 = vld [vmem:[#allocation18_spill] sm:$0xff] }
 0x461   :  { %v2931_v61 = vpop.eup %2930  ;;  %2635 = vst.msk [vmem:[%s8803_s3 + $0xf0] sm:$0xff] %vm270_vm0, %v2929_v15  ;;  %2942 = vtanh.f32 %v2130_v21  ;;  %v9249_v15 = vld [vmem:[#allocation19_spill] sm:$0xff]  ;;  %v2149_v16 = vadd.f32 %v6996_v10, %v1889_v36 }
 0x462   :  { %v2933_v27 = vpop.eup %2932  ;;  %2636 = vst.msk [vmem:[%s8803_s3 + $0xf8] sm:$0xff] %vm270_vm0, %v2931_v61  ;;  %2944 = vtanh.f32 %v2131_v33  ;;  %v1890_v33 = vmul.f32 %v6991_v2, %v9247_v7  ;;  %v2148_v13 = vadd.f32 %v6996_v10, %v1888_v29  ;;  %v9250_v61 = vld [vmem:[#allocation20_spill] sm:$0xff] }
 0x463   :  { %v2935_v35 = vpop.eup %2934  ;;  %2637 = vst.msk [vmem:[%s8803_s3 + $0x100] sm:$0xff] %vm270_vm0, %v2933_v27  ;;  %2946 = vtanh.f32 %v2132_v44  ;;  %v1891_v44 = vmul.f32 %v6991_v2, %v9248_v11  ;;  %v9251_v27 = vld [vmem:[#allocation21_spill] sm:$0xff] }
 0x464   :  { %v2937_v31 = vpop.eup %2936  ;;  %2638 = vst.msk [vmem:[%s8803_s3 + $0x108] sm:$0xff] %vm270_vm0, %v2935_v35  ;;  %2948 = vtanh.f32 %v2133_v54  ;;  %v1892_v54 = vmul.f32 %v6991_v2, %v9249_v15  ;;  %v2150_v3 = vadd.f32 %v6996_v10, %v1890_v33  ;;  %v9252_v35 = vld [vmem:[#allocation22_spill] sm:$0xff] }
 0x465   :  { %v2939_v45 = vpop.eup %2938  ;;  %2639 = vst.msk [vmem:[%s8803_s3 + $0x110] sm:$0xff] %vm270_vm0, %v2937_v31  ;;  %2950 = vtanh.f32 %v2134_v18  ;;  %v1893_v18 = vmul.f32 %v6991_v2, %v9250_v61  ;;  %v2151_v34 = vadd.f32 %v6996_v10, %v1891_v44  ;;  %v9253_v31 = vld [vmem:[#allocation23_spill] sm:$0xff] }
 0x466   :  { %v2941_v55 = vpop.eup %2940  ;;  %2640 = vst.msk [vmem:[%s8803_s3 + $0x118] sm:$0xff] %vm270_vm0, %v2939_v45  ;;  %2952 = vtanh.f32 %v2135_v30  ;;  %v1894_v30 = vmul.f32 %v6991_v2, %v9251_v27  ;;  %v2152_v40 = vadd.f32 %v6996_v10, %v1892_v54  ;;  %v9254_v45 = vld [vmem:[#allocation24_spill] sm:$0xff] }
 0x467   :  { %v2943_v62 = vpop.eup %2942  ;;  %2641 = vst.msk [vmem:[%s8803_s3 + $0x120] sm:$0xff] %vm270_vm0, %v2941_v55  ;;  %2954 = vtanh.f32 %v2136_v22  ;;  %v1895_v22 = vmul.f32 %v6991_v2, %v9252_v35  ;;  %v2153_v38 = vadd.f32 %v6996_v10, %v1893_v18  ;;  %v9255_v55 = vld [vmem:[#allocation25_spill] sm:$0xff] }
 0x468   :  { %v2945_v47 = vpop.eup %2944  ;;  %2642 = vst.msk [vmem:[%s8803_s3 + $0x128] sm:$0xff] %vm270_vm0, %v2943_v62  ;;  %2956 = vtanh.f32 %v2137_v43  ;;  %v1896_v43 = vmul.f32 %v6991_v2, %v9253_v31  ;;  %v2154_v50 = vadd.f32 %v6996_v10, %v1894_v30  ;;  %v9256_v62 = vld [vmem:[#allocation26_spill] sm:$0xff] }
 0x469   :  { %v2947_v57 = vpop.eup %2946  ;;  %2643 = vst.msk [vmem:[%s8803_s3 + $0x130] sm:$0xff] %vm270_vm0, %v2945_v47  ;;  %2958 = vtanh.f32 %v2138_v56  ;;  %v1897_v56 = vmul.f32 %v6991_v2, %v9254_v45  ;;  %v2155_v60 = vadd.f32 %v6996_v10, %v1895_v22  ;;  %v9257_v47 = vld [vmem:[#allocation27_spill] sm:$0xff] }
 0x46a   :  { %v2949_v39 = vpop.eup %2948  ;;  %2644 = vst.msk [vmem:[%s8803_s3 + $0x138] sm:$0xff] %vm270_vm0, %v2947_v57  ;;  %2960 = vtanh.f32 %v2139_v53  ;;  %v1898_v53 = vmul.f32 %v6991_v2, %v9255_v55  ;;  %v2156_v6 = vadd.f32 %v6996_v10, %v1896_v43  ;;  %v9258_v57 = vld [vmem:[#allocation28_spill] sm:$0xff] }
 0x46b   :  { %v2951_v32 = vpop.eup %2950  ;;  %2645 = vst.msk [vmem:[%s8803_s3 + $0x140] sm:$0xff] %vm270_vm0, %v2949_v39  ;;  %2962 = vtanh.f32 %v2140_v1  ;;  %v1899_v1 = vmul.f32 %v6991_v2, %v9256_v62  ;;  %v2157_v26 = vadd.f32 %v6996_v10, %v1897_v56  ;;  %v9259_v39 = vld [vmem:[#allocation29_spill] sm:$0xff] }
 0x46c   :  { %v2953_v5 = vpop.eup %2952  ;;  %2646 = vst.msk [vmem:[%s8803_s3 + $0x148] sm:$0xff] %vm270_vm0, %v2951_v32  ;;  %2964 = vtanh.f32 %v2141_v8  ;;  %v1900_v8 = vmul.f32 %v6991_v2, %v9257_v47  ;;  %v2158_v0 = vadd.f32 %v6996_v10, %v1898_v53  ;;  %v9260_v32 = vld [vmem:[#allocation30_spill] sm:$0xff] }
 0x46d   :  { %v2955_v21 = vpop.eup %2954  ;;  %2647 = vst.msk [vmem:[%s8803_s3 + $0x150] sm:$0xff] %vm270_vm0, %v2953_v5  ;;  %2966 = vtanh.f32 %v2142_v28  ;;  %v1901_v28 = vmul.f32 %v6991_v2, %v9258_v57  ;;  %v2159_v49 = vadd.f32 %v6996_v10, %v1899_v1  ;;  %v9261_v5 = vld [vmem:[#allocation31_spill] sm:$0xff] }
 0x46e   :  { %v2957_v42 = vpop.eup %2956  ;;  %2648 = vst.msk [vmem:[%s8803_s3 + $0x158] sm:$0xff] %vm270_vm0, %v2955_v21  ;;  %2968 = vtanh.f32 %v2143_v59  ;;  %v1902_v59 = vmul.f32 %v6991_v2, %v9259_v39  ;;  %v2160_v29 = vadd.f32 %v6996_v10, %v1900_v8  ;;  %v9262_v21 = vld [vmem:[#allocation32_spill] sm:$0xff] }
 0x46f   :  { %v2959_v48 = vpop.eup %2958  ;;  %2649 = vst.msk [vmem:[%s8803_s3 + $0x160] sm:$0xff] %vm270_vm0, %v2957_v42  ;;  %2970 = vtanh.f32 %v2144_v52  ;;  %v1903_v52 = vmul.f32 %v6991_v2, %v9260_v32  ;;  %v2161_v36 = vadd.f32 %v6996_v10, %v1901_v28  ;;  %v9263_v42 = vld [vmem:[#allocation33_spill] sm:$0xff] }
 0x470   :  { %v2961_v20 = vpop.eup %2960  ;;  %2650 = vst.msk [vmem:[%s8803_s3 + $0x168] sm:$0xff] %vm270_vm0, %v2959_v48  ;;  %2972 = vtanh.f32 %v2145_v4  ;;  %v1904_v4 = vmul.f32 %v6991_v2, %v9261_v5  ;;  %v2162_v33 = vadd.f32 %v6996_v10, %v1902_v59  ;;  %v9264_v48 = vld [vmem:[#allocation34_spill] sm:$0xff] }
 0x471   :  { %v2963_v23 = vpop.eup %2962  ;;  %2651 = vst.msk [vmem:[%s8803_s3 + $0x170] sm:$0xff] %vm270_vm0, %v2961_v20  ;;  %2974 = vtanh.f32 %v2146_v51  ;;  %v1905_v51 = vmul.f32 %v6991_v2, %v9262_v21  ;;  %v2163_v44 = vadd.f32 %v6996_v10, %v1903_v52  ;;  %v9265_v20 = vld [vmem:[#allocation35_spill] sm:$0xff] }
 0x472   :  { %v2965_v14 = vpop.eup %2964  ;;  %2652 = vst.msk [vmem:[%s8803_s3 + $0x178] sm:$0xff] %vm270_vm0, %v2963_v23  ;;  %2976 = vtanh.f32 %v2147_v9  ;;  %v1906_v9 = vmul.f32 %v6991_v2, %v9263_v42  ;;  %v2164_v54 = vadd.f32 %v6996_v10, %v1904_v4  ;;  %v9266_v23 = vld [vmem:[#allocation36_spill] sm:$0xff] }
 0x473   :  { %v2967_v37 = vpop.eup %2966  ;;  %2653 = vst.msk [vmem:[%s8803_s3 + $0x180] sm:$0xff] %vm270_vm0, %v2965_v14  ;;  %2978 = vtanh.f32 %v2148_v13  ;;  %v1907_v13 = vmul.f32 %v6991_v2, %v9264_v48  ;;  %v2165_v18 = vadd.f32 %v6996_v10, %v1905_v51  ;;  %v9267_v14 = vld [vmem:[#allocation37_spill] sm:$0xff] }
 0x474   :  { %v2969_v25 = vpop.eup %2968  ;;  %2654 = vst.msk [vmem:[%s8803_s3 + $0x188] sm:$0xff] %vm270_vm0, %v2967_v37  ;;  %2980 = vtanh.f32 %v2149_v16  ;;  %v1908_v16 = vmul.f32 %v6991_v2, %v9265_v20  ;;  %v2166_v30 = vadd.f32 %v6996_v10, %v1906_v9  ;;  %v9268_v37 = vld [vmem:[#allocation38_spill] sm:$0xff] }
 0x475   :  { %v2971_v46 = vpop.eup %2970  ;;  %2655 = vst.msk [vmem:[%s8803_s3 + $0x190] sm:$0xff] %vm270_vm0, %v2969_v25  ;;  %2982 = vtanh.f32 %v2150_v3  ;;  %v1909_v3 = vmul.f32 %v6991_v2, %v9266_v23  ;;  %v2167_v22 = vadd.f32 %v6996_v10, %v1907_v13  ;;  %v9269_v25 = vld [vmem:[#allocation39_spill] sm:$0xff] }
 0x476   :  { %v2973_v12 = vpop.eup %2972  ;;  %2656 = vst.msk [vmem:[%s8803_s3 + $0x198] sm:$0xff] %vm270_vm0, %v2971_v46  ;;  %2984 = vtanh.f32 %v2151_v34  ;;  %v1910_v34 = vmul.f32 %v6991_v2, %v9267_v14  ;;  %v2168_v43 = vadd.f32 %v6996_v10, %v1908_v16  ;;  %v9270_v46 = vld [vmem:[#allocation40_spill] sm:$0xff] }
 0x477   :  { %v2975_v41 = vpop.eup %2974  ;;  %2657 = vst.msk [vmem:[%s8803_s3 + $0x1a0] sm:$0xff] %vm270_vm0, %v2973_v12  ;;  %2986 = vtanh.f32 %v2152_v40  ;;  %v1911_v40 = vmul.f32 %v6991_v2, %v9268_v37  ;;  %v2169_v56 = vadd.f32 %v6996_v10, %v1909_v3  ;;  %v9271_v12 = vld [vmem:[#allocation41_spill] sm:$0xff] }
 0x478   :  { %v2977_v19 = vpop.eup %2976  ;;  %2658 = vst.msk [vmem:[%s8803_s3 + $0x1a8] sm:$0xff] %vm270_vm0, %v2975_v41  ;;  %2988 = vtanh.f32 %v2153_v38  ;;  %v1912_v38 = vmul.f32 %v6991_v2, %v9269_v25  ;;  %v2170_v53 = vadd.f32 %v6996_v10, %v1910_v34  ;;  %v9272_v41 = vld [vmem:[#allocation42_spill] sm:$0xff] }
 0x479   :  { %v2979_v17 = vpop.eup %2978  ;;  %2659 = vst.msk [vmem:[%s8803_s3 + $0x1b0] sm:$0xff] %vm270_vm0, %v2977_v19  ;;  %2990 = vtanh.f32 %v2154_v50  ;;  %v1913_v50 = vmul.f32 %v6991_v2, %v9270_v46  ;;  %v2171_v1 = vadd.f32 %v6996_v10, %v1911_v40  ;;  %v9273_v19 = vld [vmem:[#allocation43_spill] sm:$0xff] }
 0x47a   :  { %v2981_v24 = vpop.eup %2980  ;;  %2660 = vst.msk [vmem:[%s8803_s3 + $0x1b8] sm:$0xff] %vm270_vm0, %v2979_v17  ;;  %2992 = vtanh.f32 %v2155_v60  ;;  %v1914_v60 = vmul.f32 %v6991_v2, %v9271_v12  ;;  %v2172_v8 = vadd.f32 %v6996_v10, %v1912_v38  ;;  %v9274_v17 = vld [vmem:[#allocation44_spill] sm:$0xff] }
 0x47b   :  { %v2983_v58 = vpop.eup %2982  ;;  %2661 = vst.msk [vmem:[%s8803_s3 + $0x1c0] sm:$0xff] %vm270_vm0, %v2981_v24  ;;  %2994 = vtanh.f32 %v2156_v6  ;;  %v1915_v6 = vmul.f32 %v6991_v2, %v9272_v41  ;;  %v2173_v28 = vadd.f32 %v6996_v10, %v1913_v50  ;;  %v9275_v24 = vld [vmem:[#allocation45_spill] sm:$0xff] }
 0x47c   :  { %v2985_v63 = vpop.eup %2984  ;;  %2662 = vst.msk [vmem:[%s8803_s3 + $0x1c8] sm:$0xff] %vm270_vm0, %v2983_v58  ;;  %2996 = vtanh.f32 %v2157_v26  ;;  %v1916_v26 = vmul.f32 %v6991_v2, %v9273_v19  ;;  %v2174_v59 = vadd.f32 %v6996_v10, %v1914_v60  ;;  %v9276_v58 = vld [vmem:[#allocation46_spill] sm:$0xff] }
 0x47d   :  { %v2987_v7 = vpop.eup %2986  ;;  %2663 = vst.msk [vmem:[%s8803_s3 + $0x1d0] sm:$0xff] %vm270_vm0, %v2985_v63  ;;  %2998 = vtanh.f32 %v2158_v0  ;;  %v1917_v0 = vmul.f32 %v6991_v2, %v9274_v17  ;;  %v2175_v52 = vadd.f32 %v6996_v10, %v1915_v6  ;;  %v9277_v63 = vld [vmem:[#allocation47_spill] sm:$0xff] }
 0x47e   :  { %v2989_v11 = vpop.eup %2988  ;;  %2664 = vst.msk [vmem:[%s8803_s3 + $0x1d8] sm:$0xff] %vm270_vm0, %v2987_v7  ;;  %3000 = vtanh.f32 %v2159_v49  ;;  %v1918_v49 = vmul.f32 %v6991_v2, %v9275_v24  ;;  %v2176_v4 = vadd.f32 %v6996_v10, %v1916_v26  ;;  %v9278_v7 = vld [vmem:[#allocation48_spill] sm:$0xff] }
 0x47f   :  { %v2991_v15 = vpop.eup %2990  ;;  %2665 = vst.msk [vmem:[%s8803_s3 + $0x1e0] sm:$0xff] %vm270_vm0, %v2989_v11  ;;  %3002 = vtanh.f32 %v2160_v29  ;;  %v1919_v29 = vmul.f32 %v6991_v2, %v9276_v58  ;;  %v2177_v51 = vadd.f32 %v6996_v10, %v1917_v0  ;;  %v9279_v11 = vld [vmem:[#allocation49_spill] sm:$0xff] }
 0x480   :  { %v2993_v61 = vpop.eup %2992  ;;  %2666 = vst.msk [vmem:[%s8803_s3 + $0x1e8] sm:$0xff] %vm270_vm0, %v2991_v15  ;;  %3004 = vtanh.f32 %v2161_v36  ;;  %v1920_v36 = vmul.f32 %v6991_v2, %v9277_v63  ;;  %v2178_v9 = vadd.f32 %v6996_v10, %v1918_v49  ;;  %v9280_v15 = vld [vmem:[#allocation50_spill] sm:$0xff] }
 0x481   :  { %v2995_v27 = vpop.eup %2994  ;;  %2667 = vst.msk [vmem:[%s8803_s3 + $0x1f0] sm:$0xff] %vm270_vm0, %v2993_v61  ;;  %3006 = vtanh.f32 %v2162_v33  ;;  %v1921_v33 = vmul.f32 %v6991_v2, %v9278_v7  ;;  %v2179_v13 = vadd.f32 %v6996_v10, %v1919_v29  ;;  %v9281_v61 = vld [vmem:[#allocation51_spill] sm:$0xff] }
 0x482   :  { %v2997_v35 = vpop.eup %2996  ;;  %2668 = vst.msk [vmem:[%s8803_s3 + $0x1f8] sm:$0xff] %vm270_vm0, %v2995_v27  ;;  %3008 = vtanh.f32 %v2163_v44  ;;  %v1922_v44 = vmul.f32 %v6991_v2, %v9279_v11  ;;  %v2180_v16 = vadd.f32 %v6996_v10, %v1920_v36  ;;  %v9282_v27 = vld [vmem:[#allocation52_spill] sm:$0xff] }
 0x483   :  { %v2999_v31 = vpop.eup %2998  ;;  %2669 = vst.msk [vmem:[%s8803_s3 + $0x200] sm:$0xff] %vm270_vm0, %v2997_v35  ;;  %3010 = vtanh.f32 %v2164_v54  ;;  %v1923_v54 = vmul.f32 %v6991_v2, %v9280_v15  ;;  %v2181_v3 = vadd.f32 %v6996_v10, %v1921_v33  ;;  %v9283_v35 = vld [vmem:[#allocation53_spill] sm:$0xff] }
 0x484   :  { %v3001_v45 = vpop.eup %3000  ;;  %2670 = vst.msk [vmem:[%s8803_s3 + $0x208] sm:$0xff] %vm270_vm0, %v2999_v31  ;;  %3012 = vtanh.f32 %v2165_v18  ;;  %v1924_v18 = vmul.f32 %v6991_v2, %v9281_v61  ;;  %v2182_v34 = vadd.f32 %v6996_v10, %v1922_v44  ;;  %v9284_v31 = vld [vmem:[#allocation54_spill] sm:$0xff] }
 0x485   :  { %v3003_v55 = vpop.eup %3002  ;;  %2671 = vst.msk [vmem:[%s8803_s3 + $0x210] sm:$0xff] %vm270_vm0, %v3001_v45  ;;  %3014 = vtanh.f32 %v2166_v30  ;;  %v1925_v30 = vmul.f32 %v6991_v2, %v9282_v27  ;;  %v2183_v40 = vadd.f32 %v6996_v10, %v1923_v54  ;;  %v9285_v45 = vld [vmem:[#allocation55_spill] sm:$0xff] }
 0x486   :  { %v3005_v62 = vpop.eup %3004  ;;  %2672 = vst.msk [vmem:[%s8803_s3 + $0x218] sm:$0xff] %vm270_vm0, %v3003_v55  ;;  %3016 = vtanh.f32 %v2167_v22  ;;  %v1926_v22 = vmul.f32 %v6991_v2, %v9283_v35  ;;  %v2184_v38 = vadd.f32 %v6996_v10, %v1924_v18  ;;  %v9286_v55 = vld [vmem:[#allocation56_spill] sm:$0xff] }
 0x487   :  { %v3007_v47 = vpop.eup %3006  ;;  %2673 = vst.msk [vmem:[%s8803_s3 + $0x220] sm:$0xff] %vm270_vm0, %v3005_v62  ;;  %3018 = vtanh.f32 %v2168_v43  ;;  %v1927_v43 = vmul.f32 %v6991_v2, %v9284_v31  ;;  %v2185_v50 = vadd.f32 %v6996_v10, %v1925_v30  ;;  %v9287_v62 = vld [vmem:[#allocation57_spill] sm:$0xff] }
 0x488   :  { %v3009_v57 = vpop.eup %3008  ;;  %2674 = vst.msk [vmem:[%s8803_s3 + $0x228] sm:$0xff] %vm270_vm0, %v3007_v47  ;;  %3020 = vtanh.f32 %v2169_v56  ;;  %v1928_v56 = vmul.f32 %v6991_v2, %v9285_v45  ;;  %v2186_v60 = vadd.f32 %v6996_v10, %v1926_v22  ;;  %v9288_v47 = vld [vmem:[#allocation58_spill] sm:$0xff] }
 0x489   :  { %v3011_v39 = vpop.eup %3010  ;;  %2675 = vst.msk [vmem:[%s8803_s3 + $0x230] sm:$0xff] %vm270_vm0, %v3009_v57  ;;  %3022 = vtanh.f32 %v2170_v53  ;;  %v1929_v53 = vmul.f32 %v6991_v2, %v9286_v55  ;;  %v2187_v6 = vadd.f32 %v6996_v10, %v1927_v43  ;;  %v9289_v57 = vld [vmem:[#allocation59_spill] sm:$0xff]  ;;  %v7711_v43 = vld [vmem:[%s8801_s2] ss:$0 sm:$0xff] }
 0x48a   :  { %v3013_v32 = vpop.eup %3012  ;;  %2676 = vst.msk [vmem:[%s8803_s3 + $0x238] sm:$0xff] %vm270_vm0, %v3011_v39  ;;  %3024 = vtanh.f32 %v2171_v1  ;;  %v1930_v1 = vmul.f32 %v6991_v2, %v9287_v62  ;;  %v2188_v26 = vadd.f32 %v6996_v10, %v1928_v56  ;;  %v9290_v39 = vld [vmem:[#allocation60_spill] sm:$0xff] }
 0x48b   :  { %v3015_v5 = vpop.eup %3014  ;;  %2677 = vst.msk [vmem:[%s8803_s3 + $0x240] sm:$0xff] %vm270_vm0, %v3013_v32  ;;  %3026 = vtanh.f32 %v2172_v8  ;;  %v1931_v8 = vmul.f32 %v6991_v2, %v9288_v47  ;;  %v2189_v0 = vadd.f32 %v6996_v10, %v1929_v53  ;;  %v9291_v32 = vld [vmem:[#allocation61_spill] sm:$0xff] }
 0x48c   :  { %v3017_v21 = vpop.eup %3016  ;;  %2678 = vst.msk [vmem:[%s8803_s3 + $0x248] sm:$0xff] %vm270_vm0, %v3015_v5  ;;  %3028 = vtanh.f32 %v2173_v28  ;;  %v1932_v28 = vmul.f32 %v6991_v2, %v9289_v57  ;;  %v2190_v49 = vadd.f32 %v6996_v10, %v1930_v1  ;;  %v9292_v5 = vld [vmem:[#allocation62_spill] sm:$0xff] }
 0x48d   :  { %v3019_v42 = vpop.eup %3018  ;;  %2679 = vst.msk [vmem:[%s8803_s3 + $0x250] sm:$0xff] %vm270_vm0, %v3017_v21  ;;  %3030 = vtanh.f32 %v2174_v59  ;;  %v1933_v59 = vmul.f32 %v6991_v2, %v9290_v39  ;;  %v2191_v29 = vadd.f32 %v6996_v10, %v1931_v8  ;;  %v9293_v21 = vld [vmem:[#allocation63_spill] sm:$0xff] }
 0x48e   :  { %v3021_v48 = vpop.eup %3020  ;;  %2680 = vst.msk [vmem:[%s8803_s3 + $0x258] sm:$0xff] %vm270_vm0, %v3019_v42  ;;  %3032 = vtanh.f32 %v2175_v52  ;;  %v1934_v52 = vmul.f32 %v6991_v2, %v9291_v32  ;;  %v2192_v36 = vadd.f32 %v6996_v10, %v1932_v28  ;;  %v9294_v42 = vld [vmem:[#allocation64_spill] sm:$0xff] }
 0x48f   :  { %v3023_v20 = vpop.eup %3022  ;;  %2681 = vst.msk [vmem:[%s8803_s3 + $0x260] sm:$0xff] %vm270_vm0, %v3021_v48  ;;  %3034 = vtanh.f32 %v2176_v4  ;;  %v1935_v4 = vmul.f32 %v6991_v2, %v9292_v5  ;;  %v2193_v33 = vadd.f32 %v6996_v10, %v1933_v59  ;;  %v9295_v48 = vld [vmem:[#allocation65_spill] sm:$0xff] }
 0x490   :  { %v3025_v23 = vpop.eup %3024  ;;  %2682 = vst.msk [vmem:[%s8803_s3 + $0x268] sm:$0xff] %vm270_vm0, %v3023_v20  ;;  %3036 = vtanh.f32 %v2177_v51  ;;  %v1936_v51 = vmul.f32 %v6991_v2, %v9293_v21  ;;  %v2194_v44 = vadd.f32 %v6996_v10, %v1934_v52  ;;  %v9296_v20 = vld [vmem:[#allocation66_spill] sm:$0xff] }
 0x491   :  { %v3027_v14 = vpop.eup %3026  ;;  %2683 = vst.msk [vmem:[%s8803_s3 + $0x270] sm:$0xff] %vm270_vm0, %v3025_v23  ;;  %3038 = vtanh.f32 %v2178_v9  ;;  %v1937_v9 = vmul.f32 %v6991_v2, %v9294_v42  ;;  %v2195_v54 = vadd.f32 %v6996_v10, %v1935_v4  ;;  %v9297_v23 = vld [vmem:[#allocation67_spill] sm:$0xff] }
 0x492   :  { %v3029_v37 = vpop.eup %3028  ;;  %2684 = vst.msk [vmem:[%s8803_s3 + $0x278] sm:$0xff] %vm270_vm0, %v3027_v14  ;;  %3040 = vtanh.f32 %v2179_v13  ;;  %v1938_v13 = vmul.f32 %v6991_v2, %v9295_v48  ;;  %v2196_v18 = vadd.f32 %v6996_v10, %v1936_v51  ;;  %v9298_v14 = vld [vmem:[#allocation68_spill] sm:$0xff] }
 0x493   :  { %v3031_v25 = vpop.eup %3030  ;;  %2685 = vst.msk [vmem:[%s8803_s3 + $0x280] sm:$0xff] %vm270_vm0, %v3029_v37  ;;  %3042 = vtanh.f32 %v2180_v16  ;;  %v1939_v16 = vmul.f32 %v6991_v2, %v9296_v20  ;;  %v2197_v30 = vadd.f32 %v6996_v10, %v1937_v9  ;;  %v9299_v37 = vld [vmem:[#allocation69_spill] sm:$0xff] }
 0x494   :  { %v3033_v46 = vpop.eup %3032  ;;  %2686 = vst.msk [vmem:[%s8803_s3 + $0x288] sm:$0xff] %vm270_vm0, %v3031_v25  ;;  %3044 = vtanh.f32 %v2181_v3  ;;  %v1940_v3 = vmul.f32 %v6991_v2, %v9297_v23  ;;  %v2198_v22 = vadd.f32 %v6996_v10, %v1938_v13 }
 0x495   :  { %v3035_v12 = vpop.eup %3034  ;;  %2687 = vst.msk [vmem:[%s8803_s3 + $0x290] sm:$0xff] %vm270_vm0, %v3033_v46  ;;  %3046 = vtanh.f32 %v2182_v34  ;;  %v1941_v34 = vmul.f32 %v6991_v2, %v9298_v14  ;;  %v2199_v25 = vadd.f32 %v7711_v43, %v1939_v16  ;;  %v9301_v46 = vld [vmem:[#allocation71_spill] sm:$0xff] }
 0x496   :  { %v3037_v41 = vpop.eup %3036  ;;  %2688 = vst.msk [vmem:[%s8803_s3 + $0x298] sm:$0xff] %vm270_vm0, %v3035_v12  ;;  %3048 = vtanh.f32 %v2183_v40  ;;  %v1942_v40 = vmul.f32 %v6991_v2, %v9299_v37  ;;  %v2200_v56 = vadd.f32 %v7711_v43, %v1940_v3  ;;  %v9302_v12 = vld [vmem:[#allocation72_spill] sm:$0xff] }
 0x497   :  { %v3039_v19 = vpop.eup %3038  ;;  %2689 = vst.msk [vmem:[%s8803_s3 + $0x2a0] sm:$0xff] %vm270_vm0, %v3037_v41  ;;  %3050 = vtanh.f32 %v2184_v38  ;;  %v9300_v38 = vld [vmem:[#allocation70_spill] sm:$0xff]  ;;  %v2201_v53 = vadd.f32 %v7711_v43, %v1941_v34  ;;  %v9303_v41 = vld [vmem:[#allocation73_spill] sm:$0xff] }
 0x498   :  { %v3041_v17 = vpop.eup %3040  ;;  %2690 = vst.msk [vmem:[%s8803_s3 + $0x2a8] sm:$0xff] %vm270_vm0, %v3039_v19  ;;  %3052 = vtanh.f32 %v2185_v50  ;;  %v1943_v10 = vmul.f32 %v6991_v2, %v9300_v38  ;;  %v1944_v50 = vmul.f32 %v6991_v2, %v9301_v46  ;;  %v2202_v1 = vadd.f32 %v7711_v43, %v1942_v40  ;;  %v9304_v19 = vld [vmem:[#allocation74_spill] sm:$0xff] }
 0x499   :  { %v3043_v24 = vpop.eup %3042  ;;  %2691 = vst.msk [vmem:[%s8803_s3 + $0x2b0] sm:$0xff] %vm270_vm0, %v3041_v17  ;;  %3054 = vtanh.f32 %v2186_v60  ;;  %v1945_v60 = vmul.f32 %v6991_v2, %v9302_v12  ;;  %v9305_v17 = vld [vmem:[#allocation75_spill] sm:$0xff] }
 0x49a   :  { %v3045_v58 = vpop.eup %3044  ;;  %2692 = vst.msk [vmem:[%s8803_s3 + $0x2b8] sm:$0xff] %vm270_vm0, %v3043_v24  ;;  %3056 = vtanh.f32 %v2187_v6  ;;  %v1946_v6 = vmul.f32 %v6991_v2, %v9303_v41  ;;  %v2203_v8 = vadd.f32 %v7711_v43, %v1943_v10  ;;  %v2204_v28 = vadd.f32 %v7711_v43, %v1944_v50  ;;  %v9306_v24 = vld [vmem:[#allocation76_spill] sm:$0xff] }
 0x49b   :  { %v3047_v63 = vpop.eup %3046  ;;  %2693 = vst.msk [vmem:[%s8803_s3 + $0x2c0] sm:$0xff] %vm270_vm0, %v3045_v58  ;;  %3058 = vtanh.f32 %v2188_v26  ;;  %v1947_v26 = vmul.f32 %v6991_v2, %v9304_v19  ;;  %v2205_v59 = vadd.f32 %v7711_v43, %v1945_v60  ;;  %v9307_v58 = vld [vmem:[#allocation77_spill] sm:$0xff] }
 0x49c   :  { %v3049_v7 = vpop.eup %3048  ;;  %2694 = vst.msk [vmem:[%s8803_s3 + $0x2c8] sm:$0xff] %vm270_vm0, %v3047_v63  ;;  %3060 = vtanh.f32 %v2189_v0  ;;  %v1948_v0 = vmul.f32 %v6991_v2, %v9305_v17  ;;  %v2206_v52 = vadd.f32 %v7711_v43, %v1946_v6  ;;  %v9308_v63 = vld [vmem:[#allocation78_spill] sm:$0xff] }
 0x49d   :  { %v3051_v11 = vpop.eup %3050  ;;  %2695 = vst.msk [vmem:[%s8803_s3 + $0x2d0] sm:$0xff] %vm270_vm0, %v3049_v7  ;;  %3062 = vtanh.f32 %v2190_v49  ;;  %v1949_v49 = vmul.f32 %v6991_v2, %v9306_v24  ;;  %v2207_v4 = vadd.f32 %v7711_v43, %v1947_v26  ;;  %v9309_v7 = vld [vmem:[#allocation79_spill] sm:$0xff] }
 0x49e   :  { %v3053_v15 = vpop.eup %3052  ;;  %2696 = vst.msk [vmem:[%s8803_s3 + $0x2d8] sm:$0xff] %vm270_vm0, %v3051_v11  ;;  %3064 = vtanh.f32 %v2191_v29  ;;  %v1950_v29 = vmul.f32 %v6991_v2, %v9307_v58  ;;  %v2208_v51 = vadd.f32 %v7711_v43, %v1948_v0  ;;  %v9310_v11 = vld [vmem:[#allocation80_spill] sm:$0xff] }
 0x49f   :  { %v3055_v61 = vpop.eup %3054  ;;  %2697 = vst.msk [vmem:[%s8803_s3 + $0x2e0] sm:$0xff] %vm270_vm0, %v3053_v15  ;;  %3066 = vtanh.f32 %v2192_v36  ;;  %v1951_v36 = vmul.f32 %v6991_v2, %v9308_v63  ;;  %v2209_v9 = vadd.f32 %v7711_v43, %v1949_v49  ;;  %v9311_v15 = vld [vmem:[#allocation81_spill] sm:$0xff] }
 0x4a0   :  { %v3057_v27 = vpop.eup %3056  ;;  %2698 = vst.msk [vmem:[%s8803_s3 + $0x2e8] sm:$0xff] %vm270_vm0, %v3055_v61  ;;  %3068 = vtanh.f32 %v2193_v33  ;;  %v1952_v33 = vmul.f32 %v6991_v2, %v9309_v7  ;;  %v2210_v13 = vadd.f32 %v7711_v43, %v1950_v29  ;;  %v9312_v61 = vld [vmem:[#allocation82_spill] sm:$0xff] }
 0x4a1   :  { %v3059_v35 = vpop.eup %3058  ;;  %2699 = vst.msk [vmem:[%s8803_s3 + $0x2f0] sm:$0xff] %vm270_vm0, %v3057_v27  ;;  %3070 = vtanh.f32 %v2194_v44  ;;  %v1953_v44 = vmul.f32 %v6991_v2, %v9310_v11  ;;  %v2211_v16 = vadd.f32 %v7711_v43, %v1951_v36  ;;  %v9313_v27 = vld [vmem:[#allocation83_spill] sm:$0xff] }
 0x4a2   :  { %v3061_v31 = vpop.eup %3060  ;;  %2700 = vst.msk [vmem:[%s8803_s3 + $0x2f8] sm:$0xff] %vm270_vm0, %v3059_v35  ;;  %3072 = vtanh.f32 %v2195_v54  ;;  %v1954_v54 = vmul.f32 %v6991_v2, %v9311_v15  ;;  %v2212_v3 = vadd.f32 %v7711_v43, %v1952_v33  ;;  %v9314_v35 = vld [vmem:[#allocation84_spill] sm:$0xff] }
 0x4a3   :  { %v3063_v45 = vpop.eup %3062  ;;  %2701 = vst.msk [vmem:[%s8803_s3 + $0x300] sm:$0xff] %vm270_vm0, %v3061_v31  ;;  %3074 = vtanh.f32 %v2196_v18  ;;  %v1955_v18 = vmul.f32 %v6991_v2, %v9312_v61  ;;  %v2213_v34 = vadd.f32 %v7711_v43, %v1953_v44  ;;  %v9315_v31 = vld [vmem:[#allocation85_spill] sm:$0xff] }
 0x4a4   :  { %v3065_v55 = vpop.eup %3064  ;;  %2702 = vst.msk [vmem:[%s8803_s3 + $0x308] sm:$0xff] %vm270_vm0, %v3063_v45  ;;  %3076 = vtanh.f32 %v2197_v30  ;;  %v1956_v30 = vmul.f32 %v6991_v2, %v9313_v27  ;;  %v2214_v40 = vadd.f32 %v7711_v43, %v1954_v54  ;;  %v9316_v45 = vld [vmem:[#allocation86_spill] sm:$0xff] }
 0x4a5   :  { %v3067_v62 = vpop.eup %3066  ;;  %2703 = vst.msk [vmem:[%s8803_s3 + $0x310] sm:$0xff] %vm270_vm0, %v3065_v55  ;;  %3078 = vtanh.f32 %v2198_v22  ;;  %v1957_v22 = vmul.f32 %v6991_v2, %v9314_v35  ;;  %v2215_v10 = vadd.f32 %v7711_v43, %v1955_v18  ;;  %v9317_v55 = vld [vmem:[#allocation87_spill] sm:$0xff] }
 0x4a6   :  { %v3069_v47 = vpop.eup %3068  ;;  %2704 = vst.msk [vmem:[%s8803_s3 + $0x318] sm:$0xff] %vm270_vm0, %v3067_v62  ;;  %3080 = vtanh.f32 %v2199_v25  ;;  %v1958_v25 = vmul.f32 %v6991_v2, %v9315_v31  ;;  %v2216_v50 = vadd.f32 %v7711_v43, %v1956_v30  ;;  %v9318_v62 = vld [vmem:[#allocation88_spill] sm:$0xff] }
 0x4a7   :  { %v3071_v57 = vpop.eup %3070  ;;  %2705 = vst.msk [vmem:[%s8803_s3 + $0x320] sm:$0xff] %vm270_vm0, %v3069_v47  ;;  %3082 = vtanh.f32 %v2200_v56  ;;  %v1959_v56 = vmul.f32 %v6991_v2, %v9316_v45  ;;  %v2217_v60 = vadd.f32 %v7711_v43, %v1957_v22  ;;  %v9319_v47 = vld [vmem:[#allocation89_spill] sm:$0xff] }
 0x4a8   :  { %v3073_v39 = vpop.eup %3072  ;;  %2706 = vst.msk [vmem:[%s8803_s3 + $0x328] sm:$0xff] %vm270_vm0, %v3071_v57  ;;  %3084 = vtanh.f32 %v2201_v53  ;;  %v1960_v53 = vmul.f32 %v6991_v2, %v9317_v55  ;;  %v2218_v6 = vadd.f32 %v7711_v43, %v1958_v25  ;;  %v9320_v57 = vld [vmem:[#allocation90_spill] sm:$0xff] }
 0x4a9   :  { %v3075_v32 = vpop.eup %3074  ;;  %2707 = vst.msk [vmem:[%s8803_s3 + $0x330] sm:$0xff] %vm270_vm0, %v3073_v39  ;;  %3086 = vtanh.f32 %v2202_v1  ;;  %v1961_v1 = vmul.f32 %v6991_v2, %v9318_v62  ;;  %v2219_v26 = vadd.f32 %v7711_v43, %v1959_v56  ;;  %v9321_v39 = vld [vmem:[#allocation91_spill] sm:$0xff] }
 0x4aa   :  { %v3077_v5 = vpop.eup %3076  ;;  %2708 = vst.msk [vmem:[%s8803_s3 + $0x338] sm:$0xff] %vm270_vm0, %v3075_v32  ;;  %3088 = vtanh.f32 %v2203_v8  ;;  %v1962_v8 = vmul.f32 %v6991_v2, %v9319_v47  ;;  %v2220_v0 = vadd.f32 %v7711_v43, %v1960_v53  ;;  %v9322_v32 = vld [vmem:[#allocation92_spill] sm:$0xff] }
 0x4ab   :  { %v3079_v21 = vpop.eup %3078  ;;  %2709 = vst.msk [vmem:[%s8803_s3 + $0x340] sm:$0xff] %vm270_vm0, %v3077_v5  ;;  %3090 = vtanh.f32 %v2204_v28  ;;  %v1963_v28 = vmul.f32 %v6991_v2, %v9320_v57  ;;  %v2221_v49 = vadd.f32 %v7711_v43, %v1961_v1  ;;  %v9323_v5 = vld [vmem:[#allocation93_spill] sm:$0xff] }
 0x4ac   :  { %v3081_v42 = vpop.eup %3080  ;;  %2710 = vst.msk [vmem:[%s8803_s3 + $0x348] sm:$0xff] %vm270_vm0, %v3079_v21  ;;  %3092 = vtanh.f32 %v2205_v59  ;;  %v1964_v59 = vmul.f32 %v6991_v2, %v9321_v39  ;;  %v2222_v29 = vadd.f32 %v7711_v43, %v1962_v8  ;;  %v9324_v21 = vld [vmem:[#allocation94_spill] sm:$0xff] }
 0x4ad   :  { %v3083_v48 = vpop.eup %3082  ;;  %2711 = vst.msk [vmem:[%s8803_s3 + $0x350] sm:$0xff] %vm270_vm0, %v3081_v42  ;;  %3094 = vtanh.f32 %v2206_v52  ;;  %v1965_v52 = vmul.f32 %v6991_v2, %v9322_v32  ;;  %v2223_v36 = vadd.f32 %v7711_v43, %v1963_v28  ;;  %v9325_v42 = vld [vmem:[#allocation95_spill] sm:$0xff] }
 0x4ae   :  { %v3085_v20 = vpop.eup %3084  ;;  %2712 = vst.msk [vmem:[%s8803_s3 + $0x358] sm:$0xff] %vm270_vm0, %v3083_v48  ;;  %3096 = vtanh.f32 %v2207_v4  ;;  %v1966_v4 = vmul.f32 %v6991_v2, %v9323_v5  ;;  %v2224_v33 = vadd.f32 %v7711_v43, %v1964_v59  ;;  %v9326_v48 = vld [vmem:[#allocation96_spill] sm:$0xff] }
 0x4af   :  { %v3087_v23 = vpop.eup %3086  ;;  %2713 = vst.msk [vmem:[%s8803_s3 + $0x360] sm:$0xff] %vm270_vm0, %v3085_v20  ;;  %3098 = vtanh.f32 %v2208_v51  ;;  %v1967_v51 = vmul.f32 %v6991_v2, %v9324_v21  ;;  %v2225_v44 = vadd.f32 %v7711_v43, %v1965_v52  ;;  %v9327_v20 = vld [vmem:[#allocation97_spill] sm:$0xff] }
 0x4b0   :  { %v3089_v14 = vpop.eup %3088  ;;  %2714 = vst.msk [vmem:[%s8803_s3 + $0x368] sm:$0xff] %vm270_vm0, %v3087_v23  ;;  %3100 = vtanh.f32 %v2209_v9  ;;  %v1968_v9 = vmul.f32 %v6991_v2, %v9325_v42  ;;  %v2226_v54 = vadd.f32 %v7711_v43, %v1966_v4  ;;  %v9328_v23 = vld [vmem:[#allocation98_spill] sm:$0xff] }
 0x4b1   :  { %v3091_v37 = vpop.eup %3090  ;;  %2715 = vst.msk [vmem:[%s8803_s3 + $0x370] sm:$0xff] %vm270_vm0, %v3089_v14  ;;  %3102 = vtanh.f32 %v2210_v13  ;;  %v1969_v13 = vmul.f32 %v6991_v2, %v9326_v48  ;;  %v2227_v18 = vadd.f32 %v7711_v43, %v1967_v51  ;;  %v9329_v14 = vld [vmem:[#allocation99_spill] sm:$0xff] }
 0x4b2   :  { %v3093_v38 = vpop.eup %3092  ;;  %2716 = vst.msk [vmem:[%s8803_s3 + $0x378] sm:$0xff] %vm270_vm0, %v3091_v37  ;;  %3104 = vtanh.f32 %v2211_v16  ;;  %v1970_v16 = vmul.f32 %v6991_v2, %v9327_v20  ;;  %v2228_v30 = vadd.f32 %v7711_v43, %v1968_v9  ;;  %v9330_v37 = vld [vmem:[#allocation100_spill] sm:$0xff] }
 0x4b3   :  { %v3095_v46 = vpop.eup %3094  ;;  %2717 = vst.msk [vmem:[%s8803_s3 + $0x380] sm:$0xff] %vm270_vm0, %v3093_v38  ;;  %3106 = vtanh.f32 %v2212_v3  ;;  %v1971_v3 = vmul.f32 %v6991_v2, %v9328_v23  ;;  %v2229_v22 = vadd.f32 %v7711_v43, %v1969_v13  ;;  %v9331_v38 = vld [vmem:[#allocation101_spill] sm:$0xff] }
 0x4b4   :  { %v3097_v12 = vpop.eup %3096  ;;  %2718 = vst.msk [vmem:[%s8803_s3 + $0x388] sm:$0xff] %vm270_vm0, %v3095_v46  ;;  %3108 = vtanh.f32 %v2213_v34  ;;  %v1972_v34 = vmul.f32 %v6991_v2, %v9329_v14  ;;  %v2230_v25 = vadd.f32 %v7711_v43, %v1970_v16  ;;  %v9332_v46 = vld [vmem:[#allocation102_spill] sm:$0xff] }
 0x4b5   :  { %v3099_v41 = vpop.eup %3098  ;;  %2719 = vst.msk [vmem:[%s8803_s3 + $0x390] sm:$0xff] %vm270_vm0, %v3097_v12  ;;  %3110 = vtanh.f32 %v2214_v40  ;;  %v1973_v40 = vmul.f32 %v6991_v2, %v9330_v37  ;;  %v2231_v56 = vadd.f32 %v7711_v43, %v1971_v3  ;;  %v9333_v12 = vld [vmem:[#allocation103_spill] sm:$0xff] }
 0x4b6   :  { %v3101_v19 = vpop.eup %3100  ;;  %2720 = vst.msk [vmem:[%s8803_s3 + $0x398] sm:$0xff] %vm270_vm0, %v3099_v41  ;;  %3112 = vtanh.f32 %v2215_v10  ;;  %v1974_v10 = vmul.f32 %v6991_v2, %v9331_v38  ;;  %v2232_v53 = vadd.f32 %v7711_v43, %v1972_v34  ;;  %v9334_v41 = vld [vmem:[#allocation104_spill] sm:$0xff] }
 0x4b7   :  { %v3103_v17 = vpop.eup %3102  ;;  %2721 = vst.msk [vmem:[%s8803_s3 + $0x3a0] sm:$0xff] %vm270_vm0, %v3101_v19  ;;  %3114 = vtanh.f32 %v2216_v50  ;;  %v1975_v50 = vmul.f32 %v6991_v2, %v9332_v46  ;;  %v2233_v1 = vadd.f32 %v7711_v43, %v1973_v40  ;;  %v9335_v19 = vld [vmem:[#allocation105_spill] sm:$0xff] }
 0x4b8   :  { %v3105_v24 = vpop.eup %3104  ;;  %2722 = vst.msk [vmem:[%s8803_s3 + $0x3a8] sm:$0xff] %vm270_vm0, %v3103_v17  ;;  %3116 = vtanh.f32 %v2217_v60  ;;  %v1976_v60 = vmul.f32 %v6991_v2, %v9333_v12  ;;  %v2234_v8 = vadd.f32 %v7711_v43, %v1974_v10  ;;  %v9336_v17 = vld [vmem:[#allocation106_spill] sm:$0xff] }
 0x4b9   :  { %v3107_v58 = vpop.eup %3106  ;;  %2723 = vst.msk [vmem:[%s8803_s3 + $0x3b0] sm:$0xff] %vm270_vm0, %v3105_v24  ;;  %3118 = vtanh.f32 %v2218_v6  ;;  %v1977_v6 = vmul.f32 %v6991_v2, %v9334_v41  ;;  %v2235_v28 = vadd.f32 %v7711_v43, %v1975_v50  ;;  %v9337_v24 = vld [vmem:[#allocation107_spill] sm:$0xff] }
 0x4ba   :  { %v3109_v63 = vpop.eup %3108  ;;  %2724 = vst.msk [vmem:[%s8803_s3 + $0x3b8] sm:$0xff] %vm270_vm0, %v3107_v58  ;;  %3120 = vtanh.f32 %v2219_v26  ;;  %v1978_v26 = vmul.f32 %v6991_v2, %v9335_v19  ;;  %v2236_v59 = vadd.f32 %v7711_v43, %v1976_v60  ;;  %v9338_v58 = vld [vmem:[#allocation108_spill] sm:$0xff] }
 0x4bb   :  { %v3111_v7 = vpop.eup %3110  ;;  %2725 = vst.msk [vmem:[%s8803_s3 + $0x3c0] sm:$0xff] %vm270_vm0, %v3109_v63  ;;  %3122 = vtanh.f32 %v2220_v0  ;;  %v1979_v0 = vmul.f32 %v6991_v2, %v9336_v17  ;;  %v2237_v52 = vadd.f32 %v7711_v43, %v1977_v6  ;;  %v9339_v63 = vld [vmem:[#allocation109_spill] sm:$0xff] }
 0x4bc   :  { %v3113_v11 = vpop.eup %3112  ;;  %2726 = vst.msk [vmem:[%s8803_s3 + $0x3c8] sm:$0xff] %vm270_vm0, %v3111_v7  ;;  %3124 = vtanh.f32 %v2221_v49  ;;  %v1980_v49 = vmul.f32 %v6991_v2, %v9337_v24  ;;  %v2238_v4 = vadd.f32 %v7711_v43, %v1978_v26  ;;  %v9340_v7 = vld [vmem:[#allocation110_spill] sm:$0xff] }
 0x4bd   :  { %v3115_v15 = vpop.eup %3114  ;;  %2727 = vst.msk [vmem:[%s8803_s3 + $0x3d0] sm:$0xff] %vm270_vm0, %v3113_v11  ;;  %3126 = vtanh.f32 %v2222_v29  ;;  %v1981_v29 = vmul.f32 %v6991_v2, %v9338_v58  ;;  %v2239_v51 = vadd.f32 %v7711_v43, %v1979_v0  ;;  %v9341_v11 = vld [vmem:[#allocation111_spill] sm:$0xff] }
 0x4be   :  { %v3117_v61 = vpop.eup %3116  ;;  %2728 = vst.msk [vmem:[%s8803_s3 + $0x3d8] sm:$0xff] %vm270_vm0, %v3115_v15  ;;  %3128 = vtanh.f32 %v2223_v36  ;;  %v1982_v36 = vmul.f32 %v6991_v2, %v9339_v63  ;;  %v2240_v9 = vadd.f32 %v7711_v43, %v1980_v49  ;;  %v9342_v15 = vld [vmem:[#allocation112_spill] sm:$0xff] }
 0x4bf   :  { %v3119_v27 = vpop.eup %3118  ;;  %2729 = vst.msk [vmem:[%s8803_s3 + $0x3e0] sm:$0xff] %vm270_vm0, %v3117_v61  ;;  %3130 = vtanh.f32 %v2224_v33  ;;  %v1983_v33 = vmul.f32 %v6991_v2, %v9340_v7  ;;  %v2241_v13 = vadd.f32 %v7711_v43, %v1981_v29  ;;  %v9343_v61 = vld [vmem:[#allocation113_spill] sm:$0xff] }
 0x4c0   :  { %v3121_v35 = vpop.eup %3120  ;;  %2730 = vst.msk [vmem:[%s8803_s3 + $0x3e8] sm:$0xff] %vm270_vm0, %v3119_v27  ;;  %3132 = vtanh.f32 %v2225_v44  ;;  %v1984_v44 = vmul.f32 %v6991_v2, %v9341_v11  ;;  %v2242_v16 = vadd.f32 %v7711_v43, %v1982_v36  ;;  %v9344_v27 = vld [vmem:[#allocation114_spill] sm:$0xff] }
 0x4c1   :  { %v3123_v31 = vpop.eup %3122  ;;  %2731 = vst.msk [vmem:[%s8803_s3 + $0x3f0] sm:$0xff] %vm270_vm0, %v3121_v35  ;;  %3134 = vtanh.f32 %v2226_v54  ;;  %v1985_v54 = vmul.f32 %v6991_v2, %v9342_v15  ;;  %v2243_v3 = vadd.f32 %v7711_v43, %v1983_v33  ;;  %v9345_v35 = vld [vmem:[#allocation115_spill] sm:$0xff] }
 0x4c2   :  { %v3125_v45 = vpop.eup %3124  ;;  %2732 = vst.msk [vmem:[%s8803_s3 + $0x3f8] sm:$0xff] %vm270_vm0, %v3123_v31  ;;  %3136 = vtanh.f32 %v2227_v18  ;;  %v1986_v18 = vmul.f32 %v6991_v2, %v9343_v61  ;;  %v2244_v34 = vadd.f32 %v7711_v43, %v1984_v44  ;;  %v9346_v31 = vld [vmem:[#allocation116_spill] sm:$0xff] }
 0x4c3   :  { %v3127_v55 = vpop.eup %3126  ;;  %2733 = vst.msk [vmem:[%s8803_s3 + $0x400] sm:$0xff] %vm270_vm0, %v3125_v45  ;;  %3138 = vtanh.f32 %v2228_v30  ;;  %v1987_v30 = vmul.f32 %v6991_v2, %v9344_v27  ;;  %v2245_v40 = vadd.f32 %v7711_v43, %v1985_v54  ;;  %v9347_v45 = vld [vmem:[#allocation117_spill] sm:$0xff] }
 0x4c4   :  { %v3129_v62 = vpop.eup %3128  ;;  %2734 = vst.msk [vmem:[%s8803_s3 + $0x408] sm:$0xff] %vm270_vm0, %v3127_v55  ;;  %3140 = vtanh.f32 %v2229_v22  ;;  %v1988_v22 = vmul.f32 %v6991_v2, %v9345_v35  ;;  %v2246_v10 = vadd.f32 %v7711_v43, %v1986_v18  ;;  %v9348_v55 = vld [vmem:[#allocation118_spill] sm:$0xff] }
 0x4c5   :  { %v3131_v47 = vpop.eup %3130  ;;  %2735 = vst.msk [vmem:[%s8803_s3 + $0x410] sm:$0xff] %vm270_vm0, %v3129_v62  ;;  %3142 = vtanh.f32 %v2230_v25  ;;  %v1989_v25 = vmul.f32 %v6991_v2, %v9346_v31  ;;  %v2247_v50 = vadd.f32 %v7711_v43, %v1987_v30  ;;  %v9349_v62 = vld [vmem:[#allocation119_spill] sm:$0xff] }
 0x4c6   :  { %v3133_v57 = vpop.eup %3132  ;;  %2736 = vst.msk [vmem:[%s8803_s3 + $0x418] sm:$0xff] %vm270_vm0, %v3131_v47  ;;  %3144 = vtanh.f32 %v2231_v56  ;;  %v1990_v56 = vmul.f32 %v6991_v2, %v9347_v45  ;;  %v2248_v60 = vadd.f32 %v7711_v43, %v1988_v22  ;;  %v9350_v47 = vld [vmem:[#allocation120_spill] sm:$0xff] }
 0x4c7   :  { %v3135_v39 = vpop.eup %3134  ;;  %2737 = vst.msk [vmem:[%s8803_s3 + $0x420] sm:$0xff] %vm270_vm0, %v3133_v57  ;;  %3146 = vtanh.f32 %v2232_v53  ;;  %v1991_v53 = vmul.f32 %v6991_v2, %v9348_v55  ;;  %v2249_v6 = vadd.f32 %v7711_v43, %v1989_v25  ;;  %v9351_v57 = vld [vmem:[#allocation121_spill] sm:$0xff] }
 0x4c8   :  { %v3137_v32 = vpop.eup %3136  ;;  %2738 = vst.msk [vmem:[%s8803_s3 + $0x428] sm:$0xff] %vm270_vm0, %v3135_v39  ;;  %3148 = vtanh.f32 %v2233_v1  ;;  %v1992_v1 = vmul.f32 %v6991_v2, %v9349_v62  ;;  %v2250_v26 = vadd.f32 %v7711_v43, %v1990_v56  ;;  %v9352_v39 = vld [vmem:[#allocation122_spill] sm:$0xff] }
 0x4c9   :  { %v3139_v5 = vpop.eup %3138  ;;  %2739 = vst.msk [vmem:[%s8803_s3 + $0x430] sm:$0xff] %vm270_vm0, %v3137_v32  ;;  %3150 = vtanh.f32 %v2234_v8  ;;  %v1993_v8 = vmul.f32 %v6991_v2, %v9350_v47  ;;  %v2251_v0 = vadd.f32 %v7711_v43, %v1991_v53  ;;  %v9353_v32 = vld [vmem:[#allocation123_spill] sm:$0xff] }
 0x4ca   :  { %v3141_v21 = vpop.eup %3140  ;;  %2740 = vst.msk [vmem:[%s8803_s3 + $0x438] sm:$0xff] %vm270_vm0, %v3139_v5  ;;  %3152 = vtanh.f32 %v2235_v28  ;;  %v1994_v28 = vmul.f32 %v6991_v2, %v9351_v57  ;;  %v2252_v49 = vadd.f32 %v7711_v43, %v1992_v1  ;;  %v9354_v5 = vld [vmem:[#allocation124_spill] sm:$0xff] }
 0x4cb   :  { %v3143_v42 = vpop.eup %3142  ;;  %2741 = vst.msk [vmem:[%s8803_s3 + $0x440] sm:$0xff] %vm270_vm0, %v3141_v21  ;;  %3154 = vtanh.f32 %v2236_v59  ;;  %v1995_v59 = vmul.f32 %v6991_v2, %v9352_v39  ;;  %v2253_v29 = vadd.f32 %v7711_v43, %v1993_v8  ;;  %v9355_v21 = vld [vmem:[#allocation125_spill] sm:$0xff] }
 0x4cc   :  { %v3145_v48 = vpop.eup %3144  ;;  %2742 = vst.msk [vmem:[%s8803_s3 + $0x448] sm:$0xff] %vm270_vm0, %v3143_v42  ;;  %3156 = vtanh.f32 %v2237_v52  ;;  %v1996_v52 = vmul.f32 %v6991_v2, %v9353_v32  ;;  %v2254_v36 = vadd.f32 %v7711_v43, %v1994_v28  ;;  %v9356_v42 = vld [vmem:[#allocation126_spill] sm:$0xff] }
 0x4cd   :  { %v3147_v20 = vpop.eup %3146  ;;  %2743 = vst.msk [vmem:[%s8803_s3 + $0x450] sm:$0xff] %vm270_vm0, %v3145_v48  ;;  %3158 = vtanh.f32 %v2238_v4  ;;  %v1997_v4 = vmul.f32 %v6991_v2, %v9354_v5  ;;  %v2255_v33 = vadd.f32 %v7711_v43, %v1995_v59  ;;  %v9357_v48 = vld [vmem:[#allocation127_spill] sm:$0xff] }
 0x4ce   :  { %v3149_v23 = vpop.eup %3148  ;;  %2744 = vst.msk [vmem:[%s8803_s3 + $0x458] sm:$0xff] %vm270_vm0, %v3147_v20  ;;  %3160 = vtanh.f32 %v2239_v51  ;;  %v1998_v51 = vmul.f32 %v6991_v2, %v9355_v21  ;;  %v2256_v44 = vadd.f32 %v7711_v43, %v1996_v52  ;;  %v9358_v20 = vld [vmem:[#allocation128_spill] sm:$0xff] }
 0x4cf   :  { %v3151_v14 = vpop.eup %3150  ;;  %2745 = vst.msk [vmem:[%s8803_s3 + $0x460] sm:$0xff] %vm270_vm0, %v3149_v23  ;;  %3162 = vtanh.f32 %v2240_v9  ;;  %v1999_v9 = vmul.f32 %v6991_v2, %v9356_v42  ;;  %v2257_v54 = vadd.f32 %v7711_v43, %v1997_v4  ;;  %v9359_v23 = vld [vmem:[#allocation129_spill] sm:$0xff] }
 0x4d0   :  { %v3153_v37 = vpop.eup %3152  ;;  %2746 = vst.msk [vmem:[%s8803_s3 + $0x468] sm:$0xff] %vm270_vm0, %v3151_v14  ;;  %3164 = vtanh.f32 %v2241_v13  ;;  %v2000_v13 = vmul.f32 %v6991_v2, %v9357_v48  ;;  %v2258_v18 = vadd.f32 %v7711_v43, %v1998_v51  ;;  %v9360_v14 = vld [vmem:[#allocation130_spill] sm:$0xff] }
 0x4d1   :  { %v3155_v38 = vpop.eup %3154  ;;  %2747 = vst.msk [vmem:[%s8803_s3 + $0x470] sm:$0xff] %vm270_vm0, %v3153_v37  ;;  %3166 = vtanh.f32 %v2242_v16  ;;  %v2001_v16 = vmul.f32 %v6991_v2, %v9358_v20  ;;  %v2259_v30 = vadd.f32 %v7711_v43, %v1999_v9  ;;  %v9361_v37 = vld [vmem:[#allocation131_spill] sm:$0xff] }
 0x4d2   :  { %v3157_v46 = vpop.eup %3156  ;;  %2748 = vst.msk [vmem:[%s8803_s3 + $0x478] sm:$0xff] %vm270_vm0, %v3155_v38  ;;  %3168 = vtanh.f32 %v2243_v3  ;;  %v2002_v3 = vmul.f32 %v6991_v2, %v9359_v23  ;;  %v2260_v22 = vadd.f32 %v7711_v43, %v2000_v13  ;;  %v9362_v38 = vld [vmem:[#allocation132_spill] sm:$0xff] }
 0x4d3   :  { %v3159_v12 = vpop.eup %3158  ;;  %2749 = vst.msk [vmem:[%s8803_s3 + $0x480] sm:$0xff] %vm270_vm0, %v3157_v46  ;;  %3170 = vtanh.f32 %v2244_v34  ;;  %v2003_v34 = vmul.f32 %v6991_v2, %v9360_v14  ;;  %v2261_v25 = vadd.f32 %v7711_v43, %v2001_v16  ;;  %v9363_v46 = vld [vmem:[#allocation133_spill] sm:$0xff] }
 0x4d4   :  { %v3161_v41 = vpop.eup %3160  ;;  %2750 = vst.msk [vmem:[%s8803_s3 + $0x488] sm:$0xff] %vm270_vm0, %v3159_v12  ;;  %3172 = vtanh.f32 %v2245_v40  ;;  %v2004_v40 = vmul.f32 %v6991_v2, %v9361_v37  ;;  %v2262_v56 = vadd.f32 %v7711_v43, %v2002_v3  ;;  %v9364_v12 = vld [vmem:[#allocation134_spill] sm:$0xff] }
 0x4d5   :  { %v3163_v19 = vpop.eup %3162  ;;  %2751 = vst.msk [vmem:[%s8803_s3 + $0x490] sm:$0xff] %vm270_vm0, %v3161_v41  ;;  %3174 = vtanh.f32 %v2246_v10  ;;  %v2005_v10 = vmul.f32 %v6991_v2, %v9362_v38  ;;  %v2263_v53 = vadd.f32 %v7711_v43, %v2003_v34  ;;  %v9365_v41 = vld [vmem:[#allocation135_spill] sm:$0xff] }
 0x4d6   :  { %v3165_v17 = vpop.eup %3164  ;;  %2752 = vst.msk [vmem:[%s8803_s3 + $0x498] sm:$0xff] %vm270_vm0, %v3163_v19  ;;  %3176 = vtanh.f32 %v2247_v50  ;;  %v2006_v50 = vmul.f32 %v6991_v2, %v9363_v46  ;;  %v2264_v1 = vadd.f32 %v7711_v43, %v2004_v40  ;;  %v9366_v19 = vld [vmem:[#allocation136_spill] sm:$0xff] }
 0x4d7   :  { %v3167_v24 = vpop.eup %3166  ;;  %2753 = vst.msk [vmem:[%s8803_s3 + $0x4a0] sm:$0xff] %vm270_vm0, %v3165_v17  ;;  %3178 = vtanh.f32 %v2248_v60  ;;  %v2007_v60 = vmul.f32 %v6991_v2, %v9364_v12  ;;  %v2265_v8 = vadd.f32 %v7711_v43, %v2005_v10  ;;  %v9367_v17 = vld [vmem:[#allocation137_spill] sm:$0xff] }
 0x4d8   :  { %v3169_v58 = vpop.eup %3168  ;;  %2754 = vst.msk [vmem:[%s8803_s3 + $0x4a8] sm:$0xff] %vm270_vm0, %v3167_v24  ;;  %3180 = vtanh.f32 %v2249_v6  ;;  %v2008_v6 = vmul.f32 %v6991_v2, %v9365_v41  ;;  %v2266_v28 = vadd.f32 %v7711_v43, %v2006_v50  ;;  %v9368_v24 = vld [vmem:[#allocation138_spill] sm:$0xff] }
 0x4d9   :  { %v3171_v63 = vpop.eup %3170  ;;  %2755 = vst.msk [vmem:[%s8803_s3 + $0x4b0] sm:$0xff] %vm270_vm0, %v3169_v58  ;;  %3182 = vtanh.f32 %v2250_v26  ;;  %v2009_v26 = vmul.f32 %v6991_v2, %v9366_v19  ;;  %v2267_v59 = vadd.f32 %v7711_v43, %v2007_v60  ;;  %v9369_v58 = vld [vmem:[#allocation139_spill] sm:$0xff] }
 0x4da   :  { %v3173_v7 = vpop.eup %3172  ;;  %2756 = vst.msk [vmem:[%s8803_s3 + $0x4b8] sm:$0xff] %vm270_vm0, %v3171_v63  ;;  %3184 = vtanh.f32 %v2251_v0  ;;  %v2010_v0 = vmul.f32 %v6991_v2, %v9367_v17  ;;  %v2268_v52 = vadd.f32 %v7711_v43, %v2008_v6  ;;  %v9370_v63 = vld [vmem:[#allocation140_spill] sm:$0xff] }
 0x4db   :  { %v3175_v11 = vpop.eup %3174  ;;  %2757 = vst.msk [vmem:[%s8803_s3 + $0x4c0] sm:$0xff] %vm270_vm0, %v3173_v7  ;;  %3186 = vtanh.f32 %v2252_v49  ;;  %v2011_v49 = vmul.f32 %v6991_v2, %v9368_v24  ;;  %v2269_v4 = vadd.f32 %v7711_v43, %v2009_v26  ;;  %v9371_v7 = vld [vmem:[#allocation141_spill] sm:$0xff] }
 0x4dc   :  { %v3177_v15 = vpop.eup %3176  ;;  %2758 = vst.msk [vmem:[%s8803_s3 + $0x4c8] sm:$0xff] %vm270_vm0, %v3175_v11  ;;  %3188 = vtanh.f32 %v2253_v29  ;;  %v2012_v29 = vmul.f32 %v6991_v2, %v9369_v58  ;;  %v2270_v51 = vadd.f32 %v7711_v43, %v2010_v0  ;;  %v9372_v11 = vld [vmem:[#allocation142_spill] sm:$0xff] }
 0x4dd   :  { %v3179_v61 = vpop.eup %3178  ;;  %2759 = vst.msk [vmem:[%s8803_s3 + $0x4d0] sm:$0xff] %vm270_vm0, %v3177_v15  ;;  %3190 = vtanh.f32 %v2254_v36  ;;  %v2013_v36 = vmul.f32 %v6991_v2, %v9370_v63  ;;  %v2271_v9 = vadd.f32 %v7711_v43, %v2011_v49  ;;  %v9373_v15 = vld [vmem:[#allocation143_spill] sm:$0xff] }
 0x4de   :  { %v3181_v27 = vpop.eup %3180  ;;  %2760 = vst.msk [vmem:[%s8803_s3 + $0x4d8] sm:$0xff] %vm270_vm0, %v3179_v61  ;;  %3192 = vtanh.f32 %v2255_v33  ;;  %v2014_v33 = vmul.f32 %v6991_v2, %v9371_v7  ;;  %v2272_v13 = vadd.f32 %v7711_v43, %v2012_v29  ;;  %v9374_v61 = vld [vmem:[#allocation144_spill] sm:$0xff] }
 0x4df   :  { %v3183_v35 = vpop.eup %3182  ;;  %2761 = vst.msk [vmem:[%s8803_s3 + $0x4e0] sm:$0xff] %vm270_vm0, %v3181_v27  ;;  %3194 = vtanh.f32 %v2256_v44  ;;  %v2015_v44 = vmul.f32 %v6991_v2, %v9372_v11  ;;  %v2273_v16 = vadd.f32 %v7711_v43, %v2013_v36  ;;  %v9375_v27 = vld [vmem:[#allocation145_spill] sm:$0xff] }
 0x4e0   :  { %v3185_v31 = vpop.eup %3184  ;;  %2762 = vst.msk [vmem:[%s8803_s3 + $0x4e8] sm:$0xff] %vm270_vm0, %v3183_v35  ;;  %3196 = vtanh.f32 %v2257_v54  ;;  %v2016_v54 = vmul.f32 %v6991_v2, %v9373_v15  ;;  %v2274_v3 = vadd.f32 %v7711_v43, %v2014_v33  ;;  %v9376_v35 = vld [vmem:[#allocation146_spill] sm:$0xff] }
 0x4e1   :  { %v3187_v45 = vpop.eup %3186  ;;  %2763 = vst.msk [vmem:[%s8803_s3 + $0x4f0] sm:$0xff] %vm270_vm0, %v3185_v31  ;;  %3198 = vtanh.f32 %v2258_v18  ;;  %v2017_v18 = vmul.f32 %v6991_v2, %v9374_v61  ;;  %v2275_v34 = vadd.f32 %v7711_v43, %v2015_v44  ;;  %v9377_v31 = vld [vmem:[#allocation147_spill] sm:$0xff] }
 0x4e2   :  { %v3189_v55 = vpop.eup %3188  ;;  %2764 = vst.msk [vmem:[%s8803_s3 + $0x4f8] sm:$0xff] %vm270_vm0, %v3187_v45  ;;  %3200 = vtanh.f32 %v2259_v30  ;;  %v2018_v30 = vmul.f32 %v6991_v2, %v9375_v27  ;;  %v2276_v40 = vadd.f32 %v7711_v43, %v2016_v54  ;;  %v9378_v45 = vld [vmem:[#allocation148_spill] sm:$0xff] }
 0x4e3   :  { %v3191_v62 = vpop.eup %3190  ;;  %2765 = vst.msk [vmem:[%s8803_s3 + $0x500] sm:$0xff] %vm270_vm0, %v3189_v55  ;;  %3202 = vtanh.f32 %v2260_v22  ;;  %v2019_v22 = vmul.f32 %v6991_v2, %v9376_v35  ;;  %v2277_v10 = vadd.f32 %v7711_v43, %v2017_v18  ;;  %v9379_v55 = vld [vmem:[#allocation149_spill] sm:$0xff] }
 0x4e4   :  { %v3193_v47 = vpop.eup %3192  ;;  %2766 = vst.msk [vmem:[%s8803_s3 + $0x508] sm:$0xff] %vm270_vm0, %v3191_v62  ;;  %3204 = vtanh.f32 %v2261_v25  ;;  %v2020_v25 = vmul.f32 %v6991_v2, %v9377_v31  ;;  %v2278_v50 = vadd.f32 %v7711_v43, %v2018_v30  ;;  %v9380_v62 = vld [vmem:[#allocation150_spill] sm:$0xff] }
 0x4e5   :  { %v3195_v57 = vpop.eup %3194  ;;  %2767 = vst.msk [vmem:[%s8803_s3 + $0x510] sm:$0xff] %vm270_vm0, %v3193_v47  ;;  %3206 = vtanh.f32 %v2262_v56  ;;  %v2021_v56 = vmul.f32 %v6991_v2, %v9378_v45  ;;  %v2279_v60 = vadd.f32 %v7711_v43, %v2019_v22  ;;  %v9381_v47 = vld [vmem:[#allocation151_spill] sm:$0xff] }
 0x4e6   :  { %v3197_v39 = vpop.eup %3196  ;;  %2768 = vst.msk [vmem:[%s8803_s3 + $0x518] sm:$0xff] %vm270_vm0, %v3195_v57  ;;  %3208 = vtanh.f32 %v2263_v53  ;;  %v2022_v53 = vmul.f32 %v6991_v2, %v9379_v55  ;;  %v2280_v6 = vadd.f32 %v7711_v43, %v2020_v25  ;;  %v9382_v57 = vld [vmem:[#allocation152_spill] sm:$0xff] }
 0x4e7   :  { %v3199_v32 = vpop.eup %3198  ;;  %2769 = vst.msk [vmem:[%s8803_s3 + $0x520] sm:$0xff] %vm270_vm0, %v3197_v39  ;;  %3210 = vtanh.f32 %v2264_v1  ;;  %v2023_v1 = vmul.f32 %v6991_v2, %v9380_v62  ;;  %v2281_v26 = vadd.f32 %v7711_v43, %v2021_v56  ;;  %v9383_v39 = vld [vmem:[#allocation153_spill] sm:$0xff] }
 0x4e8   :  { %v3201_v5 = vpop.eup %3200  ;;  %2770 = vst.msk [vmem:[%s8803_s3 + $0x528] sm:$0xff] %vm270_vm0, %v3199_v32  ;;  %3212 = vtanh.f32 %v2265_v8  ;;  %v2024_v8 = vmul.f32 %v6991_v2, %v9381_v47  ;;  %v2282_v0 = vadd.f32 %v7711_v43, %v2022_v53  ;;  %v9384_v32 = vld [vmem:[#allocation154_spill] sm:$0xff] }
 0x4e9   :  { %v3203_v21 = vpop.eup %3202  ;;  %2771 = vst.msk [vmem:[%s8803_s3 + $0x530] sm:$0xff] %vm270_vm0, %v3201_v5  ;;  %3214 = vtanh.f32 %v2266_v28  ;;  %v2025_v28 = vmul.f32 %v6991_v2, %v9382_v57  ;;  %v2283_v49 = vadd.f32 %v7711_v43, %v2023_v1  ;;  %v9385_v5 = vld [vmem:[#allocation155_spill] sm:$0xff] }
 0x4ea   :  { %v3205_v42 = vpop.eup %3204  ;;  %2772 = vst.msk [vmem:[%s8803_s3 + $0x538] sm:$0xff] %vm270_vm0, %v3203_v21  ;;  %3216 = vtanh.f32 %v2267_v59  ;;  %v2026_v59 = vmul.f32 %v6991_v2, %v9383_v39  ;;  %v2284_v29 = vadd.f32 %v7711_v43, %v2024_v8  ;;  %v9386_v21 = vld [vmem:[#allocation156_spill] sm:$0xff] }
 0x4eb   :  { %v3207_v48 = vpop.eup %3206  ;;  %2773 = vst.msk [vmem:[%s8803_s3 + $0x540] sm:$0xff] %vm270_vm0, %v3205_v42  ;;  %3218 = vtanh.f32 %v2268_v52  ;;  %v2027_v52 = vmul.f32 %v6991_v2, %v9384_v32  ;;  %v2285_v36 = vadd.f32 %v7711_v43, %v2025_v28  ;;  %v9387_v42 = vld [vmem:[#allocation157_spill] sm:$0xff] }
 0x4ec   :  { %v3209_v20 = vpop.eup %3208  ;;  %2774 = vst.msk [vmem:[%s8803_s3 + $0x548] sm:$0xff] %vm270_vm0, %v3207_v48  ;;  %3220 = vtanh.f32 %v2269_v4  ;;  %v2028_v4 = vmul.f32 %v6991_v2, %v9385_v5  ;;  %v2286_v33 = vadd.f32 %v7711_v43, %v2026_v59  ;;  %v9388_v48 = vld [vmem:[#allocation158_spill] sm:$0xff] }
 0x4ed   :  { %v3211_v23 = vpop.eup %3210  ;;  %2775 = vst.msk [vmem:[%s8803_s3 + $0x550] sm:$0xff] %vm270_vm0, %v3209_v20  ;;  %3222 = vtanh.f32 %v2270_v51  ;;  %v2029_v51 = vmul.f32 %v6991_v2, %v9386_v21  ;;  %v2287_v44 = vadd.f32 %v7711_v43, %v2027_v52  ;;  %v9389_v20 = vld [vmem:[#allocation159_spill] sm:$0xff] }
 0x4ee   :  { %v3213_v14 = vpop.eup %3212  ;;  %2776 = vst.msk [vmem:[%s8803_s3 + $0x558] sm:$0xff] %vm270_vm0, %v3211_v23  ;;  %3224 = vtanh.f32 %v2271_v9  ;;  %v2030_v9 = vmul.f32 %v6991_v2, %v9387_v42  ;;  %v2288_v54 = vadd.f32 %v7711_v43, %v2028_v4  ;;  %v9390_v23 = vld [vmem:[#allocation160_spill] sm:$0xff] }
 0x4ef   :  { %v3215_v37 = vpop.eup %3214  ;;  %2777 = vst.msk [vmem:[%s8803_s3 + $0x560] sm:$0xff] %vm270_vm0, %v3213_v14  ;;  %3226 = vtanh.f32 %v2272_v13  ;;  %v2031_v13 = vmul.f32 %v6991_v2, %v9388_v48  ;;  %v2289_v18 = vadd.f32 %v7711_v43, %v2029_v51  ;;  %v9391_v14 = vld [vmem:[#allocation161_spill] sm:$0xff] }
 0x4f0   :  { %v3217_v38 = vpop.eup %3216  ;;  %2778 = vst.msk [vmem:[%s8803_s3 + $0x568] sm:$0xff] %vm270_vm0, %v3215_v37  ;;  %3228 = vtanh.f32 %v2273_v16  ;;  %v2032_v16 = vmul.f32 %v6991_v2, %v9389_v20  ;;  %v2290_v30 = vadd.f32 %v7711_v43, %v2030_v9  ;;  %v9392_v37 = vld [vmem:[#allocation162_spill] sm:$0xff] }
 0x4f1   :  { %v3219_v46 = vpop.eup %3218  ;;  %2779 = vst.msk [vmem:[%s8803_s3 + $0x570] sm:$0xff] %vm270_vm0, %v3217_v38  ;;  %3230 = vtanh.f32 %v2274_v3  ;;  %v2033_v3 = vmul.f32 %v6991_v2, %v9390_v23  ;;  %v2291_v22 = vadd.f32 %v7711_v43, %v2031_v13  ;;  %v9393_v38 = vld [vmem:[#allocation163_spill] sm:$0xff]  ;;  %v8437_v9 = vld [vmem:[%s8801_s2] ss:$0 sm:$0xff] }
 0x4f2   :  { %v3221_v12 = vpop.eup %3220  ;;  %2780 = vst.msk [vmem:[%s8803_s3 + $0x578] sm:$0xff] %vm270_vm0, %v3219_v46  ;;  %3232 = vtanh.f32 %v2275_v34  ;;  %v2034_v34 = vmul.f32 %v6991_v2, %v9391_v14  ;;  %v2292_v25 = vadd.f32 %v7711_v43, %v2032_v16  ;;  %v9394_v46 = vld [vmem:[#allocation164_spill] sm:$0xff] }
 0x4f3   :  { %v3223_v41 = vpop.eup %3222  ;;  %2781 = vst.msk [vmem:[%s8803_s3 + $0x580] sm:$0xff] %vm270_vm0, %v3221_v12  ;;  %3234 = vtanh.f32 %v2276_v40  ;;  %v2035_v40 = vmul.f32 %v6991_v2, %v9392_v37  ;;  %v2293_v56 = vadd.f32 %v7711_v43, %v2033_v3  ;;  %v9395_v12 = vld [vmem:[#allocation165_spill] sm:$0xff] }
 0x4f4   :  { %v3225_v19 = vpop.eup %3224  ;;  %2782 = vst.msk [vmem:[%s8803_s3 + $0x588] sm:$0xff] %vm270_vm0, %v3223_v41  ;;  %3236 = vtanh.f32 %v2277_v10  ;;  %v2036_v10 = vmul.f32 %v6991_v2, %v9393_v38  ;;  %v2294_v53 = vadd.f32 %v7711_v43, %v2034_v34  ;;  %v9396_v41 = vld [vmem:[#allocation166_spill] sm:$0xff] }
 0x4f5   :  { %v3227_v17 = vpop.eup %3226  ;;  %2783 = vst.msk [vmem:[%s8803_s3 + $0x590] sm:$0xff] %vm270_vm0, %v3225_v19  ;;  %3238 = vtanh.f32 %v2278_v50  ;;  %v2037_v50 = vmul.f32 %v6991_v2, %v9394_v46  ;;  %v2295_v1 = vadd.f32 %v7711_v43, %v2035_v40  ;;  %v9397_v19 = vld [vmem:[#allocation167_spill] sm:$0xff] }
 0x4f6   :  { %v3229_v24 = vpop.eup %3228  ;;  %2784 = vst.msk [vmem:[%s8803_s3 + $0x598] sm:$0xff] %vm270_vm0, %v3227_v17  ;;  %3240 = vtanh.f32 %v2279_v60  ;;  %v2038_v60 = vmul.f32 %v6991_v2, %v9395_v12  ;;  %v2296_v8 = vadd.f32 %v7711_v43, %v2036_v10  ;;  %v9398_v17 = vld [vmem:[#allocation168_spill] sm:$0xff] }
 0x4f7   :  { %v3231_v58 = vpop.eup %3230  ;;  %2785 = vst.msk [vmem:[%s8803_s3 + $0x5a0] sm:$0xff] %vm270_vm0, %v3229_v24  ;;  %3242 = vtanh.f32 %v2280_v6  ;;  %v2039_v6 = vmul.f32 %v6991_v2, %v9396_v41  ;;  %v2297_v28 = vadd.f32 %v7711_v43, %v2037_v50  ;;  %v9399_v24 = vld [vmem:[#allocation169_spill] sm:$0xff] }
 0x4f8   :  { %v3233_v63 = vpop.eup %3232  ;;  %2786 = vst.msk [vmem:[%s8803_s3 + $0x5a8] sm:$0xff] %vm270_vm0, %v3231_v58  ;;  %3244 = vtanh.f32 %v2281_v26  ;;  %v2040_v26 = vmul.f32 %v6991_v2, %v9397_v19  ;;  %v2298_v59 = vadd.f32 %v7711_v43, %v2038_v60  ;;  %v9400_v58 = vld [vmem:[#allocation170_spill] sm:$0xff] }
 0x4f9   :  { %v3235_v7 = vpop.eup %3234  ;;  %2787 = vst.msk [vmem:[%s8803_s3 + $0x5b0] sm:$0xff] %vm270_vm0, %v3233_v63  ;;  %3246 = vtanh.f32 %v2282_v0  ;;  %v2041_v0 = vmul.f32 %v6991_v2, %v9398_v17  ;;  %v2299_v52 = vadd.f32 %v7711_v43, %v2039_v6  ;;  %v9401_v63 = vld [vmem:[#allocation171_spill] sm:$0xff] }
 0x4fa   :  { %v3237_v11 = vpop.eup %3236  ;;  %2788 = vst.msk [vmem:[%s8803_s3 + $0x5b8] sm:$0xff] %vm270_vm0, %v3235_v7  ;;  %3248 = vtanh.f32 %v2283_v49  ;;  %v2042_v49 = vmul.f32 %v6991_v2, %v9399_v24  ;;  %v2300_v4 = vadd.f32 %v7711_v43, %v2040_v26  ;;  %v9402_v7 = vld [vmem:[#allocation172_spill] sm:$0xff] }
 0x4fb   :  { %v3239_v15 = vpop.eup %3238  ;;  %2789 = vst.msk [vmem:[%s8803_s3 + $0x5c0] sm:$0xff] %vm270_vm0, %v3237_v11  ;;  %3250 = vtanh.f32 %v2284_v29  ;;  %v2043_v29 = vmul.f32 %v6991_v2, %v9400_v58  ;;  %v2301_v51 = vadd.f32 %v7711_v43, %v2041_v0 }
 0x4fc   :  { %v3241_v61 = vpop.eup %3240  ;;  %2790 = vst.msk [vmem:[%s8803_s3 + $0x5c8] sm:$0xff] %vm270_vm0, %v3239_v15  ;;  %3252 = vtanh.f32 %v2285_v36  ;;  %v2044_v36 = vmul.f32 %v6991_v2, %v9401_v63  ;;  %v2302_v11 = vadd.f32 %v8437_v9, %v2042_v49  ;;  %v9404_v15 = vld [vmem:[#allocation174_spill] sm:$0xff] }
 0x4fd   :  { %v3243_v27 = vpop.eup %3242  ;;  %2791 = vst.msk [vmem:[%s8803_s3 + $0x5d0] sm:$0xff] %vm270_vm0, %v3241_v61  ;;  %3254 = vtanh.f32 %v2286_v33  ;;  %v2045_v33 = vmul.f32 %v6991_v2, %v9402_v7  ;;  %v2303_v13 = vadd.f32 %v8437_v9, %v2043_v29  ;;  %v9405_v61 = vld [vmem:[#allocation175_spill] sm:$0xff] }
 0x4fe   :  { %v3245_v35 = vpop.eup %3244  ;;  %2792 = vst.msk [vmem:[%s8803_s3 + $0x5d8] sm:$0xff] %vm270_vm0, %v3243_v27  ;;  %3256 = vtanh.f32 %v2287_v44  ;;  %v9403_v44 = vld [vmem:[#allocation173_spill] sm:$0xff]  ;;  %v2304_v16 = vadd.f32 %v8437_v9, %v2044_v36  ;;  %v9406_v27 = vld [vmem:[#allocation176_spill] sm:$0xff] }
 0x4ff   :  { %v3247_v31 = vpop.eup %3246  ;;  %2793 = vst.msk [vmem:[%s8803_s3 + $0x5e0] sm:$0xff] %vm270_vm0, %v3245_v35  ;;  %3258 = vtanh.f32 %v2288_v54  ;;  %v2046_v43 = vmul.f32 %v6991_v2, %v9403_v44  ;;  %v2047_v54 = vmul.f32 %v6991_v2, %v9404_v15  ;;  %v2305_v3 = vadd.f32 %v8437_v9, %v2045_v33  ;;  %v9407_v35 = vld [vmem:[#allocation177_spill] sm:$0xff] }
 0x500   :  { %v3249_v45 = vpop.eup %3248  ;;  %2794 = vst.msk [vmem:[%s8803_s3 + $0x5e8] sm:$0xff] %vm270_vm0, %v3247_v31  ;;  %3260 = vtanh.f32 %v2289_v18  ;;  %v2048_v18 = vmul.f32 %v6991_v2, %v9405_v61  ;;  %v9408_v31 = vld [vmem:[#allocation178_spill] sm:$0xff] }
 0x501   :  { %v3251_v55 = vpop.eup %3250  ;;  %2795 = vst.msk [vmem:[%s8803_s3 + $0x5f0] sm:$0xff] %vm270_vm0, %v3249_v45  ;;  %3262 = vtanh.f32 %v2290_v30  ;;  %v2049_v30 = vmul.f32 %v6991_v2, %v9406_v27  ;;  %v2306_v34 = vadd.f32 %v8437_v9, %v2046_v43  ;;  %v2307_v40 = vadd.f32 %v8437_v9, %v2047_v54  ;;  %v9409_v45 = vld [vmem:[#allocation179_spill] sm:$0xff] }
 0x502   :  { %v3253_v62 = vpop.eup %3252  ;;  %2796 = vst.msk [vmem:[%s8803_s3 + $0x5f8] sm:$0xff] %vm270_vm0, %v3251_v55  ;;  %3264 = vtanh.f32 %v2291_v22  ;;  %v2050_v22 = vmul.f32 %v6991_v2, %v9407_v35  ;;  %v2308_v10 = vadd.f32 %v8437_v9, %v2048_v18  ;;  %v9410_v55 = vld [vmem:[#allocation180_spill] sm:$0xff] }
 0x503   :  { %v3255_v47 = vpop.eup %3254  ;;  %2797 = vst.msk [vmem:[%s8803_s3 + $0x600] sm:$0xff] %vm270_vm0, %v3253_v62  ;;  %3266 = vtanh.f32 %v2292_v25  ;;  %v2051_v25 = vmul.f32 %v6991_v2, %v9408_v31  ;;  %v2309_v50 = vadd.f32 %v8437_v9, %v2049_v30  ;;  %v9411_v62 = vld [vmem:[#allocation181_spill] sm:$0xff] }
 0x504   :  { %v3257_v57 = vpop.eup %3256  ;;  %2798 = vst.msk [vmem:[%s8803_s3 + $0x608] sm:$0xff] %vm270_vm0, %v3255_v47  ;;  %3268 = vtanh.f32 %v2293_v56  ;;  %v2052_v56 = vmul.f32 %v6991_v2, %v9409_v45  ;;  %v2310_v60 = vadd.f32 %v8437_v9, %v2050_v22  ;;  %v9412_v47 = vld [vmem:[#allocation182_spill] sm:$0xff] }
 0x505   :  { %v3259_v39 = vpop.eup %3258  ;;  %2799 = vst.msk [vmem:[%s8803_s3 + $0x610] sm:$0xff] %vm270_vm0, %v3257_v57  ;;  %3270 = vtanh.f32 %v2294_v53  ;;  %v2053_v53 = vmul.f32 %v6991_v2, %v9410_v55  ;;  %v2311_v6 = vadd.f32 %v8437_v9, %v2051_v25  ;;  %v9413_v57 = vld [vmem:[#allocation183_spill] sm:$0xff] }
 0x506   :  { %v3261_v32 = vpop.eup %3260  ;;  %2800 = vst.msk [vmem:[%s8803_s3 + $0x618] sm:$0xff] %vm270_vm0, %v3259_v39  ;;  %3272 = vtanh.f32 %v2295_v1  ;;  %v2054_v1 = vmul.f32 %v6991_v2, %v9411_v62  ;;  %v2312_v26 = vadd.f32 %v8437_v9, %v2052_v56  ;;  %v9414_v39 = vld [vmem:[#allocation184_spill] sm:$0xff] }
 0x507   :  { %v3263_v5 = vpop.eup %3262  ;;  %2801 = vst.msk [vmem:[%s8803_s3 + $0x620] sm:$0xff] %vm270_vm0, %v3261_v32  ;;  %3274 = vtanh.f32 %v2296_v8  ;;  %v2055_v8 = vmul.f32 %v6991_v2, %v9412_v47  ;;  %v2313_v0 = vadd.f32 %v8437_v9, %v2053_v53  ;;  %v9415_v32 = vld [vmem:[#allocation185_spill] sm:$0xff] }
 0x508   :  { %v3265_v21 = vpop.eup %3264  ;;  %2802 = vst.msk [vmem:[%s8803_s3 + $0x628] sm:$0xff] %vm270_vm0, %v3263_v5  ;;  %3276 = vtanh.f32 %v2297_v28  ;;  %v2056_v28 = vmul.f32 %v6991_v2, %v9413_v57  ;;  %v2314_v49 = vadd.f32 %v8437_v9, %v2054_v1  ;;  %v9416_v5 = vld [vmem:[#allocation186_spill] sm:$0xff] }
 0x509   :  { %v3267_v42 = vpop.eup %3266  ;;  %2803 = vst.msk [vmem:[%s8803_s3 + $0x630] sm:$0xff] %vm270_vm0, %v3265_v21  ;;  %3278 = vtanh.f32 %v2298_v59  ;;  %v2057_v59 = vmul.f32 %v6991_v2, %v9414_v39  ;;  %v2315_v29 = vadd.f32 %v8437_v9, %v2055_v8  ;;  %v9417_v21 = vld [vmem:[#allocation187_spill] sm:$0xff] }
 0x50a   :  { %v3269_v48 = vpop.eup %3268  ;;  %2804 = vst.msk [vmem:[%s8803_s3 + $0x638] sm:$0xff] %vm270_vm0, %v3267_v42  ;;  %3280 = vtanh.f32 %v2299_v52  ;;  %v2058_v52 = vmul.f32 %v6991_v2, %v9415_v32  ;;  %v2316_v36 = vadd.f32 %v8437_v9, %v2056_v28  ;;  %v9418_v42 = vld [vmem:[#allocation188_spill] sm:$0xff] }
 0x50b   :  { %v3271_v20 = vpop.eup %3270  ;;  %2805 = vst.msk [vmem:[%s8803_s3 + $0x640] sm:$0xff] %vm270_vm0, %v3269_v48  ;;  %3282 = vtanh.f32 %v2300_v4  ;;  %v2059_v4 = vmul.f32 %v6991_v2, %v9416_v5  ;;  %v2317_v33 = vadd.f32 %v8437_v9, %v2057_v59  ;;  %v9419_v48 = vld [vmem:[#allocation189_spill] sm:$0xff] }
 0x50c   :  { %v3273_v23 = vpop.eup %3272  ;;  %2806 = vst.msk [vmem:[%s8803_s3 + $0x648] sm:$0xff] %vm270_vm0, %v3271_v20  ;;  %3284 = vtanh.f32 %v2301_v51  ;;  %v2060_v51 = vmul.f32 %v6991_v2, %v9417_v21  ;;  %v2318_v43 = vadd.f32 %v8437_v9, %v2058_v52  ;;  %v9420_v20 = vld [vmem:[#allocation190_spill] sm:$0xff] }
 0x50d   :  { %v3275_v14 = vpop.eup %3274  ;;  %2807 = vst.msk [vmem:[%s8803_s3 + $0x650] sm:$0xff] %vm270_vm0, %v3273_v23  ;;  %3286 = vtanh.f32 %v2302_v11  ;;  %v2061_v11 = vmul.f32 %v6991_v2, %v9418_v42  ;;  %v2319_v54 = vadd.f32 %v8437_v9, %v2059_v4  ;;  %v9421_v23 = vld [vmem:[#allocation191_spill] sm:$0xff] }
 0x50e   :  { %v3277_v37 = vpop.eup %3276  ;;  %2808 = vst.msk [vmem:[%s8803_s3 + $0x658] sm:$0xff] %vm270_vm0, %v3275_v14  ;;  %3288 = vtanh.f32 %v2303_v13  ;;  %v2062_v13 = vmul.f32 %v6991_v2, %v9419_v48  ;;  %v2320_v18 = vadd.f32 %v8437_v9, %v2060_v51  ;;  %v9422_v14 = vld [vmem:[#allocation192_spill] sm:$0xff] }
 0x50f   :  { %v3279_v38 = vpop.eup %3278  ;;  %2809 = vst.msk [vmem:[%s8803_s3 + $0x660] sm:$0xff] %vm270_vm0, %v3277_v37  ;;  %3290 = vtanh.f32 %v2304_v16  ;;  %v2063_v16 = vmul.f32 %v6991_v2, %v9420_v20  ;;  %v2321_v30 = vadd.f32 %v8437_v9, %v2061_v11  ;;  %v9423_v37 = vld [vmem:[#allocation193_spill] sm:$0xff] }
 0x510   :  { %v3281_v46 = vpop.eup %3280  ;;  %2810 = vst.msk [vmem:[%s8803_s3 + $0x668] sm:$0xff] %vm270_vm0, %v3279_v38  ;;  %3292 = vtanh.f32 %v2305_v3  ;;  %v2064_v3 = vmul.f32 %v6991_v2, %v9421_v23  ;;  %v2322_v22 = vadd.f32 %v8437_v9, %v2062_v13  ;;  %v9424_v38 = vld [vmem:[#allocation194_spill] sm:$0xff] }
 0x511   :  { %v3283_v12 = vpop.eup %3282  ;;  %2811 = vst.msk [vmem:[%s8803_s3 + $0x670] sm:$0xff] %vm270_vm0, %v3281_v46  ;;  %3294 = vtanh.f32 %v2306_v34  ;;  %v2065_v34 = vmul.f32 %v6991_v2, %v9422_v14  ;;  %v2323_v25 = vadd.f32 %v8437_v9, %v2063_v16  ;;  %v9425_v46 = vld [vmem:[#allocation195_spill] sm:$0xff] }
 0x512   :  { %v3285_v41 = vpop.eup %3284  ;;  %2812 = vst.msk [vmem:[%s8803_s3 + $0x678] sm:$0xff] %vm270_vm0, %v3283_v12  ;;  %3296 = vtanh.f32 %v2307_v40  ;;  %v2066_v40 = vmul.f32 %v6991_v2, %v9423_v37  ;;  %v2324_v56 = vadd.f32 %v8437_v9, %v2064_v3  ;;  %v9426_v12 = vld [vmem:[#allocation196_spill] sm:$0xff] }
 0x513   :  { %v3287_v19 = vpop.eup %3286  ;;  %2813 = vst.msk [vmem:[%s8803_s3 + $0x680] sm:$0xff] %vm270_vm0, %v3285_v41  ;;  %3298 = vtanh.f32 %v2308_v10  ;;  %v2067_v10 = vmul.f32 %v6991_v2, %v9424_v38  ;;  %v2325_v53 = vadd.f32 %v8437_v9, %v2065_v34  ;;  %v9427_v41 = vld [vmem:[#allocation197_spill] sm:$0xff] }
 0x514   :  { %v3289_v17 = vpop.eup %3288  ;;  %2814 = vst.msk [vmem:[%s8803_s3 + $0x688] sm:$0xff] %vm270_vm0, %v3287_v19  ;;  %3300 = vtanh.f32 %v2309_v50  ;;  %v2068_v50 = vmul.f32 %v6991_v2, %v9425_v46  ;;  %v2326_v1 = vadd.f32 %v8437_v9, %v2066_v40  ;;  %v9428_v19 = vld [vmem:[#allocation198_spill] sm:$0xff] }
 0x515   :  { %v3291_v24 = vpop.eup %3290  ;;  %2815 = vst.msk [vmem:[%s8803_s3 + $0x690] sm:$0xff] %vm270_vm0, %v3289_v17  ;;  %3302 = vtanh.f32 %v2310_v60  ;;  %v2069_v60 = vmul.f32 %v6991_v2, %v9426_v12  ;;  %v2327_v8 = vadd.f32 %v8437_v9, %v2067_v10  ;;  %v9429_v17 = vld [vmem:[#allocation199_spill] sm:$0xff] }
 0x516   :  { %v3293_v58 = vpop.eup %3292  ;;  %2816 = vst.msk [vmem:[%s8803_s3 + $0x698] sm:$0xff] %vm270_vm0, %v3291_v24  ;;  %3304 = vtanh.f32 %v2311_v6  ;;  %v2070_v6 = vmul.f32 %v6991_v2, %v9427_v41  ;;  %v2328_v28 = vadd.f32 %v8437_v9, %v2068_v50  ;;  %v9430_v24 = vld [vmem:[#allocation200_spill] sm:$0xff] }
 0x517   :  { %v3295_v63 = vpop.eup %3294  ;;  %2817 = vst.msk [vmem:[%s8803_s3 + $0x6a0] sm:$0xff] %vm270_vm0, %v3293_v58  ;;  %3306 = vtanh.f32 %v2312_v26  ;;  %v2071_v26 = vmul.f32 %v6991_v2, %v9428_v19  ;;  %v2329_v59 = vadd.f32 %v8437_v9, %v2069_v60  ;;  %v9431_v58 = vld [vmem:[#allocation201_spill] sm:$0xff] }
 0x518   :  { %v3297_v7 = vpop.eup %3296  ;;  %2818 = vst.msk [vmem:[%s8803_s3 + $0x6a8] sm:$0xff] %vm270_vm0, %v3295_v63  ;;  %3308 = vtanh.f32 %v2313_v0  ;;  %v2072_v0 = vmul.f32 %v6991_v2, %v9429_v17  ;;  %v2330_v52 = vadd.f32 %v8437_v9, %v2070_v6  ;;  %v9432_v63 = vld [vmem:[#allocation202_spill] sm:$0xff] }
 0x519   :  { %v3299_v44 = vpop.eup %3298  ;;  %2819 = vst.msk [vmem:[%s8803_s3 + $0x6b0] sm:$0xff] %vm270_vm0, %v3297_v7  ;;  %3310 = vtanh.f32 %v2314_v49  ;;  %v2073_v49 = vmul.f32 %v6991_v2, %v9430_v24  ;;  %v2331_v4 = vadd.f32 %v8437_v9, %v2071_v26  ;;  %v9433_v7 = vld [vmem:[#allocation203_spill] sm:$0xff] }
 0x51a   :  { %v3301_v15 = vpop.eup %3300  ;;  %2820 = vst.msk [vmem:[%s8803_s3 + $0x6b8] sm:$0xff] %vm270_vm0, %v3299_v44  ;;  %3312 = vtanh.f32 %v2315_v29  ;;  %v2074_v29 = vmul.f32 %v6991_v2, %v9431_v58  ;;  %v2332_v51 = vadd.f32 %v8437_v9, %v2072_v0  ;;  %v9434_v44 = vld [vmem:[#allocation204_spill] sm:$0xff] }
 0x51b   :  { %v3303_v61 = vpop.eup %3302  ;;  %2821 = vst.msk [vmem:[%s8803_s3 + $0x6c0] sm:$0xff] %vm270_vm0, %v3301_v15  ;;  %3314 = vtanh.f32 %v2316_v36  ;;  %v2075_v36 = vmul.f32 %v6991_v2, %v9432_v63  ;;  %v2333_v11 = vadd.f32 %v8437_v9, %v2073_v49  ;;  %v9435_v15 = vld [vmem:[#allocation205_spill] sm:$0xff] }
 0x51c   :  { %v3305_v27 = vpop.eup %3304  ;;  %2822 = vst.msk [vmem:[%s8803_s3 + $0x6c8] sm:$0xff] %vm270_vm0, %v3303_v61  ;;  %3316 = vtanh.f32 %v2317_v33  ;;  %v2076_v33 = vmul.f32 %v6991_v2, %v9433_v7  ;;  %v2334_v13 = vadd.f32 %v8437_v9, %v2074_v29  ;;  %v9436_v61 = vld [vmem:[#allocation206_spill] sm:$0xff] }
 0x51d   :  { %v3307_v35 = vpop.eup %3306  ;;  %2823 = vst.msk [vmem:[%s8803_s3 + $0x6d0] sm:$0xff] %vm270_vm0, %v3305_v27  ;;  %3318 = vtanh.f32 %v2318_v43  ;;  %v2077_v43 = vmul.f32 %v6991_v2, %v9434_v44  ;;  %v2335_v16 = vadd.f32 %v8437_v9, %v2075_v36  ;;  %v9437_v27 = vld [vmem:[#allocation207_spill] sm:$0xff] }
 0x51e   :  { %v3309_v31 = vpop.eup %3308  ;;  %2824 = vst.msk [vmem:[%s8803_s3 + $0x6d8] sm:$0xff] %vm270_vm0, %v3307_v35  ;;  %3320 = vtanh.f32 %v2319_v54  ;;  %v2078_v54 = vmul.f32 %v6991_v2, %v9435_v15  ;;  %v2336_v3 = vadd.f32 %v8437_v9, %v2076_v33  ;;  %v9438_v35 = vld [vmem:[#allocation208_spill] sm:$0xff] }
 0x51f   :  { %v3311_v45 = vpop.eup %3310  ;;  %2825 = vst.msk [vmem:[%s8803_s3 + $0x6e0] sm:$0xff] %vm270_vm0, %v3309_v31  ;;  %3322 = vtanh.f32 %v2320_v18  ;;  %v2079_v18 = vmul.f32 %v6991_v2, %v9436_v61  ;;  %v2337_v34 = vadd.f32 %v8437_v9, %v2077_v43  ;;  %v9439_v31 = vld [vmem:[#allocation209_spill] sm:$0xff] }
 0x520   :  { %v3313_v55 = vpop.eup %3312  ;;  %2826 = vst.msk [vmem:[%s8803_s3 + $0x6e8] sm:$0xff] %vm270_vm0, %v3311_v45  ;;  %3324 = vtanh.f32 %v2321_v30  ;;  %v2080_v30 = vmul.f32 %v6991_v2, %v9437_v27  ;;  %v2338_v40 = vadd.f32 %v8437_v9, %v2078_v54  ;;  %v9440_v45 = vld [vmem:[#allocation210_spill] sm:$0xff] }
 0x521   :  { %v3315_v62 = vpop.eup %3314  ;;  %2827 = vst.msk [vmem:[%s8803_s3 + $0x6f0] sm:$0xff] %vm270_vm0, %v3313_v55  ;;  %3326 = vtanh.f32 %v2322_v22  ;;  %v2081_v22 = vmul.f32 %v6991_v2, %v9438_v35  ;;  %v2339_v10 = vadd.f32 %v8437_v9, %v2079_v18  ;;  %v9441_v55 = vld [vmem:[#allocation211_spill] sm:$0xff] }
 0x522   :  { %v3317_v47 = vpop.eup %3316  ;;  %2828 = vst.msk [vmem:[%s8803_s3 + $0x6f8] sm:$0xff] %vm270_vm0, %v3315_v62  ;;  %3328 = vtanh.f32 %v2323_v25  ;;  %v2082_v25 = vmul.f32 %v6991_v2, %v9439_v31  ;;  %v2340_v50 = vadd.f32 %v8437_v9, %v2080_v30  ;;  %v9442_v62 = vld [vmem:[#allocation212_spill] sm:$0xff] }
 0x523   :  { %v3319_v57 = vpop.eup %3318  ;;  %2829 = vst.msk [vmem:[%s8803_s3 + $0x700] sm:$0xff] %vm270_vm0, %v3317_v47  ;;  %3330 = vtanh.f32 %v2324_v56  ;;  %v2083_v56 = vmul.f32 %v6991_v2, %v9440_v45  ;;  %v2341_v60 = vadd.f32 %v8437_v9, %v2081_v22  ;;  %v9443_v47 = vld [vmem:[#allocation213_spill] sm:$0xff] }
 0x524   :  { %v3321_v39 = vpop.eup %3320  ;;  %2830 = vst.msk [vmem:[%s8803_s3 + $0x708] sm:$0xff] %vm270_vm0, %v3319_v57  ;;  %3332 = vtanh.f32 %v2325_v53  ;;  %v2084_v53 = vmul.f32 %v6991_v2, %v9441_v55  ;;  %v2342_v6 = vadd.f32 %v8437_v9, %v2082_v25  ;;  %v9444_v57 = vld [vmem:[#allocation214_spill] sm:$0xff] }
 0x525   :  { %v3323_v32 = vpop.eup %3322  ;;  %2831 = vst.msk [vmem:[%s8803_s3 + $0x710] sm:$0xff] %vm270_vm0, %v3321_v39  ;;  %3334 = vtanh.f32 %v2326_v1  ;;  %v2085_v1 = vmul.f32 %v6991_v2, %v9442_v62  ;;  %v2343_v26 = vadd.f32 %v8437_v9, %v2083_v56  ;;  %v9445_v39 = vld [vmem:[#allocation215_spill] sm:$0xff] }
 0x526   :  { %v3325_v5 = vpop.eup %3324  ;;  %2832 = vst.msk [vmem:[%s8803_s3 + $0x718] sm:$0xff] %vm270_vm0, %v3323_v32  ;;  %3336 = vtanh.f32 %v2327_v8  ;;  %v2086_v8 = vmul.f32 %v6991_v2, %v9443_v47  ;;  %v2344_v0 = vadd.f32 %v8437_v9, %v2084_v53 }
 0x527   :  { %v3327_v21 = vpop.eup %3326  ;;  %2833 = vst.msk [vmem:[%s8803_s3 + $0x720] sm:$0xff] %vm270_vm0, %v3325_v5  ;;  %3338 = vtanh.f32 %v2328_v28  ;;  %v2087_v28 = vmul.f32 %v6991_v2, %v9444_v57  ;;  %v2345_v49 = vadd.f32 %v8437_v9, %v2085_v1 }
 0x528   :  { %v3329_v42 = vpop.eup %3328  ;;  %2834 = vst.msk [vmem:[%s8803_s3 + $0x728] sm:$0xff] %vm270_vm0, %v3327_v21  ;;  %3340 = vtanh.f32 %v2329_v59  ;;  %v2088_v59 = vmul.f32 %v6991_v2, %v9445_v39 }
 0x529   :  { %v3331_v48 = vpop.eup %3330  ;;  %2835 = vst.msk [vmem:[%s8803_s3 + $0x730] sm:$0xff] %vm270_vm0, %v3329_v42  ;;  %3342 = vtanh.f32 %v2330_v52  ;;  %v2346_v52 = vadd.f32 %v8437_v9, %v2086_v8  ;;  %v2347_v2 = vadd.f32 %v8437_v9, %v2087_v28 }
 0x52a   :  { %v3333_v20 = vpop.eup %3332  ;;  %2836 = vst.msk [vmem:[%s8803_s3 + $0x738] sm:$0xff] %vm270_vm0, %v3331_v48  ;;  %3344 = vtanh.f32 %v2331_v4  ;;  %v2348_v5 = vadd.f32 %v8437_v9, %v2088_v59 }
 0x52b   :  { %v3335_v23 = vpop.eup %3334  ;;  %2837 = vst.msk [vmem:[%s8803_s3 + $0x740] sm:$0xff] %vm270_vm0, %v3333_v20  ;;  %3346 = vtanh.f32 %v2332_v51 }
 0x52c   :  { %v3337_v14 = vpop.eup %3336  ;;  %2838 = vst.msk [vmem:[%s8803_s3 + $0x748] sm:$0xff] %vm270_vm0, %v3335_v23  ;;  %3348 = vtanh.f32 %v2333_v11 }
 0x52d   :  { %v3339_v37 = vpop.eup %3338  ;;  %2839 = vst.msk [vmem:[%s8803_s3 + $0x750] sm:$0xff] %vm270_vm0, %v3337_v14  ;;  %3350 = vtanh.f32 %v2334_v13 }
 0x52e   :  { %v3341_v38 = vpop.eup %3340  ;;  %2840 = vst.msk [vmem:[%s8803_s3 + $0x758] sm:$0xff] %vm270_vm0, %v3339_v37  ;;  %3352 = vtanh.f32 %v2335_v16 }
 0x52f   :  { %v3343_v46 = vpop.eup %3342  ;;  %2841 = vst.msk [vmem:[%s8803_s3 + $0x760] sm:$0xff] %vm270_vm0, %v3341_v38  ;;  %3354 = vtanh.f32 %v2336_v3 }
 0x530   :  { %v3345_v12 = vpop.eup %3344  ;;  %2842 = vst.msk [vmem:[%s8803_s3 + $0x768] sm:$0xff] %vm270_vm0, %v3343_v46  ;;  %3356 = vtanh.f32 %v2337_v34 }
 0x531   :  { %v3347_v41 = vpop.eup %3346  ;;  %2843 = vst.msk [vmem:[%s8803_s3 + $0x770] sm:$0xff] %vm270_vm0, %v3345_v12  ;;  %3358 = vtanh.f32 %v2338_v40 }
 0x532   :  { %v3349_v19 = vpop.eup %3348  ;;  %2844 = vst.msk [vmem:[%s8803_s3 + $0x778] sm:$0xff] %vm270_vm0, %v3347_v41  ;;  %3360 = vtanh.f32 %v2339_v10 }
 0x533   :  { %v3351_v17 = vpop.eup %3350  ;;  %2845 = vst.msk [vmem:[%s8803_s3 + $0x780] sm:$0xff] %vm270_vm0, %v3349_v19  ;;  %3362 = vtanh.f32 %v2340_v50 }
 0x534   :  { %v3353_v24 = vpop.eup %3352  ;;  %2846 = vst.msk [vmem:[%s8803_s3 + $0x788] sm:$0xff] %vm270_vm0, %v3351_v17  ;;  %3364 = vtanh.f32 %v2341_v60 }
 0x535   :  { %v3355_v32 = vpop.eup %3354  ;;  %2847 = vst.msk [vmem:[%s8803_s3 + $0x790] sm:$0xff] %vm270_vm0, %v3353_v24  ;;  %3366 = vtanh.f32 %v2342_v6 }
 0x536   :  { %v3357_v58 = vpop.eup %3356  ;;  %2848 = vst.msk [vmem:[%s8803_s3 + $0x798] sm:$0xff] %vm270_vm0, %v3355_v32  ;;  %3368 = vtanh.f32 %v2343_v26 }
 0x537   :  { %v3359_v29 = vpop.eup %3358  ;;  %2849 = vst.msk [vmem:[%s8803_s3 + $0x7a0] sm:$0xff] %vm270_vm0, %v3357_v58  ;;  %3370 = vtanh.f32 %v2344_v0 }
 0x538   :  { %v3361_v4 = vpop.eup %3360  ;;  %2850 = vst.msk [vmem:[%s8803_s3 + $0x7a8] sm:$0xff] %vm270_vm0, %v3359_v29  ;;  %3372 = vtanh.f32 %v2345_v49 }
 0x539   :  { %v3363_v63 = vpop.eup %3362  ;;  %2851 = vst.msk [vmem:[%s8803_s3 + $0x7b0] sm:$0xff] %vm270_vm0, %v3361_v4  ;;  %3374 = vtanh.f32 %v2346_v52 }
 0x53a   :  { %v3365_v36 = vpop.eup %3364  ;;  %2852 = vst.msk [vmem:[%s8803_s3 + $0x7b8] sm:$0xff] %vm270_vm0, %v3363_v63  ;;  %3376 = vtanh.f32 %v2347_v2 }
 0x53b   :  { %v3367_v9 = vpop.eup %3366  ;;  %2853 = vst.msk [vmem:[%s8803_s3 + $0x7c0] sm:$0xff] %vm270_vm0, %v3365_v36  ;;  %3378 = vtanh.f32 %v2348_v5 }
 0x53c   :  { %v3369_v21 = vpop.eup %3368  ;;  %2854 = vst.msk [vmem:[%s8803_s3 + $0x7c8] sm:$0xff] %vm270_vm0, %v3367_v9 }
 0x53d   :  { %v3371_v51 = vpop.eup %3370  ;;  %2855 = vst.msk [vmem:[%s8803_s3 + $0x7d0] sm:$0xff] %vm270_vm0, %v3369_v21 }
 0x53e   :  { %v3373_v7 = vpop.eup %3372  ;;  %2856 = vst.msk [vmem:[%s8803_s3 + $0x7d8] sm:$0xff] %vm270_vm0, %v3371_v51 }
 0x53f   :  { %v3375_v33 = vpop.eup %3374  ;;  %2857 = vst.msk [vmem:[%s8803_s3 + $0x7e0] sm:$0xff] %vm270_vm0, %v3373_v7 }
 0x540   :  { %v3377_v42 = vpop.eup %3376  ;;  %2858 = vst.msk [vmem:[%s8803_s3 + $0x7e8] sm:$0xff] %vm270_vm0, %v3375_v33 }
 0x541   :  { %v3379_v11 = vpop.eup %3378  ;;  %2859 = vst.msk [vmem:[%s8803_s3 + $0x7f0] sm:$0xff] %vm270_vm0, %v3377_v42 }
 0x542   :  { %2860 = vst.msk [vmem:[%s8803_s3 + $0x7f8] sm:$0xff] %vm270_vm0, %v3379_v11 }

</bundles_post_ra>
